<compile_context>
chip_gen: v5e
topology: v5e:2x2
jax: 0.10.0
libtpu: 0.0.40
codegen_flags: <defaults>
</compile_context>

<pallas_src>
import numpy as np
import jax
import jax.numpy as jnp
from jax import lax
from jax.experimental import pallas as pl
from jax.experimental.pallas import tpu as pltpu


# ------------------------------ fused Pallas kernel ------------------------------- #

def _fused_net_kernel(x_ref, w1_ref, b1_ref, w2_ref, b2_ref, w3_ref, b3_ref,
                      w4_ref, b4_ref, wf_ref, bf_ref, o_ref, h1s, h2s, h3s):
    """Bt samples per step: conv1..conv4 (+BN+ReLU+MaxPool) + AvgPool + fc0, in VMEM.

    Row space: each sample owns 32 consecutive rows.  Per-sample row Q holds
      layer-1 input  : 256 lanes = xpad[128Q : 128Q+256]   (host-prepared overlap)
      pooled layer-1 : 128 lanes = 8 positions x 16 ch     (positions 8Q..8Q+7)
      pooled layer-2 :  32 lanes = 2 positions x 16 ch     (positions 2Q, 2Q+1)
      pooled layer-3 :  64 lanes = 2 positions x 32 ch     (valid on rows Q = 4n)
      pooled layer-4 : 128 lanes = 2 positions x 64 ch     (valid on rows 0 and 16)
    Rows beyond the valid positions are junk and are zero-masked before they can feed
    the next layer's boundary (conv zero-padding) reads.
    """
    R = x_ref.shape[0]           # Bt * 32
    Bt = o_ref.shape[1]
    f32 = jnp.float32

    def mm(a, w):
        # weights may be pre-cast to bf16 host-side; astype is a no-op for f32.
        return jnp.dot(a.astype(w.dtype), w, preferred_element_type=f32)

    def pool_lanes(y):
        # columns are ordered [within-pool index | pooled slot | channel]:
        # MaxPool1d(4) == max over 4 contiguous equal lane slices.
        c = y.shape[1] // 4
        return jnp.maximum(jnp.maximum(y[:, 0:c], y[:, c:2 * c]),
                           jnp.maximum(y[:, 2 * c:3 * c], y[:, 3 * c:4 * c]))

    rows = lax.broadcasted_iota(jnp.int32, (R, 1), 0) % 32    # row index within sample

    # -------- layer 1: conv1(1->16, K=80, s=4, pad=38) + BN + ReLU + MaxPool(4)
    y1 = jnp.maximum(mm(x_ref[...], w1_ref[...]) + b1_ref[...], 0.0)      # (R, 512)
    p1 = jnp.where(rows < 25, pool_lanes(y1), 0.0)                        # (R, 128)
    h1s[0:8, :] = jnp.zeros((8, 128), f32)                                # halos = conv pad
    h1s[8:8 + R, :] = p1
    h1s[8 + R:16 + R, :] = jnp.zeros((8, 128), f32)

    # -------- layer 2: conv2(16->16, K=3, pad=1) + BN + ReLU + MaxPool(4)
    # K-split over contiguous row-shifted views (rows m-1, m, m+1).
    y2 = (mm(h1s[pl.ds(7, R), :], w2_ref[0]) +
          mm(h1s[pl.ds(8, R), :], w2_ref[1]) +
          mm(h1s[pl.ds(9, R), :], w2_ref[2]))
    y2 = jnp.maximum(y2 + b2_ref[...], 0.0)                               # (R, 128)
    p2 = jnp.where(rows < 25, pool_lanes(y2), 0.0)                        # (R, 32)
    h2s[0:8, :] = jnp.zeros((8, 32), f32)
    h2s[8:8 + R, :] = p2
    h2s[8 + R:16 + R, :] = jnp.zeros((8, 32), f32)

    # -------- layer 3: conv3(16->32, K=3, pad=1) + BN + ReLU + MaxPool(4)
    # Output row m covers 8 conv outputs; needs pooled-2 rows m-1..m+4 (6 K-split terms).
    y3 = mm(h2s[pl.ds(7, R), :], w3_ref[0])
    for jj in range(1, 6):
        y3 = y3 + mm(h2s[pl.ds(7 + jj, R), :], w3_ref[jj])
    y3 = jnp.maximum(y3 + b3_ref[...], 0.0)                               # (R, 256)
    p3 = jnp.where(rows < 24, pool_lanes(y3), 0.0)                        # (R, 64)
    h3s[0:8, :] = jnp.zeros((8, 64), f32)
    h3s[8:8 + R, :] = p3
    h3s[8 + R:32 + R, :] = jnp.zeros((24, 64), f32)

    # -------- layer 4: conv4(32->64, K=3, pad=1) + BN + ReLU + MaxPool(4)
    # Needs pooled-3 rows m-4, m, m+4, ..., m+16 (6 K-split terms, stride-4 row shifts
    # expressed as contiguous views into the halo-padded scratch).
    y4 = mm(h3s[pl.ds(4, R), :], w4_ref[0])
    for jj in range(1, 6):
        y4 = y4 + mm(h3s[pl.ds(4 + 4 * jj, R), :], w4_ref[jj])
    y4 = jnp.maximum(y4 + b4_ref[...], 0.0)                               # (R, 512)
    p4 = pool_lanes(y4)                                                   # (R, 128)

    # -------- epilogue: AvgPool1d(3) (folded 1/3 in Wf) + fc0, one (Bt, 8) block.
    # pooled-4 positions 0,1 live at row 32b (lanes 0:64 / 64:128), position 2 at row
    # 32b+16 (lanes 0:64); gather those rows for all b with two selector matmuls.
    bi = lax.broadcasted_iota(jnp.int32, (Bt, R), 0)
    ri = lax.broadcasted_iota(jnp.int32, (Bt, R), 1)
    sel0 = (ri == 32 * bi).astype(f32)
    sel1 = (ri == 32 * bi + 16).astype(f32)
    g0 = jnp.dot(sel0, p4, preferred_element_type=f32)                    # (Bt, 128)
    g1 = jnp.dot(sel1, p4, preferred_element_type=f32)                    # (Bt, 128)
    s = g0[:, 0:64] + g0[:, 64:128] + g1[:, 0:64]                         # (Bt, 64)
    o_ref[0] = (mm(s, wf_ref[...]) + bf_ref[...]).astype(o_ref.dtype)     # (Bt, 8)


# ----------------------------------- JAX glue -------------------------------------- #

def net_forward(x, ops, batch_tile=4):
    """Full forward pass. x: (B, 3200) -> (B, 6)."""
    B = x.shape[0]
    assert x.shape[1] == 3200
    Bt = max(1, min(batch_tile, B))
    while B % Bt:
        Bt -= 1
    G = B // Bt
    R = Bt * 32

    # Per sample: 38 left zeros (conv1 pad) + 3200 data, right-padded to 32*128 = 4096.
    pad_r = 32 * 128 - 3200 - 38
    xp = jnp.pad(x.astype(jnp.float32), ((0, 0), (38, pad_r))).reshape(B * 32, 128)
    # "row | next row" slab so layer 1 is one matmul (no in-kernel im2col / shifts).
    xnext = jnp.concatenate([xp[1:], jnp.zeros((1, 128), xp.dtype)], axis=0)
    xs = jnp.concatenate([xp, xnext], axis=1)                             # (B*32, 256)

    out = pl.pallas_call(
        _fused_net_kernel,
        out_shape=jax.ShapeDtypeStruct((G, Bt, 8), jnp.float32),
        grid=(G,),
        in_specs=[
            pl.BlockSpec((R, 256), lambda i: (i, 0)),            # input slab
            pl.BlockSpec((256, 512), lambda i: (0, 0)),          # W1 (BN scale folded)
            pl.BlockSpec((1, 512), lambda i: (0, 0)),            # shift1 (lane-tiled)
            pl.BlockSpec((3, 128, 128), lambda i: (0, 0, 0)),    # W2 K-split stack
            pl.BlockSpec((1, 128), lambda i: (0, 0)),            # shift2
            pl.BlockSpec((6, 32, 256), lambda i: (0, 0, 0)),     # W3 K-split stack
            pl.BlockSpec((1, 256), lambda i: (0, 0)),            # shift3
            pl.BlockSpec((6, 64, 512), lambda i: (0, 0, 0)),     # W4 K-split stack
            pl.BlockSpec((1, 512), lambda i: (0, 0)),            # shift4
            pl.BlockSpec((64, 8), lambda i: (0, 0)),             # Wf / 3 (lane-padded)
            pl.BlockSpec((1, 8), lambda i: (0, 0)),              # fc bias (lane-padded)
        ],
        out_specs=pl.BlockSpec((1, Bt, 8), lambda i: (i, 0, 0)),
        scratch_shapes=[
            pltpu.VMEM((R + 16, 128), jnp.float32),   # pooled layer-1 (+ zero halos)
            pltpu.VMEM((R + 16, 32), jnp.float32),    # pooled layer-2 (+ zero halos)
            pltpu.VMEM((R + 32, 64), jnp.float32),    # pooled layer-3 (+ zero halos)
        ],
        compiler_params=pltpu.CompilerParams(dimension_semantics=("parallel",)),
    )(xs, ops['W1'], ops['b1'], ops['W2'], ops['b2'],
      ops['W3'], ops['b3'], ops['W4'], ops['b4'], ops['Wf'], ops['bf'])
    return out.reshape(B, 8)[:, :6]


# ------------------------- parameters, operand prep, reference --------------------- #

def init_params(key):
    keys = jax.random.split(key, 9)

    def conv_init(k, cout, cin, ksz):
        k1, k2 = jax.random.split(k)
        bound = 1.0 / np.sqrt(cin * ksz)
        W = jax.random.uniform(k1, (cout, cin, ksz), jnp.float32, -bound, bound)
        b = jax.random.uniform(k2, (cout,), jnp.float32, -bound, bound)
        return W, b

    def bn_init(k, c):
        k1, k2, k3, k4 = jax.random.split(k, 4)
        gamma = jax.random.uniform(k1, (c,), jnp.float32, 0.5, 1.5)
        beta = jax.random.uniform(k2, (c,), jnp.float32, -0.5, 0.5)
        mean = 0.1 * jax.random.normal(k3, (c,), jnp.float32)
        var = jax.random.uniform(k4, (c,), jnp.float32, 0.5, 1.5)
        return gamma, beta, mean, var

    P = {}
    cfg = [(16, 1, 80), (16, 16, 3), (32, 16, 3), (64, 32, 3)]
    for i, (cout, cin, ksz) in enumerate(cfg, start=1):
        W, b = conv_init(keys[2 * (i - 1)], cout, cin, ksz)
        gamma, beta, mean, var = bn_init(keys[2 * (i - 1) + 1], cout)
        scale = gamma / jnp.sqrt(var + 1e-5)                 # eval-mode BN fold
        shift = beta + (b - mean) * scale
        P[f'W{i}'] = W
        P[f's{i}'] = scale
        P[f'h{i}'] = shift
    k1, k2 = jax.random.split(keys[8])
    bound = 1.0 / np.sqrt(64)
    Wfc = jax.random.uniform(k1, (6, 64), jnp.float32, -bound, bound)
    bfc = jax.random.uniform(k2, (6,), jnp.float32, -bound, bound)
    P['Wf'] = Wfc.T                                          # (64, 6)
    P['bf'] = bfc                                            # (6,)
    return P


def build_operands(P):
    """One-time host-side expansion of conv weights into block-Toeplitz / K-split
    matmul operands (BN scale folded in), lane-tiled shift vectors, and the
    avg-pool-folded FC weight.  Column order everywhere: within-pool index (major) |
    pooled slot | output channel, so MaxPool1d(4) is a max of 4 contiguous slices."""
    f32 = np.float32

    # --- layer 1: 32 pre-pool positions per row, taps read lanes 4v+t of the 256-wide
    #     [row | next row] input slab.
    w1 = np.asarray(P['W1'], f32)
    s1, t1 = np.asarray(P['s1'], f32), np.asarray(P['h1'], f32)
    W1 = np.zeros((256, 512), f32)
    for v in range(32):
        col0 = 128 * (v % 4) + 16 * (v // 4)
        for t in range(80):
            W1[4 * v + t, col0:col0 + 16] += w1[:, 0, t] * s1
    b1 = np.tile(t1, 32).reshape(1, 512)

    # --- layer 2: 8 output positions per row, inputs from rows m-1 / m / m+1.
    w2 = np.asarray(P['W2'], f32)
    s2, t2 = np.asarray(P['s2'], f32), np.asarray(P['h2'], f32)
    blk2 = np.transpose(w2, (1, 0, 2)) * s2[None, :, None]   # (cin, cout, tap)
    W2 = np.zeros((3, 128, 128), f32)
    for a in range(8):
        col0 = 32 * (a % 4) + 16 * (a // 4)
        for d in range(3):
            q = a - 1 + d
            j = -1 if q < 0 else (1 if q > 7 else 0)
            ain = q - 8 * j
            W2[j + 1, 16 * ain:16 * ain + 16, col0:col0 + 16] += blk2[:, :, d]
    b2 = np.tile(t2, 8).reshape(1, 128)

    # --- layer 3: 8 output positions per row; inputs (2 positions/row) from rows
    #     m-1 .. m+4  (6 K-split terms).
    w3 = np.asarray(P['W3'], f32)
    s3, t3 = np.asarray(P['s3'], f32), np.asarray(P['h3'], f32)
    blk3 = np.transpose(w3, (1, 0, 2)) * s3[None, :, None]   # (16, 32, tap)
    W3 = np.zeros((6, 32, 256), f32)
    for a in range(8):
        col0 = 64 * (a % 4) + 32 * (a // 4)
        for d in range(3):
            q = a - 1 + d
            j = q // 2
            ps = q - 2 * j
            W3[j + 1, 16 * ps:16 * ps + 16, col0:col0 + 32] += blk3[:, :, d]
    b3 = np.tile(t3, 8).reshape(1, 256)

    # --- layer 4: 8 output positions per row; inputs (2 positions/row, valid at row
    #     stride 4) from rows m-4, m, m+4, ..., m+16.
    w4 = np.asarray(P['W4'], f32)
    s4, t4 = np.asarray(P['s4'], f32), np.asarray(P['h4'], f32)
    blk4 = np.transpose(w4, (1, 0, 2)) * s4[None, :, None]   # (32, 64, tap)
    W4 = np.zeros((6, 64, 512), f32)
    for a in range(8):
        col0 = 128 * (a % 4) + 64 * (a // 4)
        for d in range(3):
            q = a - 1 + d
            j = q // 2
            ps = q - 2 * j
            W4[j + 1, 32 * ps:32 * ps + 32, col0:col0 + 64] += blk4[:, :, d]
    b4 = np.tile(t4, 8).reshape(1, 512)

    # --- fc0, with the 1/3 AvgPool mean folded in; lane-padded to 8.
    Wf = np.zeros((64, 8), f32)
    Wf[:, :6] = np.asarray(P['Wf'], f32) / 3.0
    bf = np.zeros((1, 8), f32)
    bf[0, :6] = np.asarray(P['bf'], f32)

    ops = dict(W1=W1, b1=b1, W2=W2, b2=b2, W3=W3, b3=b3, W4=W4, b4=b4, Wf=Wf, bf=bf)
    # NOTE: on v6e/v7x the W* arrays can be cast to bf16 here (fewer MXU passes);
    # keep f32 to match the f32 PyTorch semantics within 1e-3.
    return {k: jnp.asarray(v) for k, v in ops.items()}


def ref_forward(x, P):
    """Pure-JAX reference (NCW layout, mirrors the PyTorch forward in eval mode)."""
    B = x.shape[0]
    h = x.reshape(B, 1, 3200)
    specs = [
        (P['W1'], P['s1'], P['h1'], 4, 38, 4),
        (P['W2'], P['s2'], P['h2'], 1, 1, 4),
        (P['W3'], P['s3'], P['h3'], 1, 1, 4),
        (P['W4'], P['s4'], P['h4'], 1, 1, 4),
    ]
    for W, scale, shift, stride, pad, pool in specs:
        y = lax.conv_general_dilated(h, W, (stride,), [(pad, pad)],
                                     dimension_numbers=('NCH', 'OIH', 'NCH'))
        y = y * scale[None, :, None] + shift[None, :, None]
        y = jnp.maximum(y, 0.0)
        h = lax.reduce_window(y, -jnp.inf, lax.max,
                              (1, 1, pool), (1, 1, pool), 'VALID')
    h = jnp.mean(h, axis=2)                                 # AvgPool1d(3) on L=3
    return h @ P['Wf'] + P['bf']                            # fc0, then [:, 0, :]


# ------------------------------------- main ----------------------------------------- #

if __name__ == "__main__":
    B = 8                                                   # 2 grid steps of Bt=4 samples
    key = jax.random.PRNGKey(0)
    kx, kp = jax.random.split(key)
    x = jax.random.normal(kx, (B, 3200), dtype=jnp.float32)

    P = init_params(kp)
    ops = build_operands(P)

    out = jax.jit(net_forward)(x, ops)
    out = jax.block_until_ready(out)
    assert out.shape == (B, 6), out.shape

    ref = jax.block_until_ready(ref_forward(x, P))
    np.testing.assert_allclose(np.asarray(out), np.asarray(ref),
                               rtol=2e-3, atol=2e-3)
    print("KERNEL_OK")
</pallas_src>

<mosaic_0001>
module attributes {stable_mosaic.version = 11 : i64} {
  func.func @_fused_net_kernel(%arg0: i32, %arg1: memref<128x256xf32, #tpu.memory_space<vmem>>, %arg2: memref<256x512xf32, #tpu.memory_space<vmem>>, %arg3: memref<1x512xf32, #tpu.memory_space<vmem>>, %arg4: memref<3x128x128xf32, #tpu.memory_space<vmem>>, %arg5: memref<1x128xf32, #tpu.memory_space<vmem>>, %arg6: memref<6x32x256xf32, #tpu.memory_space<vmem>>, %arg7: memref<1x256xf32, #tpu.memory_space<vmem>>, %arg8: memref<6x64x512xf32, #tpu.memory_space<vmem>>, %arg9: memref<1x512xf32, #tpu.memory_space<vmem>>, %arg10: memref<64x8xf32, #tpu.memory_space<vmem>>, %arg11: memref<1x8xf32, #tpu.memory_space<vmem>>, %arg12: memref<1x4x8xf32, #tpu.memory_space<vmem>>, %arg13: memref<144x128xf32, #tpu.memory_space<vmem>>, %arg14: memref<144x32xf32, #tpu.memory_space<vmem>>, %arg15: memref<160x64xf32, #tpu.memory_space<vmem>>) attributes {dimension_semantics = [#tpu.dimension_semantics<parallel>], iteration_bounds = array<i64: 2>, scalar_prefetch = 0 : i64, scratch_operands = 3 : i64, tpu.core_type = #tpu.core_type<tc>, window_params = [{transform_indices = @transform_0, window_bounds = array<i64: 128, 256>}, {pipeline_mode = #tpu.pipeline_mode<synchronous>, transform_indices = @transform_1, window_bounds = array<i64: 256, 512>}, {pipeline_mode = #tpu.pipeline_mode<synchronous>, transform_indices = @transform_2, window_bounds = array<i64: 1, 512>}, {pipeline_mode = #tpu.pipeline_mode<synchronous>, transform_indices = @transform_3, window_bounds = array<i64: 3, 128, 128>}, {pipeline_mode = #tpu.pipeline_mode<synchronous>, transform_indices = @transform_4, window_bounds = array<i64: 1, 128>}, {pipeline_mode = #tpu.pipeline_mode<synchronous>, transform_indices = @transform_5, window_bounds = array<i64: 6, 32, 256>}, {pipeline_mode = #tpu.pipeline_mode<synchronous>, transform_indices = @transform_6, window_bounds = array<i64: 1, 256>}, {pipeline_mode = #tpu.pipeline_mode<synchronous>, transform_indices = @transform_7, window_bounds = array<i64: 6, 64, 512>}, {pipeline_mode = #tpu.pipeline_mode<synchronous>, transform_indices = @transform_8, window_bounds = array<i64: 1, 512>}, {pipeline_mode = #tpu.pipeline_mode<synchronous>, transform_indices = @transform_9, window_bounds = array<i64: 64, 8>}, {pipeline_mode = #tpu.pipeline_mode<synchronous>, transform_indices = @transform_10, window_bounds = array<i64: 1, 8>}, {transform_indices = @transform_11, window_bounds = array<i64: 1, 4, 8>}]} {
    %0 = tpu.iota {dimensions = array<i32: 0>} : vector<128x1xi32>
    %c32_i32 = arith.constant 32 : i32
    %c0_i32 = arith.constant 0 : i32
    %1 = arith.cmpi eq, %c32_i32, %c0_i32 : i32
    %c1_i32 = arith.constant 1 : i32
    %2 = arith.select %1, %c1_i32, %c32_i32 : i32
    %3 = vector.broadcast %2 : i32 to vector<128x1xi32>
    %4 = arith.remsi %0, %3 : vector<128x1xi32>
    %c0_i32_0 = arith.constant 0 : i32
    %5 = vector.broadcast %c0_i32_0 : i32 to vector<128x1xi32>
    %6 = arith.cmpi ne, %4, %5 : vector<128x1xi32>
    %c0_i32_1 = arith.constant 0 : i32
    %7 = vector.broadcast %c0_i32_1 : i32 to vector<128x1xi32>
    %8 = arith.cmpi slt, %4, %7 : vector<128x1xi32>
    %c0_i32_2 = arith.constant 0 : i32
    %9 = arith.cmpi slt, %2, %c0_i32_2 : i32
    %10 = vector.broadcast %9 : i1 to vector<128x1xi1>
    %11 = vector.broadcast %10 : vector<128x1xi1> to vector<128x1xi1>
    %12 = arith.xori %8, %11 : vector<128x1xi1>
    %13 = arith.andi %12, %6 : vector<128x1xi1>
    %14 = vector.broadcast %2 : i32 to vector<128x1xi32>
    %15 = arith.addi %4, %14 : vector<128x1xi32>
    %16 = arith.select %13, %15, %4 : vector<128x1xi1>, vector<128x1xi32>
    %c0 = arith.constant 0 : index
    %c0_3 = arith.constant 0 : index
    %17 = vector.load %arg1[%c0, %c0_3] : memref<128x256xf32, #tpu.memory_space<vmem>>, vector<128x256xf32>
    %c0_4 = arith.constant 0 : index
    %c0_5 = arith.constant 0 : index
    %18 = vector.load %arg2[%c0_4, %c0_5] : memref<256x512xf32, #tpu.memory_space<vmem>>, vector<256x512xf32>
    %cst = arith.constant dense<0.000000e+00> : vector<128x512xf32>
    %19 = tpu.matmul %17, %18, %cst {dimension_numbers = #tpu.dot_dimension_numbers<[1], [0], [0], [1], [0, 0, 1, 1], [], []>} : vector<128x256xf32>, vector<256x512xf32>, vector<128x512xf32> -> vector<128x512xf32>
    %c0_6 = arith.constant 0 : index
    %c0_7 = arith.constant 0 : index
    %20 = vector.load %arg3[%c0_6, %c0_7] : memref<1x512xf32, #tpu.memory_space<vmem>>, vector<1x512xf32>
    %21 = vector.broadcast %20 : vector<1x512xf32> to vector<128x512xf32>
    %22 = arith.addf %19, %21 : vector<128x512xf32>
    %cst_8 = arith.constant 0.000000e+00 : f32
    %23 = vector.broadcast %cst_8 : f32 to vector<128x512xf32>
    %24 = arith.maximumf %22, %23 : vector<128x512xf32>
    %c25_i32 = arith.constant 25 : i32
    %25 = vector.broadcast %c25_i32 : i32 to vector<128x1xi32>
    %26 = arith.cmpi slt, %16, %25 : vector<128x1xi32>
    %27 = vector.extract_strided_slice %24 {offsets = [0, 0], sizes = [128, 128], strides = [1, 1]} : vector<128x512xf32> to vector<128x128xf32>
    %28 = vector.extract_strided_slice %24 {offsets = [0, 128], sizes = [128, 128], strides = [1, 1]} : vector<128x512xf32> to vector<128x128xf32>
    %29 = arith.maximumf %27, %28 : vector<128x128xf32>
    %30 = vector.extract_strided_slice %24 {offsets = [0, 256], sizes = [128, 128], strides = [1, 1]} : vector<128x512xf32> to vector<128x128xf32>
    %31 = vector.extract_strided_slice %24 {offsets = [0, 384], sizes = [128, 128], strides = [1, 1]} : vector<128x512xf32> to vector<128x128xf32>
    %32 = arith.maximumf %30, %31 : vector<128x128xf32>
    %33 = arith.maximumf %29, %32 : vector<128x128xf32>
    %cst_9 = arith.constant 0.000000e+00 : f32
    %34 = vector.shape_cast %26 : vector<128x1xi1> to vector<128x1xi1>
    %35 = vector.broadcast %34 : vector<128x1xi1> to vector<128x128xi1>
    %36 = vector.broadcast %cst_9 : f32 to vector<128x128xf32>
    %37 = arith.select %35, %33, %36 : vector<128x128xi1>, vector<128x128xf32>
    %cst_10 = arith.constant 0.000000e+00 : f32
    %38 = vector.broadcast %cst_10 : f32 to vector<8x128xf32>
    %c0_11 = arith.constant 0 : index
    %c0_12 = arith.constant 0 : index
    %39 = vector.load %arg13[%c0_11, %c0_12] : memref<144x128xf32, #tpu.memory_space<vmem>>, vector<8x128xf32>
    tpu.vector_store %arg13[%c0_11, %c0_12], %38 {strides = array<i32>} : memref<144x128xf32, #tpu.memory_space<vmem>>, vector<8x128xf32>,
    %c8 = arith.constant 8 : index
    %c0_13 = arith.constant 0 : index
    %40 = vector.load %arg13[%c8, %c0_13] : memref<144x128xf32, #tpu.memory_space<vmem>>, vector<128x128xf32>
    tpu.vector_store %arg13[%c8, %c0_13], %37 {strides = array<i32>} : memref<144x128xf32, #tpu.memory_space<vmem>>, vector<128x128xf32>,
    %cst_14 = arith.constant 0.000000e+00 : f32
    %41 = vector.broadcast %cst_14 : f32 to vector<8x128xf32>
    %c136 = arith.constant 136 : index
    %c0_15 = arith.constant 0 : index
    %42 = vector.load %arg13[%c136, %c0_15] : memref<144x128xf32, #tpu.memory_space<vmem>>, vector<8x128xf32>
    tpu.vector_store %arg13[%c136, %c0_15], %41 {strides = array<i32>} : memref<144x128xf32, #tpu.memory_space<vmem>>, vector<8x128xf32>,
    %c7 = arith.constant 7 : index
    %c0_16 = arith.constant 0 : index
    %43 = vector.load %arg13[%c7, %c0_16] : memref<144x128xf32, #tpu.memory_space<vmem>>, vector<128x128xf32>
    %c0_17 = arith.constant 0 : index
    %c0_18 = arith.constant 0 : index
    %c0_19 = arith.constant 0 : index
    %44 = vector.load %arg4[%c0_17, %c0_18, %c0_19] : memref<3x128x128xf32, #tpu.memory_space<vmem>>, vector<1x128x128xf32>
    %45 = vector.shape_cast %44 : vector<1x128x128xf32> to vector<128x128xf32>
    %cst_20 = arith.constant dense<0.000000e+00> : vector<128x128xf32>
    %46 = tpu.matmul %43, %45, %cst_20 {dimension_numbers = #tpu.dot_dimension_numbers<[1], [0], [0], [1], [0, 0, 1, 1], [], []>} : vector<128x128xf32>, vector<128x128xf32>, vector<128x128xf32> -> vector<128x128xf32>
    %c8_21 = arith.constant 8 : index
    %c0_22 = arith.constant 0 : index
    %47 = vector.load %arg13[%c8_21, %c0_22] : memref<144x128xf32, #tpu.memory_space<vmem>>, vector<128x128xf32>
    %c1 = arith.constant 1 : index
    %c0_23 = arith.constant 0 : index
    %c0_24 = arith.constant 0 : index
    %48 = vector.load %arg4[%c1, %c0_23, %c0_24] : memref<3x128x128xf32, #tpu.memory_space<vmem>>, vector<1x128x128xf32>
    %49 = vector.shape_cast %48 : vector<1x128x128xf32> to vector<128x128xf32>
    %cst_25 = arith.constant dense<0.000000e+00> : vector<128x128xf32>
    %50 = tpu.matmul %47, %49, %cst_25 {dimension_numbers = #tpu.dot_dimension_numbers<[1], [0], [0], [1], [0, 0, 1, 1], [], []>} : vector<128x128xf32>, vector<128x128xf32>, vector<128x128xf32> -> vector<128x128xf32>
    %51 = arith.addf %46, %50 : vector<128x128xf32>
    %c9 = arith.constant 9 : index
    %c0_26 = arith.constant 0 : index
    %52 = vector.load %arg13[%c9, %c0_26] : memref<144x128xf32, #tpu.memory_space<vmem>>, vector<128x128xf32>
    %c2 = arith.constant 2 : index
    %c0_27 = arith.constant 0 : index
    %c0_28 = arith.constant 0 : index
    %53 = vector.load %arg4[%c2, %c0_27, %c0_28] : memref<3x128x128xf32, #tpu.memory_space<vmem>>, vector<1x128x128xf32>
    %54 = vector.shape_cast %53 : vector<1x128x128xf32> to vector<128x128xf32>
    %cst_29 = arith.constant dense<0.000000e+00> : vector<128x128xf32>
    %55 = tpu.matmul %52, %54, %cst_29 {dimension_numbers = #tpu.dot_dimension_numbers<[1], [0], [0], [1], [0, 0, 1, 1], [], []>} : vector<128x128xf32>, vector<128x128xf32>, vector<128x128xf32> -> vector<128x128xf32>
    %56 = arith.addf %51, %55 : vector<128x128xf32>
    %c0_30 = arith.constant 0 : index
    %c0_31 = arith.constant 0 : index
    %57 = vector.load %arg5[%c0_30, %c0_31] : memref<1x128xf32, #tpu.memory_space<vmem>>, vector<1x128xf32>
    %58 = vector.broadcast %57 : vector<1x128xf32> to vector<128x128xf32>
    %59 = arith.addf %56, %58 : vector<128x128xf32>
    %cst_32 = arith.constant 0.000000e+00 : f32
    %60 = vector.broadcast %cst_32 : f32 to vector<128x128xf32>
    %61 = arith.maximumf %59, %60 : vector<128x128xf32>
    %c25_i32_33 = arith.constant 25 : i32
    %62 = vector.broadcast %c25_i32_33 : i32 to vector<128x1xi32>
    %63 = arith.cmpi slt, %16, %62 : vector<128x1xi32>
    %64 = vector.extract_strided_slice %61 {offsets = [0, 0], sizes = [128, 32], strides = [1, 1]} : vector<128x128xf32> to vector<128x32xf32>
    %65 = vector.extract_strided_slice %61 {offsets = [0, 32], sizes = [128, 32], strides = [1, 1]} : vector<128x128xf32> to vector<128x32xf32>
    %66 = arith.maximumf %64, %65 : vector<128x32xf32>
    %67 = vector.extract_strided_slice %61 {offsets = [0, 64], sizes = [128, 32], strides = [1, 1]} : vector<128x128xf32> to vector<128x32xf32>
    %68 = vector.extract_strided_slice %61 {offsets = [0, 96], sizes = [128, 32], strides = [1, 1]} : vector<128x128xf32> to vector<128x32xf32>
    %69 = arith.maximumf %67, %68 : vector<128x32xf32>
    %70 = arith.maximumf %66, %69 : vector<128x32xf32>
    %cst_34 = arith.constant 0.000000e+00 : f32
    %71 = vector.shape_cast %63 : vector<128x1xi1> to vector<128x1xi1>
    %72 = vector.broadcast %71 : vector<128x1xi1> to vector<128x32xi1>
    %73 = vector.broadcast %cst_34 : f32 to vector<128x32xf32>
    %74 = arith.select %72, %70, %73 : vector<128x32xi1>, vector<128x32xf32>
    %cst_35 = arith.constant 0.000000e+00 : f32
    %75 = vector.broadcast %cst_35 : f32 to vector<8x32xf32>
    %c0_36 = arith.constant 0 : index
    %c0_37 = arith.constant 0 : index
    %76 = vector.load %arg14[%c0_36, %c0_37] : memref<144x32xf32, #tpu.memory_space<vmem>>, vector<8x32xf32>
    tpu.vector_store %arg14[%c0_36, %c0_37], %75 {strides = array<i32>} : memref<144x32xf32, #tpu.memory_space<vmem>>, vector<8x32xf32>,
    %c8_38 = arith.constant 8 : index
    %c0_39 = arith.constant 0 : index
    %77 = vector.load %arg14[%c8_38, %c0_39] : memref<144x32xf32, #tpu.memory_space<vmem>>, vector<128x32xf32>
    tpu.vector_store %arg14[%c8_38, %c0_39], %74 {strides = array<i32>} : memref<144x32xf32, #tpu.memory_space<vmem>>, vector<128x32xf32>,
    %cst_40 = arith.constant 0.000000e+00 : f32
    %78 = vector.broadcast %cst_40 : f32 to vector<8x32xf32>
    %c136_41 = arith.constant 136 : index
    %c0_42 = arith.constant 0 : index
    %79 = vector.load %arg14[%c136_41, %c0_42] : memref<144x32xf32, #tpu.memory_space<vmem>>, vector<8x32xf32>
    tpu.vector_store %arg14[%c136_41, %c0_42], %78 {strides = array<i32>} : memref<144x32xf32, #tpu.memory_space<vmem>>, vector<8x32xf32>,
    %c7_43 = arith.constant 7 : index
    %c0_44 = arith.constant 0 : index
    %80 = vector.load %arg14[%c7_43, %c0_44] : memref<144x32xf32, #tpu.memory_space<vmem>>, vector<128x32xf32>
    %c0_45 = arith.constant 0 : index
    %c0_46 = arith.constant 0 : index
    %c0_47 = arith.constant 0 : index
    %81 = vector.load %arg6[%c0_45, %c0_46, %c0_47] : memref<6x32x256xf32, #tpu.memory_space<vmem>>, vector<1x32x256xf32>
    %82 = vector.shape_cast %81 : vector<1x32x256xf32> to vector<32x256xf32>
    %cst_48 = arith.constant dense<0.000000e+00> : vector<128x256xf32>
    %83 = tpu.matmul %80, %82, %cst_48 {dimension_numbers = #tpu.dot_dimension_numbers<[1], [0], [0], [1], [0, 0, 1, 1], [], []>} : vector<128x32xf32>, vector<32x256xf32>, vector<128x256xf32> -> vector<128x256xf32>
    %c8_49 = arith.constant 8 : index
    %c0_50 = arith.constant 0 : index
    %84 = vector.load %arg14[%c8_49, %c0_50] : memref<144x32xf32, #tpu.memory_space<vmem>>, vector<128x32xf32>
    %c1_51 = arith.constant 1 : index
    %c0_52 = arith.constant 0 : index
    %c0_53 = arith.constant 0 : index
    %85 = vector.load %arg6[%c1_51, %c0_52, %c0_53] : memref<6x32x256xf32, #tpu.memory_space<vmem>>, vector<1x32x256xf32>
    %86 = vector.shape_cast %85 : vector<1x32x256xf32> to vector<32x256xf32>
    %cst_54 = arith.constant dense<0.000000e+00> : vector<128x256xf32>
    %87 = tpu.matmul %84, %86, %cst_54 {dimension_numbers = #tpu.dot_dimension_numbers<[1], [0], [0], [1], [0, 0, 1, 1], [], []>} : vector<128x32xf32>, vector<32x256xf32>, vector<128x256xf32> -> vector<128x256xf32>
    %88 = arith.addf %83, %87 : vector<128x256xf32>
    %c9_55 = arith.constant 9 : index
    %c0_56 = arith.constant 0 : index
    %89 = vector.load %arg14[%c9_55, %c0_56] : memref<144x32xf32, #tpu.memory_space<vmem>>, vector<128x32xf32>
    %c2_57 = arith.constant 2 : index
    %c0_58 = arith.constant 0 : index
    %c0_59 = arith.constant 0 : index
    %90 = vector.load %arg6[%c2_57, %c0_58, %c0_59] : memref<6x32x256xf32, #tpu.memory_space<vmem>>, vector<1x32x256xf32>
    %91 = vector.shape_cast %90 : vector<1x32x256xf32> to vector<32x256xf32>
    %cst_60 = arith.constant dense<0.000000e+00> : vector<128x256xf32>
    %92 = tpu.matmul %89, %91, %cst_60 {dimension_numbers = #tpu.dot_dimension_numbers<[1], [0], [0], [1], [0, 0, 1, 1], [], []>} : vector<128x32xf32>, vector<32x256xf32>, vector<128x256xf32> -> vector<128x256xf32>
    %93 = arith.addf %88, %92 : vector<128x256xf32>
    %c10 = arith.constant 10 : index
    %c0_61 = arith.constant 0 : index
    %94 = vector.load %arg14[%c10, %c0_61] : memref<144x32xf32, #tpu.memory_space<vmem>>, vector<128x32xf32>
    %c3 = arith.constant 3 : index
    %c0_62 = arith.constant 0 : index
    %c0_63 = arith.constant 0 : index
    %95 = vector.load %arg6[%c3, %c0_62, %c0_63] : memref<6x32x256xf32, #tpu.memory_space<vmem>>, vector<1x32x256xf32>
    %96 = vector.shape_cast %95 : vector<1x32x256xf32> to vector<32x256xf32>
    %cst_64 = arith.constant dense<0.000000e+00> : vector<128x256xf32>
    %97 = tpu.matmul %94, %96, %cst_64 {dimension_numbers = #tpu.dot_dimension_numbers<[1], [0], [0], [1], [0, 0, 1, 1], [], []>} : vector<128x32xf32>, vector<32x256xf32>, vector<128x256xf32> -> vector<128x256xf32>
    %98 = arith.addf %93, %97 : vector<128x256xf32>
    %c11 = arith.constant 11 : index
    %c0_65 = arith.constant 0 : index
    %99 = vector.load %arg14[%c11, %c0_65] : memref<144x32xf32, #tpu.memory_space<vmem>>, vector<128x32xf32>
    %c4 = arith.constant 4 : index
    %c0_66 = arith.constant 0 : index
    %c0_67 = arith.constant 0 : index
    %100 = vector.load %arg6[%c4, %c0_66, %c0_67] : memref<6x32x256xf32, #tpu.memory_space<vmem>>, vector<1x32x256xf32>
    %101 = vector.shape_cast %100 : vector<1x32x256xf32> to vector<32x256xf32>
    %cst_68 = arith.constant dense<0.000000e+00> : vector<128x256xf32>
    %102 = tpu.matmul %99, %101, %cst_68 {dimension_numbers = #tpu.dot_dimension_numbers<[1], [0], [0], [1], [0, 0, 1, 1], [], []>} : vector<128x32xf32>, vector<32x256xf32>, vector<128x256xf32> -> vector<128x256xf32>
    %103 = arith.addf %98, %102 : vector<128x256xf32>
    %c12 = arith.constant 12 : index
    %c0_69 = arith.constant 0 : index
    %104 = vector.load %arg14[%c12, %c0_69] : memref<144x32xf32, #tpu.memory_space<vmem>>, vector<128x32xf32>
    %c5 = arith.constant 5 : index
    %c0_70 = arith.constant 0 : index
    %c0_71 = arith.constant 0 : index
    %105 = vector.load %arg6[%c5, %c0_70, %c0_71] : memref<6x32x256xf32, #tpu.memory_space<vmem>>, vector<1x32x256xf32>
    %106 = vector.shape_cast %105 : vector<1x32x256xf32> to vector<32x256xf32>
    %cst_72 = arith.constant dense<0.000000e+00> : vector<128x256xf32>
    %107 = tpu.matmul %104, %106, %cst_72 {dimension_numbers = #tpu.dot_dimension_numbers<[1], [0], [0], [1], [0, 0, 1, 1], [], []>} : vector<128x32xf32>, vector<32x256xf32>, vector<128x256xf32> -> vector<128x256xf32>
    %108 = arith.addf %103, %107 : vector<128x256xf32>
    %c0_73 = arith.constant 0 : index
    %c0_74 = arith.constant 0 : index
    %109 = vector.load %arg7[%c0_73, %c0_74] : memref<1x256xf32, #tpu.memory_space<vmem>>, vector<1x256xf32>
    %110 = vector.broadcast %109 : vector<1x256xf32> to vector<128x256xf32>
    %111 = arith.addf %108, %110 : vector<128x256xf32>
    %cst_75 = arith.constant 0.000000e+00 : f32
    %112 = vector.broadcast %cst_75 : f32 to vector<128x256xf32>
    %113 = arith.maximumf %111, %112 : vector<128x256xf32>
    %c24_i32 = arith.constant 24 : i32
    %114 = vector.broadcast %c24_i32 : i32 to vector<128x1xi32>
    %115 = arith.cmpi slt, %16, %114 : vector<128x1xi32>
    %116 = vector.extract_strided_slice %113 {offsets = [0, 0], sizes = [128, 64], strides = [1, 1]} : vector<128x256xf32> to vector<128x64xf32>
    %117 = vector.extract_strided_slice %113 {offsets = [0, 64], sizes = [128, 64], strides = [1, 1]} : vector<128x256xf32> to vector<128x64xf32>
    %118 = arith.maximumf %116, %117 : vector<128x64xf32>
    %119 = vector.extract_strided_slice %113 {offsets = [0, 128], sizes = [128, 64], strides = [1, 1]} : vector<128x256xf32> to vector<128x64xf32>
    %120 = vector.extract_strided_slice %113 {offsets = [0, 192], sizes = [128, 64], strides = [1, 1]} : vector<128x256xf32> to vector<128x64xf32>
    %121 = arith.maximumf %119, %120 : vector<128x64xf32>
    %122 = arith.maximumf %118, %121 : vector<128x64xf32>
    %cst_76 = arith.constant 0.000000e+00 : f32
    %123 = vector.shape_cast %115 : vector<128x1xi1> to vector<128x1xi1>
    %124 = vector.broadcast %123 : vector<128x1xi1> to vector<128x64xi1>
    %125 = vector.broadcast %cst_76 : f32 to vector<128x64xf32>
    %126 = arith.select %124, %122, %125 : vector<128x64xi1>, vector<128x64xf32>
    %cst_77 = arith.constant 0.000000e+00 : f32
    %127 = vector.broadcast %cst_77 : f32 to vector<8x64xf32>
    %c0_78 = arith.constant 0 : index
    %c0_79 = arith.constant 0 : index
    %128 = vector.load %arg15[%c0_78, %c0_79] : memref<160x64xf32, #tpu.memory_space<vmem>>, vector<8x64xf32>
    tpu.vector_store %arg15[%c0_78, %c0_79], %127 {strides = array<i32>} : memref<160x64xf32, #tpu.memory_space<vmem>>, vector<8x64xf32>,
    %c8_80 = arith.constant 8 : index
    %c0_81 = arith.constant 0 : index
    %129 = vector.load %arg15[%c8_80, %c0_81] : memref<160x64xf32, #tpu.memory_space<vmem>>, vector<128x64xf32>
    tpu.vector_store %arg15[%c8_80, %c0_81], %126 {strides = array<i32>} : memref<160x64xf32, #tpu.memory_space<vmem>>, vector<128x64xf32>,
    %cst_82 = arith.constant 0.000000e+00 : f32
    %130 = vector.broadcast %cst_82 : f32 to vector<24x64xf32>
    %c136_83 = arith.constant 136 : index
    %c0_84 = arith.constant 0 : index
    %131 = vector.load %arg15[%c136_83, %c0_84] : memref<160x64xf32, #tpu.memory_space<vmem>>, vector<24x64xf32>
    tpu.vector_store %arg15[%c136_83, %c0_84], %130 {strides = array<i32>} : memref<160x64xf32, #tpu.memory_space<vmem>>, vector<24x64xf32>,
    %c4_85 = arith.constant 4 : index
    %c0_86 = arith.constant 0 : index
    %132 = vector.load %arg15[%c4_85, %c0_86] : memref<160x64xf32, #tpu.memory_space<vmem>>, vector<128x64xf32>
    %c0_87 = arith.constant 0 : index
    %c0_88 = arith.constant 0 : index
    %c0_89 = arith.constant 0 : index
    %133 = vector.load %arg8[%c0_87, %c0_88, %c0_89] : memref<6x64x512xf32, #tpu.memory_space<vmem>>, vector<1x64x512xf32>
    %134 = vector.shape_cast %133 : vector<1x64x512xf32> to vector<64x512xf32>
    %cst_90 = arith.constant dense<0.000000e+00> : vector<128x512xf32>
    %135 = tpu.matmul %132, %134, %cst_90 {dimension_numbers = #tpu.dot_dimension_numbers<[1], [0], [0], [1], [0, 0, 1, 1], [], []>} : vector<128x64xf32>, vector<64x512xf32>, vector<128x512xf32> -> vector<128x512xf32>
    %c8_91 = arith.constant 8 : index
    %c0_92 = arith.constant 0 : index
    %136 = vector.load %arg15[%c8_91, %c0_92] : memref<160x64xf32, #tpu.memory_space<vmem>>, vector<128x64xf32>
    %c1_93 = arith.constant 1 : index
    %c0_94 = arith.constant 0 : index
    %c0_95 = arith.constant 0 : index
    %137 = vector.load %arg8[%c1_93, %c0_94, %c0_95] : memref<6x64x512xf32, #tpu.memory_space<vmem>>, vector<1x64x512xf32>
    %138 = vector.shape_cast %137 : vector<1x64x512xf32> to vector<64x512xf32>
    %cst_96 = arith.constant dense<0.000000e+00> : vector<128x512xf32>
    %139 = tpu.matmul %136, %138, %cst_96 {dimension_numbers = #tpu.dot_dimension_numbers<[1], [0], [0], [1], [0, 0, 1, 1], [], []>} : vector<128x64xf32>, vector<64x512xf32>, vector<128x512xf32> -> vector<128x512xf32>
    %140 = arith.addf %135, %139 : vector<128x512xf32>
    %c12_97 = arith.constant 12 : index
    %c0_98 = arith.constant 0 : index
    %141 = vector.load %arg15[%c12_97, %c0_98] : memref<160x64xf32, #tpu.memory_space<vmem>>, vector<128x64xf32>
    %c2_99 = arith.constant 2 : index
    %c0_100 = arith.constant 0 : index
    %c0_101 = arith.constant 0 : index
    %142 = vector.load %arg8[%c2_99, %c0_100, %c0_101] : memref<6x64x512xf32, #tpu.memory_space<vmem>>, vector<1x64x512xf32>
    %143 = vector.shape_cast %142 : vector<1x64x512xf32> to vector<64x512xf32>
    %cst_102 = arith.constant dense<0.000000e+00> : vector<128x512xf32>
    %144 = tpu.matmul %141, %143, %cst_102 {dimension_numbers = #tpu.dot_dimension_numbers<[1], [0], [0], [1], [0, 0, 1, 1], [], []>} : vector<128x64xf32>, vector<64x512xf32>, vector<128x512xf32> -> vector<128x512xf32>
    %145 = arith.addf %140, %144 : vector<128x512xf32>
    %c16 = arith.constant 16 : index
    %c0_103 = arith.constant 0 : index
    %146 = vector.load %arg15[%c16, %c0_103] : memref<160x64xf32, #tpu.memory_space<vmem>>, vector<128x64xf32>
    %c3_104 = arith.constant 3 : index
    %c0_105 = arith.constant 0 : index
    %c0_106 = arith.constant 0 : index
    %147 = vector.load %arg8[%c3_104, %c0_105, %c0_106] : memref<6x64x512xf32, #tpu.memory_space<vmem>>, vector<1x64x512xf32>
    %148 = vector.shape_cast %147 : vector<1x64x512xf32> to vector<64x512xf32>
    %cst_107 = arith.constant dense<0.000000e+00> : vector<128x512xf32>
    %149 = tpu.matmul %146, %148, %cst_107 {dimension_numbers = #tpu.dot_dimension_numbers<[1], [0], [0], [1], [0, 0, 1, 1], [], []>} : vector<128x64xf32>, vector<64x512xf32>, vector<128x512xf32> -> vector<128x512xf32>
    %150 = arith.addf %145, %149 : vector<128x512xf32>
    %c20 = arith.constant 20 : index
    %c0_108 = arith.constant 0 : index
    %151 = vector.load %arg15[%c20, %c0_108] : memref<160x64xf32, #tpu.memory_space<vmem>>, vector<128x64xf32>
    %c4_109 = arith.constant 4 : index
    %c0_110 = arith.constant 0 : index
    %c0_111 = arith.constant 0 : index
    %152 = vector.load %arg8[%c4_109, %c0_110, %c0_111] : memref<6x64x512xf32, #tpu.memory_space<vmem>>, vector<1x64x512xf32>
    %153 = vector.shape_cast %152 : vector<1x64x512xf32> to vector<64x512xf32>
    %cst_112 = arith.constant dense<0.000000e+00> : vector<128x512xf32>
    %154 = tpu.matmul %151, %153, %cst_112 {dimension_numbers = #tpu.dot_dimension_numbers<[1], [0], [0], [1], [0, 0, 1, 1], [], []>} : vector<128x64xf32>, vector<64x512xf32>, vector<128x512xf32> -> vector<128x512xf32>
    %155 = arith.addf %150, %154 : vector<128x512xf32>
    %c24 = arith.constant 24 : index
    %c0_113 = arith.constant 0 : index
    %156 = vector.load %arg15[%c24, %c0_113] : memref<160x64xf32, #tpu.memory_space<vmem>>, vector<128x64xf32>
    %c5_114 = arith.constant 5 : index
    %c0_115 = arith.constant 0 : index
    %c0_116 = arith.constant 0 : index
    %157 = vector.load %arg8[%c5_114, %c0_115, %c0_116] : memref<6x64x512xf32, #tpu.memory_space<vmem>>, vector<1x64x512xf32>
    %158 = vector.shape_cast %157 : vector<1x64x512xf32> to vector<64x512xf32>
    %cst_117 = arith.constant dense<0.000000e+00> : vector<128x512xf32>
    %159 = tpu.matmul %156, %158, %cst_117 {dimension_numbers = #tpu.dot_dimension_numbers<[1], [0], [0], [1], [0, 0, 1, 1], [], []>} : vector<128x64xf32>, vector<64x512xf32>, vector<128x512xf32> -> vector<128x512xf32>
    %160 = arith.addf %155, %159 : vector<128x512xf32>
    %c0_118 = arith.constant 0 : index
    %c0_119 = arith.constant 0 : index
    %161 = vector.load %arg9[%c0_118, %c0_119] : memref<1x512xf32, #tpu.memory_space<vmem>>, vector<1x512xf32>
    %162 = vector.broadcast %161 : vector<1x512xf32> to vector<128x512xf32>
    %163 = arith.addf %160, %162 : vector<128x512xf32>
    %cst_120 = arith.constant 0.000000e+00 : f32
    %164 = vector.broadcast %cst_120 : f32 to vector<128x512xf32>
    %165 = arith.maximumf %163, %164 : vector<128x512xf32>
    %166 = vector.extract_strided_slice %165 {offsets = [0, 0], sizes = [128, 128], strides = [1, 1]} : vector<128x512xf32> to vector<128x128xf32>
    %167 = vector.extract_strided_slice %165 {offsets = [0, 128], sizes = [128, 128], strides = [1, 1]} : vector<128x512xf32> to vector<128x128xf32>
    %168 = arith.maximumf %166, %167 : vector<128x128xf32>
    %169 = vector.extract_strided_slice %165 {offsets = [0, 256], sizes = [128, 128], strides = [1, 1]} : vector<128x512xf32> to vector<128x128xf32>
    %170 = vector.extract_strided_slice %165 {offsets = [0, 384], sizes = [128, 128], strides = [1, 1]} : vector<128x512xf32> to vector<128x128xf32>
    %171 = arith.maximumf %169, %170 : vector<128x128xf32>
    %172 = arith.maximumf %168, %171 : vector<128x128xf32>
    %173 = tpu.iota {dimensions = array<i32: 0>} : vector<4x128xi32>
    %174 = tpu.iota {dimensions = array<i32: 1>} : vector<4x128xi32>
    %c32_i32_121 = arith.constant 32 : i32
    %175 = vector.broadcast %c32_i32_121 : i32 to vector<4x128xi32>
    %176 = arith.muli %175, %173 : vector<4x128xi32>
    %177 = arith.cmpi eq, %174, %176 : vector<4x128xi32>
    %178 = arith.extui %177 : vector<4x128xi1> to vector<4x128xi32>
    %179 = arith.sitofp %178 : vector<4x128xi32> to vector<4x128xf32>
    %c32_i32_122 = arith.constant 32 : i32
    %180 = vector.broadcast %c32_i32_122 : i32 to vector<4x128xi32>
    %181 = arith.muli %180, %173 : vector<4x128xi32>
    %c16_i32 = arith.constant 16 : i32
    %182 = vector.broadcast %c16_i32 : i32 to vector<4x128xi32>
    %183 = arith.addi %181, %182 : vector<4x128xi32>
    %184 = arith.cmpi eq, %174, %183 : vector<4x128xi32>
    %185 = arith.extui %184 : vector<4x128xi1> to vector<4x128xi32>
    %186 = arith.sitofp %185 : vector<4x128xi32> to vector<4x128xf32>
    %cst_123 = arith.constant dense<0.000000e+00> : vector<4x128xf32>
    %187 = tpu.matmul %179, %172, %cst_123 {dimension_numbers = #tpu.dot_dimension_numbers<[1], [0], [0], [1], [0, 0, 1, 1], [], []>} : vector<4x128xf32>, vector<128x128xf32>, vector<4x128xf32> -> vector<4x128xf32>
    %cst_124 = arith.constant dense<0.000000e+00> : vector<4x128xf32>
    %188 = tpu.matmul %186, %172, %cst_124 {dimension_numbers = #tpu.dot_dimension_numbers<[1], [0], [0], [1], [0, 0, 1, 1], [], []>} : vector<4x128xf32>, vector<128x128xf32>, vector<4x128xf32> -> vector<4x128xf32>
    %189 = vector.extract_strided_slice %187 {offsets = [0, 0], sizes = [4, 64], strides = [1, 1]} : vector<4x128xf32> to vector<4x64xf32>
    %190 = vector.extract_strided_slice %187 {offsets = [0, 64], sizes = [4, 64], strides = [1, 1]} : vector<4x128xf32> to vector<4x64xf32>
    %191 = arith.addf %189, %190 : vector<4x64xf32>
    %192 = vector.extract_strided_slice %188 {offsets = [0, 0], sizes = [4, 64], strides = [1, 1]} : vector<4x128xf32> to vector<4x64xf32>
    %193 = arith.addf %191, %192 : vector<4x64xf32>
    %c0_125 = arith.constant 0 : index
    %c0_126 = arith.constant 0 : index
    %194 = vector.load %arg10[%c0_125, %c0_126] : memref<64x8xf32, #tpu.memory_space<vmem>>, vector<64x8xf32>
    %cst_127 = arith.constant dense<0.000000e+00> : vector<4x8xf32>
    %195 = tpu.matmul %193, %194, %cst_127 {dimension_numbers = #tpu.dot_dimension_numbers<[1], [0], [0], [1], [0, 0, 1, 1], [], []>} : vector<4x64xf32>, vector<64x8xf32>, vector<4x8xf32> -> vector<4x8xf32>
    %c0_128 = arith.constant 0 : index
    %c0_129 = arith.constant 0 : index
    %196 = vector.load %arg11[%c0_128, %c0_129] : memref<1x8xf32, #tpu.memory_space<vmem>>, vector<1x8xf32>
    %197 = vector.broadcast %196 : vector<1x8xf32> to vector<4x8xf32>
    %198 = arith.addf %195, %197 : vector<4x8xf32>
    %c0_130 = arith.constant 0 : index
    %c0_131 = arith.constant 0 : index
    %c0_132 = arith.constant 0 : index
    %199 = vector.load %arg12[%c0_130, %c0_131, %c0_132] : memref<1x4x8xf32, #tpu.memory_space<vmem>>, vector<1x4x8xf32>
    %200 = vector.shape_cast %199 : vector<1x4x8xf32> to vector<4x8xf32>
    %201 = vector.shape_cast %198 : vector<4x8xf32> to vector<1x4x8xf32>
    tpu.vector_store %arg12[%c0_130, %c0_131, %c0_132], %201 {strides = array<i32>} : memref<1x4x8xf32, #tpu.memory_space<vmem>>, vector<1x4x8xf32>,
    return
  }
  func.func @transform_0(%arg0: i32) -> (i32, i32) {
    %c0_i32 = arith.constant 0 : i32
    %c0_i32_0 = arith.constant 0 : i32
    return %arg0, %c0_i32 : i32, i32
  }
  func.func @transform_1(%arg0: i32) -> (i32, i32) {
    %c0_i32 = arith.constant 0 : i32
    %c0_i32_0 = arith.constant 0 : i32
    %c0_i32_1 = arith.constant 0 : i32
    return %c0_i32, %c0_i32_0 : i32, i32
  }
  func.func @transform_2(%arg0: i32) -> (i32, i32) {
    %c0_i32 = arith.constant 0 : i32
    %c0_i32_0 = arith.constant 0 : i32
    %c0_i32_1 = arith.constant 0 : i32
    return %c0_i32, %c0_i32_0 : i32, i32
  }
  func.func @transform_3(%arg0: i32) -> (i32, i32, i32) {
    %c0_i32 = arith.constant 0 : i32
    %c0_i32_0 = arith.constant 0 : i32
    %c0_i32_1 = arith.constant 0 : i32
    %c0_i32_2 = arith.constant 0 : i32
    return %c0_i32, %c0_i32_0, %c0_i32_1 : i32, i32, i32
  }
  func.func @transform_4(%arg0: i32) -> (i32, i32) {
    %c0_i32 = arith.constant 0 : i32
    %c0_i32_0 = arith.constant 0 : i32
    %c0_i32_1 = arith.constant 0 : i32
    return %c0_i32, %c0_i32_0 : i32, i32
  }
  func.func @transform_5(%arg0: i32) -> (i32, i32, i32) {
    %c0_i32 = arith.constant 0 : i32
    %c0_i32_0 = arith.constant 0 : i32
    %c0_i32_1 = arith.constant 0 : i32
    %c0_i32_2 = arith.constant 0 : i32
    return %c0_i32, %c0_i32_0, %c0_i32_1 : i32, i32, i32
  }
  func.func @transform_6(%arg0: i32) -> (i32, i32) {
    %c0_i32 = arith.constant 0 : i32
    %c0_i32_0 = arith.constant 0 : i32
    %c0_i32_1 = arith.constant 0 : i32
    return %c0_i32, %c0_i32_0 : i32, i32
  }
  func.func @transform_7(%arg0: i32) -> (i32, i32, i32) {
    %c0_i32 = arith.constant 0 : i32
    %c0_i32_0 = arith.constant 0 : i32
    %c0_i32_1 = arith.constant 0 : i32
    %c0_i32_2 = arith.constant 0 : i32
    return %c0_i32, %c0_i32_0, %c0_i32_1 : i32, i32, i32
  }
  func.func @transform_8(%arg0: i32) -> (i32, i32) {
    %c0_i32 = arith.constant 0 : i32
    %c0_i32_0 = arith.constant 0 : i32
    %c0_i32_1 = arith.constant 0 : i32
    return %c0_i32, %c0_i32_0 : i32, i32
  }
  func.func @transform_9(%arg0: i32) -> (i32, i32) {
    %c0_i32 = arith.constant 0 : i32
    %c0_i32_0 = arith.constant 0 : i32
    %c0_i32_1 = arith.constant 0 : i32
    return %c0_i32, %c0_i32_0 : i32, i32
  }
  func.func @transform_10(%arg0: i32) -> (i32, i32) {
    %c0_i32 = arith.constant 0 : i32
    %c0_i32_0 = arith.constant 0 : i32
    %c0_i32_1 = arith.constant 0 : i32
    return %c0_i32, %c0_i32_0 : i32, i32
  }
  func.func @transform_11(%arg0: i32) -> (i32, i32, i32) {
    %c0_i32 = arith.constant 0 : i32
    %c0_i32_0 = arith.constant 0 : i32
    %c0_i32_1 = arith.constant 0 : i32
    return %arg0, %c0_i32, %c0_i32_0 : i32, i32, i32
  }
}

</mosaic_0001>

<bundles_post_ra>
// kernel: net_forward.1
= control target key start
LH: loop header
LB: loop body
LE: loop exit
PB: predicated region body
PF: predicated region fallthrough
CT: control target
= control target key end

     0   :  { %s11882_s0 = inlined_call_operand.vmem [shape: f32[256,256], index: 0, kind: input, shape index: {}]   ;;  %s11883_s1 = inlined_call_operand.vmem [shape: f32[256,512], index: 1, kind: input, shape index: {}]   ;;  %s11884_s2 = inlined_call_operand.vmem [shape: f32[1,512], index: 2, kind: input, shape index: {}]   ;;  %s11885_s3 = inlined_call_operand.hbm [shape: f32[3,128,128], index: 3, kind: input, shape index: {}]   ;;  %s11886_s4 = inlined_call_operand.vmem [shape: f32[1,128], index: 4, kind: input, shape index: {}]   ;;  %s11887_s5 = inlined_call_operand.hbm [shape: f32[6,32,256], index: 5, kind: input, shape index: {}]   ;;  %s11888_s6 = inlined_call_operand.vmem [shape: f32[1,256], index: 6, kind: input, shape index: {}]   ;;  %s11889_s7 = inlined_call_operand.vmem [shape: f32[6,64,512], index: 7, kind: input, shape index: {}]   ;;  %s11890_s8 = inlined_call_operand.vmem [shape: f32[1,512], index: 8, kind: input, shape index: {}]   ;;  %s11891_s9 = inlined_call_operand.vmem [shape: f32[64,8], index: 9, kind: input, shape index: {}]   ;;  %s11892_s10 = inlined_call_operand.vmem [shape: f32[1,8], index: 10, kind: input, shape index: {}]   ;;  %s11893_s11 = inlined_call_operand.hbm [shape: f32[2,4,8], index: 11, kind: output, shape index: {}]  }
   0x1   :  { %11903 = sst [smem:[#allocation164_spill]] %s11885_s3 }
   0x2   :  { %16 = vsyncpa [#allocation6], 0 }
   0x3   :  { %17 = vsyncpa [#allocation9], 0 }
   0x4   :  { %18 = vsyncpa [#allocation7], 0 }
   0x5   :  { %20 = vsyncpa [#allocation7 + $0x1], 0  ;;  %s7565_s17 = smov 0   ;;  %s7567_s18 = smov 0  }
   0x6   :  { %s7569_s19 = smov 0   ;;  %s7571_s20 = smov 0  }
   0x7 LB: > { %11904 = sst [smem:[#allocation14_spill]] %s7489_s19  ;;  %s7586_s21 = sadd.s32 4294967295, %s7493_s20   ;;  %s7493_s20 = sphi %s7571_s20, %s12394_s20   ;;  %s7489_s19 = sphi %s7569_s19, %s12391_s19   ;;  %s7485_s18 = sphi %s7567_s18, %s12393_s18   ;;  %s7481_s17 = sphi %s7565_s17, %s12392_s17  }
   0x8   : > { %s6506_s22 = sadd.s32 4294967294, %s7493_s20   ;;  %s7590_s23 = sadd.s32 1, %s7493_s20  }
   0x9   : > { %s269_s24 = sadd.s32 1, %s7489_s19  ;;  %s266_s25 = ssub.s32 %s7493_s20, %s7590_s23 }
   0xa   : > { %p279_p0 = scmp.ne.s32.totalorder %s7489_s19, %s7485_s18  ;;  %p267_p1 = scmp.eq.s32.totalorder %s266_s25, 0 }
   0xb   : > { %p280_p2 = scmp.eq.s32.totalorder %s7586_s21, 1  ;;  %p285_p3 = scmp.ne.s32.totalorder %s7485_s18, %s7481_s17 }
   0xc   : > { %p286_p4 = scmp.eq.s32.totalorder %s6506_s22, 1  ;;  %p6507_p7 = scmp.ge.s32.totalorder %s7493_s20, 1 }
   0xd   : > { %s7601_s26 = scalar_select %p267_p1, %s7489_s19, %s269_s24  }
   0xe   : > { %p7603_p5 = por %p280_p2, %p279_p0  ;;  %p7607_p6 = por %p286_p4, %p285_p3 }
   0xf   : > { %11905 = sst [smem:[#allocation15_spill]] %s7601_s26  ;;  %p293_p8 = scmp.lt.s32.totalorder %s7493_s20, 3 }
  0x10   : > { %p7309_p9 = scmp.eq.s32.totalorder %s7586_s21, 0  ;;  %s11909_s3 = sld [smem:[#allocation164_spill]] }
  0x11   : > { %p7614_p10 = pnand %p6507_p7, %p293_p8  ;;  %s7495_s14 = smov [#allocation5]  }
  0x12   : > { %s312_s15 = sshll.u32 %s7495_s14, 4  ;;  %s327_s24 = sshll.u32 %s11887_s5, 4  ;;  %s313_s15 = int_to_ptr.vmem [resolvable:$true] %s312_s15  ;;  %s328_s24 = int_to_ptr.hbm [resolvable:$true] %s327_s24 }
  0x13   : > { %p7298_p11 = pneg %p7614_p10  ;;  %s7496_s25 = smov 128  }
  0x14   : > { %s7497_s26 = smov 8   ;;  %s7498_s19 = smov [#allocation8]  }
  0x15   : > { %p7299_p12 = pnand %p7309_p9, %p7298_p11  ;;  %s329_s30 = sshll.u32 %s7498_s19, 4  ;;  %s330_s30 = int_to_ptr.vmem [resolvable:$true] %s329_s30 }
  0x16   : > { %s310_s13 = sshll.u32 %s11909_s3, 4  ;;  %s7499_s12 = smov 256   ;;  %s311_s13 = int_to_ptr.hbm [resolvable:$true] %s310_s13 }
  0x17   : > { %7301 = dma.hbm_to_vmem [thread:$0]  (!%p7299_p12), %s311_s13, 6144, %s313_s15, [#allocation6], %s7496_s25, %s7496_s25, %s7497_s26  }
  0x18   : > { %s7500_s3 = smov 16   ;;  %370 = sbr.rel (%p7614_p10) target bundleno = 2700 (0xa8c), region = 64 }
  0x19   : > { %7304 = dma.hbm_to_vmem [thread:$0]  (!%p7299_p12), %s328_s24, 6144, %s330_s30, [#allocation9], %s7499_s12, %s7499_s12, %s7500_s3  }
  0x1d   : > { %7468 = dma.done.wait (%p7309_p9), [#allocation6], 6144  }
  0x1e   : > { %7470 = vsyncadd (%p7309_p9), [#allocation6], 4294961152 }
  0x1f   : > { %7472 = dma.done.wait (%p7309_p9), [#allocation9], 6144  }
  0x20   : > { %7474 = vsyncadd (%p7309_p9), [#allocation9], 4294961152  ;;  %v726_v0 = vld [vmem:[%s11883_s1 + $0x1e8] sm:$0xff]  ;;  %v725_v4 = vld [vmem:[%s11883_s1 + $0x1e0] sm:$0xff]  ;;  %s6515_s15 = sshll.u32 %s7586_s21, 4  ;;  %vm3712_vm0 = vcmask 523264  }
  0x21   : > { %v722_v1 = vld [vmem:[%s11883_s1 + $0x1c8] sm:$0xff]  ;;  %933 = vmatpush.msra.mxu2 %v726_v0  ;;  %803 = vmatpush.msra.mxu0 %v725_v4  ;;  %v721_v7 = vld [vmem:[%s11883_s1 + $0x1c0] sm:$0xff]  ;;  %p7746_p13 = scmp.lt.s32.totalorder %s6515_s15, 31  ;;  %s7502_s25 = smov 96   ;;  %vm2038_vm5 = vcmask 261120   ;;  %vm6407_vm8 = vcmask 60416  }
  0x22   : > { %v790_v2 = vld [vmem:[%s11883_s1 + $0x3e8] sm:$0xff]  ;;  %v789_v9 = vld [vmem:[%s11883_s1 + $0x3e0] sm:$0xff]  ;;  %s7503_s30 = smov 64   ;;  %s414_s16 = sand.u32 1, %s7485_s18  }
  0x23   : > { %998 = vmatpush.msra.mxu3 %v790_v2  ;;  %v786_v3 = vld [vmem:[%s11883_s1 + $0x3c8] sm:$0xff]  ;;  %934 = vmatpush.msra.mxu2 %v722_v1  ;;  %v717_v11 = vld [vmem:[%s11883_s1 + $0x1a0] sm:$0xff]  ;;  %s12396_s15 = smov (!%p7746_p13, %s6515_s15), 31  ;;  %s7260_s24 = sshll.u32 %s7586_s21, 2 }
  0x24   : > { %v718_v5 = vld [vmem:[%s11883_s1 + $0x1a8] sm:$0xff]  ;;  %804 = vmatpush.msra.mxu0 %v721_v7  ;;  %868 = vmatpush.msra.mxu1 %v789_v9  ;;  %v785_v12 = vld [vmem:[%s11883_s1 + $0x3c0] sm:$0xff]  ;;  %s7263_s29 = sshll.u32 %s12396_s15, 4  ;;  %s6420_s12 = scalar_lea.hbm %s11893_s11, %s7260_s24 }
  0x25   : > { %v782_v6 = vld [vmem:[%s11883_s1 + $0x3a8] sm:$0xff]  ;;  %999 = vmatpush.msra.mxu3 %v786_v3  ;;  %935 = vmatpush.msra.mxu2 %v718_v5  ;;  %v713_v13 = vld [vmem:[%s11883_s1 + $0x180] sm:$0xff]  ;;  %s7826_s22 = scalar_lea.vmem %s11882_s0, %s7263_s29  ;;  %s6424_s3 = sshll.u32 %s6420_s12, 4  ;;  %s6425_s3 = int_to_ptr.hbm [resolvable:$true] %s6424_s3 }
  0x26   : > { %v714_v8 = vld [vmem:[%s11883_s1 + $0x188] sm:$0xff]  ;;  %v781_v14 = vld [vmem:[%s11883_s1 + $0x3a0] sm:$0xff]  ;;  %805 = vmatpush.msra.mxu0 %v717_v11  ;;  %869 = vmatpush.msra.mxu1 %v785_v12  ;;  %v7860_v2 = vld [vmem:[%s7826_s22 + $0x10] sm:$0xff]  ;;  %s6410_s13 = scalar_lea.sflag [#allocation7], %s414_s16  ;;  %s7437_s21 = sshra.s32 %s6425_s3, 4  ;;  %s7438_s21 = int_to_ptr.hbm [resolvable:$true] %s7437_s21 }
  0x27   : > { %v778_v10 = vld [vmem:[%s11883_s1 + $0x388] sm:$0xff]  ;;  %1000 = vmatpush.msra.mxu3 %v782_v6  ;;  %936 = vmatpush.msra.mxu2 %v714_v8  ;;  %v709_v17 = vld [vmem:[%s11883_s1 + $0x160] sm:$0xff]  ;;  %v7863_v3 = vld [vmem:[%s7826_s22 + $0x18] sm:$0xff]  ;;  %s7439_s14 = scalar_lea.hbm %s7438_s21, 4  ;;  %p7444_p3 = scmp.lt.s32.totalorder %s7438_s21, %s11893_s11 }
  0x28   : > { %v710_v15 = vld [vmem:[%s11883_s1 + $0x168] sm:$0xff]  ;;  %v777_v18 = vld [vmem:[%s11883_s1 + $0x380] sm:$0xff]  ;;  %806 = vmatpush.msra.mxu0 %v713_v13  ;;  %870 = vmatpush.msra.mxu1 %v781_v14  ;;  %v7880_v6 = vld [vmem:[%s7826_s22 + $0x30] sm:$0xff]  ;;  %p7440_p0 = scmp.ne.s32.totalorder %s7438_s21, %s7439_s14 }
  0x29   : > { %v774_v16 = vld [vmem:[%s11883_s1 + $0x368] sm:$0xff]  ;;  %1001 = vmatpush.msra.mxu3 %v778_v10  ;;  %937 = vmatpush.msra.mxu2 %v710_v15  ;;  %v705_v21 = vld [vmem:[%s11883_s1 + $0x140] sm:$0xff]  ;;  %v7883_v7 = vld [vmem:[%s7826_s22 + $0x38] sm:$0xff] }
  0x2a   : > { %v706_v19 = vld [vmem:[%s11883_s1 + $0x148] sm:$0xff]  ;;  %v773_v22 = vld [vmem:[%s11883_s1 + $0x360] sm:$0xff]  ;;  %807 = vmatpush.msra.mxu0 %v709_v17  ;;  %871 = vmatpush.msra.mxu1 %v777_v18  ;;  %v7900_v10 = vld [vmem:[%s7826_s22 + $0x50] sm:$0xff]  ;;  %p7441_p1 = pnand %p7440_p0, %p7603_p5 }
  0x2b   : > { %v770_v20 = vld [vmem:[%s11883_s1 + $0x348] sm:$0xff]  ;;  %1002 = vmatpush.msra.mxu3 %v774_v16  ;;  %938 = vmatpush.msra.mxu2 %v706_v19  ;;  %v701_v25 = vld [vmem:[%s11883_s1 + $0x120] sm:$0xff]  ;;  %v7903_v11 = vld [vmem:[%s7826_s22 + $0x58] sm:$0xff] }
  0x2c   : > { %v702_v23 = vld [vmem:[%s11883_s1 + $0x128] sm:$0xff]  ;;  %v769_v26 = vld [vmem:[%s11883_s1 + $0x340] sm:$0xff]  ;;  %808 = vmatpush.msra.mxu0 %v705_v21  ;;  %872 = vmatpush.msra.mxu1 %v773_v22  ;;  %v7920_v14 = vld [vmem:[%s7826_s22 + $0x70] sm:$0xff]  ;;  %p7442_p2 = pneg %p7441_p1 }
  0x2d   : > { %v766_v24 = vld [vmem:[%s11883_s1 + $0x328] sm:$0xff]  ;;  %1003 = vmatpush.msra.mxu3 %v770_v20  ;;  %939 = vmatpush.msra.mxu2 %v702_v23  ;;  %v697_v29 = vld [vmem:[%s11883_s1 + $0x100] sm:$0xff]  ;;  %v7923_v15 = vld [vmem:[%s7826_s22 + $0x78] sm:$0xff] }
  0x2e   : > { %v698_v27 = vld [vmem:[%s11883_s1 + $0x108] sm:$0xff]  ;;  %v765_v30 = vld [vmem:[%s11883_s1 + $0x320] sm:$0xff]  ;;  %809 = vmatpush.msra.mxu0 %v701_v25  ;;  %873 = vmatpush.msra.mxu1 %v769_v26  ;;  %v728_v18 = vld [vmem:[%s11883_s1 + $0x1f8] sm:$0xff] }
  0x2f   : > { %v762_v28 = vld [vmem:[%s11883_s1 + $0x308] sm:$0xff]  ;;  %1004 = vmatpush.msra.mxu3 %v766_v24  ;;  %940 = vmatpush.msra.mxu2 %v698_v27  ;;  %v693_v33 = vld [vmem:[%s11883_s1 + $0xe0] sm:$0xff]  ;;  %v724_v19 = vld [vmem:[%s11883_s1 + $0x1d8] sm:$0xff] }
  0x30   : > { %v694_v31 = vld [vmem:[%s11883_s1 + $0xe8] sm:$0xff]  ;;  %v761_v34 = vld [vmem:[%s11883_s1 + $0x300] sm:$0xff]  ;;  %810 = vmatpush.msra.mxu0 %v697_v29  ;;  %874 = vmatpush.msra.mxu1 %v765_v30  ;;  %v792_v20 = vld [vmem:[%s11883_s1 + $0x3f8] sm:$0xff] }
  0x31   : > { %v758_v32 = vld [vmem:[%s11883_s1 + $0x2e8] sm:$0xff]  ;;  %1005 = vmatpush.msra.mxu3 %v762_v28  ;;  %941 = vmatpush.msra.mxu2 %v694_v31  ;;  %v689_v37 = vld [vmem:[%s11883_s1 + $0xc0] sm:$0xff]  ;;  %v788_v21 = vld [vmem:[%s11883_s1 + $0x3d8] sm:$0xff] }
  0x32   : > { %v690_v35 = vld [vmem:[%s11883_s1 + $0xc8] sm:$0xff]  ;;  %v757_v38 = vld [vmem:[%s11883_s1 + $0x2e0] sm:$0xff]  ;;  %811 = vmatpush.msra.mxu0 %v693_v33  ;;  %875 = vmatpush.msra.mxu1 %v761_v34  ;;  %v720_v22 = vld [vmem:[%s11883_s1 + $0x1b8] sm:$0xff] }
  0x33   : > { %v754_v36 = vld [vmem:[%s11883_s1 + $0x2c8] sm:$0xff]  ;;  %1006 = vmatpush.msra.mxu3 %v758_v32  ;;  %942 = vmatpush.msra.mxu2 %v690_v35  ;;  %v685_v41 = vld [vmem:[%s11883_s1 + $0xa0] sm:$0xff]  ;;  %v727_v23 = vld [vmem:[%s11883_s1 + $0x1f0] sm:$0xff] }
  0x34   : > { %v686_v39 = vld [vmem:[%s11883_s1 + $0xa8] sm:$0xff]  ;;  %v753_v42 = vld [vmem:[%s11883_s1 + $0x2c0] sm:$0xff]  ;;  %812 = vmatpush.msra.mxu0 %v689_v37  ;;  %876 = vmatpush.msra.mxu1 %v757_v38  ;;  %v784_v24 = vld [vmem:[%s11883_s1 + $0x3b8] sm:$0xff] }
  0x35   : > { %v750_v40 = vld [vmem:[%s11883_s1 + $0x2a8] sm:$0xff]  ;;  %1007 = vmatpush.msra.mxu3 %v754_v36  ;;  %943 = vmatpush.msra.mxu2 %v686_v39  ;;  %v681_v45 = vld [vmem:[%s11883_s1 + $0x80] sm:$0xff]  ;;  %v716_v25 = vld [vmem:[%s11883_s1 + $0x198] sm:$0xff] }
  0x36   : > { %v682_v43 = vld [vmem:[%s11883_s1 + $0x88] sm:$0xff]  ;;  %v749_v46 = vld [vmem:[%s11883_s1 + $0x2a0] sm:$0xff]  ;;  %813 = vmatpush.msra.mxu0 %v685_v41  ;;  %877 = vmatpush.msra.mxu1 %v753_v42  ;;  %v7964_v26 = vld [vmem:[%s7826_s22 + $0x90] sm:$0xff] }
  0x37   : > { %v746_v44 = vld [vmem:[%s11883_s1 + $0x288] sm:$0xff]  ;;  %1008 = vmatpush.msra.mxu3 %v750_v40  ;;  %944 = vmatpush.msra.mxu2 %v682_v43  ;;  %v677_v49 = vld [vmem:[%s11883_s1 + $0x60] sm:$0xff]  ;;  %v7967_v27 = vld [vmem:[%s7826_s22 + $0x98] sm:$0xff] }
  0x38   : > { %v678_v47 = vld [vmem:[%s11883_s1 + $0x68] sm:$0xff]  ;;  %v745_v50 = vld [vmem:[%s11883_s1 + $0x280] sm:$0xff]  ;;  %814 = vmatpush.msra.mxu0 %v681_v45  ;;  %878 = vmatpush.msra.mxu1 %v749_v46  ;;  %v723_v28 = vld [vmem:[%s11883_s1 + $0x1d0] sm:$0xff] }
  0x39   : > { %v742_v48 = vld [vmem:[%s11883_s1 + $0x268] sm:$0xff]  ;;  %1009 = vmatpush.msra.mxu3 %v746_v44  ;;  %945 = vmatpush.msra.mxu2 %v678_v47  ;;  %v673_v53 = vld [vmem:[%s11883_s1 + $0x40] sm:$0xff]  ;;  %v791_v29 = vld [vmem:[%s11883_s1 + $0x3f0] sm:$0xff] }
  0x3a   : > { %v674_v51 = vld [vmem:[%s11883_s1 + $0x48] sm:$0xff]  ;;  %v741_v54 = vld [vmem:[%s11883_s1 + $0x260] sm:$0xff]  ;;  %815 = vmatpush.msra.mxu0 %v677_v49  ;;  %879 = vmatpush.msra.mxu1 %v745_v50  ;;  %v712_v30 = vld [vmem:[%s11883_s1 + $0x178] sm:$0xff] }
  0x3b   : > { %v738_v52 = vld [vmem:[%s11883_s1 + $0x248] sm:$0xff]  ;;  %1010 = vmatpush.msra.mxu3 %v742_v48  ;;  %946 = vmatpush.msra.mxu2 %v674_v51  ;;  %v669_v57 = vld [vmem:[%s11883_s1 + $0x20] sm:$0xff]  ;;  %v780_v31 = vld [vmem:[%s11883_s1 + $0x398] sm:$0xff] }
  0x3c   : > { %v670_v55 = vld [vmem:[%s11883_s1 + $0x28] sm:$0xff]  ;;  %v737_v58 = vld [vmem:[%s11883_s1 + $0x240] sm:$0xff]  ;;  %816 = vmatpush.msra.mxu0 %v673_v53  ;;  %880 = vmatpush.msra.mxu1 %v741_v54  ;;  %v719_v32 = vld [vmem:[%s11883_s1 + $0x1b0] sm:$0xff] }
  0x3d   : > { %v734_v56 = vld [vmem:[%s11883_s1 + $0x228] sm:$0xff]  ;;  %1011 = vmatpush.msra.mxu3 %v738_v52  ;;  %947 = vmatpush.msra.mxu2 %v670_v55  ;;  %v7841_v61 = vld [vmem:[%s7826_s22] sm:$0xff]  ;;  %v787_v33 = vld [vmem:[%s11883_s1 + $0x3d0] sm:$0xff] }
  0x3e   : > { %v666_v59 = vld [vmem:[%s11883_s1 + $0x8] sm:$0xff]  ;;  %817 = vmatpush.msra.mxu0 %v669_v57  ;;  %881 = vmatpush.msra.mxu1 %v737_v58  ;;  %v665_v63 = vld [vmem:[%s11883_s1] sm:$0xff]  ;;  %v708_v34 = vld [vmem:[%s11883_s1 + $0x158] sm:$0xff] }
  0x3f   : > { %v730_v60 = vld [vmem:[%s11883_s1 + $0x208] sm:$0xff]  ;;  %1012 = vmatpush.msra.mxu3 %v734_v56  ;;  %v733_v0 = vld [vmem:[%s11883_s1 + $0x220] sm:$0xff]  ;;  %948 = vmatpush.msra.mxu2 %v666_v59  ;;  %v776_v35 = vld [vmem:[%s11883_s1 + $0x378] sm:$0xff] }
  0x40   : > { %v7844_v62 = vld [vmem:[%s7826_s22 + $0x8] sm:$0xff]  ;;  %949 = vmatmul.f32.vlgmr.msra.gmra.mxu2 %v7841_v61  ;;  %v729_v1 = vld [vmem:[%s11883_s1 + $0x200] sm:$0xff]  ;;  %818 = vmatpush.msra.mxu0 %v665_v63  ;;  %v715_v36 = vld [vmem:[%s11883_s1 + $0x190] sm:$0xff] }
  0x41   : > { %1013 = vmatpush.msra.mxu3 %v730_v60  ;;  %882 = vmatpush.msra.mxu1 %v733_v0  ;;  %v7870_v4 = vld [vmem:[%s7826_s22 + $0x20] sm:$0xff]  ;;  %v7873_v5 = vld [vmem:[%s7826_s22 + $0x28] sm:$0xff]  ;;  %v704_v37 = vld [vmem:[%s11883_s1 + $0x138] sm:$0xff] }
  0x42   : > { %1014 = vmatmul.f32.vlgmr.msra.gmra.mxu3 %v7844_v62  ;;  %819 = vmatmul.f32.vlgmr.msra.gmra.mxu0 %v7841_v61  ;;  %v7890_v8 = vld [vmem:[%s7826_s22 + $0x40] sm:$0xff]  ;;  %v7893_v9 = vld [vmem:[%s7826_s22 + $0x48] sm:$0xff]  ;;  %v783_v38 = vld [vmem:[%s11883_s1 + $0x3b0] sm:$0xff] }
  0x43   : > { %883 = vmatpush.msra.mxu1 %v729_v1  ;;  %v7910_v12 = vld [vmem:[%s7826_s22 + $0x60] sm:$0xff]  ;;  %v7913_v13 = vld [vmem:[%s7826_s22 + $0x68] sm:$0xff]  ;;  %1193 = vmatpush.msrb.mxu2 %v728_v18  ;;  %v772_v39 = vld [vmem:[%s11883_s1 + $0x358] sm:$0xff] }
  0x44   : > { %884 = vmatmul.f32.vlgmr.msra.gmra.mxu1 %v7844_v62  ;;  %v7930_v16 = vld [vmem:[%s7826_s22 + $0x80] sm:$0xff]  ;;  %v7933_v17 = vld [vmem:[%s7826_s22 + $0x88] sm:$0xff]  ;;  %1258 = vmatpush.msrb.mxu3 %v792_v20  ;;  %v711_v42 = vld [vmem:[%s11883_s1 + $0x170] sm:$0xff] }
  0x45   : > { %1194 = vmatpush.msrb.mxu2 %v724_v19  ;;  %1063 = vmatpush.msrb.mxu0 %v727_v23  ;;  %v8010_v40 = vld [vmem:[%s7826_s22 + $0xa0] sm:$0xff]  ;;  %v8013_v41 = vld [vmem:[%s7826_s22 + $0xa8] sm:$0xff]  ;;  %v779_v43 = vld [vmem:[%s11883_s1 + $0x390] sm:$0xff] }
  0x46   : > { %1259 = vmatpush.msrb.mxu3 %v788_v21  ;;  %1128 = vmatpush.msrb.mxu1 %v791_v29  ;;  %v700_v44 = vld [vmem:[%s11883_s1 + $0x118] sm:$0xff]  ;;  %v707_v46 = vld [vmem:[%s11883_s1 + $0x150] sm:$0xff]  ;;  %v8105_v23 = vld [vmem:[%s7826_s22 + $0xc8] sm:$0xff] }
  0x47   : > { %1195 = vmatpush.msrb.mxu2 %v720_v22  ;;  %1064 = vmatpush.msrb.mxu0 %v723_v28  ;;  %v768_v45 = vld [vmem:[%s11883_s1 + $0x338] sm:$0xff]  ;;  %v775_v48 = vld [vmem:[%s11883_s1 + $0x370] sm:$0xff]  ;;  %v8102_v22 = vld [vmem:[%s7826_s22 + $0xc0] sm:$0xff] }
  0x48   : > { %952 = vmatmul.f32.gmra.mxu2 %v7860_v2  ;;  %1260 = vmatpush.msrb.mxu3 %v784_v24  ;;  %v696_v47 = vld [vmem:[%s11883_s1 + $0xf8] sm:$0xff]  ;;  %v703_v50 = vld [vmem:[%s11883_s1 + $0x130] sm:$0xff] }
  0x49   : > { %1196 = vmatpush.msrb.mxu2 %v716_v25  ;;  %1065 = vmatpush.msrb.mxu0 %v719_v32  ;;  %v764_v49 = vld [vmem:[%s11883_s1 + $0x318] sm:$0xff]  ;;  %v771_v52 = vld [vmem:[%s11883_s1 + $0x350] sm:$0xff] }
  0x4a   : > { %1017 = vmatmul.f32.gmra.mxu3 %v7863_v3  ;;  %822 = vmatmul.f32.gmra.mxu0 %v7860_v2  ;;  %v692_v51 = vld [vmem:[%s11883_s1 + $0xd8] sm:$0xff]  ;;  %v8056_v54 = vld [vmem:[%s7826_s22 + $0xb0] sm:$0xff] }
  0x4b   : > { %1197 = vmatpush.msrb.mxu2 %v712_v30  ;;  %1261 = vmatpush.msrb.mxu3 %v780_v31  ;;  %v760_v53 = vld [vmem:[%s11883_s1 + $0x2f8] sm:$0xff]  ;;  %v699_v56 = vld [vmem:[%s11883_s1 + $0x110] sm:$0xff] }
  0x4c   : > { %887 = vmatmul.f32.gmra.mxu1 %v7863_v3  ;;  %1066 = vmatpush.msrb.mxu0 %v715_v36  ;;  %v8059_v55 = vld [vmem:[%s7826_s22 + $0xb8] sm:$0xff]  ;;  %v767_v57 = vld [vmem:[%s11883_s1 + $0x330] sm:$0xff] }
  0x4d   : > { %1198 = vmatpush.msrb.mxu2 %v708_v34  ;;  %1129 = vmatpush.msrb.mxu1 %v787_v33  ;;  %v688_v58 = vld [vmem:[%s11883_s1 + $0xb8] sm:$0xff]  ;;  %v695_v60 = vld [vmem:[%s11883_s1 + $0xf0] sm:$0xff] }
  0x4e   : > { %1262 = vmatpush.msrb.mxu3 %v776_v35  ;;  %1067 = vmatpush.msrb.mxu0 %v711_v42  ;;  %v756_v59 = vld [vmem:[%s11883_s1 + $0x2d8] sm:$0xff]  ;;  %v763_v0 = vld [vmem:[%s11883_s1 + $0x310] sm:$0xff] }
  0x4f   : > { %1199 = vmatpush.msrb.mxu2 %v704_v37  ;;  %1130 = vmatpush.msrb.mxu1 %v783_v38  ;;  %v684_v63 = vld [vmem:[%s11883_s1 + $0x98] sm:$0xff]  ;;  %v691_v18 = vld [vmem:[%s11883_s1 + $0xd0] sm:$0xff] }
  0x50   : > { %955 = vmatmul.f32.gmra.mxu2 %v7870_v4  ;;  %1263 = vmatpush.msrb.mxu3 %v772_v39  ;;  %v752_v1 = vld [vmem:[%s11883_s1 + $0x2b8] sm:$0xff]  ;;  %v759_v20 = vld [vmem:[%s11883_s1 + $0x2f0] sm:$0xff] }
  0x51   : > { %1131 = vmatpush.msrb.mxu1 %v779_v43  ;;  %1200 = vmatpush.msrb.mxu2 %v700_v44  ;;  %v680_v19 = vld [vmem:[%s11883_s1 + $0x78] sm:$0xff]  ;;  %v687_v24 = vld [vmem:[%s11883_s1 + $0xb0] sm:$0xff] }
  0x52   : > { %1020 = vmatmul.f32.gmra.mxu3 %v7873_v5  ;;  %825 = vmatmul.f32.gmra.mxu0 %v7870_v4  ;;  %v748_v21 = vld [vmem:[%s11883_s1 + $0x298] sm:$0xff]  ;;  %v755_v25 = vld [vmem:[%s11883_s1 + $0x2d0] sm:$0xff] }
  0x53   : > { %1264 = vmatpush.msrb.mxu3 %v768_v45  ;;  %1068 = vmatpush.msrb.mxu0 %v707_v46  ;;  %v676_v28 = vld [vmem:[%s11883_s1 + $0x58] sm:$0xff]  ;;  %v683_v30 = vld [vmem:[%s11883_s1 + $0x90] sm:$0xff] }
  0x54   : > { %890 = vmatmul.f32.gmra.mxu1 %v7873_v5  ;;  %1201 = vmatpush.msrb.mxu2 %v696_v47  ;;  %v744_v29 = vld [vmem:[%s11883_s1 + $0x278] sm:$0xff]  ;;  %v751_v32 = vld [vmem:[%s11883_s1 + $0x2b0] sm:$0xff] }
  0x55   : > { %1132 = vmatpush.msrb.mxu1 %v775_v48  ;;  %1265 = vmatpush.msrb.mxu3 %v764_v49  ;;  %v672_v31 = vld [vmem:[%s11883_s1 + $0x38] sm:$0xff]  ;;  %v679_v34 = vld [vmem:[%s11883_s1 + $0x70] sm:$0xff] }
  0x56   : > { %1069 = vmatpush.msrb.mxu0 %v703_v50  ;;  %1202 = vmatpush.msrb.mxu2 %v692_v51  ;;  %v740_v33 = vld [vmem:[%s11883_s1 + $0x258] sm:$0xff]  ;;  %v747_v36 = vld [vmem:[%s11883_s1 + $0x290] sm:$0xff]  ;;  %v8182_v50 = vld [vmem:[%s7826_s22 + $0xe0] sm:$0xff] }
  0x57   : > { %1133 = vmatpush.msrb.mxu1 %v771_v52  ;;  %1266 = vmatpush.msrb.mxu3 %v760_v53  ;;  %v668_v35 = vld [vmem:[%s11883_s1 + $0x18] sm:$0xff]  ;;  %v8148_v38 = vld [vmem:[%s7826_s22 + $0xd0] sm:$0xff]  ;;  %v8185_v51 = vld [vmem:[%s7826_s22 + $0xe8] sm:$0xff] }
  0x58   : > { %958 = vmatmul.f32.gmra.mxu2 %v7880_v6  ;;  %1070 = vmatpush.msrb.mxu0 %v699_v56  ;;  %v736_v37 = vld [vmem:[%s11883_s1 + $0x238] sm:$0xff]  ;;  %v675_v42 = vld [vmem:[%s11883_s1 + $0x50] sm:$0xff]  ;;  %v8204_v56 = vld [vmem:[%s11884_s2] sm:$0xf] }
  0x59   : > { %1134 = vmatpush.msrb.mxu1 %v767_v57  ;;  %1203 = vmatpush.msrb.mxu2 %v688_v58  ;;  %v8151_v39 = vld [vmem:[%s7826_s22 + $0xd8] sm:$0xff]  ;;  %v743_v43 = vld [vmem:[%s11883_s1 + $0x270] sm:$0xff]  ;;  %v8211_v58 = vperm.slane %v8204_v56, 1 }
  0x5a   : > { %1023 = vmatmul.f32.gmra.mxu3 %v7883_v7  ;;  %828 = vmatmul.f32.gmra.mxu0 %v7880_v6  ;;  %v732_v44 = vld [vmem:[%s11883_s1 + $0x218] sm:$0xff]  ;;  %v671_v45 = vld [vmem:[%s11883_s1 + $0x30] sm:$0xff] }
  0x5b   : > { %1267 = vmatpush.msrb.mxu3 %v756_v59  ;;  %1071 = vmatpush.msrb.mxu0 %v695_v60  ;;  %v739_v46 = vld [vmem:[%s11883_s1 + $0x250] sm:$0xff]  ;;  %v8195_v53 = vld [vmem:[%s7826_s22 + $0xf8] sm:$0xff] }
  0x5c   : > { %893 = vmatmul.f32.gmra.mxu1 %v7883_v7  ;;  %1204 = vmatpush.msrb.mxu2 %v684_v63  ;;  %v667_v47 = vld [vmem:[%s11883_s1 + $0x10] sm:$0xff] }
  0x5d   : > { %1135 = vmatpush.msrb.mxu1 %v763_v0  ;;  %1268 = vmatpush.msrb.mxu3 %v752_v1  ;;  %v735_v48 = vld [vmem:[%s11883_s1 + $0x230] sm:$0xff] }
  0x5e   : > { %1072 = vmatpush.msrb.mxu0 %v691_v18  ;;  %1205 = vmatpush.msrb.mxu2 %v680_v19  ;;  %v731_v49 = vld [vmem:[%s11883_s1 + $0x210] sm:$0xff] }
  0x5f   : > { %1136 = vmatpush.msrb.mxu1 %v759_v20  ;;  %1269 = vmatpush.msrb.mxu3 %v748_v21  ;;  %v8192_v52 = vld [vmem:[%s7826_s22 + $0xf0] sm:$0xff]  ;;  %s6514_s22 = sshll.u32 %s414_s16, 2 }
  0x60   : > { %961 = vmatmul.f32.gmra.mxu2 %v7890_v8  ;;  %1073 = vmatpush.msrb.mxu0 %v687_v24  ;;  %s416_s29 = scalar_lea.vmem [#allocation10], %s6514_s22  ;;  %s7443_s22 = scalar_lea.hbm %s11893_s11, 8 }
  0x61   : > { %1137 = vmatpush.msrb.mxu1 %v755_v25  ;;  %1206 = vmatpush.msrb.mxu2 %v676_v28  ;;  %s6422_s26 = sshll.u32 %s416_s29, 4  ;;  %p7445_p4 = scmp.lt.s32.totalorder %s7443_s22, %s7439_s14  ;;  %s6423_s26 = int_to_ptr.vmem [resolvable:$true] %s6422_s26 }
  0x62   : > { %1026 = vmatmul.f32.gmra.mxu3 %v7893_v9  ;;  %831 = vmatmul.f32.gmra.mxu0 %v7890_v8 }
  0x63   : > { %1270 = vmatpush.msrb.mxu3 %v744_v29  ;;  %1074 = vmatpush.msrb.mxu0 %v683_v30  ;;  %p7446_p7 = por %p7445_p4, %p7444_p3 }
  0x64   : > { %896 = vmatmul.f32.gmra.mxu1 %v7893_v9  ;;  %1207 = vmatpush.msrb.mxu2 %v672_v31 }
  0x65   : > { %1138 = vmatpush.msrb.mxu1 %v751_v32  ;;  %1271 = vmatpush.msrb.mxu3 %v740_v33  ;;  %p7447_p8 = pnand %p7446_p7, %p7442_p2 }
  0x66   : > { %1075 = vmatpush.msrb.mxu0 %v679_v34  ;;  %1208 = vmatpush.msrb.mxu2 %v668_v35 }
  0x67   : > { %1139 = vmatpush.msrb.mxu1 %v747_v36  ;;  %1272 = vmatpush.msrb.mxu3 %v736_v37 }
  0x68   : > { %964 = vmatmul.f32.gmra.mxu2 %v7900_v10  ;;  %1076 = vmatpush.msrb.mxu0 %v675_v42 }
  0x69   : > { %1140 = vmatpush.msrb.mxu1 %v743_v43  ;;  %1273 = vmatpush.msrb.mxu3 %v732_v44 }
  0x6a   : > { %1029 = vmatmul.f32.gmra.mxu3 %v7903_v11  ;;  %834 = vmatmul.f32.gmra.mxu0 %v7900_v10 }
  0x6b   : > { %1077 = vmatpush.msrb.mxu0 %v671_v45  ;;  %1141 = vmatpush.msrb.mxu1 %v739_v46 }
  0x6c   : > { %899 = vmatmul.f32.gmra.mxu1 %v7903_v11 }
  0x6d   : > { %1078 = vmatpush.msrb.mxu0 %v667_v47  ;;  %1142 = vmatpush.msrb.mxu1 %v735_v48 }
  0x6f   : > { %1143 = vmatpush.msrb.mxu1 %v731_v49 }
  0x70   : > { %967 = vmatmul.f32.gmra.mxu2 %v7910_v12 }
  0x72   : > { %1032 = vmatmul.f32.gmra.mxu3 %v7913_v13  ;;  %837 = vmatmul.f32.gmra.mxu0 %v7910_v12 }
  0x74   : > { %902 = vmatmul.f32.gmra.mxu1 %v7913_v13 }
  0x78   : > { %970 = vmatmul.f32.gmra.mxu2 %v7920_v14 }
  0x7a   : > { %1035 = vmatmul.f32.gmra.mxu3 %v7923_v15  ;;  %840 = vmatmul.f32.gmra.mxu0 %v7920_v14 }
  0x7c   : > { %905 = vmatmul.f32.gmra.mxu1 %v7923_v15 }
  0x80   : > { %973 = vmatmul.f32.gmra.mxu2 %v7930_v16 }
  0x82   : > { %1038 = vmatmul.f32.gmra.mxu3 %v7933_v17  ;;  %843 = vmatmul.f32.gmra.mxu0 %v7930_v16 }
  0x84   : > { %908 = vmatmul.f32.gmra.mxu1 %v7933_v17 }
  0x88   : > { %976 = vmatmul.f32.gmra.mxu2 %v7964_v26 }
  0x8a   : > { %1041 = vmatmul.f32.gmra.mxu3 %v7967_v27  ;;  %846 = vmatmul.f32.gmra.mxu0 %v7964_v26 }
  0x8c   : > { %911 = vmatmul.f32.gmra.mxu1 %v7967_v27 }
  0x90   : > { %979 = vmatmul.f32.gmra.mxu2 %v8010_v40 }
  0x92   : > { %1044 = vmatmul.f32.gmra.mxu3 %v8013_v41  ;;  %849 = vmatmul.f32.gmra.mxu0 %v8010_v40 }
  0x94   : > { %914 = vmatmul.f32.gmra.mxu1 %v8013_v41 }
  0x98   : > { %982 = vmatmul.f32.gmra.mxu2 %v8056_v54 }
  0x9a   : > { %1047 = vmatmul.f32.gmra.mxu3 %v8059_v55  ;;  %852 = vmatmul.f32.gmra.mxu0 %v8056_v54 }
  0x9c   : > { %917 = vmatmul.f32.gmra.mxu1 %v8059_v55 }
  0xa0   : > { %985 = vmatmul.f32.gmra.mxu2 %v8102_v22 }
  0xa2   : > { %1050 = vmatmul.f32.gmra.mxu3 %v8105_v23  ;;  %855 = vmatmul.f32.gmra.mxu0 %v8102_v22 }
  0xa4   : > { %920 = vmatmul.f32.gmra.mxu1 %v8105_v23 }
  0xa8   : > { %988 = vmatmul.f32.gmra.mxu2 %v8148_v38 }
  0xaa   : > { %1053 = vmatmul.f32.gmra.mxu3 %v8151_v39  ;;  %858 = vmatmul.f32.gmra.mxu0 %v8148_v38 }
  0xac   : > { %923 = vmatmul.f32.gmra.mxu1 %v8151_v39 }
  0xb0   : > { %991 = vmatmul.f32.gmra.mxu2 %v8182_v50 }
  0xb2   : > { %1056 = vmatmul.f32.gmra.mxu3 %v8185_v51  ;;  %861 = vmatmul.f32.gmra.mxu0 %v8182_v50 }
  0xb4   : > { %926 = vmatmul.f32.gmra.mxu1 %v8185_v51 }
  0xb8   : > { %994 = vmatmul.f32.gmra.mxu2 %v8192_v52 }
  0xba   : > { %1059 = vmatmul.f32.gmra.mxu3 %v8195_v53  ;;  %864 = vmatmul.f32.gmra.mxu0 %v8192_v52 }
  0xbc   : > { %929 = vmatmul.f32.gmra.mxu1 %v8195_v53 }
  0xbf   : > { %v8206_v57 = vpop.f32.mrf.mxu0 }
  0xc0   : > { %1209 = vmatmul.f32.vlgmr.msrb.gmra.mxu2 %v7841_v61 }
  0xc1   : > { %v8213_v59 = vpop.f32.mrf.mxu1 }
  0xc2   : > { %1274 = vmatmul.f32.vlgmr.msrb.gmra.mxu3 %v7844_v62  ;;  %1079 = vmatmul.f32.vlgmr.msrb.gmra.mxu0 %v7841_v61 }
  0xc3   : > { %v950_v60 = vpop.f32.mrf.mxu2 }
  0xc4   : > { %v951_v0 = vadd.f32 %v950_v60, %v8211_v58  ;;  %1144 = vmatmul.f32.vlgmr.msrb.gmra.mxu1 %v7844_v62 }
  0xc5   : > { %v1015_v63 = vpop.f32.mrf.mxu3 }
  0xc6   : > { %v8218_v1 = vadd.f32 %v1015_v63, %v951_v0 }
  0xc7   : > { %v8220_v18 = vpop.f32.mrf.mxu0 }
  0xc8   : > { %1212 = vmatmul.f32.gmra.mxu2 %v7860_v2 }
  0xc9   : > { %v8224_v19 = vpop.f32.mrf.mxu1 }
  0xca   : > { %1277 = vmatmul.f32.gmra.mxu3 %v7863_v3  ;;  %1082 = vmatmul.f32.gmra.mxu0 %v7860_v2 }
  0xcb   : > { %v953_v20 = vpop.f32.mrf.mxu2 }
  0xcc   : > { %v954_v21 = vadd.f32 %v953_v20, %v8211_v58  ;;  %1147 = vmatmul.f32.gmra.mxu1 %v7863_v3 }
  0xcd   : > { %v1018_v61 = vpop.f32.mrf.mxu3 }
  0xce   : > { %v8229_v24 = vadd.f32 %v1018_v61, %v954_v21 }
  0xcf   : > { %v8231_v62 = vpop.f32.mrf.mxu0 }
  0xd0   : > { %1215 = vmatmul.f32.gmra.mxu2 %v7870_v4 }
  0xd1   : > { %v8235_v25 = vpop.f32.mrf.mxu1 }
  0xd2   : > { %1280 = vmatmul.f32.gmra.mxu3 %v7873_v5  ;;  %1085 = vmatmul.f32.gmra.mxu0 %v7870_v4 }
  0xd3   : > { %v956_v28 = vpop.f32.mrf.mxu2 }
  0xd4   : > { %v957_v29 = vadd.f32 %v956_v28, %v8211_v58  ;;  %1150 = vmatmul.f32.gmra.mxu1 %v7873_v5 }
  0xd5   : > { %v1021_v2 = vpop.f32.mrf.mxu3 }
  0xd6   : > { %v8240_v30 = vadd.f32 %v1021_v2, %v957_v29 }
  0xd7   : > { %v8242_v3 = vpop.f32.mrf.mxu0 }
  0xd8   : > { %1218 = vmatmul.f32.gmra.mxu2 %v7880_v6 }
  0xd9   : > { %v8246_v31 = vpop.f32.mrf.mxu1 }
  0xda   : > { %1283 = vmatmul.f32.gmra.mxu3 %v7883_v7  ;;  %1088 = vmatmul.f32.gmra.mxu0 %v7880_v6 }
  0xdb   : > { %v959_v32 = vpop.f32.mrf.mxu2 }
  0xdc   : > { %v960_v33 = vadd.f32 %v959_v32, %v8211_v58  ;;  %1153 = vmatmul.f32.gmra.mxu1 %v7883_v7 }
  0xdd   : > { %v1024_v4 = vpop.f32.mrf.mxu3 }
  0xde   : > { %v8251_v34 = vadd.f32 %v1024_v4, %v960_v33 }
  0xdf   : > { %v8253_v5 = vpop.f32.mrf.mxu0 }
  0xe0   : > { %1221 = vmatmul.f32.gmra.mxu2 %v7890_v8 }
  0xe1   : > { %v8257_v35 = vpop.f32.mrf.mxu1 }
  0xe2   : > { %1286 = vmatmul.f32.gmra.mxu3 %v7893_v9  ;;  %1091 = vmatmul.f32.gmra.mxu0 %v7890_v8 }
  0xe3   : > { %v962_v36 = vpop.f32.mrf.mxu2 }
  0xe4   : > { %v963_v37 = vadd.f32 %v962_v36, %v8211_v58  ;;  %1156 = vmatmul.f32.gmra.mxu1 %v7893_v9 }
  0xe5   : > { %v1027_v6 = vpop.f32.mrf.mxu3 }
  0xe6   : > { %v8262_v42 = vadd.f32 %v1027_v6, %v963_v37  ;;  %v1578_v6 = vld [vmem:[#allocation5 + $0xe0] sm:$0xff]  ;;  %v1548_v37 = vld [vmem:[#allocation5 + $0x78] sm:$0xff] }
  0xe7   : > { %v8264_v7 = vpop.f32.mrf.mxu0  ;;  %1647 = vmatpush.msra.mxu1 %v1548_v37 }
  0xe8   : > { %1224 = vmatmul.f32.gmra.mxu2 %v7900_v10 }
  0xe9   : > { %v8268_v43 = vpop.f32.mrf.mxu1 }
  0xea   : > { %1289 = vmatmul.f32.gmra.mxu3 %v7903_v11  ;;  %1094 = vmatmul.f32.gmra.mxu0 %v7900_v10 }
  0xeb   : > { %v965_v44 = vpop.f32.mrf.mxu2 }
  0xec   : > { %v966_v45 = vadd.f32 %v965_v44, %v8211_v58  ;;  %1159 = vmatmul.f32.gmra.mxu1 %v7903_v11  ;;  %v1577_v44 = vld [vmem:[#allocation5 + $0xd8] sm:$0xff] }
  0xed   : > { %v1030_v8 = vpop.f32.mrf.mxu3 }
  0xee   : > { %v8273_v46 = vadd.f32 %v1030_v8, %v966_v45  ;;  %v1576_v45 = vld [vmem:[#allocation5 + $0xd0] sm:$0xff] }
  0xef   : > { %v8275_v9 = vpop.f32.mrf.mxu0 }
  0xf0   : > { %1227 = vmatmul.f32.gmra.mxu2 %v7910_v12 }
  0xf1   : > { %v8279_v47 = vpop.f32.mrf.mxu1 }
  0xf2   : > { %1292 = vmatmul.f32.gmra.mxu3 %v7913_v13  ;;  %1097 = vmatmul.f32.gmra.mxu0 %v7910_v12 }
  0xf3   : > { %v968_v48 = vpop.f32.mrf.mxu2 }
  0xf4   : > { %v969_v49 = vadd.f32 %v968_v48, %v8211_v58  ;;  %1162 = vmatmul.f32.gmra.mxu1 %v7913_v13 }
  0xf5   : > { %v1033_v10 = vpop.f32.mrf.mxu3 }
  0xf6   : > { %v8284_v60 = vadd.f32 %v1033_v10, %v969_v49  ;;  %v1575_v10 = vld [vmem:[#allocation5 + $0xc8] sm:$0xff] }
  0xf7   : > { %v8286_v11 = vpop.f32.mrf.mxu0 }
  0xf8   : > { %1230 = vmatmul.f32.gmra.mxu2 %v7920_v14 }
  0xf9   : > { %v8290_v63 = vpop.f32.mrf.mxu1 }
  0xfa   : > { %1295 = vmatmul.f32.gmra.mxu3 %v7923_v15  ;;  %1100 = vmatmul.f32.gmra.mxu0 %v7920_v14 }
  0xfb   : > { %v971_v0 = vpop.f32.mrf.mxu2 }
  0xfc   : > { %v972_v20 = vadd.f32 %v971_v0, %v8211_v58  ;;  %1165 = vmatmul.f32.gmra.mxu1 %v7923_v15 }
  0xfd   : > { %v1036_v12 = vpop.f32.mrf.mxu3 }
  0xfe   : > { %v8295_v61 = vadd.f32 %v1036_v12, %v972_v20  ;;  %v1545_v12 = vld [vmem:[#allocation5 + $0x60] sm:$0xff] }
  0xff   : > { %v8297_v13 = vpop.f32.mrf.mxu0  ;;  %v1574_v20 = vld [vmem:[#allocation5 + $0xc0] sm:$0xff] }
 0x100   : > { %1233 = vmatmul.f32.gmra.mxu2 %v7930_v16 }
 0x101   : > { %v8301_v21 = vpop.f32.mrf.mxu1 }
 0x102   : > { %1298 = vmatmul.f32.gmra.mxu3 %v7933_v17  ;;  %1103 = vmatmul.f32.gmra.mxu0 %v7930_v16  ;;  %v1581_v16 = vld [vmem:[#allocation5 + $0xf8] sm:$0xff] }
 0x103   : > { %v8304_v28 = vpop.f32.mrf.mxu2  ;;  %1582 = vmatpush.msra.mxu0 %v1581_v16  ;;  %7264 = vmatpush.msra.mxu3 %v1581_v16  ;;  %v1544_v16 = vld [vmem:[#allocation5 + $0x58] sm:$0xff] }
 0x104   : > { %1168 = vmatmul.f32.gmra.mxu1 %v7933_v17  ;;  %v1580_v17 = vld [vmem:[#allocation5 + $0xf0] sm:$0xff] }
 0x105   : > { %v8306_v14 = vpop.f32.mrf.mxu3  ;;  %1583 = vmatpush.msra.mxu0 %v1580_v17  ;;  %7265 = vmatpush.msra.mxu3 %v1580_v17  ;;  %v1744_v17 = vld [vmem:[#allocation5 + $0x178] sm:$0xff] }
 0x106   : > { %1745 = vmatpush.msra.mxu2 %v1744_v17  ;;  %v1540_v17 = vld [vmem:[#allocation5 + $0x38] sm:$0xff] }
 0x107   : > { %v8309_v2 = vpop.f32.mrf.mxu0 }
 0x108   : > { %1236 = vmatmul.f32.gmra.mxu2 %v7964_v26 }
 0x109   : > { %v8313_v15 = vpop.f32.mrf.mxu1 }
 0x10a   : > { %1301 = vmatmul.f32.gmra.mxu3 %v7967_v27  ;;  %1106 = vmatmul.f32.gmra.mxu0 %v7964_v26  ;;  %v1579_v26 = vld [vmem:[#allocation5 + $0xe8] sm:$0xff] }
 0x10b   : > { %v8316_v29 = vpop.f32.mrf.mxu2  ;;  %1584 = vmatpush.msra.mxu0 %v1579_v26  ;;  %7266 = vmatpush.msra.mxu3 %v1579_v26  ;;  %v1543_v26 = vld [vmem:[#allocation5 + $0x50] sm:$0xff] }
 0x10c   : > { %1171 = vmatmul.f32.gmra.mxu1 %v7967_v27 }
 0x10d   : > { %v8318_v32 = vpop.f32.mrf.mxu3  ;;  %1585 = vmatpush.msra.mxu0 %v1578_v6  ;;  %7267 = vmatpush.msra.mxu3 %v1578_v6  ;;  %v1743_v6 = vld [vmem:[#allocation5 + $0x170] sm:$0xff] }
 0x10e   : > { %1746 = vmatpush.msra.mxu2 %v1743_v6  ;;  %v1739_v6 = vld [vmem:[#allocation5 + $0x150] sm:$0xff] }
 0x10f   : > { %v8321_v4 = vpop.f32.mrf.mxu0  ;;  %1586 = vmatpush.msra.mxu0 %v1577_v44  ;;  %7268 = vmatpush.msra.mxu3 %v1577_v44  ;;  %v1542_v44 = vld [vmem:[#allocation5 + $0x48] sm:$0xff] }
 0x110   : > { %1239 = vmatmul.f32.gmra.mxu2 %v8010_v40 }
 0x111   : > { %v8325_v33 = vpop.f32.mrf.mxu1  ;;  %1587 = vmatpush.msra.mxu0 %v1576_v45  ;;  %7269 = vmatpush.msra.mxu3 %v1576_v45 }
 0x112   : > { %1304 = vmatmul.f32.gmra.mxu3 %v8013_v41  ;;  %1109 = vmatmul.f32.gmra.mxu0 %v8010_v40  ;;  %v1547_v40 = vld [vmem:[#allocation5 + $0x70] sm:$0xff] }
 0x113   : > { %v8328_v36 = vpop.f32.mrf.mxu2  ;;  %1648 = vmatpush.msra.mxu1 %v1547_v40  ;;  %1588 = vmatpush.msra.mxu0 %v1575_v10  ;;  %v1742_v40 = vld [vmem:[#allocation5 + $0x168] sm:$0xff] }
 0x114   : > { %1174 = vmatmul.f32.gmra.mxu1 %v8013_v41  ;;  %v1546_v41 = vld [vmem:[#allocation5 + $0x68] sm:$0xff]  ;;  %7270 = vmatpush.msra.mxu3 %v1575_v10  ;;  %v1572_v10 = vld [vmem:[#allocation5 + $0xb0] sm:$0xff] }
 0x115   : > { %v8330_v27 = vpop.f32.mrf.mxu3  ;;  %1649 = vmatpush.msra.mxu1 %v1546_v41  ;;  %1589 = vmatpush.msra.mxu0 %v1574_v20 }
 0x116   : > { %7271 = vmatpush.msra.mxu3 %v1574_v20  ;;  %1747 = vmatpush.msra.mxu2 %v1742_v40  ;;  %v1539_v20 = vld [vmem:[#allocation5 + $0x30] sm:$0xff]  ;;  %v1538_v40 = vld [vmem:[#allocation5 + $0x28] sm:$0xff] }
 0x117   : > { %v8333_v8 = vpop.f32.mrf.mxu0  ;;  %1650 = vmatpush.msra.mxu1 %v1545_v12  ;;  %v1541_v12 = vld [vmem:[#allocation5 + $0x40] sm:$0xff] }
 0x118   : > { %1242 = vmatmul.f32.gmra.mxu2 %v8056_v54 }
 0x119   : > { %v8337_v48 = vpop.f32.mrf.mxu1  ;;  %1651 = vmatpush.msra.mxu1 %v1544_v16  ;;  %v1741_v16 = vld [vmem:[#allocation5 + $0x160] sm:$0xff] }
 0x11a   : > { %1307 = vmatmul.f32.gmra.mxu3 %v8059_v55  ;;  %1112 = vmatmul.f32.gmra.mxu0 %v8056_v54 }
 0x11b   : > { %v8340_v49 = vpop.f32.mrf.mxu2  ;;  %1652 = vmatpush.msra.mxu1 %v1543_v26  ;;  %1748 = vmatpush.msra.mxu2 %v1741_v16  ;;  %v1740_v26 = vld [vmem:[#allocation5 + $0x158] sm:$0xff] }
 0x11c   : > { %1177 = vmatmul.f32.gmra.mxu1 %v8059_v55  ;;  %v1573_v55 = vld [vmem:[#allocation5 + $0xb8] sm:$0xff] }
 0x11d   : > { %v8342_v0 = vpop.f32.mrf.mxu3  ;;  %1653 = vmatpush.msra.mxu1 %v1542_v44  ;;  %1590 = vmatpush.msra.mxu0 %v1573_v55 }
 0x11e   : > { %7272 = vmatpush.msra.mxu3 %v1573_v55  ;;  %1749 = vmatpush.msra.mxu2 %v1740_v26  ;;  %v1570_v55 = vld [vmem:[#allocation5 + $0xa0] sm:$0xff] }
 0x11f   : > { %v8345_v54 = vpop.f32.mrf.mxu0  ;;  %1654 = vmatpush.msra.mxu1 %v1541_v12  ;;  %1591 = vmatpush.msra.mxu0 %v1572_v10  ;;  %v1738_v12 = vld [vmem:[#allocation5 + $0x148] sm:$0xff]  ;;  %v1537_v26 = vld [vmem:[#allocation5 + $0x20] sm:$0xff] }
 0x120   : > { %1245 = vmatmul.f32.gmra.mxu2 %v8102_v22  ;;  %7273 = vmatpush.msra.mxu3 %v1572_v10 }
 0x121   : > { %v8349_v37 = vpop.f32.mrf.mxu1  ;;  %1655 = vmatpush.msra.mxu1 %v1540_v17  ;;  %1750 = vmatpush.msra.mxu2 %v1739_v6  ;;  %v1568_v6 = vld [vmem:[#allocation5 + $0x90] sm:$0xff] }
 0x122   : > { %1310 = vmatmul.f32.gmra.mxu3 %v8105_v23  ;;  %1115 = vmatmul.f32.gmra.mxu0 %v8102_v22 }
 0x123   : > { %v8352_v45 = vpop.f32.mrf.mxu2  ;;  %1656 = vmatpush.msra.mxu1 %v1539_v20  ;;  %1751 = vmatpush.msra.mxu2 %v1738_v12  ;;  %v1736_v20 = vld [vmem:[#allocation5 + $0x138] sm:$0xff] }
 0x124   : > { %1180 = vmatmul.f32.gmra.mxu1 %v8105_v23  ;;  %v1571_v23 = vld [vmem:[#allocation5 + $0xa8] sm:$0xff] }
 0x125   : > { %v8354_v41 = vpop.f32.mrf.mxu3  ;;  %1592 = vmatpush.msra.mxu0 %v1571_v23  ;;  %1657 = vmatpush.msra.mxu1 %v1538_v40  ;;  %v1735_v40 = vld [vmem:[#allocation5 + $0x130] sm:$0xff] }
 0x126   : > { %11911 = vst [vmem:[#allocation16_spill] sm:$0xff] %v8354_v41  ;;  %v11895_v41 = vmov 0.0   ;;  %7274 = vmatpush.msra.mxu3 %v1571_v23  ;;  %v1534_v23 = vld [vmem:[#allocation5 + $0x8] sm:$0xff] }
 0x127   : > { %v8357_v22 = vpop.f32.mrf.mxu0  ;;  %1593 = vmatpush.msra.mxu0 %v1570_v55  ;;  %1658 = vmatpush.msra.mxu1 %v1537_v26  ;;  %1499 = vst [vmem:[#allocation2] sm:$0xff] %v11895_v41  ;;  %v1734_v26 = vld [vmem:[#allocation5 + $0x128] sm:$0xff] }
 0x128   : > { %11912 = vst [vmem:[#allocation17_spill] sm:$0xff] %v8357_v22  ;;  %1248 = vmatmul.f32.gmra.mxu2 %v8148_v38  ;;  %v1737_v22 = vld [vmem:[#allocation5 + $0x140] sm:$0xff]  ;;  %7275 = vmatpush.msra.mxu3 %v1570_v55  ;;  %v1730_v55 = vld [vmem:[#allocation5 + $0x108] sm:$0xff] }
 0x129   : > { %v8361_v44 = vpop.f32.mrf.mxu1  ;;  %1752 = vmatpush.msra.mxu2 %v1737_v22  ;;  %1516 = vst [vmem:[#allocation2 + $0x88] sm:$0xff] %v11895_v41  ;;  %v1567_v22 = vld [vmem:[#allocation5 + $0x88] sm:$0xff]  ;;  %v1566_v41 = vld [vmem:[#allocation5 + $0x80] sm:$0xff] }
 0x12a   : > { %1313 = vmatmul.f32.gmra.mxu3 %v8151_v39  ;;  %11913 = vst [vmem:[#allocation18_spill] sm:$0xff] %v8361_v44  ;;  %1118 = vmatmul.f32.gmra.mxu0 %v8148_v38  ;;  %v1569_v44 = vld [vmem:[#allocation5 + $0x98] sm:$0xff] }
 0x12b   : > { %v8364_v16 = vpop.f32.mrf.mxu2  ;;  %v1536_v38 = vld [vmem:[#allocation5 + $0x18] sm:$0xff]  ;;  %1594 = vmatpush.msra.mxu0 %v1569_v44  ;;  %1753 = vmatpush.msra.mxu2 %v1736_v20 }
 0x12c   : > { %11914 = vst [vmem:[#allocation19_spill] sm:$0xff] %v8364_v16  ;;  %1183 = vmatmul.f32.gmra.mxu1 %v8151_v39  ;;  %v1535_v39 = vld [vmem:[#allocation5 + $0x10] sm:$0xff]  ;;  %v1733_v16 = vld [vmem:[#allocation5 + $0x120] sm:$0xff]  ;;  %v1732_v20 = vld [vmem:[#allocation5 + $0x118] sm:$0xff]  ;;  %7276 = vmatpush.msra.mxu3 %v1569_v44 }
 0x12d   : > { %v8366_v17 = vpop.f32.mrf.mxu3  ;;  %1659 = vmatpush.msra.mxu1 %v1536_v38  ;;  %1595 = vmatpush.msra.mxu0 %v1568_v6 }
 0x12e   : > { %11915 = vst [vmem:[#allocation20_spill] sm:$0xff] %v8366_v17  ;;  %1754 = vmatpush.msra.mxu2 %v1735_v40  ;;  %v1533_v17 = vld [vmem:[#allocation5] sm:$0xff]  ;;  %v8388_v40 = vperm.slane %v8204_v56, 0  ;;  %7277 = vmatpush.msra.mxu3 %v1568_v6 }
 0x12f   : > { %v8370_v10 = vpop.f32.mrf.mxu0  ;;  %1660 = vmatpush.msra.mxu1 %v1535_v39  ;;  %1596 = vmatpush.msra.mxu0 %v1567_v22  ;;  %v1731_v39 = vld [vmem:[#allocation5 + $0x110] sm:$0xff] }
 0x130   : > { %11916 = vst [vmem:[#allocation21_spill] sm:$0xff] %v8370_v10  ;;  %1251 = vmatmul.f32.gmra.mxu2 %v8182_v50  ;;  %7278 = vmatpush.msra.mxu3 %v1567_v22  ;;  %v11924_v22 = vmov 0.0  }
 0x131   : > { %v8375_v12 = vpop.f32.mrf.mxu1  ;;  %1661 = vmatpush.msra.mxu1 %v1534_v23  ;;  %1755 = vmatpush.msra.mxu2 %v1734_v26  ;;  %v821_v26 = vadd.f32 %v8206_v57, %v8388_v40  ;;  %3713 = vst.msk [vmem:[#allocation4] sm:$0xff] %vm3712_vm0, %v11924_v22 }
 0x132   : > { %1316 = vmatmul.f32.gmra.mxu3 %v8185_v51  ;;  %11917 = vst [vmem:[#allocation22_spill] sm:$0xff] %v8375_v12  ;;  %1121 = vmatmul.f32.gmra.mxu0 %v8182_v50 }
 0x133   : > { %v8378_v10 = vpop.f32.mrf.mxu2  ;;  %1597 = vmatpush.msra.mxu0 %v1566_v41  ;;  %1662 = vmatpush.msra.mxu1 %v1533_v17  ;;  %v1729_v17 = vld [vmem:[#allocation5 + $0x100] sm:$0xff]  ;;  %3717 = vst.msk [vmem:[#allocation4 + $0x20] sm:$0xff] %vm3712_vm0, %v11924_v22 }
 0x134   : > { %11918 = vst [vmem:[#allocation23_spill] sm:$0xff] %v8378_v10  ;;  %1186 = vmatmul.f32.gmra.mxu1 %v8185_v51  ;;  %1756 = vmatpush.msra.mxu2 %v1733_v16  ;;  %v8399_v16 = vperm.slane %v8204_v56, 2 }
 0x135   : > { %v8380_v38 = vpop.f32.mrf.mxu3  ;;  %7279 = vmatpush.msra.mxu3 %v1566_v41  ;;  %3721 = vst.msk [vmem:[#allocation4 + $0x40] sm:$0xff] %vm3712_vm0, %v11924_v22 }
 0x136   : > { %11919 = vst [vmem:[#allocation24_spill] sm:$0xff] %v8380_v38  ;;  %1757 = vmatpush.msra.mxu2 %v1732_v20  ;;  %v8405_v20 = vperm.slane %v8204_v56, 3 }
 0x137   : > { %v8383_v50 = vpop.f32.mrf.mxu0  ;;  %3725 = vst.msk [vmem:[#allocation4 + $0x60] sm:$0xff] %vm3712_vm0, %v11924_v22 }
 0x138   : > { %11920 = vst [vmem:[#allocation25_spill] sm:$0xff] %v8383_v50  ;;  %1254 = vmatmul.f32.gmra.mxu2 %v8192_v52 }
 0x139   : > { %v8390_v51 = vpop.f32.mrf.mxu1  ;;  %1758 = vmatpush.msra.mxu2 %v1731_v39  ;;  %3729 = vst.msk [vmem:[#allocation4 + $0x80] sm:$0xff] %vm3712_vm0, %v11924_v22 }
 0x13a   : > { %1319 = vmatmul.f32.gmra.mxu3 %v8195_v53  ;;  %11921 = vst [vmem:[#allocation26_spill] sm:$0xff] %v8390_v51  ;;  %1124 = vmatmul.f32.gmra.mxu0 %v8192_v52 }
 0x13b   : > { %v8393_v44 = vpop.f32.mrf.mxu2  ;;  %1759 = vmatpush.msra.mxu2 %v1730_v55  ;;  %3730 = vst.msk [vmem:[#allocation4 + $0x88] sm:$0xff] %vm3712_vm0, %v11924_v22 }
 0x13c   : > { %11922 = vst [vmem:[#allocation27_spill] sm:$0xff] %v8393_v44  ;;  %1189 = vmatmul.f32.gmra.mxu1 %v8195_v53  ;;  %v886_v53 = vadd.f32 %v8213_v59, %v821_v26  ;;  %v1324_v59 = vmax.f32 %v8218_v1, 0.0  ;;  %v824_v26 = vadd.f32 %v8220_v18, %v8388_v40 }
 0x13d   : > { %v8395_v23 = vpop.f32.mrf.mxu3  ;;  %1760 = vmatpush.msra.mxu2 %v1729_v17  ;;  %3731 = vst.msk [vmem:[#allocation4 + $0x90] sm:$0xff] %vm3712_vm0, %v11924_v22  ;;  %v1328_v22 = vmax.f32 %v8229_v24, 0.0 }
 0x13e   : > { %11923 = vst [vmem:[#allocation28_spill] sm:$0xff] %v8395_v23  ;;  %v1323_v17 = vmax.f32 %v886_v53, 0.0  ;;  %v889_v53 = vadd.f32 %v8224_v19, %v824_v26 }
 0x13f   : > { %v1080_v52 = vpop.f32.mrf.mxu0 }
 0x140   : > { %v1081_v6 = vadd.f32 %v1080_v52, %v8399_v16  ;;  %v1403_v44 = vmax.f32 %v1323_v17, %v1324_v59 }
 0x141   : > { %v1145_v39 = vpop.f32.mrf.mxu1 }
 0x142   : > { %v1146_v57 = vadd.f32 %v1145_v39, %v1081_v6 }
 0x143   : > { %v1210_v41 = vpop.f32.mrf.mxu2 }
 0x144   : > { %v1211_v56 = vadd.f32 %v1210_v41, %v8405_v20  ;;  %v1325_v52 = vmax.f32 %v1146_v57, 0.0  ;;  %v827_v57 = vadd.f32 %v8231_v62, %v8388_v40  ;;  %v11897_v62 = vlaneseq }
 0x145   : > { %v1275_v55 = vpop.f32.mrf.mxu3 }
 0x146   : > { %v1276_v6 = vadd.f32 %v1275_v55, %v1211_v56  ;;  %v1327_v55 = vmax.f32 %v889_v53, 0.0  ;;  %v830_v53 = vadd.f32 %v8242_v3, %v8388_v40 }
 0x147   : > { %v1083_v39 = vpop.f32.mrf.mxu0 }
 0x148   : > { %v1326_v23 = vmax.f32 %v1276_v6, 0.0  ;;  %v1084_v41 = vadd.f32 %v1083_v39, %v8399_v16 }
 0x149   : > { %v1148_v51 = vpop.f32.mrf.mxu1 }
 0x14a   : > { %v1419_v50 = vmax.f32 %v1325_v52, %v1326_v23  ;;  %v1149_v38 = vadd.f32 %v1148_v51, %v1084_v41  ;;  %v892_v51 = vadd.f32 %v8235_v25, %v827_v57  ;;  %v8439_v57 = vshrl.u32 %v11897_v62, 7 }
 0x14b   : > { %v1213_v12 = vpop.f32.mrf.mxu2 }
 0x14c   : > { %v1435_v10 = vmax.f32 %v1403_v44, %v1419_v50  ;;  %v1214_v18 = vadd.f32 %v1213_v12, %v8405_v20  ;;  %v1329_v56 = vmax.f32 %v1149_v38, 0.0  ;;  %v1404_v50 = vmax.f32 %v1327_v55, %v1328_v22  ;;  %11925 = vst [vmem:[#allocation29_spill] sm:$0xff] %v8439_v57 }
 0x14d   : > { %v1278_v1 = vpop.f32.mrf.mxu3  ;;  %v1331_v41 = vmax.f32 %v892_v51, 0.0  ;;  %v428_v3 = vadd.s32 24, %v8439_v57 }
 0x14e   : > { %1500 = vst [vmem:[#allocation2 + $0x8] sm:$0xff] %v1435_v10  ;;  %v1279_v6 = vadd.f32 %v1278_v1, %v1214_v18  ;;  %1598 = vmatmul.f32.vlgmr.msra.gmra.mxu0 %v1435_v10  ;;  %v1332_v10 = vmax.f32 %v8240_v30, 0.0 }
 0x14f   : > { %v1086_v17 = vpop.f32.mrf.mxu0 }
 0x150   : > { %v1330_v59 = vmax.f32 %v1279_v6, 0.0  ;;  %v1087_v19 = vadd.f32 %v1086_v17, %v8399_v16  ;;  %v1405_v6 = vmax.f32 %v1331_v41, %v1332_v10  ;;  %v895_v17 = vadd.f32 %v8246_v31, %v830_v53 }
 0x151   : > { %v1151_v23 = vpop.f32.mrf.mxu1  ;;  %v466_v41 = vand.u32 31, %v428_v3 }
 0x152   : > { %v1420_v44 = vmax.f32 %v1329_v56, %v1330_v59  ;;  %v1152_v12 = vadd.f32 %v1151_v23, %v1087_v19 }
 0x153   : > { %v1216_v26 = vpop.f32.mrf.mxu2  ;;  %vm8450_vm1 = vcmp.lt.s32.totalorder %v466_v41, 25 }
 0x154   : > { %v1436_v39 = vmax.f32 %v1404_v50, %v1420_v44  ;;  %v1217_v24 = vadd.f32 %v1216_v26, %v8405_v20  ;;  %v1333_v1 = vmax.f32 %v1152_v12, 0.0  ;;  %v833_v44 = vadd.f32 %v8253_v5, %v8388_v40 }
 0x155   : > { %v1281_v52 = vpop.f32.mrf.mxu3  ;;  %v1517_v38 = vld [vmem:[#allocation2 + $0x7] sm:$0xff] }
 0x156   : > { %1501 = vst [vmem:[#allocation2 + $0x10] sm:$0xff] %v1436_v39  ;;  %v1282_v25 = vadd.f32 %v1281_v52, %v1217_v24  ;;  %1663 = vmatmul.f32.vlgmr.msra.gmra.mxu1 %v1517_v38  ;;  %1601 = vmatmul.f32.gmra.mxu0 %v1436_v39  ;;  %v1335_v52 = vmax.f32 %v895_v17, 0.0  ;;  %v1336_v39 = vmax.f32 %v8251_v34, 0.0 }
 0x157   : > { %v1089_v18 = vpop.f32.mrf.mxu0 }
 0x158   : > { %v1334_v55 = vmax.f32 %v1282_v25, 0.0  ;;  %v1090_v22 = vadd.f32 %v1089_v18, %v8399_v16  ;;  %v1406_v5 = vmax.f32 %v1335_v52, %v1336_v39 }
 0x159   : > { %v1154_v56 = vpop.f32.mrf.mxu1 }
 0x15a   : > { %v1421_v30 = vmax.f32 %v1333_v1, %v1334_v55  ;;  %v1155_v59 = vadd.f32 %v1154_v56, %v1090_v22  ;;  %v898_v1 = vadd.f32 %v8257_v35, %v833_v44  ;;  %v836_v35 = vadd.f32 %v8264_v7, %v8388_v40 }
 0x15b   : > { %v1219_v19 = vpop.f32.mrf.mxu2 }
 0x15c   : > { %v1437_v23 = vmax.f32 %v1405_v6, %v1421_v30  ;;  %v1220_v50 = vadd.f32 %v1219_v19, %v8405_v20  ;;  %v1337_v24 = vmax.f32 %v1155_v59, 0.0  ;;  %v1339_v30 = vmax.f32 %v898_v1, 0.0 }
 0x15d   : > { %v1284_v51 = vpop.f32.mrf.mxu3  ;;  %v1518_v12 = vld [vmem:[#allocation2 + $0xf] sm:$0xff]  ;;  %v1340_v59 = vmax.f32 %v8262_v42, 0.0  ;;  %v901_v39 = vadd.f32 %v8268_v43, %v836_v35 }
 0x15e   : > { %v1712_v26 = vld [vmem:[#allocation2 + $0x9] sm:$0xff]  ;;  %1502 = vst [vmem:[#allocation2 + $0x18] sm:$0xff] %v1437_v23  ;;  %v1285_v31 = vadd.f32 %v1284_v51, %v1220_v50  ;;  %1666 = vmatmul.f32.gmra.mxu1 %v1518_v12  ;;  %1604 = vmatmul.f32.gmra.mxu0 %v1437_v23 }
 0x15f   : > { %1761 = vmatmul.f32.vlgmr.msra.gmra.mxu2 %v1712_v26  ;;  %v1092_v38 = vpop.f32.mrf.mxu0  ;;  %v1407_v52 = vmax.f32 %v1339_v30, %v1340_v59  ;;  %v1343_v1 = vmax.f32 %v901_v39, 0.0 }
 0x160   : > { %v1338_v10 = vmax.f32 %v1285_v31, 0.0  ;;  %v1093_v53 = vadd.f32 %v1092_v38, %v8399_v16 }
 0x161   : > { %v1157_v25 = vpop.f32.mrf.mxu1 }
 0x162   : > { %v1422_v18 = vmax.f32 %v1337_v24, %v1338_v10  ;;  %v1158_v55 = vadd.f32 %v1157_v25, %v1093_v53  ;;  %v839_v53 = vadd.f32 %v8275_v9, %v8388_v40  ;;  %v1344_v25 = vmax.f32 %v8273_v46, 0.0 }
 0x163   : > { %v1222_v34 = vpop.f32.mrf.mxu2 }
 0x164   : > { %v1438_v6 = vmax.f32 %v1406_v5, %v1422_v18  ;;  %v1223_v17 = vadd.f32 %v1222_v34, %v8405_v20  ;;  %v1341_v23 = vmax.f32 %v1158_v55, 0.0  ;;  %v1408_v59 = vmax.f32 %v1343_v1, %v1344_v25 }
 0x165   : > { %v1287_v56 = vpop.f32.mrf.mxu3  ;;  %v1519_v19 = vld [vmem:[#allocation2 + $0x17] sm:$0xff] }
 0x166   : > { %v1713_v3 = vld [vmem:[#allocation2 + $0x11] sm:$0xff]  ;;  %v1486_v51 = vsel %vm8450_vm1, %v1438_v6, 0.0  ;;  %v1288_v50 = vadd.f32 %v1287_v56, %v1223_v17  ;;  %1669 = vmatmul.f32.gmra.mxu1 %v1519_v19  ;;  %7359 = vmatmul.msk.f32.gmra.mxu0 %vm8450_vm1, %v1438_v6  ;;  %v904_v17 = vadd.f32 %v8279_v47, %v839_v53  ;;  %v432_v53 = vadd.s32 56, %v8439_v57 }
 0x167   : > { %1764 = vmatmul.f32.gmra.mxu2 %v1713_v3  ;;  %1503 = vst [vmem:[#allocation2 + $0x20] sm:$0xff] %v1486_v51  ;;  %v1095_v44 = vpop.f32.mrf.mxu0 }
 0x168   : > { %v1342_v12 = vmax.f32 %v1288_v50, 0.0  ;;  %v1096_v42 = vadd.f32 %v1095_v44, %v8399_v16 }
 0x169   : > { %v1160_v26 = vpop.f32.mrf.mxu1 }
 0x16a   : > { %v1423_v7 = vmax.f32 %v1341_v23, %v1342_v12  ;;  %v1161_v24 = vadd.f32 %v1160_v26, %v1096_v42  ;;  %v1347_v23 = vmax.f32 %v904_v17, 0.0  ;;  %v1348_v12 = vmax.f32 %v8284_v60, 0.0 }
 0x16b   : > { %v1225_v31 = vpop.f32.mrf.mxu2  ;;  %v842_v42 = vadd.f32 %v8286_v11, %v8388_v40  ;;  %v494_v17 = vand.u32 31, %v432_v53 }
 0x16c   : > { %v1439_v38 = vmax.f32 %v1407_v52, %v1423_v7  ;;  %v1226_v10 = vadd.f32 %v1225_v31, %v8405_v20  ;;  %v1345_v5 = vmax.f32 %v1161_v24, 0.0  ;;  %v1409_v31 = vmax.f32 %v1347_v23, %v1348_v12 }
 0x16d   : > { %v1290_v41 = vpop.f32.mrf.mxu3  ;;  %vm8486_vm2 = vcmp.lt.s32.totalorder %v494_v17, 25 }
 0x16e   : > { %1504 = vst [vmem:[#allocation2 + $0x28] sm:$0xff] %v1439_v38  ;;  %v1291_v18 = vadd.f32 %v1290_v41, %v1226_v10  ;;  %v1520_v55 = vld [vmem:[#allocation2 + $0x1f] sm:$0xff]  ;;  %1610 = vmatmul.f32.gmra.mxu0 %v1439_v38  ;;  %v907_v41 = vadd.f32 %v8290_v63, %v842_v42  ;;  %v1352_v63 = vmax.f32 %v8295_v61, 0.0 }
 0x16f   : > { %v1714_v34 = vld [vmem:[#allocation2 + $0x19] sm:$0xff]  ;;  %1672 = vmatmul.f32.gmra.mxu1 %v1520_v55  ;;  %v1098_v43 = vpop.f32.mrf.mxu0 }
 0x170   : > { %1767 = vmatmul.f32.gmra.mxu2 %v1714_v34  ;;  %v1346_v56 = vmax.f32 %v1291_v18, 0.0  ;;  %v1099_v6 = vadd.f32 %v1098_v43, %v8399_v16  ;;  %v975_v18 = vadd.f32 %v8304_v28, %v8211_v58  ;;  %v1351_v43 = vmax.f32 %v907_v41, 0.0 }
 0x171   : > { %v1163_v30 = vpop.f32.mrf.mxu1 }
 0x172   : > { %v1424_v9 = vmax.f32 %v1345_v5, %v1346_v56  ;;  %v1164_v19 = vadd.f32 %v1163_v30, %v1099_v6  ;;  %v845_v5 = vadd.f32 %v8297_v13, %v8388_v40  ;;  %v1040_v28 = vadd.f32 %v8306_v14, %v975_v18 }
 0x173   : > { %v1228_v3 = vpop.f32.mrf.mxu2  ;;  %v851_v18 = vadd.f32 %v8321_v4, %v8388_v40 }
 0x174   : > { %v1440_v35 = vmax.f32 %v1408_v59, %v1424_v9  ;;  %v1229_v51 = vadd.f32 %v1228_v3, %v8405_v20  ;;  %v1349_v26 = vmax.f32 %v1164_v19, 0.0  ;;  %v910_v13 = vadd.f32 %v8301_v21, %v845_v5 }
 0x175   : > { %v1293_v46 = vpop.f32.mrf.mxu3  ;;  %v1521_v50 = vld [vmem:[#allocation2 + $0x27] sm:$0xff]  ;;  %v1410_v3 = vmax.f32 %v1351_v43, %v1352_v63  ;;  %v1356_v42 = vmax.f32 %v1040_v28, 0.0  ;;  %v848_v21 = vadd.f32 %v8309_v2, %v8388_v40 }
 0x176   : > { %v1715_v44 = vld [vmem:[#allocation2 + $0x21] sm:$0xff]  ;;  %1505 = vst [vmem:[#allocation2 + $0x30] sm:$0xff] %v1440_v35  ;;  %v1294_v47 = vadd.f32 %v1293_v46, %v1229_v51  ;;  %1613 = vmatmul.f32.gmra.mxu0 %v1440_v35  ;;  %v1355_v12 = vmax.f32 %v910_v13, 0.0 }
 0x177   : > { %1675 = vmatmul.f32.gmra.mxu1 %v1521_v50  ;;  %v1101_v52 = vpop.f32.mrf.mxu0 }
 0x178   : > { %1770 = vmatmul.f32.gmra.mxu2 %v1715_v44  ;;  %v1350_v39 = vmax.f32 %v1294_v47, 0.0  ;;  %v1102_v7 = vadd.f32 %v1101_v52, %v8399_v16  ;;  %v978_v47 = vadd.f32 %v8316_v29, %v8211_v58  ;;  %v1411_v2 = vmax.f32 %v1355_v12, %v1356_v42 }
 0x179   : > { %v1166_v24 = vpop.f32.mrf.mxu1  ;;  %v854_v12 = vadd.f32 %v8333_v8, %v8388_v40 }
 0x17a   : > { %v1425_v38 = vmax.f32 %v1349_v26, %v1350_v39  ;;  %v1167_v10 = vadd.f32 %v1166_v24, %v1102_v7  ;;  %v1043_v29 = vadd.f32 %v8318_v32, %v978_v47 }
 0x17b   : > { %v1231_v60 = vpop.f32.mrf.mxu2 }
 0x17c   : > { %v1441_v1 = vmax.f32 %v1409_v31, %v1425_v38  ;;  %v1232_v25 = vadd.f32 %v1231_v60, %v8405_v20  ;;  %v1353_v56 = vmax.f32 %v1167_v10, 0.0  ;;  %v913_v10 = vadd.f32 %v8313_v15, %v848_v21 }
 0x17d   : > { %v1296_v11 = vpop.f32.mrf.mxu3  ;;  %v1522_v55 = vld [vmem:[#allocation2 + $0x2f] sm:$0xff]  ;;  %v1360_v43 = vmax.f32 %v1043_v29, 0.0  ;;  %v987_v29 = vadd.f32 %v8352_v45, %v8211_v58 }
 0x17e   : > { %v1716_v34 = vld [vmem:[#allocation2 + $0x29] sm:$0xff]  ;;  %1506 = vst [vmem:[#allocation2 + $0x38] sm:$0xff] %v1441_v1  ;;  %v1297_v6 = vadd.f32 %v1296_v11, %v1232_v25  ;;  %1616 = vmatmul.f32.gmra.mxu0 %v1441_v1 }
 0x17f   : > { %1678 = vmatmul.f32.gmra.mxu1 %v1522_v55  ;;  %v1104_v30 = vpop.f32.mrf.mxu0  ;;  %v981_v55 = vadd.f32 %v8328_v36, %v8211_v58 }
 0x180   : > { %1773 = vmatmul.f32.gmra.mxu2 %v1716_v34  ;;  %v1354_v59 = vmax.f32 %v1297_v6, 0.0  ;;  %v1105_v9 = vadd.f32 %v1104_v30, %v8399_v16  ;;  %v1359_v34 = vmax.f32 %v913_v10, 0.0  ;;  %v857_v10 = vadd.f32 %v8345_v54, %v8388_v40 }
 0x181   : > { %v1169_v19 = vpop.f32.mrf.mxu1  ;;  %v1046_v4 = vadd.f32 %v8330_v27, %v981_v55 }
 0x182   : > { %v1426_v46 = vmax.f32 %v1353_v56, %v1354_v59  ;;  %v1170_v35 = vadd.f32 %v1169_v19, %v1105_v9  ;;  %v916_v59 = vadd.f32 %v8325_v33, %v851_v18  ;;  %v1412_v36 = vmax.f32 %v1359_v34, %v1360_v43  ;;  %v11930_v34 = vld [vmem:[#allocation16_spill] sm:$0xff] }
 0x183   : > { %v1234_v51 = vpop.f32.mrf.mxu2  ;;  %v984_v33 = vadd.f32 %v8340_v49, %v8211_v58  ;;  %v436_v49 = vadd.s32 88, %v8439_v57  ;;  %v922_v54 = vadd.f32 %v8349_v37, %v857_v10  ;;  %v1052_v43 = vadd.f32 %v11930_v34, %v987_v29 }
 0x184   : > { %v1442_v50 = vmax.f32 %v1410_v3, %v1426_v46  ;;  %v1235_v44 = vadd.f32 %v1234_v51, %v8405_v20  ;;  %v1357_v39 = vmax.f32 %v1170_v35, 0.0  ;;  %v1363_v51 = vmax.f32 %v916_v59, 0.0 }
 0x185   : > { %v1299_v23 = vpop.f32.mrf.mxu3  ;;  %v1523_v26 = vld [vmem:[#allocation2 + $0x37] sm:$0xff] }
 0x186   : > { %v1717_v14 = vld [vmem:[#allocation2 + $0x31] sm:$0xff]  ;;  %v1490_v52 = vsel %vm8486_vm2, %v1442_v50, 0.0  ;;  %v1300_v7 = vadd.f32 %v1299_v23, %v1235_v44  ;;  %7360 = vmatmul.msk.f32.gmra.mxu0 %vm8486_vm2, %v1442_v50  ;;  %v1364_v23 = vmax.f32 %v1046_v4, 0.0  ;;  %v1371_v4 = vmax.f32 %v922_v54, 0.0 }
 0x187   : > { %1507 = vst [vmem:[#allocation2 + $0x40] sm:$0xff] %v1490_v52  ;;  %1681 = vmatmul.f32.gmra.mxu1 %v1523_v26  ;;  %v1107_v24 = vpop.f32.mrf.mxu0 }
 0x188   : > { %1776 = vmatmul.f32.gmra.mxu2 %v1717_v14  ;;  %v1358_v31 = vmax.f32 %v1300_v7, 0.0  ;;  %v1108_v41 = vadd.f32 %v1107_v24, %v8399_v16  ;;  %v1413_v47 = vmax.f32 %v1363_v51, %v1364_v23  ;;  %v1049_v7 = vadd.f32 %v8342_v0, %v984_v33 }
 0x189   : > { %v1172_v38 = vpop.f32.mrf.mxu1 }
 0x18a   : > { %v1427_v60 = vmax.f32 %v1357_v39, %v1358_v31  ;;  %v1173_v53 = vadd.f32 %v1172_v38, %v1108_v41  ;;  %v919_v39 = vadd.f32 %v8337_v48, %v854_v12 }
 0x18b   : > { %v1237_v11 = vpop.f32.mrf.mxu2 }
 0x18c   : > { %v1443_v25 = vmax.f32 %v1411_v2, %v1427_v60  ;;  %v1238_v5 = vadd.f32 %v1237_v11, %v8405_v20  ;;  %v1361_v63 = vmax.f32 %v1173_v53, 0.0  ;;  %v1367_v48 = vmax.f32 %v919_v39, 0.0 }
 0x18d   : > { %v1302_v1 = vpop.f32.mrf.mxu3  ;;  %v1368_v11 = vmax.f32 %v1049_v7, 0.0 }
 0x18e   : > { %1508 = vst [vmem:[#allocation2 + $0x48] sm:$0xff] %v1443_v25  ;;  %v1303_v15 = vadd.f32 %v1302_v1, %v1238_v5  ;;  %v1524_v56 = vld [vmem:[#allocation2 + $0x3f] sm:$0xff]  ;;  %1622 = vmatmul.f32.gmra.mxu0 %v1443_v25  ;;  %v522_v25 = vand.u32 31, %v436_v49 }
 0x18f   : > { %v1718_v32 = vld [vmem:[#allocation2 + $0x39] sm:$0xff]  ;;  %1684 = vmatmul.f32.gmra.mxu1 %v1524_v56  ;;  %v1110_v6 = vpop.f32.mrf.mxu0 }
 0x190   : > { %1779 = vmatmul.f32.gmra.mxu2 %v1718_v32  ;;  %v1362_v17 = vmax.f32 %v1303_v15, 0.0  ;;  %v1111_v30 = vadd.f32 %v1110_v6, %v8399_v16  ;;  %vm8527_vm3 = vcmp.lt.s32.totalorder %v522_v25, 25  ;;  %v11938_v49 = vld [vmem:[#allocation23_spill] sm:$0xff]  ;;  %v2719_v32 = vld [vmem:[#allocation8 + $0xe8] sm:$0xff] }
 0x191   : > { %v1175_v9 = vpop.f32.mrf.mxu1 }
 0x192   : > { %v1428_v13 = vmax.f32 %v1361_v63, %v1362_v17  ;;  %v1176_v28 = vadd.f32 %v1175_v9, %v1111_v30  ;;  %v1414_v63 = vmax.f32 %v1367_v48, %v1368_v11  ;;  %v1372_v9 = vmax.f32 %v1052_v43, 0.0 }
 0x193   : > { %v1240_v19 = vpop.f32.mrf.mxu2 }
 0x194   : > { %v1444_v46 = vmax.f32 %v1412_v36, %v1428_v13  ;;  %v1241_v35 = vadd.f32 %v1240_v19, %v8405_v20  ;;  %v1365_v27 = vmax.f32 %v1176_v28, 0.0  ;;  %v11933_v36 = vld [vmem:[#allocation17_spill] sm:$0xff]  ;;  %v11934_v19 = vld [vmem:[#allocation19_spill] sm:$0xff]  ;;  %v1415_v12 = vmax.f32 %v1371_v4, %v1372_v9 }
 0x195   : > { %v1305_v3 = vpop.f32.mrf.mxu3  ;;  %v1525_v50 = vld [vmem:[#allocation2 + $0x47] sm:$0xff]  ;;  %v860_v37 = vadd.f32 %v11933_v36, %v8388_v40  ;;  %v11941_v4 = vld [vmem:[#allocation25_spill] sm:$0xff] }
 0x196   : > { %v1719_v44 = vld [vmem:[#allocation2 + $0x41] sm:$0xff]  ;;  %1509 = vst [vmem:[#allocation2 + $0x50] sm:$0xff] %v1444_v46  ;;  %v1306_v42 = vadd.f32 %v1305_v3, %v1241_v35  ;;  %1625 = vmatmul.f32.gmra.mxu0 %v1444_v46  ;;  %v990_v3 = vadd.f32 %v11934_v19, %v8211_v58  ;;  %v866_v9 = vadd.f32 %v11941_v4, %v8388_v40 }
 0x197   : > { %1687 = vmatmul.f32.gmra.mxu1 %v1525_v50  ;;  %v1113_v21 = vpop.f32.mrf.mxu0  ;;  %v11942_v36 = vld [vmem:[#allocation27_spill] sm:$0xff] }
 0x198   : > { %1782 = vmatmul.f32.gmra.mxu2 %v1719_v44  ;;  %v1366_v26 = vmax.f32 %v1306_v42, 0.0  ;;  %v1114_v14 = vadd.f32 %v1113_v21, %v8399_v16  ;;  %v11936_v21 = vld [vmem:[#allocation20_spill] sm:$0xff] }
 0x199   : > { %v1178_v52 = vpop.f32.mrf.mxu1 }
 0x19a   : > { %v1429_v8 = vmax.f32 %v1365_v27, %v1366_v26  ;;  %v1179_v24 = vadd.f32 %v1178_v52, %v1114_v14  ;;  %v11935_v27 = vld [vmem:[#allocation18_spill] sm:$0xff]  ;;  %v1055_v26 = vadd.f32 %v11936_v21, %v990_v3 }
 0x19b   : > { %v1243_v31 = vpop.f32.mrf.mxu2  ;;  %v925_v42 = vadd.f32 %v11935_v27, %v860_v37  ;;  %v996_v37 = vadd.f32 %v11942_v36, %v8211_v58 }
 0x19c   : > { %v1445_v2 = vmax.f32 %v1413_v47, %v1429_v8  ;;  %v1244_v38 = vadd.f32 %v1243_v31, %v8405_v20  ;;  %v1369_v0 = vmax.f32 %v1179_v24, 0.0  ;;  %v11937_v24 = vld [vmem:[#allocation21_spill] sm:$0xff] }
 0x19d   : > { %v1308_v41 = vpop.f32.mrf.mxu3  ;;  %v1526_v60 = vld [vmem:[#allocation2 + $0x4f] sm:$0xff]  ;;  %v863_v31 = vadd.f32 %v11937_v24, %v8388_v40 }
 0x19e   : > { %v1720_v53 = vld [vmem:[#allocation2 + $0x49] sm:$0xff]  ;;  %1510 = vst [vmem:[#allocation2 + $0x58] sm:$0xff] %v1445_v2  ;;  %v1309_v1 = vadd.f32 %v1308_v41, %v1244_v38  ;;  %1628 = vmatmul.f32.gmra.mxu0 %v1445_v2  ;;  %v993_v41 = vadd.f32 %v11938_v49, %v8211_v58  ;;  %v1375_v2 = vmax.f32 %v925_v42, 0.0  ;;  %v1376_v38 = vmax.f32 %v1055_v26, 0.0 }
 0x19f   : > { %1690 = vmatmul.f32.gmra.mxu1 %v1526_v60  ;;  %v1116_v5 = vpop.f32.mrf.mxu0  ;;  %v440_v58 = vadd.s32 120, %v8439_v57 }
 0x1a0   : > { %1785 = vmatmul.f32.gmra.mxu2 %v1720_v53  ;;  %v1370_v18 = vmax.f32 %v1309_v1, 0.0  ;;  %v1117_v55 = vadd.f32 %v1116_v5, %v8399_v16  ;;  %v11939_v1 = vld [vmem:[#allocation22_spill] sm:$0xff]  ;;  %v11940_v5 = vld [vmem:[#allocation24_spill] sm:$0xff]  ;;  %v1416_v54 = vmax.f32 %v1375_v2, %v1376_v38 }
 0x1a1   : > { %v1181_v45 = vpop.f32.mrf.mxu1  ;;  %v928_v25 = vadd.f32 %v11939_v1, %v863_v31 }
 0x1a2   : > { %v1430_v15 = vmax.f32 %v1369_v0, %v1370_v18  ;;  %v1182_v56 = vadd.f32 %v1181_v45, %v1117_v55  ;;  %v1058_v18 = vadd.f32 %v11940_v5, %v993_v41  ;;  %v8572_v5 = vld [vmem:[%s11886_s4] ss:$0 sm:$0xff] }
 0x1a3   : > { %v1246_v6 = vpop.f32.mrf.mxu2 }
 0x1a4   : > { %v1446_v30 = vmax.f32 %v1414_v63, %v1430_v15  ;;  %v1247_v59 = vadd.f32 %v1246_v6, %v8405_v20  ;;  %v1373_v35 = vmax.f32 %v1182_v56, 0.0  ;;  %v1379_v6 = vmax.f32 %v928_v25, 0.0 }
 0x1a5   : > { %v1311_v17 = vpop.f32.mrf.mxu3  ;;  %v1527_v13 = vld [vmem:[#allocation2 + $0x57] sm:$0xff] }
 0x1a6   : > { %v1721_v28 = vld [vmem:[#allocation2 + $0x51] sm:$0xff]  ;;  %v1494_v46 = vsel %vm8527_vm3, %v1446_v30, 0.0  ;;  %v1312_v51 = vadd.f32 %v1311_v17, %v1247_v59  ;;  %7361 = vmatmul.msk.f32.gmra.mxu0 %vm8527_vm3, %v1446_v30  ;;  %v1380_v17 = vmax.f32 %v1058_v18, 0.0 }
 0x1a7   : > { %1511 = vst [vmem:[#allocation2 + $0x60] sm:$0xff] %v1494_v46  ;;  %1693 = vmatmul.f32.gmra.mxu1 %v1527_v13  ;;  %v1119_v23 = vpop.f32.mrf.mxu0 }
 0x1a8   : > { %1788 = vmatmul.f32.gmra.mxu2 %v1721_v28  ;;  %v1374_v50 = vmax.f32 %v1312_v51, 0.0  ;;  %v1120_v44 = vadd.f32 %v1119_v23, %v8399_v16  ;;  %v11943_v23 = vld [vmem:[#allocation26_spill] sm:$0xff] }
 0x1a9   : > { %v1184_v33 = vpop.f32.mrf.mxu1 }
 0x1aa   : > { %v1431_v14 = vmax.f32 %v1373_v35, %v1374_v50  ;;  %v1185_v47 = vadd.f32 %v1184_v33, %v1120_v44  ;;  %v1417_v35 = vmax.f32 %v1379_v6, %v1380_v17  ;;  %v931_v50 = vadd.f32 %v11943_v23, %v866_v9  ;;  %v11944_v44 = vld [vmem:[#allocation28_spill] sm:$0xff] }
 0x1ab   : > { %v1249_v52 = vpop.f32.mrf.mxu2 }
 0x1ac   : > { %v1447_v7 = vmax.f32 %v1415_v12, %v1431_v14  ;;  %v1250_v8 = vadd.f32 %v1249_v52, %v8405_v20  ;;  %v1377_v10 = vmax.f32 %v1185_v47, 0.0  ;;  %v1061_v12 = vadd.f32 %v11944_v44, %v996_v37 }
 0x1ad   : > { %v1314_v39 = vpop.f32.mrf.mxu3  ;;  %v1383_v52 = vmax.f32 %v931_v50, 0.0 }
 0x1ae   : > { %1512 = vst [vmem:[#allocation2 + $0x68] sm:$0xff] %v1447_v7  ;;  %v1315_v29 = vadd.f32 %v1314_v39, %v1250_v8  ;;  %v1528_v60 = vld [vmem:[#allocation2 + $0x5f] sm:$0xff]  ;;  %1634 = vmatmul.f32.gmra.mxu0 %v1447_v7  ;;  %v550_v8 = vand.u32 31, %v440_v58 }
 0x1af   : > { %v1722_v53 = vld [vmem:[#allocation2 + $0x59] sm:$0xff]  ;;  %1696 = vmatmul.f32.gmra.mxu1 %v1528_v60  ;;  %v1122_v48 = vpop.f32.mrf.mxu0 }
 0x1b0   : > { %1791 = vmatmul.f32.gmra.mxu2 %v1722_v53  ;;  %v1378_v11 = vmax.f32 %v1315_v29, 0.0  ;;  %v1123_v0 = vadd.f32 %v1122_v48, %v8399_v16  ;;  %vm8561_vm4 = vcmp.lt.s32.totalorder %v550_v8, 25 }
 0x1b1   : > { %v1187_v55 = vpop.f32.mrf.mxu1 }
 0x1b2   : > { %v1432_v34 = vmax.f32 %v1377_v10, %v1378_v11  ;;  %v1188_v43 = vadd.f32 %v1187_v55, %v1123_v0 }
 0x1b3   : > { %v1252_v45 = vpop.f32.mrf.mxu2 }
 0x1b4   : > { %v1448_v15 = vmax.f32 %v1416_v54, %v1432_v34  ;;  %v1253_v56 = vadd.f32 %v1252_v45, %v8405_v20  ;;  %v1381_v13 = vmax.f32 %v1188_v43, 0.0 }
 0x1b5   : > { %v1317_v63 = vpop.f32.mrf.mxu3  ;;  %v1529_v30 = vld [vmem:[#allocation2 + $0x67] sm:$0xff] }
 0x1b6   : > { %v1723_v59 = vld [vmem:[#allocation2 + $0x61] sm:$0xff]  ;;  %1513 = vst [vmem:[#allocation2 + $0x70] sm:$0xff] %v1448_v15  ;;  %v1318_v28 = vadd.f32 %v1317_v63, %v1253_v56  ;;  %1637 = vmatmul.f32.gmra.mxu0 %v1448_v15 }
 0x1b7   : > { %1699 = vmatmul.f32.gmra.mxu1 %v1529_v30  ;;  %v1125_v19 = vpop.f32.mrf.mxu0 }
 0x1b8   : > { %1794 = vmatmul.f32.gmra.mxu2 %v1723_v59  ;;  %v1382_v3 = vmax.f32 %v1318_v28, 0.0  ;;  %v1126_v46 = vadd.f32 %v1125_v19, %v8399_v16  ;;  %v1384_v16 = vmax.f32 %v1061_v12, 0.0 }
 0x1b9   : > { %v1190_v51 = vpop.f32.mrf.mxu1 }
 0x1ba   : > { %v1433_v40 = vmax.f32 %v1381_v13, %v1382_v3  ;;  %v1191_v33 = vadd.f32 %v1190_v51, %v1126_v46  ;;  %v1418_v31 = vmax.f32 %v1383_v52, %v1384_v16 }
 0x1bb   : > { %v1255_v27 = vpop.f32.mrf.mxu2 }
 0x1bc   : > { %v1449_v21 = vmax.f32 %v1417_v35, %v1433_v40  ;;  %v1256_v26 = vadd.f32 %v1255_v27, %v8405_v20  ;;  %v1385_v39 = vmax.f32 %v1191_v33, 0.0 }
 0x1bd   : > { %v1320_v42 = vpop.f32.mrf.mxu3  ;;  %v1530_v14 = vld [vmem:[#allocation2 + $0x6f] sm:$0xff] }
 0x1be   : > { %v1724_v47 = vld [vmem:[#allocation2 + $0x69] sm:$0xff]  ;;  %1514 = vst [vmem:[#allocation2 + $0x78] sm:$0xff] %v1449_v21  ;;  %v1321_v7 = vadd.f32 %v1320_v42, %v1256_v26  ;;  %1640 = vmatmul.f32.vlgmr.msra.gmra.mxu3 %v1449_v21 }
 0x1bf   : > { %1702 = vmatmul.f32.gmra.mxu1 %v1530_v14 }
 0x1c0   : > { %1797 = vmatmul.f32.gmra.mxu2 %v1724_v47  ;;  %v1386_v24 = vmax.f32 %v1321_v7, 0.0 }
 0x1c2   : > { %v1434_v49 = vmax.f32 %v1385_v39, %v1386_v24 }
 0x1c4   : > { %v1450_v2 = vmax.f32 %v1418_v31, %v1434_v49 }
 0x1c5   : > { %v1531_v20 = vld [vmem:[#allocation2 + $0x77] sm:$0xff] }
 0x1c6   : > { %v1725_v38 = vld [vmem:[#allocation2 + $0x71] sm:$0xff]  ;;  %v1498_v10 = vsel %vm8561_vm4, %v1450_v2, 0.0  ;;  %7362 = vmatmul.msk.f32.gmra.mxu3 %vm8561_vm4, %v1450_v2 }
 0x1c7   : > { %1515 = vst [vmem:[#allocation2 + $0x80] sm:$0xff] %v1498_v10  ;;  %1705 = vmatmul.f32.gmra.mxu1 %v1531_v20 }
 0x1c8   : > { %1800 = vmatmul.f32.gmra.mxu2 %v1725_v38 }
 0x1cb   : > { %v1599_v48 = vpop.f32.mrf.mxu0 }
 0x1ce   : > { %v1532_v29 = vld [vmem:[#allocation2 + $0x7f] sm:$0xff] }
 0x1cf   : > { %v1726_v60 = vld [vmem:[#allocation2 + $0x79] sm:$0xff]  ;;  %1708 = vmatmul.f32.gmra.mxu1 %v1532_v29  ;;  %v1727_v11 = vld [vmem:[#allocation2 + $0x81] sm:$0xff] }
 0x1d0   : > { %1803 = vmatmul.f32.gmra.mxu2 %v1726_v60 }
 0x1d3   : > { %v1664_v53 = vpop.f32.mrf.mxu1  ;;  %v1602_v1 = vpop.f32.mrf.mxu0 }
 0x1d4   : > { %v1665_v25 = vadd.f32 %v1664_v53, %v1599_v48 }
 0x1d8   : > { %1806 = vmatmul.f32.gmra.mxu2 %v1727_v11 }
 0x1db   : > { %v1667_v0 = vpop.f32.mrf.mxu1  ;;  %v1605_v63 = vpop.f32.mrf.mxu0 }
 0x1dc   : > { %v1668_v45 = vadd.f32 %v1667_v0, %v1602_v1 }
 0x1e2   : > { %v1762_v18 = vpop.f32.mrf.mxu2 }
 0x1e3   : > { %v1810_v55 = vadd.f32 %v1762_v18, %v1665_v25  ;;  %v1670_v34 = vpop.f32.mrf.mxu1  ;;  %v1608_v4 = vpop.f32.mrf.mxu0 }
 0x1e4   : > { %v1671_v59 = vadd.f32 %v1670_v34, %v1605_v63 }
 0x1e5   : > { %v8575_v54 = vadd.f32 %v8572_v5, %v1810_v55 }
 0x1e7   : > { %v1846_v43 = vmax.f32 %v8575_v54, 0.0 }
 0x1e9   : > { %1878 = vrot.lane.b32.xlu0 %v1846_v43, %s7502_s25 }
 0x1ea   : > { %v1765_v15 = vpop.f32.mrf.mxu2 }
 0x1eb   : > { %v1811_v56 = vadd.f32 %v1765_v15, %v1668_v45  ;;  %v1611_v35 = vpop.f32.mrf.mxu0 }
 0x1ec   : > { %v1673_v30 = vpop.f32.mrf.mxu1 }
 0x1ed   : > { %v1831_v6 = vadd.f32 %v8572_v5, %v1811_v56  ;;  %v1674_v28 = vadd.f32 %v1673_v30, %v1608_v4 }
 0x1ef   : > { %v1847_v17 = vmax.f32 %v1831_v6, 0.0 }
 0x1f1   : > { %1880 = vrot.lane.b32.xlu0 %v1847_v17, %s7502_s25 }
 0x1f3   : > { %v1768_v9 = vpop.f32.mrf.mxu2  ;;  %v1614_v27 = vpop.f32.mrf.mxu0 }
 0x1f4   : > { %v1812_v36 = vadd.f32 %v1768_v9, %v1671_v59  ;;  %v1676_v19 = vpop.f32.mrf.mxu1 }
 0x1f5   : > { %v1677_v50 = vadd.f32 %v1676_v19, %v1611_v35 }
 0x1f6   : > { %v8582_v37 = vadd.f32 %v8572_v5, %v1812_v36 }
 0x1f8   : > { %v1848_v13 = vmax.f32 %v8582_v37, 0.0 }
 0x1fa   : > { %1882 = vrot.lane.b32.xlu1 %v1848_v13, %s7502_s25 }
 0x1fb   : > { %v1771_v3 = vpop.f32.mrf.mxu2  ;;  %v1617_v16 = vpop.f32.mrf.mxu0 }
 0x1fc   : > { %v1813_v46 = vadd.f32 %v1771_v3, %v1674_v28  ;;  %v1679_v40 = vpop.f32.mrf.mxu1 }
 0x1fd   : > { %v1680_v42 = vadd.f32 %v1679_v40, %v1614_v27 }
 0x1fe   : > { %v8589_v51 = vadd.f32 %v8572_v5, %v1813_v46 }
 0x200   : > { %v1849_v23 = vmax.f32 %v8589_v51, 0.0  ;;  %v7358_v51 = vld [vmem:[#allocation2] sm:$0xff] }
 0x201   : > { %2039 = vst.msk [vmem:[#allocation3] sm:$0xff] %vm2038_vm5, %v7358_v51 }
 0x202   : > { %1884 = vrot.lane.b32.xlu1 %v1849_v23, %s7502_s25  ;;  %2056 = vst.msk [vmem:[#allocation3 + $0x88] sm:$0xff] %vm2038_vm5, %v7358_v51 }
 0x203   : > { %v1774_v44 = vpop.f32.mrf.mxu2  ;;  %v1620_v2 = vpop.f32.mrf.mxu0 }
 0x204   : > { %v1814_v12 = vadd.f32 %v1774_v44, %v1677_v50  ;;  %v1682_v47 = vpop.f32.mrf.mxu1 }
 0x205   : > { %v1683_v39 = vadd.f32 %v1682_v47, %v1617_v16 }
 0x206   : > { %v1834_v33 = vadd.f32 %v8572_v5, %v1814_v12 }
 0x208   : > { %v1850_v58 = vmax.f32 %v1834_v33, 0.0 }
 0x20a   : > { %1886 = vrot.lane.b32.xlu2 %v1850_v58, %s7502_s25 }
 0x20b   : > { %v1777_v21 = vpop.f32.mrf.mxu2  ;;  %v1623_v10 = vpop.f32.mrf.mxu0 }
 0x20c   : > { %v1815_v26 = vadd.f32 %v1777_v21, %v1680_v42  ;;  %v1685_v49 = vpop.f32.mrf.mxu1 }
 0x20d   : > { %v1686_v60 = vadd.f32 %v1685_v49, %v1620_v2 }
 0x20e   : > { %v8598_v14 = vadd.f32 %v8572_v5, %v1815_v26 }
 0x210   : > { %v1851_v52 = vmax.f32 %v8598_v14, 0.0 }
 0x212   : > { %1888 = vrot.lane.b32.xlu2 %v1851_v52, %s7502_s25 }
 0x213   : > { %v1780_v7 = vpop.f32.mrf.mxu2  ;;  %v1626_v48 = vpop.f32.mrf.mxu0 }
 0x214   : > { %v1816_v8 = vadd.f32 %v1780_v7, %v1683_v39  ;;  %v1688_v38 = vpop.f32.mrf.mxu1 }
 0x215   : > { %v1689_v55 = vadd.f32 %v1688_v38, %v1623_v10 }
 0x216   : > { %v8605_v24 = vadd.f32 %v8572_v5, %v1816_v8 }
 0x218   : > { %v1852_v31 = vmax.f32 %v8605_v24, 0.0  ;;  %v8698_v24 = vld [vmem:[#allocation8 + $0x38] sm:$0xff] }
 0x219   : > { %2409 = vmatpush.msrb.mxu2 %v8698_v24 }
 0x21a   : > { %1890 = vrot.lane.b32.xlu1 %v1852_v31, %s7502_s25 }
 0x21b   : > { %v1783_v20 = vpop.f32.mrf.mxu2  ;;  %v1629_v56 = vpop.f32.mrf.mxu0 }
 0x21c   : > { %v1691_v53 = vpop.f32.mrf.mxu1  ;;  %v1817_v0 = vadd.f32 %v1783_v20, %v1686_v60 }
 0x21d   : > { %v1692_v30 = vadd.f32 %v1691_v53, %v1626_v48 }
 0x21e   : > { %v8616_v18 = vadd.f32 %v8572_v5, %v1817_v0  ;;  %v2105_v0 = vld [vmem:[#allocation8 + $0x78] sm:$0xff] }
 0x21f   : > { %2231 = vmatpush.msrb.mxu0 %v2105_v0 }
 0x220   : > { %v1853_v15 = vmax.f32 %v8616_v18, 0.0 }
 0x223   : > { %v1786_v29 = vpop.f32.mrf.mxu2  ;;  %v1632_v28 = vpop.f32.mrf.mxu0 }
 0x224   : > { %v1818_v34 = vadd.f32 %v1786_v29, %v1689_v55  ;;  %v1694_v45 = vpop.f32.mrf.mxu1  ;;  %v2103_v55 = vld [vmem:[#allocation8 + $0x68] sm:$0xff] }
 0x225   : > { %v1695_v50 = vadd.f32 %v1694_v45, %v1629_v56  ;;  %v2100_v45 = vld [vmem:[#allocation8 + $0x50] sm:$0xff]  ;;  %2232 = vmatpush.msrb.mxu0 %v2103_v55  ;;  %v2101_v56 = vld [vmem:[#allocation8 + $0x58] sm:$0xff] }
 0x227   : > { %2233 = vmatpush.msrb.mxu0 %v2101_v56 }
 0x22b   : > { %v1789_v1 = vpop.f32.mrf.mxu2  ;;  %v1635_v42 = vpop.f32.mrf.mxu0 }
 0x22c   : > { %v1697_v36 = vpop.f32.mrf.mxu1 }
 0x22d   : > { %v1698_v35 = vadd.f32 %v1697_v36, %v1632_v28  ;;  %v2073_v36 = vld [vmem:[#allocation8] sm:$0xff] }
 0x233   : > { %v1792_v6 = vpop.f32.mrf.mxu2  ;;  %v1638_v2 = vpop.f32.mrf.mxu0 }
 0x234   : > { %v1820_v12 = vadd.f32 %v1792_v6, %v1695_v50  ;;  %v1700_v27 = vpop.f32.mrf.mxu1  ;;  %v2075_v6 = vld [vmem:[#allocation8 + $0x10] sm:$0xff] }
 0x235   : > { %v1701_v47 = vadd.f32 %v1700_v27, %v1635_v42 }
 0x23b   : > { %v1795_v19 = vpop.f32.mrf.mxu2 }
 0x23c   : > { %v1821_v44 = vadd.f32 %v1795_v19, %v1698_v35  ;;  %v2074_v19 = vld [vmem:[#allocation8 + $0x8] sm:$0xff] }
 0x243   : > { %v1798_v21 = vpop.f32.mrf.mxu2 }
 0x244   : > { %v1822_v39 = vadd.f32 %v1798_v21, %v1701_v47 }
 0x246   : > { %v8679_v49 = vadd.f32 %v8572_v5, %v1822_v39 }
 0x248   : > { %v1858_v14 = vmax.f32 %v8679_v49, 0.0 }
 0x24b   : > { %v1801_v20 = vpop.f32.mrf.mxu2 }
 0x253   : > { %v1804_v35 = vpop.f32.mrf.mxu2 }
 0x25b   : > { %v1879_v11 = vpop.permute.xlu0 %1878  ;;  %v1807_v27 = vpop.f32.mrf.mxu2 }
 0x25c   : > { %v8611_v25 = vmax.f32 %v1846_v43, %v1879_v11  ;;  %v8627_v43 = vadd.f32 %v8572_v5, %v1818_v34  ;;  %v2104_v11 = vld [vmem:[#allocation8 + $0x70] sm:$0xff]  ;;  %v2078_v34 = vld [vmem:[#allocation8 + $0x28] sm:$0xff] }
 0x25d   : > { %2166 = vmatpush.msrb.mxu3 %v2104_v11  ;;  %2410 = vmatpush.msrb.mxu2 %v2078_v34 }
 0x25e   : > { %1958 = vrot.lane.b32.xlu0 %v8611_v25, %s7503_s30  ;;  %v1854_v4 = vmax.f32 %v8627_v43, 0.0 }
 0x263   : > { %v1881_v54 = vpop.permute.xlu0 %1880 }
 0x264   : > { %v8618_v63 = vmax.f32 %v1847_v17, %v1881_v54  ;;  %v1819_v17 = vadd.f32 %v1789_v1, %v1692_v30  ;;  %v1887_v3 = vpop.permute.xlu2 %1886  ;;  %v2079_v1 = vld [vmem:[#allocation8 + $0x30] sm:$0xff]  ;;  %v2077_v54 = vld [vmem:[#allocation8 + $0x20] sm:$0xff]  ;;  %v2076_v30 = vld [vmem:[#allocation8 + $0x18] sm:$0xff] }
 0x265   : > { %v8642_v37 = vmax.f32 %v1850_v58, %v1887_v3  ;;  %v8657_v58 = vadd.f32 %v8572_v5, %v1821_v44  ;;  %2344 = vmatpush.msrb.mxu1 %v2079_v1  ;;  %2411 = vmatpush.msrb.mxu2 %v2076_v30  ;;  %v1641_v3 = vpop.f32.mrf.mxu3 }
 0x266   : > { %1892 = vrot.lane.b32.xlu0 %v1853_v15, %s7502_s25  ;;  %1960 = vrot.lane.b32.xlu2 %v8618_v63, %s7503_s30  ;;  %v8640_v46 = vadd.f32 %v8572_v5, %v1819_v17  ;;  %v2099_v17 = vld [vmem:[#allocation8 + $0x48] sm:$0xff] }
 0x267   : > { %v1857_v16 = vmax.f32 %v8657_v58, 0.0  ;;  %2345 = vmatpush.msrb.mxu1 %v2077_v54  ;;  %2234 = vmatpush.msrb.mxu0 %v2099_v17 }
 0x268   : > { %v1855_v33 = vmax.f32 %v8640_v46, 0.0  ;;  %2412 = vmatpush.msrb.mxu2 %v2074_v19 }
 0x269   : > { %2346 = vmatpush.msrb.mxu1 %v2075_v6 }
 0x26b   : > { %2347 = vmatpush.msrb.mxu1 %v2073_v36 }
 0x26c   : > { %v1883_v59 = vpop.permute.xlu1 %1882  ;;  %v1889_v26 = vpop.permute.xlu2 %1888 }
 0x26d   : > { %v8632_v9 = vmax.f32 %v1848_v13, %v1883_v59  ;;  %v8667_v7 = vmax.f32 %v1851_v52, %v1889_v26  ;;  %v1703_v52 = vpop.f32.mrf.mxu1  ;;  %v2098_v59 = vld [vmem:[#allocation8 + $0x40] sm:$0xff] }
 0x26e   : > { %1894 = vrot.lane.b32.xlu2 %v1854_v4, %s7502_s25  ;;  %v1704_v38 = vadd.f32 %v1703_v52, %v1638_v2 }
 0x26f   : > { %1962 = vrot.lane.b32.xlu1 %v8632_v9, %s7503_s30 }
 0x270   : > { %v1823_v29 = vadd.f32 %v1801_v20, %v1704_v38 }
 0x272   : > { %v8692_v53 = vadd.f32 %v8572_v5, %v1823_v29 }
 0x274   : > { %v1885_v13 = vpop.permute.xlu1 %1884  ;;  %v1859_v48 = vmax.f32 %v8692_v53, 0.0 }
 0x275   : > { %v8646_v40 = vmax.f32 %v1849_v23, %v1885_v13  ;;  %v8661_v23 = vadd.f32 %v8572_v5, %v1820_v12  ;;  %v1706_v28 = vpop.f32.mrf.mxu1  ;;  %v1644_v12 = vpop.f32.mrf.mxu3 }
 0x276   : > { %1966 = vrot.lane.b32.xlu2 %v8642_v37, %s7503_s30  ;;  %v1707_v43 = vadd.f32 %v1706_v28, %v1641_v3 }
 0x277   : > { %1896 = vrot.lane.b32.xlu1 %v1855_v33, %s7502_s25  ;;  %1964 = vrot.lane.b32.xlu0 %v8646_v40, %s7503_s30  ;;  %v1856_v8 = vmax.f32 %v8661_v23, 0.0 }
 0x278   : > { %v1824_v38 = vadd.f32 %v1804_v35, %v1707_v43 }
 0x27d   : > { %v1709_v13 = vpop.f32.mrf.mxu1 }
 0x27e   : > { %1900 = vrot.lane.b32.xlu2 %v1857_v16, %s7502_s25  ;;  %v1710_v51 = vadd.f32 %v1709_v13, %v1644_v12 }
 0x27f   : > { %1968 = vrot.lane.b32.xlu1 %v8667_v7, %s7503_s30  ;;  %1898 = vrot.lane.b32.xlu0 %v1856_v8, %s7502_s25 }
 0x280   : > { %v1825_v21 = vadd.f32 %v1807_v27, %v1710_v51 }
 0x282   : > { %v8710_v47 = vadd.f32 %v8572_v5, %v1825_v21 }
 0x284   : > { %v1861_v20 = vmax.f32 %v8710_v47, 0.0 }
 0x287   : > { %1902 = vrot.lane.b32.xlu1 %v1858_v14, %s7502_s25 }
 0x28c   : > { %v1891_v10 = vpop.permute.xlu1 %1890 }
 0x28d   : > { %v8687_v60 = vmax.f32 %v1852_v31, %v1891_v10  ;;  %v2102_v31 = vld [vmem:[#allocation8 + $0x60] sm:$0xff] }
 0x28e   : > { %2167 = vmatpush.msrb.mxu3 %v2102_v31 }
 0x28f   : > { %1970 = vrot.lane.b32.xlu0 %v8687_v60, %s7503_s30 }
 0x290   : > { %2168 = vmatpush.msrb.mxu3 %v2100_v45 }
 0x292   : > { %2169 = vmatpush.msrb.mxu3 %v2098_v59 }
 0x294   : > { %7280 = vmatpush.msra.mxu3 %v2079_v1 }
 0x296   : > { %7281 = vmatpush.msra.mxu3 %v2077_v54 }
 0x297   : > { %1904 = vrot.lane.b32.xlu0 %v1859_v48, %s7502_s25 }
 0x298   : > { %7282 = vmatpush.msra.mxu3 %v2075_v6 }
 0x29a   : > { %7283 = vmatpush.msra.mxu3 %v2073_v36 }
 0x2c0   : > { %v1961_v50 = vpop.permute.xlu2 %1960 }
 0x2c1   : > { %v2007_v44 = vmax.f32 %v8618_v63, %v1961_v50 }
 0x2c3   : > { %2041 = vst.msk [vmem:[#allocation3 + $0x10] sm:$0xff] %vm2038_vm5, %v2007_v44 }
 0x2c8   : > { %v1895_v42 = vpop.permute.xlu2 %1894 }
 0x2c9   : > { %v8705_v26 = vmax.f32 %v1854_v4, %v1895_v42 }
 0x2ca   : > { %v2082_v0 = vld [vmem:[#allocation3 + $0x10] sm:$0xff] }
 0x2cb   : > { %1974 = vrot.lane.b32.xlu1 %v8705_v26, %s7503_s30 }
 0x2d0   : > { %v1967_v63 = vpop.permute.xlu2 %1966  ;;  %v1959_v39 = vpop.permute.xlu0 %1958 }
 0x2d1   : > { %v2010_v52 = vmax.f32 %v8642_v37, %v1967_v63  ;;  %v2006_v2 = vmax.f32 %v8611_v25, %v1959_v39  ;;  %v8729_v25 = vadd.f32 %v8572_v5, %v1824_v38 }
 0x2d3   : > { %2044 = vst.msk [vmem:[#allocation3 + $0x28] sm:$0xff] %vm2038_vm5, %v2010_v52  ;;  %1908 = vrot.lane.b32.xlu1 %v1861_v20, %s7502_s25 }
 0x2d4   : > { %2040 = vst.msk [vmem:[#allocation3 + $0x8] sm:$0xff] %vm2038_vm5, %v2006_v2 }
 0x2d8   : > { %v1893_v4 = vpop.permute.xlu0 %1892  ;;  %v1901_v46 = vpop.permute.xlu2 %1900 }
 0x2d9   : > { %v8722_v10 = vmax.f32 %v1853_v15, %v1893_v4  ;;  %v1860_v15 = vmax.f32 %v8729_v25, 0.0  ;;  %v8760_v22 = vmax.f32 %v1857_v16, %v1901_v46 }
 0x2da   : > { %v2085_v16 = vld [vmem:[#allocation3 + $0x28] sm:$0xff] }
 0x2db   : > { %v2081_v37 = vld [vmem:[#allocation3 + $0x8] sm:$0xff]  ;;  %1972 = vrot.lane.b32.xlu2 %v8722_v10, %s7503_s30 }
 0x2dc   : > { %v2057_v29 = vld [vmem:[#allocation3 + $0x7] sm:$0xff]  ;;  %6518 = vmatmul.msk.f32.vlgmr.msrb.gmra.mxu3 %vm2038_vm5, %v2081_v37  ;;  %6534 = vmatmul.msk.f32.vlgmr.msrb.gmra.mxu0 %vm2038_vm5, %v2081_v37  ;;  %v2058_v5 = vld [vmem:[#allocation3 + $0xf] sm:$0xff] }
 0x2dd   : > { %6550 = vmatmul.msk.f32.vlgmr.msrb.gmra.mxu1 %vm2038_vm5, %v2057_v29  ;;  %6566 = vmatmul.msk.f32.vlgmr.msrb.gmra.mxu2 %vm2038_vm5, %v2057_v29 }
 0x2de   : > { %7284 = vmatpush.msrb.mxu3 %v8698_v24 }
 0x2e0   : > { %7285 = vmatpush.msrb.mxu3 %v2078_v34 }
 0x2e1   : > { %v1963_v18 = vpop.permute.xlu1 %1962 }
 0x2e2   : > { %v2008_v11 = vmax.f32 %v8632_v9, %v1963_v18  ;;  %7286 = vmatpush.msrb.mxu3 %v2076_v30 }
 0x2e3   : > { %1906 = vrot.lane.b32.xlu2 %v1860_v15, %s7502_s25 }
 0x2e4   : > { %2042 = vst.msk [vmem:[#allocation3 + $0x18] sm:$0xff] %vm2038_vm5, %v2008_v11  ;;  %6519 = vmatmul.msk.f32.gmra.mxu3 %vm2038_vm5, %v2082_v0  ;;  %6535 = vmatmul.msk.f32.gmra.mxu0 %vm2038_vm5, %v2082_v0 }
 0x2e5   : > { %6551 = vmatmul.msk.f32.gmra.mxu1 %vm2038_vm5, %v2058_v5  ;;  %6567 = vmatmul.msk.f32.gmra.mxu2 %vm2038_vm5, %v2058_v5 }
 0x2e6   : > { %7287 = vmatpush.msrb.mxu3 %v2074_v19 }
 0x2e9   : > { %v1897_v1 = vpop.permute.xlu1 %1896  ;;  %v1965_v9 = vpop.permute.xlu0 %1964 }
 0x2ea   : > { %v8746_v24 = vmax.f32 %v1855_v33, %v1897_v1  ;;  %v2009_v31 = vmax.f32 %v8646_v40, %v1965_v9  ;;  %v2720_v9 = vld [vmem:[#allocation8 + $0xf0] sm:$0xff] }
 0x2eb   : > { %v2083_v55 = vld [vmem:[#allocation3 + $0x18] sm:$0xff]  ;;  %2782 = vmatpush.msra.mxu1 %v2720_v9 }
 0x2ec   : > { %v2059_v54 = vld [vmem:[#allocation3 + $0x17] sm:$0xff]  ;;  %v2025_v34 = vsel %vm8450_vm1, %v2009_v31, 0.0  ;;  %1976 = vrot.lane.b32.xlu0 %v8746_v24, %s7503_s30  ;;  %6520 = vmatmul.msk.f32.gmra.mxu3 %vm2038_vm5, %v2083_v55 }
 0x2ed   : > { %2043 = vst.msk [vmem:[#allocation3 + $0x20] sm:$0xff] %vm2038_vm5, %v2025_v34  ;;  %6536 = vmatmul.msk.f32.gmra.mxu0 %vm2038_vm5, %v2083_v55  ;;  %6552 = vmatmul.msk.f32.gmra.mxu1 %vm2038_vm5, %v2059_v54  ;;  %v2718_v31 = vld [vmem:[#allocation8 + $0xe0] sm:$0xff]  ;;  %v2716_v55 = vld [vmem:[#allocation8 + $0xd0] sm:$0xff] }
 0x2ee   : > { %6568 = vmatmul.msk.f32.gmra.mxu2 %vm2038_vm5, %v2059_v54  ;;  %v2717_v54 = vld [vmem:[#allocation8 + $0xd8] sm:$0xff]  ;;  %2783 = vmatpush.msra.mxu1 %v2718_v31 }
 0x2f0   : > { %2784 = vmatpush.msra.mxu1 %v2716_v55 }
 0x2f1   : > { %v1969_v40 = vpop.permute.xlu1 %1968  ;;  %v1899_v33 = vpop.permute.xlu0 %1898 }
 0x2f2   : > { %v2011_v45 = vmax.f32 %v8667_v7, %v1969_v40  ;;  %v8765_v56 = vmax.f32 %v1856_v8, %v1899_v33 }
 0x2f4   : > { %2045 = vst.msk [vmem:[#allocation3 + $0x30] sm:$0xff] %vm2038_vm5, %v2011_v45  ;;  %1980 = vrot.lane.b32.xlu0 %v8760_v22, %s7503_s30  ;;  %1978 = vrot.lane.b32.xlu2 %v8765_v56, %s7503_s30  ;;  %v2084_v6 = vld [vmem:[#allocation3 + $0x20] sm:$0xff] }
 0x2f5   : > { %v2060_v30 = vld [vmem:[#allocation3 + $0x1f] sm:$0xff]  ;;  %6521 = vmatmul.msk.f32.gmra.mxu3 %vm2038_vm5, %v2084_v6  ;;  %6537 = vmatmul.msk.f32.gmra.mxu0 %vm2038_vm5, %v2084_v6  ;;  %v2061_v7 = vld [vmem:[#allocation3 + $0x27] sm:$0xff] }
 0x2f6   : > { %6553 = vmatmul.msk.f32.gmra.mxu1 %vm2038_vm5, %v2060_v30  ;;  %6569 = vmatmul.msk.f32.gmra.mxu2 %vm2038_vm5, %v2060_v30  ;;  %v2715_v30 = vld [vmem:[#allocation8 + $0xc8] sm:$0xff] }
 0x2f9   : > { %v1903_v58 = vpop.permute.xlu1 %1902 }
 0x2fa   : > { %v8778_v23 = vmax.f32 %v1858_v14, %v1903_v58 }
 0x2fb   : > { %v2086_v49 = vld [vmem:[#allocation3 + $0x30] sm:$0xff] }
 0x2fc   : > { %1982 = vrot.lane.b32.xlu1 %v8778_v23, %s7503_s30  ;;  %v2062_v14 = vld [vmem:[#allocation3 + $0x2f] sm:$0xff] }
 0x2fd   : > { %6522 = vmatmul.msk.f32.gmra.mxu3 %vm2038_vm5, %v2085_v16  ;;  %6538 = vmatmul.msk.f32.gmra.mxu0 %vm2038_vm5, %v2085_v16 }
 0x2fe   : > { %6554 = vmatmul.msk.f32.gmra.mxu1 %vm2038_vm5, %v2061_v7  ;;  %6570 = vmatmul.msk.f32.gmra.mxu2 %vm2038_vm5, %v2061_v7 }
 0x301   : > { %v1971_v8 = vpop.permute.xlu0 %1970 }
 0x302   : > { %v2012_v59 = vmax.f32 %v8687_v60, %v1971_v8 }
 0x304   : > { %2046 = vst.msk [vmem:[#allocation3 + $0x38] sm:$0xff] %vm2038_vm5, %v2012_v59 }
 0x305   : > { %6523 = vmatmul.msk.f32.gmra.mxu3 %vm2038_vm5, %v2086_v49  ;;  %6539 = vmatmul.msk.f32.gmra.mxu0 %vm2038_vm5, %v2086_v49 }
 0x306   : > { %6555 = vmatmul.msk.f32.gmra.mxu1 %vm2038_vm5, %v2062_v14  ;;  %6571 = vmatmul.msk.f32.gmra.mxu2 %vm2038_vm5, %v2062_v14 }
 0x309   : > { %v1905_v17 = vpop.permute.xlu0 %1904 }
 0x30a   : > { %v1939_v36 = vmax.f32 %v1859_v48, %v1905_v17 }
 0x30b   : > { %v2087_v28 = vld [vmem:[#allocation3 + $0x38] sm:$0xff] }
 0x30c   : > { %v2063_v19 = vld [vmem:[#allocation3 + $0x37] sm:$0xff]  ;;  %1984 = vrot.lane.b32.xlu2 %v1939_v36, %s7503_s30 }
 0x30d   : > { %6524 = vmatmul.msk.f32.gmra.mxu3 %vm2038_vm5, %v2087_v28  ;;  %6540 = vmatmul.msk.f32.gmra.mxu0 %vm2038_vm5, %v2087_v28  ;;  %v2698_v28 = vld [vmem:[#allocation3 + $0x12] sm:$0xff] }
 0x30e   : > { %6556 = vmatmul.msk.f32.gmra.mxu1 %vm2038_vm5, %v2063_v19  ;;  %6572 = vmatmul.msk.f32.gmra.mxu2 %vm2038_vm5, %v2063_v19  ;;  %v2699_v19 = vld [vmem:[#allocation3 + $0x1a] sm:$0xff] }
 0x335   : > { %v1973_v60 = vpop.permute.xlu2 %1972 }
 0x336   : > { %v2013_v3 = vmax.f32 %v8722_v10, %v1973_v60 }
 0x338   : > { %v2029_v35 = vsel %vm8486_vm2, %v2013_v3, 0.0 }
 0x339   : > { %2047 = vst.msk [vmem:[#allocation3 + $0x40] sm:$0xff] %vm2038_vm5, %v2029_v35  ;;  %v2486_v35 = vld [vmem:[#allocation8 + $0xb8] sm:$0xff] }
 0x33a   : > { %2612 = vmatpush.msra.mxu0 %v2486_v35 }
 0x33d   : > { %v1975_v53 = vpop.permute.xlu1 %1974  ;;  %v1907_v48 = vpop.permute.xlu2 %1906 }
 0x33e   : > { %v2014_v50 = vmax.f32 %v8705_v26, %v1975_v53  ;;  %v8806_v44 = vmax.f32 %v1860_v15, %v1907_v48  ;;  %v2484_v48 = vld [vmem:[#allocation8 + $0xa8] sm:$0xff] }
 0x33f   : > { %2613 = vmatpush.msra.mxu0 %v2484_v48 }
 0x340   : > { %2048 = vst.msk [vmem:[#allocation3 + $0x48] sm:$0xff] %vm2038_vm5, %v2014_v50  ;;  %1986 = vrot.lane.b32.xlu0 %v8806_v44, %s7503_s30  ;;  %v2088_v13 = vld [vmem:[#allocation3 + $0x40] sm:$0xff] }
 0x341   : > { %v2064_v12 = vld [vmem:[#allocation3 + $0x3f] sm:$0xff]  ;;  %6525 = vmatmul.msk.f32.gmra.mxu3 %vm2038_vm5, %v2088_v13  ;;  %6541 = vmatmul.msk.f32.gmra.mxu0 %vm2038_vm5, %v2088_v13 }
 0x342   : > { %6557 = vmatmul.msk.f32.gmra.mxu1 %vm2038_vm5, %v2064_v12  ;;  %6573 = vmatmul.msk.f32.gmra.mxu2 %vm2038_vm5, %v2064_v12  ;;  %v2700_v13 = vld [vmem:[#allocation3 + $0x22] sm:$0xff]  ;;  %v2703_v55 = vld [vmem:[#allocation3 + $0x3a] sm:$0xff] }
 0x343   : > { %v2482_v12 = vld [vmem:[#allocation8 + $0x98] sm:$0xff]  ;;  %v3173_v57 = vld [vmem:[#allocation3 + $0x3c] sm:$0xff] }
 0x344   : > { %2614 = vmatpush.msra.mxu0 %v2482_v12  ;;  %v3191_v12 = vld [vmem:[#allocation8 + $0x178] sm:$0xff] }
 0x345   : > { %v1909_v61 = vpop.permute.xlu1 %1908 }
 0x346   : > { %v8817_v27 = vmax.f32 %v1861_v20, %v1909_v61 }
 0x347   : > { %v2089_v51 = vld [vmem:[#allocation3 + $0x48] sm:$0xff] }
 0x348   : > { %v2065_v42 = vld [vmem:[#allocation3 + $0x47] sm:$0xff]  ;;  %1988 = vrot.lane.b32.xlu1 %v8817_v27, %s7503_s30 }
 0x349   : > { %6526 = vmatmul.msk.f32.gmra.mxu3 %vm2038_vm5, %v2089_v51  ;;  %6542 = vmatmul.msk.f32.gmra.mxu0 %vm2038_vm5, %v2089_v51  ;;  %v2704_v41 = vld [vmem:[#allocation3 + $0x42] sm:$0xff] }
 0x34a   : > { %6558 = vmatmul.msk.f32.gmra.mxu1 %vm2038_vm5, %v2065_v42  ;;  %6574 = vmatmul.msk.f32.gmra.mxu2 %vm2038_vm5, %v2065_v42  ;;  %v2480_v42 = vld [vmem:[#allocation8 + $0x88] sm:$0xff] }
 0x34b   : > { %2615 = vmatpush.msra.mxu0 %v2480_v42 }
 0x34e   : > { %v1979_v21 = vpop.permute.xlu2 %1978 }
 0x34f   : > { %v2016_v26 = vmax.f32 %v8765_v56, %v1979_v21  ;;  %v2714_v56 = vld [vmem:[#allocation8 + $0xc0] sm:$0xff] }
 0x350   : > { %2785 = vmatpush.msra.mxu1 %v2714_v56  ;;  %v2701_v21 = vld [vmem:[#allocation3 + $0x2a] sm:$0xff] }
 0x351   : > { %2050 = vst.msk [vmem:[#allocation3 + $0x58] sm:$0xff] %vm2038_vm5, %v2016_v26  ;;  %v2483_v56 = vld [vmem:[#allocation8 + $0xa0] sm:$0xff] }
 0x358   : > { %v2091_v33 = vld [vmem:[#allocation3 + $0x58] sm:$0xff] }
 0x359   : > { %v8827_v47 = vpop.f32.mrf.mxu0 }
 0x35a   : > { %v8829_v63 = vpop.f32.mrf.mxu1 }
 0x35e   : > { %v1977_v39 = vpop.permute.xlu0 %1976 }
 0x35f   : > { %v8831_v52 = vpop.f32.mrf.mxu3  ;;  %v2015_v2 = vmax.f32 %v8746_v24, %v1977_v39  ;;  %v2721_v24 = vld [vmem:[#allocation8 + $0xf8] sm:$0xff] }
 0x360   : > { %v8834_v20 = vpop.f32.mrf.mxu2  ;;  %2847 = vmatpush.msra.mxu2 %v2721_v24 }
 0x361   : > { %2049 = vst.msk [vmem:[#allocation3 + $0x50] sm:$0xff] %vm2038_vm5, %v2015_v2  ;;  %v8837_v43 = vpop.f32.mrf.mxu0 }
 0x362   : > { %v8839_v4 = vpop.f32.mrf.mxu1  ;;  %2848 = vmatpush.msra.mxu2 %v2719_v32 }
 0x364   : > { %2849 = vmatpush.msra.mxu2 %v2717_v54 }
 0x366   : > { %v1985_v38 = vpop.permute.xlu2 %1984  ;;  %v1981_v10 = vpop.permute.xlu0 %1980  ;;  %2850 = vmatpush.msra.mxu2 %v2715_v30 }
 0x367   : > { %v8841_v37 = vpop.f32.mrf.mxu3  ;;  %v2019_v29 = vmax.f32 %v1939_v36, %v1985_v38  ;;  %v2017_v25 = vmax.f32 %v8760_v22, %v1981_v10  ;;  %v2697_v36 = vld [vmem:[#allocation3 + $0xa] sm:$0xff] }
 0x368   : > { %v8844_v18 = vpop.f32.mrf.mxu2  ;;  %v2090_v15 = vld [vmem:[#allocation3 + $0x50] sm:$0xff]  ;;  %3317 = vmatpush.msrb.mxu2 %v3191_v12 }
 0x369   : > { %v2066_v11 = vld [vmem:[#allocation3 + $0x4f] sm:$0xff]  ;;  %2053 = vst.msk [vmem:[#allocation3 + $0x70] sm:$0xff] %vm2038_vm5, %v2019_v29  ;;  %v2033_v0 = vsel %vm8527_vm3, %v2017_v25, 0.0  ;;  %6527 = vmatmul.msk.f32.gmra.mxu3 %vm2038_vm5, %v2090_v15  ;;  %6543 = vmatmul.msk.f32.gmra.mxu0 %vm2038_vm5, %v2090_v15  ;;  %v2067_v45 = vld [vmem:[#allocation3 + $0x57] sm:$0xff] }
 0x36a   : > { %2051 = vst.msk [vmem:[#allocation3 + $0x60] sm:$0xff] %vm2038_vm5, %v2033_v0  ;;  %v8852_v5 = vpop.f32.mrf.mxu0  ;;  %v8854_v1 = vpop.f32.mrf.mxu1  ;;  %6559 = vmatmul.msk.f32.gmra.mxu1 %vm2038_vm5, %v2066_v11  ;;  %6575 = vmatmul.msk.f32.gmra.mxu2 %vm2038_vm5, %v2066_v11  ;;  %v2702_v25 = vld [vmem:[#allocation3 + $0x32] sm:$0xff]  ;;  %v2705_v30 = vld [vmem:[#allocation3 + $0x4a] sm:$0xff] }
 0x36b   : > { %v3167_v12 = vld [vmem:[#allocation3 + $0xc] sm:$0xff] }
 0x36e   : > { %v1983_v34 = vpop.permute.xlu1 %1982 }
 0x36f   : > { %v2018_v46 = vmax.f32 %v8778_v23, %v1983_v34  ;;  %v8859_v40 = vpop.f32.mrf.mxu3 }
 0x370   : > { %v2094_v14 = vld [vmem:[#allocation3 + $0x70] sm:$0xff] }
 0x371   : > { %2052 = vst.msk [vmem:[#allocation3 + $0x68] sm:$0xff] %vm2038_vm5, %v2018_v46  ;;  %v8862_v22 = vpop.f32.mrf.mxu2  ;;  %6528 = vmatmul.msk.f32.gmra.mxu3 %vm2038_vm5, %v2091_v33  ;;  %6544 = vmatmul.msk.f32.gmra.mxu0 %vm2038_vm5, %v2091_v33  ;;  %v2092_v16 = vld [vmem:[#allocation3 + $0x60] sm:$0xff] }
 0x372   : > { %6560 = vmatmul.msk.f32.gmra.mxu1 %vm2038_vm5, %v2067_v45  ;;  %6576 = vmatmul.msk.f32.gmra.mxu2 %vm2038_vm5, %v2067_v45  ;;  %v2245_v6 = vpop.f32.mrf.mxu0  ;;  %v2068_v8 = vld [vmem:[#allocation3 + $0x5f] sm:$0xff]  ;;  %v2462_v45 = vld [vmem:[#allocation3 + $0x9] sm:$0xff] }
 0x373   : > { %v2358_v58 = vpop.f32.mrf.mxu1  ;;  %v2485_v46 = vld [vmem:[#allocation8 + $0xb0] sm:$0xff] }
 0x374   : > { %v2481_v6 = vld [vmem:[#allocation8 + $0x90] sm:$0xff]  ;;  %v2479_v58 = vld [vmem:[#allocation8 + $0x80] sm:$0xff] }
 0x378   : > { %v2180_v23 = vpop.f32.mrf.mxu3  ;;  %v2093_v59 = vld [vmem:[#allocation3 + $0x68] sm:$0xff] }
 0x379   : > { %v2423_v7 = vpop.f32.mrf.mxu2  ;;  %6529 = vmatmul.msk.f32.gmra.mxu3 %vm2038_vm5, %v2092_v16  ;;  %6545 = vmatmul.msk.f32.gmra.mxu0 %vm2038_vm5, %v2092_v16  ;;  %v2069_v49 = vld [vmem:[#allocation3 + $0x67] sm:$0xff]  ;;  %v2070_v17 = vld [vmem:[#allocation3 + $0x6f] sm:$0xff] }
 0x37a   : > { %6561 = vmatmul.msk.f32.gmra.mxu1 %vm2038_vm5, %v2068_v8  ;;  %6577 = vmatmul.msk.f32.gmra.mxu2 %vm2038_vm5, %v2068_v8  ;;  %v8884_v60 = vpop.f32.mrf.mxu0  ;;  %v2463_v16 = vld [vmem:[#allocation3 + $0x11] sm:$0xff]  ;;  %v2464_v8 = vld [vmem:[#allocation3 + $0x19] sm:$0xff]  ;;  %v2708_v48 = vld [vmem:[#allocation3 + $0x62] sm:$0xff] }
 0x37b   : > { %v8888_v3 = vpop.f32.mrf.mxu1  ;;  %v2706_v7 = vld [vmem:[#allocation3 + $0x52] sm:$0xff] }
 0x380   : > { %v8890_v53 = vpop.f32.mrf.mxu3 }
 0x381   : > { %6530 = vmatmul.msk.f32.gmra.mxu3 %vm2038_vm5, %v2093_v59  ;;  %6546 = vmatmul.msk.f32.gmra.mxu0 %vm2038_vm5, %v2093_v59  ;;  %v8892_v50 = vpop.f32.mrf.mxu2 }
 0x382   : > { %6562 = vmatmul.msk.f32.gmra.mxu1 %vm2038_vm5, %v2069_v49  ;;  %6578 = vmatmul.msk.f32.gmra.mxu2 %vm2038_vm5, %v2069_v49  ;;  %v8896_v61 = vpop.f32.mrf.mxu0 }
 0x383   : > { %v8898_v51 = vpop.f32.mrf.mxu1 }
 0x388   : > { %v8900_v26 = vpop.f32.mrf.mxu3 }
 0x389   : > { %6531 = vmatmul.msk.f32.gmra.mxu3 %vm2038_vm5, %v2094_v14  ;;  %6547 = vmatmul.msk.f32.gmra.mxu0 %vm2038_vm5, %v2094_v14  ;;  %v8904_v2 = vpop.f32.mrf.mxu2  ;;  %v2707_v14 = vld [vmem:[#allocation3 + $0x5a] sm:$0xff] }
 0x38a   : > { %6563 = vmatmul.msk.f32.gmra.mxu1 %vm2038_vm5, %v2070_v17  ;;  %6579 = vmatmul.msk.f32.gmra.mxu2 %vm2038_vm5, %v2070_v17  ;;  %v8908_v10 = vpop.f32.mrf.mxu0 }
 0x38b   : > { %v8910_v29 = vpop.f32.mrf.mxu1 }
 0x38c   : > { %11947 = vst [vmem:[#allocation16_spill] sm:$0xff] %v8910_v29 }
 0x390   : > { %v8915_v0 = vpop.f32.mrf.mxu3 }
 0x391   : > { %11948 = vst [vmem:[#allocation17_spill] sm:$0xff] %v8915_v0  ;;  %v8917_v24 = vpop.f32.mrf.mxu2  ;;  %v2415_v0 = vadd.f32 %v8834_v20, %v8827_v47 }
 0x392   : > { %6614 = vmatmul.msk.f32.vlgmr.msra.gmra.mxu1 %vm2038_vm5, %v2697_v36  ;;  %6630 = vmatmul.msk.f32.vlgmr.msra.gmra.mxu2 %vm2038_vm5, %v2697_v36 }
 0x39a   : > { %6615 = vmatmul.msk.f32.gmra.mxu1 %vm2038_vm5, %v2698_v28  ;;  %6631 = vmatmul.msk.f32.gmra.mxu2 %vm2038_vm5, %v2698_v28  ;;  %v2465_v28 = vld [vmem:[#allocation3 + $0x21] sm:$0xff] }
 0x3a2   : > { %6616 = vmatmul.msk.f32.gmra.mxu1 %vm2038_vm5, %v2699_v19  ;;  %6632 = vmatmul.msk.f32.gmra.mxu2 %vm2038_vm5, %v2699_v19 }
 0x3aa   : > { %6617 = vmatmul.msk.f32.gmra.mxu1 %vm2038_vm5, %v2700_v13  ;;  %6633 = vmatmul.msk.f32.gmra.mxu2 %vm2038_vm5, %v2700_v13  ;;  %v3190_v13 = vld [vmem:[#allocation8 + $0x170] sm:$0xff] }
 0x3ab   : > { %3252 = vmatpush.msrb.mxu1 %v3190_v13 }
 0x3b2   : > { %6618 = vmatmul.msk.f32.gmra.mxu1 %vm2038_vm5, %v2701_v21  ;;  %6634 = vmatmul.msk.f32.gmra.mxu2 %vm2038_vm5, %v2701_v21  ;;  %v1987_v39 = vpop.permute.xlu0 %1986 }
 0x3b3   : > { %v2020_v38 = vmax.f32 %v8806_v44, %v1987_v39  ;;  %v2466_v39 = vld [vmem:[#allocation3 + $0x29] sm:$0xff] }
 0x3b5   : > { %2054 = vst.msk [vmem:[#allocation3 + $0x78] sm:$0xff] %vm2038_vm5, %v2020_v38  ;;  %v3188_v38 = vld [vmem:[#allocation8 + $0x160] sm:$0xff] }
 0x3b6   : > { %3253 = vmatpush.msrb.mxu1 %v3188_v38  ;;  %v2471_v38 = vld [vmem:[#allocation3 + $0x51] sm:$0xff] }
 0x3ba   : > { %6619 = vmatmul.msk.f32.gmra.mxu1 %vm2038_vm5, %v2702_v25  ;;  %6635 = vmatmul.msk.f32.gmra.mxu2 %vm2038_vm5, %v2702_v25  ;;  %v1989_v15 = vpop.permute.xlu1 %1988  ;;  %v3189_v25 = vld [vmem:[#allocation8 + $0x168] sm:$0xff] }
 0x3bb   : > { %v2021_v11 = vmax.f32 %v8817_v27, %v1989_v15  ;;  %3318 = vmatpush.msrb.mxu2 %v3189_v25 }
 0x3bc   : > { %v2095_v9 = vld [vmem:[#allocation3 + $0x78] sm:$0xff] }
 0x3bd   : > { %v2037_v44 = vsel %vm8561_vm4, %v2021_v11, 0.0  ;;  %6532 = vmatmul.msk.f32.gmra.mxu3 %vm2038_vm5, %v2095_v9  ;;  %6548 = vmatmul.msk.f32.gmra.mxu0 %vm2038_vm5, %v2095_v9  ;;  %v2071_v33 = vld [vmem:[#allocation3 + $0x77] sm:$0xff]  ;;  %v3186_v9 = vld [vmem:[#allocation8 + $0x150] sm:$0xff] }
 0x3be   : > { %2055 = vst.msk [vmem:[#allocation3 + $0x80] sm:$0xff] %vm2038_vm5, %v2037_v44  ;;  %v2257_v31 = vpop.f32.mrf.mxu0  ;;  %v3187_v44 = vld [vmem:[#allocation8 + $0x158] sm:$0xff]  ;;  %3254 = vmatpush.msrb.mxu1 %v3186_v9  ;;  %v3168_v9 = vld [vmem:[#allocation3 + $0x14] sm:$0xff] }
 0x3bf   : > { %v2370_v32 = vpop.f32.mrf.mxu1  ;;  %v3184_v31 = vld [vmem:[#allocation8 + $0x140] sm:$0xff]  ;;  %3319 = vmatpush.msrb.mxu2 %v3187_v44  ;;  %v2472_v44 = vld [vmem:[#allocation3 + $0x59] sm:$0xff] }
 0x3c0   : > { %v3185_v32 = vld [vmem:[#allocation8 + $0x148] sm:$0xff]  ;;  %3255 = vmatpush.msrb.mxu1 %v3184_v31 }
 0x3c1   : > { %3320 = vmatpush.msrb.mxu2 %v3185_v32  ;;  %v3169_v32 = vld [vmem:[#allocation3 + $0x1c] sm:$0xff] }
 0x3c2   : > { %6620 = vmatmul.msk.f32.gmra.mxu1 %vm2038_vm5, %v2703_v55  ;;  %6636 = vmatmul.msk.f32.gmra.mxu2 %vm2038_vm5, %v2703_v55  ;;  %v2709_v55 = vld [vmem:[#allocation3 + $0x6a] sm:$0xff] }
 0x3c4   : > { %v2192_v27 = vpop.f32.mrf.mxu3 }
 0x3c5   : > { %v2435_v54 = vpop.f32.mrf.mxu2  ;;  %v2096_v34 = vld [vmem:[#allocation3 + $0x80] sm:$0xff] }
 0x3c6   : > { %6533 = vmatmul.msk.f32.gmra.mxu3 %vm2038_vm5, %v2096_v34  ;;  %6549 = vmatmul.msk.f32.gmra.mxu0 %vm2038_vm5, %v2096_v34  ;;  %v2072_v23 = vld [vmem:[#allocation3 + $0x7f] sm:$0xff]  ;;  %v8938_v59 = vpop.f32.mrf.mxu0  ;;  %v2467_v34 = vld [vmem:[#allocation3 + $0x31] sm:$0xff] }
 0x3c7   : > { %11949 = vst [vmem:[#allocation19_spill] sm:$0xff] %v8938_v59  ;;  %v8942_v49 = vpop.f32.mrf.mxu1 }
 0x3c8   : > { %11950 = vst [vmem:[#allocation18_spill] sm:$0xff] %v8942_v49  ;;  %v2942_v49 = vld [vmem:[#allocation3 + $0x5b] sm:$0xff] }
 0x3ca   : > { %6621 = vmatmul.msk.f32.gmra.mxu1 %vm2038_vm5, %v2704_v41  ;;  %6637 = vmatmul.msk.f32.gmra.mxu2 %vm2038_vm5, %v2704_v41 }
 0x3cc   : > { %v8946_v17 = vpop.f32.mrf.mxu3 }
 0x3cd   : > { %11951 = vst [vmem:[#allocation20_spill] sm:$0xff] %v8946_v17  ;;  %v8948_v36 = vpop.f32.mrf.mxu2 }
 0x3ce   : > { %6564 = vmatmul.msk.f32.vlgmr.msra.gmra.mxu3 %vm2038_vm5, %v2071_v33  ;;  %6598 = vmatmul.msk.f32.vlgmr.msra.gmra.mxu0 %vm2038_vm5, %v2462_v45  ;;  %11952 = vst [vmem:[#allocation21_spill] sm:$0xff] %v8948_v36 }
 0x3cf   : > { %2547 = vmatpush.msra.mxu3 %v2485_v46 }
 0x3d1   : > { %2548 = vmatpush.msra.mxu3 %v2483_v56 }
 0x3d2   : > { %6622 = vmatmul.msk.f32.gmra.mxu1 %vm2038_vm5, %v2705_v30  ;;  %6638 = vmatmul.msk.f32.gmra.mxu2 %vm2038_vm5, %v2705_v30 }
 0x3d3   : > { %2549 = vmatpush.msra.mxu3 %v2481_v6  ;;  %v2468_v6 = vld [vmem:[#allocation3 + $0x39] sm:$0xff] }
 0x3d5   : > { %2550 = vmatpush.msra.mxu3 %v2479_v58  ;;  %v2711_v58 = vld [vmem:[#allocation3 + $0x7a] sm:$0xff] }
 0x3d6   : > { %6565 = vmatmul.msk.f32.gmra.mxu3 %vm2038_vm5, %v2072_v23  ;;  %6599 = vmatmul.msk.f32.gmra.mxu0 %vm2038_vm5, %v2463_v16 }
 0x3da   : > { %6623 = vmatmul.msk.f32.gmra.mxu1 %vm2038_vm5, %v2706_v7  ;;  %6639 = vmatmul.msk.f32.gmra.mxu2 %vm2038_vm5, %v2706_v7 }
 0x3de   : > { %6580 = vmatmul.msk.f32.vlgmr.msrb.gmra.mxu3 %vm2038_vm5, %v2071_v33  ;;  %6600 = vmatmul.msk.f32.gmra.mxu0 %vm2038_vm5, %v2464_v8  ;;  %v2710_v33 = vld [vmem:[#allocation3 + $0x72] sm:$0xff] }
 0x3e2   : > { %6624 = vmatmul.msk.f32.gmra.mxu1 %vm2038_vm5, %v2707_v14  ;;  %6640 = vmatmul.msk.f32.gmra.mxu2 %vm2038_vm5, %v2707_v14  ;;  %v2712_v14 = vld [vmem:[#allocation3 + $0x82] sm:$0xff] }
 0x3e6   : > { %v8950_v19 = vpop.f32.mrf.mxu0  ;;  %6581 = vmatmul.msk.f32.gmra.mxu3 %vm2038_vm5, %v2072_v23  ;;  %6601 = vmatmul.msk.f32.gmra.mxu0 %vm2038_vm5, %v2465_v28 }
 0x3e7   : > { %11953 = vst [vmem:[#allocation23_spill] sm:$0xff] %v8950_v19  ;;  %v8954_v35 = vpop.f32.mrf.mxu1  ;;  %v2940_v19 = vld [vmem:[#allocation3 + $0x4b] sm:$0xff] }
 0x3e8   : > { %11954 = vst [vmem:[#allocation22_spill] sm:$0xff] %v8954_v35 }
 0x3ea   : > { %6625 = vmatmul.msk.f32.gmra.mxu1 %vm2038_vm5, %v2708_v48  ;;  %6641 = vmatmul.msk.f32.gmra.mxu2 %vm2038_vm5, %v2708_v48  ;;  %v2470_v48 = vld [vmem:[#allocation3 + $0x49] sm:$0xff] }
 0x3ec   : > { %v8958_v42 = vpop.f32.mrf.mxu3 }
 0x3ed   : > { %11955 = vst [vmem:[#allocation24_spill] sm:$0xff] %v8958_v42  ;;  %v8960_v21 = vpop.f32.mrf.mxu2  ;;  %v2939_v42 = vld [vmem:[#allocation3 + $0x43] sm:$0xff] }
 0x3ee   : > { %11956 = vst [vmem:[#allocation25_spill] sm:$0xff] %v8960_v21  ;;  %v8962_v15 = vpop.f32.mrf.mxu0  ;;  %6582 = vmatmul.msk.f32.vlgmr.msra.gmra.mxu3 %vm2038_vm5, %v2462_v45  ;;  %6602 = vmatmul.msk.f32.gmra.mxu0 %vm2038_vm5, %v2466_v39 }
 0x3ef   : > { %11957 = vst [vmem:[#allocation27_spill] sm:$0xff] %v8962_v15  ;;  %v8966_v11 = vpop.f32.mrf.mxu1 }
 0x3f0   : > { %11958 = vst [vmem:[#allocation26_spill] sm:$0xff] %v8966_v11 }
 0x3f2   : > { %6626 = vmatmul.msk.f32.gmra.mxu1 %vm2038_vm5, %v2709_v55  ;;  %6642 = vmatmul.msk.f32.gmra.mxu2 %vm2038_vm5, %v2709_v55 }
 0x3f4   : > { %v8970_v27 = vpop.f32.mrf.mxu3 }
 0x3f5   : > { %11959 = vst [vmem:[#allocation28_spill] sm:$0xff] %v8970_v27  ;;  %v8972_v54 = vpop.f32.mrf.mxu2  ;;  %v3177_v27 = vld [vmem:[#allocation3 + $0x5c] sm:$0xff] }
 0x3f6   : > { %11960 = vst [vmem:[#allocation30_spill] sm:$0xff] %v8972_v54  ;;  %v2269_v41 = vpop.f32.mrf.mxu0  ;;  %6583 = vmatmul.msk.f32.gmra.mxu3 %vm2038_vm5, %v2463_v16  ;;  %6603 = vmatmul.msk.f32.gmra.mxu0 %vm2038_vm5, %v2467_v34  ;;  %v2469_v16 = vld [vmem:[#allocation3 + $0x41] sm:$0xff] }
 0x3f7   : > { %v2382_v46 = vpop.f32.mrf.mxu1  ;;  %v2935_v54 = vld [vmem:[#allocation3 + $0x23] sm:$0xff] }
 0x3f8   : > { %v2956_v46 = vld [vmem:[#allocation8 + $0x138] sm:$0xff] }
 0x3f9   : > { %3082 = vmatpush.msrb.mxu0 %v2956_v46 }
 0x3fa   : > { %6627 = vmatmul.msk.f32.gmra.mxu1 %vm2038_vm5, %v2710_v33  ;;  %6643 = vmatmul.msk.f32.gmra.mxu2 %vm2038_vm5, %v2710_v33 }
 0x3fc   : > { %v2204_v45 = vpop.f32.mrf.mxu3 }
 0x3fd   : > { %v2447_v56 = vpop.f32.mrf.mxu2  ;;  %v3170_v45 = vld [vmem:[#allocation3 + $0x24] sm:$0xff] }
 0x3fe   : > { %6584 = vmatmul.msk.f32.gmra.mxu3 %vm2038_vm5, %v2464_v8  ;;  %6604 = vmatmul.msk.f32.gmra.mxu0 %vm2038_vm5, %v2468_v6  ;;  %v9020_v33 = vpop.f32.mrf.mxu0  ;;  %v2954_v56 = vld [vmem:[#allocation8 + $0x128] sm:$0xff] }
 0x3ff   : > { %v8980_v30 = vpop.f32.mrf.mxu1  ;;  %11965 = vst [vmem:[#allocation35_spill] sm:$0xff] %v9020_v33  ;;  %3083 = vmatpush.msrb.mxu0 %v2954_v56  ;;  %v2475_v56 = vld [vmem:[#allocation3 + $0x71] sm:$0xff] }
 0x400   : > { %11961 = vst [vmem:[#allocation31_spill] sm:$0xff] %v8980_v30  ;;  %v2953_v30 = vld [vmem:[#allocation8 + $0x120] sm:$0xff] }
 0x401   : > { %v2949_v33 = vld [vmem:[#allocation8 + $0x100] sm:$0xff] }
 0x402   : > { %6628 = vmatmul.msk.f32.gmra.mxu1 %vm2038_vm5, %v2711_v58  ;;  %6644 = vmatmul.msk.f32.gmra.mxu2 %vm2038_vm5, %v2711_v58 }
 0x405   : > { %v8984_v23 = vpop.f32.mrf.mxu2 }
 0x406   : > { %11962 = vst [vmem:[#allocation32_spill] sm:$0xff] %v8984_v23  ;;  %6585 = vmatmul.msk.f32.gmra.mxu3 %vm2038_vm5, %v2465_v28  ;;  %6605 = vmatmul.msk.f32.gmra.mxu0 %vm2038_vm5, %v2469_v16  ;;  %v9030_v46 = vpop.f32.mrf.mxu0  ;;  %v2932_v23 = vld [vmem:[#allocation3 + $0xb] sm:$0xff] }
 0x407   : > { %v8988_v7 = vpop.f32.mrf.mxu1  ;;  %11967 = vst [vmem:[#allocation37_spill] sm:$0xff] %v9030_v46  ;;  %v3174_v46 = vld [vmem:[#allocation3 + $0x44] sm:$0xff] }
 0x408   : > { %11963 = vst [vmem:[#allocation33_spill] sm:$0xff] %v8988_v7 }
 0x40a   : > { %6629 = vmatmul.msk.f32.gmra.mxu1 %vm2038_vm5, %v2712_v14  ;;  %6645 = vmatmul.msk.f32.gmra.mxu2 %vm2038_vm5, %v2712_v14  ;;  %v2474_v14 = vld [vmem:[#allocation3 + $0x69] sm:$0xff] }
 0x40d   : > { %v8992_v8 = vpop.f32.mrf.mxu2 }
 0x40e   : > { %11964 = vst [vmem:[#allocation34_spill] sm:$0xff] %v8992_v8  ;;  %6586 = vmatmul.msk.f32.gmra.mxu3 %vm2038_vm5, %v2466_v39  ;;  %6606 = vmatmul.msk.f32.gmra.mxu0 %vm2038_vm5, %v2470_v48 }
 0x40f   : > { %v8996_v13 = vpop.f32.mrf.mxu1 }
 0x412   : > { %6678 = vmatmul.msk.f32.vlgmr.msrb.gmra.mxu1 %vm2038_vm5, %v3167_v12  ;;  %6694 = vmatmul.msk.f32.vlgmr.msrb.gmra.mxu2 %vm2038_vm5, %v3167_v12  ;;  %v2950_v12 = vld [vmem:[#allocation8 + $0x108] sm:$0xff] }
 0x415   : > { %v9000_v28 = vpop.f32.mrf.mxu2 }
 0x416   : > { %6587 = vmatmul.msk.f32.gmra.mxu3 %vm2038_vm5, %v2467_v34  ;;  %6607 = vmatmul.msk.f32.gmra.mxu0 %vm2038_vm5, %v2471_v38  ;;  %v2473_v34 = vld [vmem:[#allocation3 + $0x61] sm:$0xff] }
 0x417   : > { %v9004_v25 = vpop.f32.mrf.mxu1 }
 0x41a   : > { %6679 = vmatmul.msk.f32.gmra.mxu1 %vm2038_vm5, %v3168_v9  ;;  %6695 = vmatmul.msk.f32.gmra.mxu2 %vm2038_vm5, %v3168_v9 }
 0x41d   : > { %v9008_v39 = vpop.f32.mrf.mxu2 }
 0x41e   : > { %6588 = vmatmul.msk.f32.gmra.mxu3 %vm2038_vm5, %v2468_v6  ;;  %6608 = vmatmul.msk.f32.gmra.mxu0 %vm2038_vm5, %v2472_v44  ;;  %v2952_v6 = vld [vmem:[#allocation8 + $0x118] sm:$0xff] }
 0x41f   : > { %v9012_v31 = vpop.f32.mrf.mxu1  ;;  %3084 = vmatpush.msrb.mxu0 %v2952_v6 }
 0x421   : > { %3085 = vmatpush.msrb.mxu0 %v2950_v12 }
 0x422   : > { %6680 = vmatmul.msk.f32.gmra.mxu1 %vm2038_vm5, %v3169_v32  ;;  %6696 = vmatmul.msk.f32.gmra.mxu2 %vm2038_vm5, %v3169_v32  ;;  %v2955_v32 = vld [vmem:[#allocation8 + $0x130] sm:$0xff] }
 0x423   : > { %3017 = vmatpush.msrb.mxu3 %v2955_v32 }
 0x425   : > { %v9016_v55 = vpop.f32.mrf.mxu2  ;;  %3018 = vmatpush.msrb.mxu3 %v2953_v30 }
 0x426   : > { %6589 = vmatmul.msk.f32.gmra.mxu3 %vm2038_vm5, %v2469_v16  ;;  %6609 = vmatmul.msk.f32.gmra.mxu0 %vm2038_vm5, %v2473_v34  ;;  %v9024_v16 = vpop.f32.mrf.mxu3 }
 0x427   : > { %v2796_v41 = vpop.f32.mrf.mxu1  ;;  %11966 = vst [vmem:[#allocation36_spill] sm:$0xff] %v9024_v16 }
 0x428   : > { %v3171_v41 = vld [vmem:[#allocation3 + $0x2c] sm:$0xff] }
 0x42a   : > { %6681 = vmatmul.msk.f32.gmra.mxu1 %vm2038_vm5, %v3170_v45  ;;  %6697 = vmatmul.msk.f32.gmra.mxu2 %vm2038_vm5, %v3170_v45 }
 0x42d   : > { %v2861_v58 = vpop.f32.mrf.mxu2 }
 0x42e   : > { %6590 = vmatmul.msk.f32.gmra.mxu3 %vm2038_vm5, %v2470_v48  ;;  %6610 = vmatmul.msk.f32.gmra.mxu0 %vm2038_vm5, %v2474_v14  ;;  %v9040_v6 = vpop.f32.mrf.mxu3  ;;  %v3172_v58 = vld [vmem:[#allocation3 + $0x34] sm:$0xff] }
 0x42f   : > { %v9028_v9 = vpop.f32.mrf.mxu1  ;;  %11969 = vst [vmem:[#allocation39_spill] sm:$0xff] %v9040_v6 }
 0x432   : > { %6682 = vmatmul.msk.f32.gmra.mxu1 %vm2038_vm5, %v3171_v41  ;;  %6698 = vmatmul.msk.f32.gmra.mxu2 %vm2038_vm5, %v3171_v41  ;;  %v2476_v41 = vld [vmem:[#allocation3 + $0x79] sm:$0xff] }
 0x435   : > { %v9034_v45 = vpop.f32.mrf.mxu2 }
 0x436   : > { %6591 = vmatmul.msk.f32.gmra.mxu3 %vm2038_vm5, %v2471_v38  ;;  %6611 = vmatmul.msk.f32.gmra.mxu0 %vm2038_vm5, %v2475_v56 }
 0x437   : > { %v9038_v48 = vpop.f32.mrf.mxu1 }
 0x438   : > { %11968 = vst [vmem:[#allocation38_spill] sm:$0xff] %v9038_v48 }
 0x43a   : > { %6683 = vmatmul.msk.f32.gmra.mxu1 %vm2038_vm5, %v3172_v58  ;;  %6699 = vmatmul.msk.f32.gmra.mxu2 %vm2038_vm5, %v3172_v58  ;;  %v2278_v12 = vpop.f32.mrf.mxu0  ;;  %v2477_v58 = vld [vmem:[#allocation3 + $0x81] sm:$0xff] }
 0x43d   : > { %v9044_v32 = vpop.f32.mrf.mxu2 }
 0x43e   : > { %6592 = vmatmul.msk.f32.gmra.mxu3 %vm2038_vm5, %v2472_v44  ;;  %6612 = vmatmul.msk.f32.gmra.mxu0 %vm2038_vm5, %v2476_v41 }
 0x43f   : > { %v9048_v38 = vpop.f32.mrf.mxu1 }
 0x440   : > { %11970 = vst [vmem:[#allocation40_spill] sm:$0xff] %v9048_v38  ;;  %v2213_v62 = vpop.f32.mrf.mxu3  ;;  %v2943_v38 = vld [vmem:[#allocation3 + $0x63] sm:$0xff] }
 0x442   : > { %6684 = vmatmul.msk.f32.gmra.mxu1 %vm2038_vm5, %v3173_v57  ;;  %6700 = vmatmul.msk.f32.gmra.mxu2 %vm2038_vm5, %v3173_v57  ;;  %v2951_v57 = vld [vmem:[#allocation8 + $0x110] sm:$0xff] }
 0x443   : > { %v2281_v7 = vpop.f32.mrf.mxu0  ;;  %3019 = vmatpush.msrb.mxu3 %v2951_v57  ;;  %v2933_v57 = vld [vmem:[#allocation3 + $0x13] sm:$0xff] }
 0x445   : > { %v9052_v6 = vpop.f32.mrf.mxu2  ;;  %3020 = vmatpush.msrb.mxu3 %v2949_v33 }
 0x446   : > { %11971 = vst [vmem:[#allocation41_spill] sm:$0xff] %v9052_v6  ;;  %6593 = vmatmul.msk.f32.gmra.mxu3 %vm2038_vm5, %v2473_v34  ;;  %6613 = vmatmul.msk.f32.gmra.mxu0 %vm2038_vm5, %v2477_v58 }
 0x447   : > { %v2808_v8 = vpop.f32.mrf.mxu1 }
 0x449   : > { %v2216_v44 = vpop.f32.mrf.mxu3 }
 0x44a   : > { %6685 = vmatmul.msk.f32.gmra.mxu1 %vm2038_vm5, %v3174_v46  ;;  %6701 = vmatmul.msk.f32.gmra.mxu2 %vm2038_vm5, %v3174_v46  ;;  %v3175_v44 = vld [vmem:[#allocation3 + $0x4c] sm:$0xff] }
 0x44b   : > { %v9058_v16 = vpop.f32.mrf.mxu0 }
 0x44d   : > { %v2873_v7 = vpop.f32.mrf.mxu2 }
 0x44e   : > { %6594 = vmatmul.msk.f32.gmra.mxu3 %vm2038_vm5, %v2474_v14  ;;  %6662 = vmatmul.msk.f32.vlgmr.msrb.gmra.mxu0 %vm2038_vm5, %v2932_v23  ;;  %v3176_v7 = vld [vmem:[#allocation3 + $0x54] sm:$0xff] }
 0x44f   : > { %v9062_v8 = vpop.f32.mrf.mxu1 }
 0x450   : > { %11972 = vst [vmem:[#allocation42_spill] sm:$0xff] %v9062_v8  ;;  %v3182_v8 = vld [vmem:[#allocation3 + $0x84] sm:$0xff] }
 0x451   : > { %v2391_v34 = vpop.f32.mrf.mxu3 }
 0x452   : > { %v9064_v11 = vadd.f32 %v2391_v34, %v2213_v62  ;;  %6686 = vmatmul.msk.f32.gmra.mxu1 %vm2038_vm5, %v3175_v44  ;;  %6702 = vmatmul.msk.f32.gmra.mxu2 %vm2038_vm5, %v3175_v44  ;;  %v2934_v44 = vld [vmem:[#allocation3 + $0x1b] sm:$0xff] }
 0x453   : > { %v9068_v30 = vpop.f32.mrf.mxu0 }
 0x454   : > { %11973 = vst [vmem:[#allocation43_spill] sm:$0xff] %v9064_v11 }
 0x455   : > { %v9070_v46 = vpop.f32.mrf.mxu2 }
 0x456   : > { %11974 = vst [vmem:[#allocation44_spill] sm:$0xff] %v9070_v46  ;;  %6595 = vmatmul.msk.f32.gmra.mxu3 %vm2038_vm5, %v2475_v56  ;;  %6663 = vmatmul.msk.f32.gmra.mxu0 %vm2038_vm5, %v2933_v57 }
 0x457   : > { %v9074_v14 = vpop.f32.mrf.mxu1 }
 0x458   : > { %11975 = vst [vmem:[#allocation45_spill] sm:$0xff] %v9074_v14 }
 0x459   : > { %v2394_v33 = vpop.f32.mrf.mxu3 }
 0x45a   : > { %6687 = vmatmul.msk.f32.gmra.mxu1 %vm2038_vm5, %v3176_v7  ;;  %6703 = vmatmul.msk.f32.gmra.mxu2 %vm2038_vm5, %v3176_v7 }
 0x45b   : > { %v9078_v62 = vpop.f32.mrf.mxu0 }
 0x45d   : > { %v9080_v34 = vpop.f32.mrf.mxu2 }
 0x45e   : > { %11976 = vst [vmem:[#allocation46_spill] sm:$0xff] %v9080_v34  ;;  %6596 = vmatmul.msk.f32.gmra.mxu3 %vm2038_vm5, %v2476_v41  ;;  %6664 = vmatmul.msk.f32.gmra.mxu0 %vm2038_vm5, %v2934_v44  ;;  %v3178_v34 = vld [vmem:[#allocation3 + $0x64] sm:$0xff] }
 0x45f   : > { %v9084_v56 = vpop.f32.mrf.mxu1 }
 0x460   : > { %11977 = vst [vmem:[#allocation47_spill] sm:$0xff] %v9084_v56 }
 0x461   : > { %v2456_v11 = vpop.f32.mrf.mxu3 }
 0x462   : > { %v9086_v14 = vadd.f32 %v2456_v11, %v2278_v12  ;;  %6688 = vmatmul.msk.f32.gmra.mxu1 %vm2038_vm5, %v3177_v27  ;;  %6704 = vmatmul.msk.f32.gmra.mxu2 %vm2038_vm5, %v3177_v27 }
 0x463   : > { %v2626_v33 = vpop.f32.mrf.mxu0 }
 0x464   : > { %11978 = vst [vmem:[#allocation48_spill] sm:$0xff] %v9086_v14  ;;  %v2936_v14 = vld [vmem:[#allocation3 + $0x2b] sm:$0xff] }
 0x465   : > { %v9090_v7 = vpop.f32.mrf.mxu2  ;;  %v3179_v33 = vld [vmem:[#allocation3 + $0x6c] sm:$0xff] }
 0x466   : > { %11979 = vst [vmem:[#allocation49_spill] sm:$0xff] %v9090_v7  ;;  %6597 = vmatmul.msk.f32.gmra.mxu3 %vm2038_vm5, %v2477_v58  ;;  %6665 = vmatmul.msk.f32.gmra.mxu0 %vm2038_vm5, %v2935_v54  ;;  %v2938_v7 = vld [vmem:[#allocation3 + $0x3b] sm:$0xff] }
 0x467   : > { %v2820_v41 = vpop.f32.mrf.mxu1 }
 0x468   : > { %v2937_v41 = vld [vmem:[#allocation3 + $0x33] sm:$0xff] }
 0x469   : > { %v2459_v15 = vpop.f32.mrf.mxu3 }
 0x46a   : > { %6689 = vmatmul.msk.f32.gmra.mxu1 %vm2038_vm5, %v3178_v34  ;;  %6705 = vmatmul.msk.f32.gmra.mxu2 %vm2038_vm5, %v3178_v34 }
 0x46b   : > { %v9096_v11 = vpop.f32.mrf.mxu0 }
 0x46d   : > { %v2885_v12 = vpop.f32.mrf.mxu2 }
 0x46e   : > { %6646 = vmatmul.msk.f32.vlgmr.msrb.gmra.mxu3 %vm2038_vm5, %v2932_v23  ;;  %6666 = vmatmul.msk.f32.gmra.mxu0 %vm2038_vm5, %v2936_v14 }
 0x46f   : > { %v9100_v27 = vpop.f32.mrf.mxu1 }
 0x470   : > { %11980 = vst [vmem:[#allocation50_spill] sm:$0xff] %v9100_v27  ;;  %v3180_v27 = vld [vmem:[#allocation3 + $0x74] sm:$0xff] }
 0x471   : > { %v9102_v58 = vpop.f32.mrf.mxu3 }
 0x472   : > { %6690 = vmatmul.msk.f32.gmra.mxu1 %vm2038_vm5, %v3179_v33  ;;  %6706 = vmatmul.msk.f32.gmra.mxu2 %vm2038_vm5, %v3179_v33 }
 0x473   : > { %v9106_v15 = vpop.f32.mrf.mxu0 }
 0x475   : > { %v9108_v34 = vpop.f32.mrf.mxu2 }
 0x476   : > { %11981 = vst [vmem:[#allocation51_spill] sm:$0xff] %v9108_v34  ;;  %6647 = vmatmul.msk.f32.gmra.mxu3 %vm2038_vm5, %v2933_v57  ;;  %6667 = vmatmul.msk.f32.gmra.mxu0 %vm2038_vm5, %v2937_v41 }
 0x477   : > { %v9112_v23 = vpop.f32.mrf.mxu1 }
 0x478   : > { %11982 = vst [vmem:[#allocation52_spill] sm:$0xff] %v9112_v23  ;;  %v3181_v23 = vld [vmem:[#allocation3 + $0x7c] sm:$0xff] }
 0x479   : > { %v9114_v12 = vpop.f32.mrf.mxu3 }
 0x47a   : > { %6691 = vmatmul.msk.f32.gmra.mxu1 %vm2038_vm5, %v3180_v27  ;;  %6707 = vmatmul.msk.f32.gmra.mxu2 %vm2038_vm5, %v3180_v27 }
 0x47b   : > { %v9118_v56 = vpop.f32.mrf.mxu0 }
 0x47d   : > { %v9120_v33 = vpop.f32.mrf.mxu2 }
 0x47e   : > { %11983 = vst [vmem:[#allocation53_spill] sm:$0xff] %v9120_v33  ;;  %6648 = vmatmul.msk.f32.gmra.mxu3 %vm2038_vm5, %v2934_v44  ;;  %6668 = vmatmul.msk.f32.gmra.mxu0 %vm2038_vm5, %v2938_v7 }
 0x47f   : > { %v9124_v57 = vpop.f32.mrf.mxu1 }
 0x480   : > { %11984 = vst [vmem:[#allocation54_spill] sm:$0xff] %v9124_v57 }
 0x481   : > { %v9126_v34 = vpop.f32.mrf.mxu3 }
 0x482   : > { %6692 = vmatmul.msk.f32.gmra.mxu1 %vm2038_vm5, %v3181_v23  ;;  %6708 = vmatmul.msk.f32.gmra.mxu2 %vm2038_vm5, %v3181_v23 }
 0x483   : > { %v2638_v35 = vpop.f32.mrf.mxu0 }
 0x485   : > { %v9130_v27 = vpop.f32.mrf.mxu2 }
 0x486   : > { %11985 = vst [vmem:[#allocation55_spill] sm:$0xff] %v9130_v27  ;;  %6649 = vmatmul.msk.f32.gmra.mxu3 %vm2038_vm5, %v2935_v54  ;;  %6669 = vmatmul.msk.f32.gmra.mxu0 %vm2038_vm5, %v2939_v42 }
 0x487   : > { %v2832_v44 = vpop.f32.mrf.mxu1 }
 0x488   : > { %v2941_v44 = vld [vmem:[#allocation3 + $0x53] sm:$0xff] }
 0x489   : > { %v2561_v33 = vpop.f32.mrf.mxu3 }
 0x48a   : > { %6693 = vmatmul.msk.f32.gmra.mxu1 %vm2038_vm5, %v3182_v8  ;;  %6709 = vmatmul.msk.f32.gmra.mxu2 %vm2038_vm5, %v3182_v8 }
 0x48b   : > { %v9136_v57 = vpop.f32.mrf.mxu0 }
 0x48c   : > { %11986 = vst [vmem:[#allocation56_spill] sm:$0xff] %v9136_v57 }
 0x48d   : > { %v2897_v21 = vpop.f32.mrf.mxu2 }
 0x48e   : > { %6650 = vmatmul.msk.f32.gmra.mxu3 %vm2038_vm5, %v2936_v14  ;;  %6670 = vmatmul.msk.f32.gmra.mxu0 %vm2038_vm5, %v2940_v19 }
 0x48f   : > { %v9140_v35 = vpop.f32.mrf.mxu1 }
 0x491   : > { %v9142_v54 = vpop.f32.mrf.mxu3 }
 0x493   : > { %v9144_v23 = vpop.f32.mrf.mxu0 }
 0x494   : > { %11987 = vst [vmem:[#allocation57_spill] sm:$0xff] %v9144_v23 }
 0x495   : > { %v3322_v33 = vpop.f32.mrf.mxu2 }
 0x496   : > { %6651 = vmatmul.msk.f32.gmra.mxu3 %vm2038_vm5, %v2937_v41  ;;  %6671 = vmatmul.msk.f32.gmra.mxu0 %vm2038_vm5, %v2941_v44 }
 0x497   : > { %v9148_v8 = vpop.f32.mrf.mxu1 }
 0x499   : > { %v9150_v21 = vpop.f32.mrf.mxu3 }
 0x49b   : > { %v9152_v27 = vpop.f32.mrf.mxu0 }
 0x49c   : > { %11988 = vst [vmem:[#allocation58_spill] sm:$0xff] %v9152_v27 }
 0x49d   : > { %v9154_v14 = vpop.f32.mrf.mxu2 }
 0x49e   : > { %6652 = vmatmul.msk.f32.gmra.mxu3 %vm2038_vm5, %v2938_v7  ;;  %6672 = vmatmul.msk.f32.gmra.mxu0 %vm2038_vm5, %v2942_v49  ;;  %v2944_v7 = vld [vmem:[#allocation3 + $0x6b] sm:$0xff] }
 0x49f   : > { %v9158_v23 = vpop.f32.mrf.mxu1 }
 0x4a1   : > { %v9160_v17 = vpop.f32.mrf.mxu3 }
 0x4a2   : > { %11989 = vst [vmem:[#allocation59_spill] sm:$0xff] %v9160_v17 }
 0x4a3   : > { %v2650_v41 = vpop.f32.mrf.mxu0 }
 0x4a5   : > { %v9162_v46 = vpop.f32.mrf.mxu2 }
 0x4a6   : > { %6653 = vmatmul.msk.f32.gmra.mxu3 %vm2038_vm5, %v2939_v42  ;;  %6673 = vmatmul.msk.f32.gmra.mxu0 %vm2038_vm5, %v2943_v38  ;;  %v2945_v42 = vld [vmem:[#allocation3 + $0x73] sm:$0xff] }
 0x4a7   : > { %v3266_v27 = vpop.f32.mrf.mxu1 }
 0x4a9   : > { %v2573_v57 = vpop.f32.mrf.mxu3 }
 0x4ab   : > { %v9166_v36 = vpop.f32.mrf.mxu0 }
 0x4ac   : > { %11990 = vst [vmem:[#allocation60_spill] sm:$0xff] %v9166_v36  ;;  %v2946_v36 = vld [vmem:[#allocation3 + $0x7b] sm:$0xff] }
 0x4ad   : > { %v3331_v59 = vpop.f32.mrf.mxu2 }
 0x4ae   : > { %6654 = vmatmul.msk.f32.gmra.mxu3 %vm2038_vm5, %v2940_v19  ;;  %6674 = vmatmul.msk.f32.gmra.mxu0 %vm2038_vm5, %v2944_v7 }
 0x4af   : > { %v9170_v6 = vpop.f32.mrf.mxu1 }
 0x4b1   : > { %v9172_v41 = vpop.f32.mrf.mxu3 }
 0x4b2   : > { %11991 = vst [vmem:[#allocation61_spill] sm:$0xff] %v9172_v41 }
 0x4b3   : > { %v9174_v17 = vpop.f32.mrf.mxu0 }
 0x4b4   : > { %11992 = vst [vmem:[#allocation62_spill] sm:$0xff] %v9174_v17 }
 0x4b5   : > { %v9176_v29 = vpop.f32.mrf.mxu2 }
 0x4b6   : > { %6655 = vmatmul.msk.f32.gmra.mxu3 %vm2038_vm5, %v2941_v44  ;;  %6675 = vmatmul.msk.f32.gmra.mxu0 %vm2038_vm5, %v2945_v42 }
 0x4b7   : > { %v9180_v57 = vpop.f32.mrf.mxu1 }
 0x4b8   : > { %11993 = vst [vmem:[#allocation63_spill] sm:$0xff] %v9180_v57 }
 0x4b9   : > { %v9182_v59 = vpop.f32.mrf.mxu3 }
 0x4ba   : > { %11994 = vst [vmem:[#allocation64_spill] sm:$0xff] %v9182_v59  ;;  %v2947_v59 = vld [vmem:[#allocation3 + $0x83] sm:$0xff] }
 0x4bb   : > { %v9184_v19 = vpop.f32.mrf.mxu0 }
 0x4bc   : > { %11995 = vst [vmem:[#allocation65_spill] sm:$0xff] %v9184_v19  ;;  %v2666_v19 = vadd.f32 %v9058_v16, %v2415_v0 }
 0x4bd   : > { %v9186_v27 = vpop.f32.mrf.mxu2 }
 0x4be   : > { %11996 = vst [vmem:[#allocation66_spill] sm:$0xff] %v9186_v27  ;;  %6656 = vmatmul.msk.f32.gmra.mxu3 %vm2038_vm5, %v2942_v49  ;;  %6676 = vmatmul.msk.f32.gmra.mxu0 %vm2038_vm5, %v2946_v36 }
 0x4bf   : > { %v9190_v17 = vpop.f32.mrf.mxu1 }
 0x4c0   : > { %11997 = vst [vmem:[#allocation67_spill] sm:$0xff] %v9190_v17  ;;  %v3402_v17 = vld [vmem:[%s11888_s6] sm:$0x3] }
 0x4c1   : > { %v9192_v41 = vpop.f32.mrf.mxu3  ;;  %v9205_v47 = vperm.slane %v3402_v17, 1 }
 0x4c2   : > { %11998 = vst [vmem:[#allocation68_spill] sm:$0xff] %v9192_v41 }
 0x4c3   : > { %v2662_v44 = vpop.f32.mrf.mxu0 }
 0x4c4   : > { %v2901_v44 = vadd.f32 %v9000_v28, %v2666_v19 }
 0x4c5   : > { %v9196_v57 = vpop.f32.mrf.mxu2 }
 0x4c6   : > { %11999 = vst [vmem:[#allocation69_spill] sm:$0xff] %v9196_v57  ;;  %6657 = vmatmul.msk.f32.gmra.mxu3 %vm2038_vm5, %v2943_v38  ;;  %6677 = vmatmul.msk.f32.gmra.mxu0 %vm2038_vm5, %v2947_v59 }
 0x4c7   : > { %v3278_v49 = vpop.f32.mrf.mxu1 }
 0x4c9   : > { %v2585_v48 = vpop.f32.mrf.mxu3 }
 0x4cb   : > { %v3087_v41 = vpop.f32.mrf.mxu0 }
 0x4cc   : > { %v3136_v27 = vadd.f32 %v3087_v41, %v2901_v44 }
 0x4cd   : > { %v3343_v20 = vpop.f32.mrf.mxu2 }
 0x4ce   : > { %v3371_v57 = vadd.f32 %v3322_v33, %v3136_v27  ;;  %6658 = vmatmul.msk.f32.gmra.mxu3 %vm2038_vm5, %v2944_v7 }
 0x4cf   : > { %v9208_v0 = vpop.f32.mrf.mxu1 }
 0x4d0   : > { %v9211_v16 = vadd.f32 %v9205_v47, %v3371_v57 }
 0x4d1   : > { %v9213_v48 = vpop.f32.mrf.mxu3 }
 0x4d2   : > { %12000 = vst [vmem:[#allocation70_spill] sm:$0xff] %v9211_v16  ;;  %v11899_v38 = vmax.f32 %v9211_v16, 0.0  ;;  %v2350_v16 = vadd.f32 %v8829_v63, %v8831_v52  ;;  %v9248_v52 = vperm.slane %v3402_v17, 0 }
 0x4d3   : > { %12001 = vst [vmem:[#allocation71_spill] sm:$0xff] %v9213_v48  ;;  %v3090_v49 = vpop.f32.mrf.mxu0  ;;  %v2418_v48 = vadd.f32 %v8844_v18, %v8837_v43  ;;  %v2421_v43 = vadd.f32 %v8862_v22, %v8852_v5 }
 0x4d4   : > { %3584 = vrot.lane.b32.xlu0 %v11899_v38, %s7503_s30 }
 0x4d5   : > { %v9219_v28 = vpop.f32.mrf.mxu2 }
 0x4d6   : > { %6659 = vmatmul.msk.f32.gmra.mxu3 %vm2038_vm5, %v2945_v42 }
 0x4d7   : > { %v9222_v33 = vpop.f32.mrf.mxu1 }
 0x4d8   : > { %12002 = vst [vmem:[#allocation72_spill] sm:$0xff] %v9222_v33 }
 0x4d9   : > { %v9224_v7 = vpop.f32.mrf.mxu3 }
 0x4da   : > { %12003 = vst [vmem:[#allocation73_spill] sm:$0xff] %v9224_v7 }
 0x4db   : > { %v3093_v41 = vpop.f32.mrf.mxu0 }
 0x4dd   : > { %v9226_v57 = vpop.f32.mrf.mxu2 }
 0x4de   : > { %6660 = vmatmul.msk.f32.gmra.mxu3 %vm2038_vm5, %v2946_v36  ;;  %v2665_v36 = vadd.f32 %v9102_v58, %v2350_v16  ;;  %v2670_v16 = vadd.f32 %v9078_v62, %v2421_v43  ;;  %v2427_v62 = vadd.f32 %v8892_v50, %v8884_v60 }
 0x4df   : > { %v9229_v19 = vpop.f32.mrf.mxu1 }
 0x4e0   : > { %12004 = vst [vmem:[#allocation74_spill] sm:$0xff] %v9229_v19  ;;  %v2668_v19 = vadd.f32 %v9068_v30, %v2418_v48 }
 0x4e1   : > { %v9231_v27 = vpop.f32.mrf.mxu3 }
 0x4e2   : > { %12005 = vst [vmem:[#allocation75_spill] sm:$0xff] %v9231_v27 }
 0x4e3   : > { %v3096_v44 = vpop.f32.mrf.mxu0 }
 0x4e4   : > { %v2900_v44 = vadd.f32 %v8996_v13, %v2665_v36 }
 0x4e5   : > { %v9233_v20 = vpop.f32.mrf.mxu2 }
 0x4e6   : > { %12006 = vst [vmem:[#allocation76_spill] sm:$0xff] %v9233_v20  ;;  %6661 = vmatmul.msk.f32.gmra.mxu3 %vm2038_vm5, %v2947_v59  ;;  %v2353_v59 = vadd.f32 %v8839_v4, %v8841_v37 }
 0x4e7   : > { %v3290_v38 = vpop.f32.mrf.mxu1 }
 0x4e8   : > { %v2903_v38 = vadd.f32 %v9008_v39, %v2668_v19  ;;  %v2667_v18 = vadd.f32 %v9114_v12, %v2353_v59  ;;  %v2356_v12 = vadd.f32 %v8854_v1, %v8859_v40  ;;  %v2674_v40 = vadd.f32 %v9096_v11, %v2427_v62 }
 0x4e9   : > { %v2597_v42 = vpop.f32.mrf.mxu3 }
 0x4ea   : > { %v3138_v30 = vadd.f32 %v3090_v49, %v2903_v38  ;;  %v2902_v39 = vadd.f32 %v9004_v25, %v2667_v18  ;;  %v2669_v25 = vadd.f32 %v9126_v34, %v2356_v12  ;;  %v2909_v36 = vadd.f32 %v9034_v45, %v2674_v40 }
 0x4eb   : > { %v3099_v7 = vpop.f32.mrf.mxu0 }
 0x4ec   : > { %v3373_v17 = vadd.f32 %v9154_v14, %v3138_v30  ;;  %v2904_v50 = vadd.f32 %v9012_v31, %v2669_v25 }
 0x4ed   : > { %v3355_v33 = vpop.f32.mrf.mxu2 }
 0x4ee   : > { %v9280_v19 = vadd.f32 %v9205_v47, %v3373_v17 }
 0x4ef   : > { %v9242_v27 = vpop.f32.mrf.mxu1 }
 0x4f0   : > { %v3443_v34 = vmax.f32 %v9280_v19, 0.0 }
 0x4f1   : > { %v3022_v20 = vpop.f32.mrf.mxu3 }
 0x4f2   : > { %v3135_v63 = vadd.f32 %v3022_v20, %v2900_v44 }
 0x4f3   : > { %v9250_v42 = vpop.f32.mrf.mxu0 }
 0x4f4   : > { %v3370_v58 = vadd.f32 %v9140_v35, %v3135_v63  ;;  %v2905_v35 = vadd.f32 %v9016_v55, %v2670_v16 }
 0x4f5   : > { %v9256_v13 = vpop.f32.mrf.mxu2 }
 0x4f6   : > { %v9260_v4 = vadd.f32 %v9248_v52, %v3370_v58  ;;  %v3140_v14 = vadd.f32 %v3093_v41, %v2905_v35  ;;  %v2365_v35 = vadd.f32 %v8898_v51, %v8900_v26  ;;  %v12007_v26 = vld [vmem:[#allocation66_spill] sm:$0xff] }
 0x4f7   : > { %v9262_v37 = vpop.f32.mrf.mxu1 }
 0x4f8   : > { %v3440_v5 = vmax.f32 %v9260_v4, 0.0  ;;  %v3375_v60 = vadd.f32 %v9162_v46, %v3140_v14  ;;  %v3144_v46 = vadd.f32 %v3099_v7, %v2909_v36  ;;  %v2362_v7 = vadd.f32 %v8888_v3, %v8890_v53  ;;  %v12008_v14 = vld [vmem:[#allocation38_spill] sm:$0xff]  ;;  %v12064_v4 = vld [vmem:[#allocation55_spill] sm:$0xff] }
 0x4f9   : > { %v3025_v22 = vpop.f32.mrf.mxu3 }
 0x4fa   : > { %v3137_v48 = vadd.f32 %v3025_v22, %v2902_v39  ;;  %3504 = vrot.lane.b32.xlu2 %v3440_v5, %s7503_s30  ;;  %v9303_v59 = vadd.f32 %v9205_v47, %v3375_v60  ;;  %v3379_v43 = vadd.f32 %v9176_v29, %v3144_v46  ;;  %v2430_v29 = vadd.f32 %v8904_v2, %v8896_v61 }
 0x4fb   : > { %v9275_v49 = vpop.f32.mrf.mxu0  ;;  %v2673_v16 = vadd.f32 %v9142_v54, %v2362_v7  ;;  %v2433_v2 = vadd.f32 %v8917_v24, %v8908_v10  ;;  %v12010_v10 = vld [vmem:[#allocation16_spill] sm:$0xff] }
 0x4fc   : > { %v3372_v33 = vadd.f32 %v9148_v8, %v3137_v48  ;;  %v3445_v18 = vmax.f32 %v9303_v59, 0.0  ;;  %v9325_v17 = vadd.f32 %v9205_v47, %v3379_v43  ;;  %v2676_v3 = vadd.f32 %v9106_v15, %v2430_v29  ;;  %v12016_v7 = vld [vmem:[#allocation56_spill] sm:$0xff] }
 0x4fd   : > { %v9282_v1 = vpop.f32.mrf.mxu2  ;;  %v2908_v53 = vadd.f32 %v9028_v9, %v2673_v16  ;;  %v2675_v15 = vadd.f32 %v9150_v21, %v2365_v35  ;;  %v2678_v25 = vadd.f32 %v9118_v56, %v2433_v2  ;;  %v12011_v21 = vld [vmem:[#allocation41_spill] sm:$0xff] }
 0x4fe   : > { %v9286_v55 = vadd.f32 %v9248_v52, %v3372_v33  ;;  %v3449_v22 = vmax.f32 %v9325_v17, 0.0  ;;  %v2911_v48 = vadd.f32 %v9044_v32, %v2676_v3  ;;  %v12013_v56 = vld [vmem:[#allocation21_spill] sm:$0xff] }
 0x4ff   : > { %v9288_v20 = vpop.f32.mrf.mxu1  ;;  %v2910_v33 = vadd.f32 %v12008_v14, %v2675_v15 }
 0x500   : > { %v3442_v8 = vmax.f32 %v9286_v55, 0.0  ;;  %v3146_v9 = vadd.f32 %v9250_v42, %v2911_v48 }
 0x501   : > { %v3028_v41 = vpop.f32.mrf.mxu3 }
 0x502   : > { %v3139_v44 = vadd.f32 %v3028_v41, %v2904_v50  ;;  %3586 = vrot.lane.b32.xlu2 %v3443_v34, %s7503_s30  ;;  %3506 = vrot.lane.b32.xlu1 %v3442_v8, %s7503_s30  ;;  %v3381_v32 = vadd.f32 %v12007_v26, %v3146_v9  ;;  %v12009_v50 = vld [vmem:[#allocation17_spill] sm:$0xff]  ;;  %v2913_v41 = vadd.f32 %v12011_v21, %v2678_v25  ;;  %v12020_v25 = vld [vmem:[#allocation67_spill] sm:$0xff]  ;;  %v12022_v21 = vld [vmem:[#allocation18_spill] sm:$0xff] }
 0x503   : > { %v3108_v11 = vpop.f32.mrf.mxu0  ;;  %v2368_v24 = vadd.f32 %v12010_v10, %v12009_v50 }
 0x504   : > { %v3374_v31 = vadd.f32 %v9158_v23, %v3139_v44  ;;  %v12014_v11 = vld [vmem:[#allocation59_spill] sm:$0xff] }
 0x505   : > { %v9305_v38 = vpop.f32.mrf.mxu2  ;;  %v2677_v46 = vadd.f32 %v12014_v11, %v2368_v24  ;;  %v12021_v24 = vld [vmem:[#allocation20_spill] sm:$0xff] }
 0x506   : > { %v9308_v45 = vadd.f32 %v9248_v52, %v3374_v31  ;;  %v3148_v31 = vadd.f32 %v9275_v49, %v2913_v41  ;;  %v12019_v49 = vld [vmem:[#allocation44_spill] sm:$0xff]  ;;  %v2374_v41 = vadd.f32 %v12022_v21, %v12021_v24  ;;  %v6738_v24 = vld [vmem:[%s11889_s7 + $0x1e0] sm:$0xff] }
 0x507   : > { %v3302_v63 = vpop.f32.mrf.mxu1  ;;  %v6739_v21 = vld [vmem:[%s11889_s7 + $0x1e8] sm:$0xff]  ;;  %3886 = vmatpush.msra.mxu3 %v6738_v24 }
 0x508   : > { %v3444_v30 = vmax.f32 %v9308_v45, 0.0  ;;  %v12015_v63 = vld [vmem:[#allocation63_spill] sm:$0xff]  ;;  %3951 = vmatpush.msra.mxu0 %v6739_v21  ;;  %v12040_v24 = vld [vmem:[#allocation32_spill] sm:$0xff] }
 0x509   : > { %v3031_v58 = vpop.f32.mrf.mxu3 }
 0x50a   : > { %3588 = vrot.lane.b32.xlu1 %v3445_v18, %s7503_s30  ;;  %3508 = vrot.lane.b32.xlu0 %v3444_v30, %s7503_s30  ;;  %v9362_v58 = vadd.f32 %v9205_v47, %v3381_v32 }
 0x50b   : > { %v3111_v23 = vpop.f32.mrf.mxu0 }
 0x50c   : > { %v3451_v35 = vmax.f32 %v9362_v58, 0.0 }
 0x50d   : > { %v3367_v39 = vpop.f32.mrf.mxu2 }
 0x50e   : > { %v12017_v39 = vld [vmem:[#allocation69_spill] sm:$0xff] }
 0x50f   : > { %v3383_v3 = vadd.f32 %v12017_v39, %v3148_v31  ;;  %v12028_v39 = vld [vmem:[#allocation24_spill] sm:$0xff] }
 0x511   : > { %v3034_v12 = vpop.f32.mrf.mxu3  ;;  %v9381_v32 = vadd.f32 %v9205_v47, %v3383_v3  ;;  %v12029_v3 = vld [vmem:[#allocation22_spill] sm:$0xff] }
 0x512   : > { %v3143_v62 = vadd.f32 %v3034_v12, %v2908_v53  ;;  %3592 = vrot.lane.b32.xlu0 %v3449_v22, %s7503_s30  ;;  %v12018_v53 = vld [vmem:[#allocation40_spill] sm:$0xff] }
 0x513   : > { %v3114_v61 = vpop.f32.mrf.mxu0  ;;  %v2912_v12 = vadd.f32 %v12018_v53, %v2677_v46  ;;  %v12026_v46 = vld [vmem:[#allocation57_spill] sm:$0xff]  ;;  %v2377_v53 = vadd.f32 %v12029_v3, %v12028_v39  ;;  %v12036_v39 = vld [vmem:[#allocation28_spill] sm:$0xff]  ;;  %v12037_v3 = vld [vmem:[#allocation26_spill] sm:$0xff] }
 0x514   : > { %v3378_v54 = vadd.f32 %v9170_v6, %v3143_v62  ;;  %v12012_v6 = vld [vmem:[#allocation19_spill] sm:$0xff] }
 0x515   : > { %v2439_v36 = vadd.f32 %v12013_v56, %v12012_v6  ;;  %v12025_v56 = vld [vmem:[#allocation61_spill] sm:$0xff] }
 0x516   : > { %v9343_v51 = vadd.f32 %v9248_v52, %v3378_v54 }
 0x517   : > { %v2682_v29 = vadd.f32 %v12016_v7, %v2439_v36  ;;  %v2681_v36 = vadd.f32 %v12025_v56, %v2374_v41  ;;  %v6740_v41 = vld [vmem:[%s11889_s7 + $0x1f0] sm:$0xff] }
 0x518   : > { %v3448_v40 = vmax.f32 %v9343_v51, 0.0  ;;  %4016 = vmatpush.msra.mxu1 %v6740_v41  ;;  %v12041_v41 = vld [vmem:[#allocation68_spill] sm:$0xff] }
 0x519   : > { %v3037_v60 = vpop.f32.mrf.mxu3  ;;  %v2917_v2 = vadd.f32 %v12019_v49, %v2682_v29 }
 0x51a   : > { %v3145_v42 = vadd.f32 %v3037_v60, %v2910_v33  ;;  %3512 = vrot.lane.b32.xlu2 %v3448_v40, %s7503_s30  ;;  %v3453_v60 = vmax.f32 %v9381_v32, 0.0 }
 0x51b   : > { %v9356_v44 = vpop.f32.mrf.mxu0  ;;  %v3152_v54 = vadd.f32 %v3111_v23, %v2917_v2 }
 0x51c   : > { %v3380_v43 = vadd.f32 %v12015_v63, %v3145_v42  ;;  %v12023_v42 = vld [vmem:[#allocation23_spill] sm:$0xff]  ;;  %v12027_v63 = vld [vmem:[#allocation42_spill] sm:$0xff] }
 0x51d   : > { %v3387_v33 = vadd.f32 %v9219_v28, %v3152_v54  ;;  %v12024_v28 = vld [vmem:[#allocation25_spill] sm:$0xff] }
 0x51e   : > { %v9366_v16 = vadd.f32 %v9248_v52, %v3380_v43  ;;  %v2442_v6 = vadd.f32 %v12024_v28, %v12023_v42  ;;  %v2916_v43 = vadd.f32 %v12027_v63, %v2681_v36  ;;  %v6735_v42 = vld [vmem:[%s11889_s7 + $0x1c8] sm:$0xff]  ;;  %v12034_v28 = vld [vmem:[#allocation58_spill] sm:$0xff]  ;;  %v6736_v36 = vld [vmem:[%s11889_s7 + $0x1d0] sm:$0xff] }
 0x51f   : > { %v9403_v11 = vadd.f32 %v9205_v47, %v3387_v33  ;;  %3952 = vmatpush.msra.mxu0 %v6735_v42  ;;  %v12035_v63 = vld [vmem:[#allocation45_spill] sm:$0xff]  ;;  %4017 = vmatpush.msra.mxu1 %v6736_v36  ;;  %v12042_v36 = vld [vmem:[#allocation72_spill] sm:$0xff] }
 0x520   : > { %v3450_v48 = vmax.f32 %v9366_v16, 0.0  ;;  %v2684_v31 = vadd.f32 %v12026_v46, %v2442_v6  ;;  %v6737_v46 = vld [vmem:[%s11889_s7 + $0x1d8] sm:$0xff]  ;;  %v6728_v42 = vld [vmem:[%s11889_s7 + $0x190] sm:$0xff] }
 0x521   : > { %v3040_v62 = vpop.f32.mrf.mxu3  ;;  %v3457_v7 = vmax.f32 %v9403_v11, 0.0 }
 0x522   : > { %v3147_v15 = vadd.f32 %v3040_v62, %v2912_v12  ;;  %3594 = vrot.lane.b32.xlu2 %v3451_v35, %s7503_s30  ;;  %3514 = vrot.lane.b32.xlu1 %v3450_v48, %s7503_s30  ;;  %v12030_v12 = vld [vmem:[#allocation46_spill] sm:$0xff] }
 0x523   : > { %v3120_v9 = vpop.f32.mrf.mxu0  ;;  %v2919_v62 = vadd.f32 %v12030_v12, %v2684_v31 }
 0x524   : > { %v3382_v26 = vadd.f32 %v12020_v25, %v3147_v15  ;;  %v12031_v15 = vld [vmem:[#allocation27_spill] sm:$0xff]  ;;  %v12032_v9 = vld [vmem:[#allocation30_spill] sm:$0xff]  ;;  %v12033_v25 = vld [vmem:[#allocation64_spill] sm:$0xff] }
 0x525   : > { %v2445_v54 = vadd.f32 %v12032_v9, %v12031_v15  ;;  %v3154_v33 = vadd.f32 %v3114_v61, %v2919_v62  ;;  %v6741_v61 = vld [vmem:[%s11889_s7 + $0x1f8] sm:$0xff]  ;;  %v6730_v62 = vld [vmem:[%s11889_s7 + $0x1a0] sm:$0xff]  ;;  %v12038_v15 = vld [vmem:[#allocation49_spill] sm:$0xff] }
 0x526   : > { %v9384_v14 = vadd.f32 %v9248_v52, %v3382_v26  ;;  %v2683_v26 = vadd.f32 %v12033_v25, %v2377_v53  ;;  %4081 = vmatpush.msra.mxu2 %v6741_v61  ;;  %v2380_v53 = vadd.f32 %v12037_v3, %v12036_v39  ;;  %v6733_v25 = vld [vmem:[%s11889_s7 + $0x1b8] sm:$0xff]  ;;  %v6723_v39 = vld [vmem:[%s11889_s7 + $0x168] sm:$0xff]  ;;  %v6724_v3 = vld [vmem:[%s11889_s7 + $0x170] sm:$0xff] }
 0x527   : > { %v2686_v6 = vadd.f32 %v12034_v28, %v2445_v54  ;;  %v3389_v31 = vadd.f32 %v9226_v57, %v3154_v33  ;;  %v6732_v57 = vld [vmem:[%s11889_s7 + $0x1b0] sm:$0xff]  ;;  %v6727_v33 = vld [vmem:[%s11889_s7 + $0x188] sm:$0xff]  ;;  %v6729_v28 = vld [vmem:[%s11889_s7 + $0x198] sm:$0xff] }
 0x528   : > { %v3452_v50 = vmax.f32 %v9384_v14, 0.0  ;;  %4082 = vmatpush.msra.mxu2 %v6737_v46  ;;  %v2685_v61 = vadd.f32 %v12041_v41, %v2380_v53  ;;  %4018 = vmatpush.msra.mxu1 %v6732_v57  ;;  %v12043_v53 = vld [vmem:[#allocation60_spill] sm:$0xff]  ;;  %v6720_v57 = vld [vmem:[%s11889_s7 + $0x150] sm:$0xff] }
 0x529   : > { %v3043_v10 = vpop.f32.mrf.mxu3  ;;  %v2921_v9 = vadd.f32 %v12038_v15, %v2686_v6  ;;  %v12044_v15 = vld [vmem:[#allocation76_spill] sm:$0xff] }
 0x52a   : > { %3596 = vrot.lane.b32.xlu1 %v3453_v60, %s7503_s30  ;;  %3516 = vrot.lane.b32.xlu0 %v3452_v50, %s7503_s30  ;;  %v6715_v41 = vld [vmem:[%s11889_s7 + $0x128] sm:$0xff] }
 0x52b   : > { %v9397_v23 = vpop.f32.mrf.mxu0  ;;  %v3156_v6 = vadd.f32 %v9356_v44, %v2921_v9  ;;  %4083 = vmatpush.msra.mxu2 %v6733_v25  ;;  %4019 = vmatpush.msra.mxu1 %v6728_v42  ;;  %v6725_v44 = vld [vmem:[%s11889_s7 + $0x178] sm:$0xff]  ;;  %v12046_v42 = vld [vmem:[#allocation51_spill] sm:$0xff] }
 0x52d   : > { %4084 = vmatpush.msra.mxu2 %v6729_v28  ;;  %4020 = vmatpush.msra.mxu1 %v6724_v3  ;;  %v3391_v9 = vadd.f32 %v12044_v15, %v3156_v6  ;;  %v6712_v3 = vld [vmem:[%s11889_s7 + $0x110] sm:$0xff] }
 0x52f   : > { %4085 = vmatpush.msra.mxu2 %v6725_v44  ;;  %4021 = vmatpush.msra.mxu1 %v6720_v57 }
 0x531   : > { %v3046_v29 = vpop.f32.mrf.mxu3 }
 0x532   : > { %v3151_v49 = vadd.f32 %v3046_v29, %v2916_v43  ;;  %3600 = vrot.lane.b32.xlu0 %v3457_v7, %s7503_s30  ;;  %v2918_v43 = vadd.f32 %v12035_v63, %v2683_v26  ;;  %v6726_v26 = vld [vmem:[%s11889_s7 + $0x180] sm:$0xff]  ;;  %v9489_v63 = vadd.f32 %v9205_v47, %v3389_v31 }
 0x533   : > { %v9414_v2 = vpop.f32.mrf.mxu0  ;;  %v6718_v31 = vld [vmem:[%s11889_s7 + $0x140] sm:$0xff] }
 0x534   : > { %v3386_v10 = vadd.f32 %v9208_v0, %v3151_v49  ;;  %v6734_v0 = vld [vmem:[%s11889_s7 + $0x1c0] sm:$0xff]  ;;  %v6731_v49 = vld [vmem:[%s11889_s7 + $0x1a8] sm:$0xff] }
 0x535   : > { %3887 = vmatpush.msra.mxu3 %v6734_v0  ;;  %3953 = vmatpush.msra.mxu0 %v6731_v49  ;;  %v6719_v49 = vld [vmem:[%s11889_s7 + $0x148] sm:$0xff] }
 0x536   : > { %v9440_v56 = vadd.f32 %v9248_v52, %v3386_v10  ;;  %v12039_v10 = vld [vmem:[#allocation35_spill] sm:$0xff] }
 0x537   : > { %3888 = vmatpush.msra.mxu3 %v6730_v62  ;;  %v2451_v21 = vadd.f32 %v12040_v24, %v12039_v10  ;;  %3954 = vmatpush.msra.mxu0 %v6727_v33  ;;  %v6721_v10 = vld [vmem:[%s11889_s7 + $0x158] sm:$0xff]  ;;  %v6714_v24 = vld [vmem:[%s11889_s7 + $0x120] sm:$0xff] }
 0x538   : > { %v3456_v29 = vmax.f32 %v9440_v56, 0.0  ;;  %4086 = vmatpush.msra.mxu2 %v6721_v10  ;;  %v12049_v10 = vld [vmem:[#allocation31_spill] sm:$0xff] }
 0x539   : > { %v3049_v12 = vpop.f32.mrf.mxu3  ;;  %3889 = vmatpush.msra.mxu3 %v6726_v26  ;;  %3955 = vmatpush.msra.mxu0 %v6723_v39  ;;  %v3459_v26 = vmax.f32 %v9489_v63, 0.0  ;;  %v6711_v39 = vld [vmem:[%s11889_s7 + $0x108] sm:$0xff]  ;;  %v3777_v63 = vld [vmem:[%s11889_s7 + $0xe0] sm:$0xff] }
 0x53a   : > { %v3153_v54 = vadd.f32 %v3049_v12, %v2918_v43  ;;  %3520 = vrot.lane.b32.xlu2 %v3456_v29, %s7503_s30  ;;  %v6722_v43 = vld [vmem:[%s11889_s7 + $0x160] sm:$0xff]  ;;  %v2690_v12 = vadd.f32 %v12043_v53, %v2451_v21 }
 0x53b   : > { %v9478_v0 = vpop.f32.mrf.mxu0  ;;  %3890 = vmatpush.msra.mxu3 %v6722_v43  ;;  %3956 = vmatpush.msra.mxu0 %v6719_v49  ;;  %v6713_v49 = vld [vmem:[%s11889_s7 + $0x118] sm:$0xff] }
 0x53c   : > { %v3388_v46 = vadd.f32 %v12042_v36, %v3153_v54  ;;  %v12045_v54 = vld [vmem:[#allocation47_spill] sm:$0xff]  ;;  %v2925_v28 = vadd.f32 %v12046_v42, %v2690_v12  ;;  %v6717_v36 = vld [vmem:[%s11889_s7 + $0x138] sm:$0xff]  ;;  %v9554_v12 = vadd.f32 %v9205_v47, %v3391_v9 }
 0x53d   : > { %v2920_v25 = vadd.f32 %v12045_v54, %v2685_v61  ;;  %3891 = vmatpush.msra.mxu3 %v6718_v31  ;;  %v6716_v61 = vld [vmem:[%s11889_s7 + $0x130] sm:$0xff]  ;;  %v12047_v31 = vld [vmem:[#allocation74_spill] sm:$0xff]  ;;  %3957 = vmatpush.msra.mxu0 %v6715_v41 }
 0x53e   : > { %v9508_v62 = vadd.f32 %v9248_v52, %v3388_v46  ;;  %v6710_v46 = vld [vmem:[%s11889_s7 + $0x100] sm:$0xff]  ;;  %v3160_v44 = vadd.f32 %v9397_v23, %v2925_v28  ;;  %4022 = vmatpush.msra.mxu1 %v6716_v61  ;;  %4087 = vmatpush.msra.mxu2 %v6717_v36  ;;  %v3461_v15 = vmax.f32 %v9554_v12, 0.0  ;;  %v12051_v61 = vld [vmem:[#allocation37_spill] sm:$0xff]  ;;  %v12052_v42 = vld [vmem:[#allocation34_spill] sm:$0xff] }
 0x53f   : > { %3892 = vmatpush.msra.mxu3 %v6714_v24  ;;  %3958 = vmatpush.msra.mxu0 %v6711_v39  ;;  %v2454_v28 = vadd.f32 %v12052_v42, %v12051_v61  ;;  %v12059_v42 = vld [vmem:[#allocation70_spill] sm:$0xff]  ;;  %v3778_v12 = vld [vmem:[%s11889_s7 + $0xe8] sm:$0xff] }
 0x540   : > { %v3458_v33 = vmax.f32 %v9508_v62, 0.0  ;;  %4023 = vmatpush.msra.mxu1 %v6712_v3  ;;  %4088 = vmatpush.msra.mxu2 %v6713_v49  ;;  %v3395_v23 = vadd.f32 %v9256_v13, %v3160_v44  ;;  %v12055_v44 = vld [vmem:[#allocation39_spill] sm:$0xff]  ;;  %v3780_v62 = vld [vmem:[%s11889_s7 + $0xf8] sm:$0xff] }
 0x541   : > { %v3052_v21 = vpop.f32.mrf.mxu3  ;;  %3893 = vmatpush.msra.mxu3 %v6710_v46  ;;  %v12054_v46 = vld [vmem:[#allocation50_spill] sm:$0xff]  ;;  %4259 = vmatpush.msrb.mxu0 %v3778_v12 }
 0x542   : > { %v3155_v6 = vadd.f32 %v3052_v21, %v2920_v25  ;;  %3602 = vrot.lane.b32.xlu2 %v3459_v26, %s7503_s30  ;;  %3522 = vrot.lane.b32.xlu1 %v3458_v33, %s7503_s30  ;;  %v12048_v25 = vld [vmem:[#allocation36_spill] sm:$0xff]  ;;  %v12050_v21 = vld [vmem:[#allocation71_spill] sm:$0xff]  ;;  %v9575_v13 = vadd.f32 %v9205_v47, %v3395_v23  ;;  %v12057_v23 = vld [vmem:[#allocation53_spill] sm:$0xff] }
 0x543   : > { %v3132_v43 = vpop.f32.mrf.mxu0  ;;  %v2386_v24 = vadd.f32 %v12049_v10, %v12048_v25  ;;  %v12058_v10 = vld [vmem:[#allocation73_spill] sm:$0xff]  ;;  %4194 = vmatpush.msrb.mxu3 %v3777_v63  ;;  %4389 = vmatpush.msrb.mxu2 %v3780_v62 }
 0x544   : > { %v3390_v53 = vadd.f32 %v12047_v31, %v3155_v6  ;;  %v12053_v6 = vld [vmem:[#allocation62_spill] sm:$0xff]  ;;  %v3465_v39 = vmax.f32 %v9575_v13, 0.0  ;;  %v12056_v31 = vld [vmem:[#allocation33_spill] sm:$0xff] }
 0x545   : > { %v2689_v41 = vadd.f32 %v12050_v21, %v2386_v24  ;;  %v2692_v36 = vadd.f32 %v12053_v6, %v2454_v28  ;;  %v12060_v28 = vmax.f32 %v12059_v42, 0.0  ;;  %v3776_v13 = vld [vmem:[%s11889_s7 + $0xd8] sm:$0xff] }
 0x546   : > { %v9560_v57 = vadd.f32 %v9248_v52, %v3390_v53  ;;  %v2389_v53 = vadd.f32 %v12056_v31, %v12055_v44  ;;  %v3585_v49 = vpop.permute.xlu0 %3584  ;;  %v12062_v44 = vld [vmem:[#allocation65_spill] sm:$0xff]  ;;  %4390 = vmatpush.msrb.mxu2 %v3776_v13 }
 0x547   : > { %v2924_v43 = vadd.f32 %v12054_v46, %v2689_v41  ;;  %v2927_v25 = vadd.f32 %v12057_v23, %v2692_v36  ;;  %v3632_v6 = vmax.f32 %v12060_v28, %v3585_v49  ;;  %v12063_v23 = vld [vmem:[#allocation52_spill] sm:$0xff] }
 0x548   : > { %v3460_v9 = vmax.f32 %v9560_v57, 0.0  ;;  %v2691_v24 = vadd.f32 %v12058_v10, %v2389_v53  ;;  %v12066_v10 = vld [vmem:[#allocation75_spill] sm:$0xff]  ;;  %v3779_v57 = vld [vmem:[%s11889_s7 + $0xf0] sm:$0xff] }
 0x549   : > { %v3055_v54 = vpop.f32.mrf.mxu3  ;;  %v3162_v41 = vadd.f32 %v9414_v2, %v2927_v25  ;;  %v12065_v25 = vld [vmem:[#allocation43_spill] sm:$0xff]  ;;  %4324 = vmatpush.msrb.mxu1 %v3779_v57 }
 0x54a   : > { %3604 = vrot.lane.b32.xlu1 %v3461_v15, %s7503_s30  ;;  %3524 = vrot.lane.b32.xlu0 %v3460_v9, %s7503_s30  ;;  %v2926_v53 = vadd.f32 %v12063_v23, %v2691_v24 }
 0x551   : > { %v3058_v3 = vpop.f32.mrf.mxu3 }
 0x552   : > { %v3159_v54 = vadd.f32 %v3058_v3, %v2924_v43  ;;  %3608 = vrot.lane.b32.xlu0 %v3465_v39, %s7503_s30  ;;  %v12061_v3 = vld [vmem:[#allocation48_spill] sm:$0xff] }
 0x553   : > { %v2694_v31 = vadd.f32 %v12062_v44, %v12061_v3 }
 0x554   : > { %v3394_v21 = vadd.f32 %v9242_v27, %v3159_v54  ;;  %v3505_v61 = vpop.permute.xlu2 %3504  ;;  %v3397_v54 = vadd.f32 %v9282_v1, %v3162_v41  ;;  %v12067_v41 = vld [vmem:[#allocation54_spill] sm:$0xff] }
 0x555   : > { %v3552_v46 = vmax.f32 %v3440_v5, %v3505_v61  ;;  %v2929_v5 = vadd.f32 %v12064_v4, %v2694_v31 }
 0x556   : > { %v9596_v43 = vadd.f32 %v9248_v52, %v3394_v21  ;;  %v2693_v21 = vadd.f32 %v12066_v10, %v12065_v25  ;;  %v9613_v42 = vadd.f32 %v9205_v47, %v3397_v54 }
 0x557   : > { %v3648_v36 = vmax.f32 %v3552_v46, %v3632_v6  ;;  %v3164_v24 = vadd.f32 %v9478_v0, %v2929_v5 }
 0x558   : > { %v3464_v27 = vmax.f32 %v9596_v43, 0.0  ;;  %v2928_v28 = vadd.f32 %v12067_v41, %v2693_v21  ;;  %v3773_v43 = vld [vmem:[%s11889_s7 + $0xc0] sm:$0xff] }
 0x559   : > { %3714 = vst.msk [vmem:[#allocation4 + $0x8] sm:$0xff] %vm3712_vm0, %v3648_v36  ;;  %v3061_v2 = vpop.f32.mrf.mxu3  ;;  %v3399_v3 = vadd.f32 %v9305_v38, %v3164_v24  ;;  %4195 = vmatpush.msrb.mxu3 %v3773_v43 }
 0x55a   : > { %v3161_v49 = vadd.f32 %v3061_v2, %v2926_v53  ;;  %3528 = vrot.lane.b32.xlu2 %v3464_v27, %s7503_s30 }
 0x55b   : > { %v9634_v31 = vadd.f32 %v9205_v47, %v3399_v3 }
 0x55c   : > { %v3396_v61 = vadd.f32 %v9262_v37, %v3161_v49  ;;  %v3467_v37 = vmax.f32 %v9613_v42, 0.0  ;;  %v3755_v42 = vld [vmem:[%s11889_s7 + $0x30] sm:$0xff] }
 0x55d   : > { %v3469_v54 = vmax.f32 %v9634_v31, 0.0  ;;  %v3796_v31 = vld [vmem:[#allocation4 + $0x80] sm:$0xff] }
 0x55e   : > { %v9616_v1 = vadd.f32 %v9248_v52, %v3396_v61 }
 0x560   : > { %v3781_v6 = vld [vmem:[#allocation4 + $0x8] sm:$0xff]  ;;  %v3466_v46 = vmax.f32 %v9616_v1, 0.0  ;;  %v3756_v1 = vld [vmem:[%s11889_s7 + $0x38] sm:$0xff] }
 0x561   : > { %v3064_v44 = vpop.f32.mrf.mxu3  ;;  %6742 = vmatmul.msk.f32.vlgmr.msra.gmra.mxu3 %vm3712_vm0, %v3781_v6  ;;  %6758 = vmatmul.msk.f32.vlgmr.msra.gmra.mxu0 %vm3712_vm0, %v3781_v6 }
 0x562   : > { %v3163_v0 = vadd.f32 %v3064_v44, %v2928_v28  ;;  %6774 = vmatmul.msk.f32.vlgmr.msra.gmra.mxu1 %vm3712_vm0, %v3781_v6  ;;  %6790 = vmatmul.msk.f32.vlgmr.msra.gmra.mxu2 %vm3712_vm0, %v3781_v6  ;;  %v3788_v44 = vld [vmem:[#allocation4 + $0x40] sm:$0xff] }
 0x563   : > { %3610 = vrot.lane.b32.xlu2 %v3467_v37, %s7503_s30  ;;  %3530 = vrot.lane.b32.xlu1 %v3466_v46, %s7503_s30 }
 0x564   : > { %v3398_v38 = vadd.f32 %v9288_v20, %v3163_v0  ;;  %v3587_v20 = vpop.permute.xlu2 %3586 }
 0x565   : > { %v3633_v47 = vmax.f32 %v3443_v34, %v3587_v20 }
 0x566   : > { %v9637_v36 = vadd.f32 %v9248_v52, %v3398_v38 }
 0x568   : > { %v3468_v23 = vmax.f32 %v9637_v36, 0.0 }
 0x569   : > { %v3067_v53 = vpop.f32.mrf.mxu3 }
 0x56a   : > { %3532 = vrot.lane.b32.xlu0 %v3468_v23, %s7503_s30 }
 0x56b   : > { %3612 = vrot.lane.b32.xlu1 %v3469_v54, %s7503_s30 }
 0x574   : > { %v3507_v2 = vpop.permute.xlu1 %3506  ;;  %v3513_v19 = vpop.permute.xlu2 %3512 }
 0x575   : > { %v3553_v52 = vmax.f32 %v3442_v8, %v3507_v2  ;;  %v3556_v34 = vmax.f32 %v3448_v40, %v3513_v19  ;;  %v3765_v19 = vld [vmem:[%s11889_s7 + $0x80] sm:$0xff] }
 0x577   : > { %v3649_v49 = vmax.f32 %v3553_v52, %v3633_v47 }
 0x579   : > { %3715 = vst.msk [vmem:[#allocation4 + $0x10] sm:$0xff] %vm3712_vm0, %v3649_v49 }
 0x57c   : > { %v3589_v4 = vpop.permute.xlu1 %3588  ;;  %v3509_v5 = vpop.permute.xlu0 %3508 }
 0x57d   : > { %v3634_v25 = vmax.f32 %v3445_v18, %v3589_v4  ;;  %v3554_v10 = vmax.f32 %v3444_v30, %v3509_v5  ;;  %v3784_v18 = vld [vmem:[#allocation4 + $0x20] sm:$0xff]  ;;  %v3595_v30 = vpop.permute.xlu2 %3594 }
 0x57f   : > { %v3650_v21 = vmax.f32 %v3554_v10, %v3634_v25  ;;  %v3769_v25 = vld [vmem:[%s11889_s7 + $0xa0] sm:$0xff]  ;;  %v3770_v10 = vld [vmem:[%s11889_s7 + $0xa8] sm:$0xff] }
 0x580   : > { %v3782_v61 = vld [vmem:[#allocation4 + $0x10] sm:$0xff]  ;;  %4196 = vmatpush.msrb.mxu3 %v3769_v25 }
 0x581   : > { %3716 = vst.msk [vmem:[#allocation4 + $0x18] sm:$0xff] %vm3712_vm0, %v3650_v21  ;;  %6743 = vmatmul.msk.f32.gmra.mxu3 %vm3712_vm0, %v3782_v61  ;;  %6759 = vmatmul.msk.f32.gmra.mxu0 %vm3712_vm0, %v3782_v61  ;;  %v3771_v21 = vld [vmem:[%s11889_s7 + $0xb0] sm:$0xff] }
 0x582   : > { %6775 = vmatmul.msk.f32.gmra.mxu1 %vm3712_vm0, %v3782_v61  ;;  %6791 = vmatmul.msk.f32.gmra.mxu2 %vm3712_vm0, %v3782_v61  ;;  %v3772_v61 = vld [vmem:[%s11889_s7 + $0xb8] sm:$0xff] }
 0x583   : > { %4391 = vmatpush.msrb.mxu2 %v3772_v61  ;;  %4197 = vmatpush.msrb.mxu3 %v3765_v19 }
 0x584   : > { %v3593_v55 = vpop.permute.xlu0 %3592 }
 0x585   : > { %v3636_v8 = vmax.f32 %v3449_v22, %v3593_v55  ;;  %v3637_v22 = vmax.f32 %v3451_v35, %v3595_v30  ;;  %v3792_v55 = vld [vmem:[#allocation4 + $0x60] sm:$0xff]  ;;  %v3762_v30 = vld [vmem:[%s11889_s7 + $0x68] sm:$0xff] }
 0x587   : > { %v3652_v59 = vmax.f32 %v3556_v34, %v3636_v8  ;;  %v3768_v34 = vld [vmem:[%s11889_s7 + $0x98] sm:$0xff]  ;;  %v3766_v8 = vld [vmem:[%s11889_s7 + $0x88] sm:$0xff] }
 0x588   : > { %v3783_v45 = vld [vmem:[#allocation4 + $0x18] sm:$0xff]  ;;  %4392 = vmatpush.msrb.mxu2 %v3768_v34 }
 0x589   : > { %3718 = vst.msk [vmem:[#allocation4 + $0x28] sm:$0xff] %vm3712_vm0, %v3652_v59  ;;  %6744 = vmatmul.msk.f32.gmra.mxu3 %vm3712_vm0, %v3783_v45  ;;  %6760 = vmatmul.msk.f32.gmra.mxu0 %vm3712_vm0, %v3783_v45  ;;  %v3767_v59 = vld [vmem:[%s11889_s7 + $0x90] sm:$0xff] }
 0x58a   : > { %6776 = vmatmul.msk.f32.gmra.mxu1 %vm3712_vm0, %v3783_v45  ;;  %6792 = vmatmul.msk.f32.gmra.mxu2 %vm3712_vm0, %v3783_v45 }
 0x590   : > { %v3785_v24 = vld [vmem:[#allocation4 + $0x28] sm:$0xff] }
 0x591   : > { %6745 = vmatmul.msk.f32.gmra.mxu3 %vm3712_vm0, %v3784_v18  ;;  %6761 = vmatmul.msk.f32.gmra.mxu0 %vm3712_vm0, %v3784_v18  ;;  %v9928_v13 = vld [vmem:[#allocation4 + $0x24] sm:$0xff] }
 0x592   : > { %6777 = vmatmul.msk.f32.gmra.mxu1 %vm3712_vm0, %v3784_v18  ;;  %6793 = vmatmul.msk.f32.gmra.mxu2 %vm3712_vm0, %v3784_v18  ;;  %v3761_v18 = vld [vmem:[%s11889_s7 + $0x60] sm:$0xff] }
 0x593   : > { %4198 = vmatpush.msrb.mxu3 %v3761_v18 }
 0x594   : > { %v3515_v17 = vpop.permute.xlu1 %3514  ;;  %v3521_v6 = vpop.permute.xlu2 %3520 }
 0x595   : > { %v3557_v51 = vmax.f32 %v3450_v48, %v3515_v17  ;;  %v3560_v32 = vmax.f32 %v3456_v29, %v3521_v6  ;;  %v3763_v17 = vld [vmem:[%s11889_s7 + $0x70] sm:$0xff] }
 0x597   : > { %v3653_v40 = vmax.f32 %v3557_v51, %v3637_v22  ;;  %v3764_v22 = vld [vmem:[%s11889_s7 + $0x78] sm:$0xff]  ;;  %v3757_v51 = vld [vmem:[%s11889_s7 + $0x40] sm:$0xff] }
 0x598   : > { %4393 = vmatpush.msrb.mxu2 %v3764_v22  ;;  %4199 = vmatpush.msrb.mxu3 %v3757_v51 }
 0x599   : > { %3719 = vst.msk [vmem:[#allocation4 + $0x30] sm:$0xff] %vm3712_vm0, %v3653_v40  ;;  %6746 = vmatmul.msk.f32.gmra.mxu3 %vm3712_vm0, %v3785_v24  ;;  %6762 = vmatmul.msk.f32.gmra.mxu0 %vm3712_vm0, %v3785_v24  ;;  %v3758_v40 = vld [vmem:[%s11889_s7 + $0x48] sm:$0xff] }
 0x59a   : > { %6778 = vmatmul.msk.f32.gmra.mxu1 %vm3712_vm0, %v3785_v24  ;;  %6794 = vmatmul.msk.f32.gmra.mxu2 %vm3712_vm0, %v3785_v24 }
 0x59c   : > { %v3597_v41 = vpop.permute.xlu1 %3596  ;;  %v3517_v28 = vpop.permute.xlu0 %3516 }
 0x59d   : > { %v3638_v58 = vmax.f32 %v3453_v60, %v3597_v41  ;;  %v3558_v16 = vmax.f32 %v3452_v50, %v3517_v28  ;;  %v3603_v56 = vpop.permute.xlu2 %3602  ;;  %v3759_v41 = vld [vmem:[%s11889_s7 + $0x50] sm:$0xff]  ;;  %v3760_v28 = vld [vmem:[%s11889_s7 + $0x58] sm:$0xff] }
 0x59e   : > { %4394 = vmatpush.msrb.mxu2 %v3760_v28  ;;  %v6898_v28 = vld [vmem:[%s11889_s7 + $0x2e0] sm:$0xff] }
 0x59f   : > { %v3654_v35 = vmax.f32 %v3558_v16, %v3638_v58  ;;  %v3753_v58 = vld [vmem:[%s11889_s7 + $0x20] sm:$0xff] }
 0x5a0   : > { %v3786_v48 = vld [vmem:[#allocation4 + $0x30] sm:$0xff]  ;;  %4200 = vmatpush.msrb.mxu3 %v3753_v58  ;;  %4395 = vmatpush.msrb.mxu2 %v3756_v1  ;;  %v6901_v58 = vld [vmem:[%s11889_s7 + $0x2f8] sm:$0xff] }
 0x5a1   : > { %3720 = vst.msk [vmem:[#allocation4 + $0x38] sm:$0xff] %vm3712_vm0, %v3654_v35  ;;  %6747 = vmatmul.msk.f32.gmra.mxu3 %vm3712_vm0, %v3786_v48  ;;  %6763 = vmatmul.msk.f32.gmra.mxu0 %vm3712_vm0, %v3786_v48 }
 0x5a2   : > { %6779 = vmatmul.msk.f32.gmra.mxu1 %vm3712_vm0, %v3786_v48  ;;  %6795 = vmatmul.msk.f32.gmra.mxu2 %vm3712_vm0, %v3786_v48 }
 0x5a4   : > { %v3601_v3 = vpop.permute.xlu0 %3600 }
 0x5a5   : > { %v3640_v14 = vmax.f32 %v3457_v7, %v3601_v3  ;;  %v3641_v7 = vmax.f32 %v3459_v26, %v3603_v56  ;;  %v3754_v3 = vld [vmem:[%s11889_s7 + $0x28] sm:$0xff] }
 0x5a7   : > { %v3656_v60 = vmax.f32 %v3560_v32, %v3640_v14  ;;  %v3751_v32 = vld [vmem:[%s11889_s7 + $0x10] sm:$0xff]  ;;  %v3752_v14 = vld [vmem:[%s11889_s7 + $0x18] sm:$0xff] }
 0x5a8   : > { %v3787_v50 = vld [vmem:[#allocation4 + $0x38] sm:$0xff]  ;;  %4396 = vmatpush.msrb.mxu2 %v3752_v14 }
 0x5a9   : > { %3722 = vst.msk [vmem:[#allocation4 + $0x48] sm:$0xff] %vm3712_vm0, %v3656_v60  ;;  %6748 = vmatmul.msk.f32.gmra.mxu3 %vm3712_vm0, %v3787_v50  ;;  %6764 = vmatmul.msk.f32.gmra.mxu0 %vm3712_vm0, %v3787_v50 }
 0x5aa   : > { %6780 = vmatmul.msk.f32.gmra.mxu1 %vm3712_vm0, %v3787_v50  ;;  %6796 = vmatmul.msk.f32.gmra.mxu2 %vm3712_vm0, %v3787_v50 }
 0x5ab   : > { %4746 = vmatpush.msra.mxu2 %v6901_v58  ;;  %v6891_v58 = vld [vmem:[%s11889_s7 + $0x2a8] sm:$0xff] }
 0x5b0   : > { %v3789_v38 = vld [vmem:[#allocation4 + $0x48] sm:$0xff] }
 0x5b1   : > { %6749 = vmatmul.msk.f32.gmra.mxu3 %vm3712_vm0, %v3788_v44  ;;  %6765 = vmatmul.msk.f32.gmra.mxu0 %vm3712_vm0, %v3788_v44 }
 0x5b2   : > { %6781 = vmatmul.msk.f32.gmra.mxu1 %vm3712_vm0, %v3788_v44  ;;  %6797 = vmatmul.msk.f32.gmra.mxu2 %vm3712_vm0, %v3788_v44 }
 0x5b4   : > { %v3523_v11 = vpop.permute.xlu1 %3522  ;;  %v3529_v52 = vpop.permute.xlu2 %3528 }
 0x5b5   : > { %v3561_v29 = vmax.f32 %v3458_v33, %v3523_v11 }
 0x5b7   : > { %v3657_v0 = vmax.f32 %v3561_v29, %v3641_v7  ;;  %v3733_v29 = vld [vmem:[#allocation4 + $0x4] sm:$0xff] }
 0x5b9   : > { %3723 = vst.msk [vmem:[#allocation4 + $0x50] sm:$0xff] %vm3712_vm0, %v3657_v0  ;;  %6750 = vmatmul.msk.f32.gmra.mxu3 %vm3712_vm0, %v3789_v38  ;;  %6766 = vmatmul.msk.f32.gmra.mxu0 %vm3712_vm0, %v3789_v38 }
 0x5ba   : > { %6782 = vmatmul.msk.f32.gmra.mxu1 %vm3712_vm0, %v3789_v38  ;;  %6798 = vmatmul.msk.f32.gmra.mxu2 %vm3712_vm0, %v3789_v38 }
 0x5bc   : > { %v3605_v26 = vpop.permute.xlu1 %3604  ;;  %v3525_v33 = vpop.permute.xlu0 %3524 }
 0x5bd   : > { %v3642_v53 = vmax.f32 %v3461_v15, %v3605_v26  ;;  %v3562_v20 = vmax.f32 %v3460_v9, %v3525_v33  ;;  %v3564_v9 = vmax.f32 %v3464_v27, %v3529_v52  ;;  %v3775_v27 = vld [vmem:[%s11889_s7 + $0xd0] sm:$0xff]  ;;  %v3611_v45 = vpop.permute.xlu2 %3610 }
 0x5be   : > { %4325 = vmatpush.msrb.mxu1 %v3775_v27  ;;  %v3645_v16 = vmax.f32 %v3467_v37, %v3611_v45  ;;  %v3750_v37 = vld [vmem:[%s11889_s7 + $0x8] sm:$0xff] }
 0x5bf   : > { %v3658_v2 = vmax.f32 %v3562_v20, %v3642_v53  ;;  %v9874_v26 = vld [vmem:[#allocation4 + $0xc] sm:$0xff] }
 0x5c0   : > { %v3790_v47 = vld [vmem:[#allocation4 + $0x50] sm:$0xff]  ;;  %4326 = vmatpush.msrb.mxu1 %v3771_v21 }
 0x5c1   : > { %3724 = vst.msk [vmem:[#allocation4 + $0x58] sm:$0xff] %vm3712_vm0, %v3658_v2  ;;  %6751 = vmatmul.msk.f32.gmra.mxu3 %vm3712_vm0, %v3790_v47  ;;  %6767 = vmatmul.msk.f32.gmra.mxu0 %vm3712_vm0, %v3790_v47  ;;  %v9946_v21 = vld [vmem:[#allocation4 + $0x2c] sm:$0xff] }
 0x5c2   : > { %6783 = vmatmul.msk.f32.gmra.mxu1 %vm3712_vm0, %v3790_v47  ;;  %6799 = vmatmul.msk.f32.gmra.mxu2 %vm3712_vm0, %v3790_v47  ;;  %v9892_v47 = vld [vmem:[#allocation4 + $0x14] sm:$0xff]  ;;  %v10030_v1 = vld [vmem:[#allocation4 + $0x4c] sm:$0xff] }
 0x5c3   : > { %4327 = vmatpush.msrb.mxu1 %v3767_v59 }
 0x5c4   : > { %v3609_v15 = vpop.permute.xlu0 %3608 }
 0x5c5   : > { %v3644_v49 = vmax.f32 %v3465_v39, %v3609_v15  ;;  %v3774_v39 = vld [vmem:[%s11889_s7 + $0xc8] sm:$0xff]  ;;  %4328 = vmatpush.msrb.mxu1 %v3763_v17  ;;  %v9982_v17 = vld [vmem:[#allocation4 + $0x3c] sm:$0xff] }
 0x5c6   : > { %4260 = vmatpush.msrb.mxu0 %v3774_v39 }
 0x5c7   : > { %v3660_v4 = vmax.f32 %v3564_v9, %v3644_v49  ;;  %4329 = vmatpush.msrb.mxu1 %v3759_v41  ;;  %v9910_v9 = vld [vmem:[#allocation4 + $0x1c] sm:$0xff]  ;;  %v10000_v41 = vld [vmem:[#allocation4 + $0x44] sm:$0xff] }
 0x5c8   : > { %v3791_v5 = vld [vmem:[#allocation4 + $0x58] sm:$0xff]  ;;  %4261 = vmatpush.msrb.mxu0 %v3770_v10 }
 0x5c9   : > { %3726 = vst.msk [vmem:[#allocation4 + $0x68] sm:$0xff] %vm3712_vm0, %v3660_v4  ;;  %6752 = vmatmul.msk.f32.gmra.mxu3 %vm3712_vm0, %v3791_v5  ;;  %6768 = vmatmul.msk.f32.gmra.mxu0 %vm3712_vm0, %v3791_v5 }
 0x5ca   : > { %6784 = vmatmul.msk.f32.gmra.mxu1 %vm3712_vm0, %v3791_v5  ;;  %6800 = vmatmul.msk.f32.gmra.mxu2 %vm3712_vm0, %v3791_v5 }
 0x5cb   : > { %4262 = vmatpush.msrb.mxu0 %v3766_v8  ;;  %4330 = vmatpush.msrb.mxu1 %v3755_v42  ;;  %v9964_v8 = vld [vmem:[#allocation4 + $0x34] sm:$0xff] }
 0x5cc   : > { %v6900_v42 = vld [vmem:[%s11889_s7 + $0x2f0] sm:$0xff] }
 0x5cd   : > { %4263 = vmatpush.msrb.mxu0 %v3762_v30  ;;  %4331 = vmatpush.msrb.mxu1 %v3751_v32 }
 0x5cf   : > { %4264 = vmatpush.msrb.mxu0 %v3758_v40  ;;  %4681 = vmatpush.msra.mxu1 %v6900_v42  ;;  %v6892_v42 = vld [vmem:[%s11889_s7 + $0x2b0] sm:$0xff] }
 0x5d0   : > { %v3793_v6 = vld [vmem:[#allocation4 + $0x68] sm:$0xff] }
 0x5d1   : > { %6753 = vmatmul.msk.f32.gmra.mxu3 %vm3712_vm0, %v3792_v55  ;;  %6769 = vmatmul.msk.f32.gmra.mxu0 %vm3712_vm0, %v3792_v55 }
 0x5d2   : > { %6785 = vmatmul.msk.f32.gmra.mxu1 %vm3712_vm0, %v3792_v55  ;;  %6801 = vmatmul.msk.f32.gmra.mxu2 %vm3712_vm0, %v3792_v55 }
 0x5d3   : > { %4265 = vmatpush.msrb.mxu0 %v3754_v3  ;;  %v6899_v3 = vld [vmem:[%s11889_s7 + $0x2e8] sm:$0xff] }
 0x5d5   : > { %v3531_v24 = vpop.permute.xlu1 %3530  ;;  %4266 = vmatpush.msrb.mxu0 %v3750_v37 }
 0x5d6   : > { %v3565_v35 = vmax.f32 %v3466_v46, %v3531_v24  ;;  %v3749_v46 = vld [vmem:[%s11889_s7] sm:$0xff] }
 0x5d7   : > { %4201 = vmatpush.msrb.mxu3 %v3749_v46  ;;  %4616 = vmatpush.msra.mxu0 %v6899_v3  ;;  %v10084_v3 = vld [vmem:[#allocation4 + $0x5c] sm:$0xff] }
 0x5d8   : > { %v3661_v48 = vmax.f32 %v3565_v35, %v3645_v16 }
 0x5d9   : > { %6754 = vmatmul.msk.f32.gmra.mxu3 %vm3712_vm0, %v3793_v6  ;;  %6770 = vmatmul.msk.f32.gmra.mxu0 %vm3712_vm0, %v3793_v6 }
 0x5da   : > { %3727 = vst.msk [vmem:[#allocation4 + $0x70] sm:$0xff] %vm3712_vm0, %v3661_v48  ;;  %6786 = vmatmul.msk.f32.gmra.mxu1 %vm3712_vm0, %v3793_v6  ;;  %6802 = vmatmul.msk.f32.gmra.mxu2 %vm3712_vm0, %v3793_v6 }
 0x5db   : > { %4551 = vmatpush.msra.mxu3 %v6898_v28  ;;  %v6890_v28 = vld [vmem:[%s11889_s7 + $0x2a0] sm:$0xff] }
 0x5dc   : > { %v3533_v60 = vpop.permute.xlu0 %3532 }
 0x5dd   : > { %v3613_v50 = vpop.permute.xlu1 %3612  ;;  %v3566_v44 = vmax.f32 %v3468_v23, %v3533_v60  ;;  %v10048_v60 = vld [vmem:[#allocation4 + $0x54] sm:$0xff] }
 0x5de   : > { %v3646_v56 = vmax.f32 %v3469_v54, %v3613_v50  ;;  %v9858_v23 = vpop.f32.mrf.mxu0  ;;  %v6894_v50 = vld [vmem:[%s11889_s7 + $0x2c0] sm:$0xff] }
 0x5df   : > { %12068 = vst [vmem:[#allocation66_spill] sm:$0xff] %v9858_v23  ;;  %v9860_v54 = vpop.f32.mrf.mxu1  ;;  %4552 = vmatpush.msra.mxu3 %v6894_v50  ;;  %v6893_v50 = vld [vmem:[%s11889_s7 + $0x2b8] sm:$0xff] }
 0x5e0   : > { %v3662_v11 = vmax.f32 %v3566_v44, %v3646_v56  ;;  %12069 = vst [vmem:[#allocation38_spill] sm:$0xff] %v9860_v54  ;;  %v6897_v44 = vld [vmem:[%s11889_s7 + $0x2d8] sm:$0xff]  ;;  %v6996_v54 = vld [vmem:[%s11889_s7 + $0x3f0] sm:$0xff] }
 0x5e1   : > { %v3794_v7 = vld [vmem:[#allocation4 + $0x70] sm:$0xff]  ;;  %4747 = vmatpush.msra.mxu2 %v6897_v44  ;;  %4553 = vmatpush.msra.mxu3 %v6890_v28  ;;  %v6886_v44 = vld [vmem:[%s11889_s7 + $0x280] sm:$0xff]  ;;  %v6889_v28 = vld [vmem:[%s11889_s7 + $0x298] sm:$0xff] }
 0x5e2   : > { %3728 = vst.msk [vmem:[#allocation4 + $0x78] sm:$0xff] %vm3712_vm0, %v3662_v11  ;;  %6755 = vmatmul.msk.f32.gmra.mxu3 %vm3712_vm0, %v3794_v7  ;;  %6771 = vmatmul.msk.f32.gmra.mxu0 %vm3712_vm0, %v3794_v7 }
 0x5e3   : > { %6787 = vmatmul.msk.f32.gmra.mxu1 %vm3712_vm0, %v3794_v7  ;;  %6803 = vmatmul.msk.f32.gmra.mxu2 %vm3712_vm0, %v3794_v7 }
 0x5e4   : > { %v9866_v0 = vpop.f32.mrf.mxu3  ;;  %4748 = vmatpush.msra.mxu2 %v6893_v50  ;;  %4554 = vmatpush.msra.mxu3 %v6886_v44  ;;  %v6879_v44 = vld [vmem:[%s11889_s7 + $0x248] sm:$0xff] }
 0x5e5   : > { %v9868_v38 = vpop.f32.mrf.mxu2 }
 0x5e6   : > { %4749 = vmatpush.msra.mxu2 %v6889_v28  ;;  %v6881_v28 = vld [vmem:[%s11889_s7 + $0x258] sm:$0xff] }
 0x5e9   : > { %v3795_v36 = vld [vmem:[#allocation4 + $0x78] sm:$0xff] }
 0x5ea   : > { %6756 = vmatmul.msk.f32.gmra.mxu3 %vm3712_vm0, %v3795_v36  ;;  %6772 = vmatmul.msk.f32.gmra.mxu0 %vm3712_vm0, %v3795_v36 }
 0x5eb   : > { %6788 = vmatmul.msk.f32.gmra.mxu1 %vm3712_vm0, %v3795_v36  ;;  %6804 = vmatmul.msk.f32.gmra.mxu2 %vm3712_vm0, %v3795_v36  ;;  %v6895_v36 = vld [vmem:[%s11889_s7 + $0x2c8] sm:$0xff] }
 0x5ec   : > { %4617 = vmatpush.msra.mxu0 %v6895_v36  ;;  %v6887_v36 = vld [vmem:[%s11889_s7 + $0x288] sm:$0xff] }
 0x5ee   : > { %4618 = vmatpush.msra.mxu0 %v6891_v58 }
 0x5f0   : > { %4619 = vmatpush.msra.mxu0 %v6887_v36 }
 0x5f2   : > { %6757 = vmatmul.msk.f32.gmra.mxu3 %vm3712_vm0, %v3796_v31  ;;  %6773 = vmatmul.msk.f32.gmra.mxu0 %vm3712_vm0, %v3796_v31 }
 0x5f3   : > { %6789 = vmatmul.msk.f32.gmra.mxu1 %vm3712_vm0, %v3796_v31  ;;  %6805 = vmatmul.msk.f32.gmra.mxu2 %vm3712_vm0, %v3796_v31  ;;  %v6896_v31 = vld [vmem:[%s11889_s7 + $0x2d0] sm:$0xff] }
 0x5f4   : > { %4682 = vmatpush.msra.mxu1 %v6896_v31  ;;  %v6888_v31 = vld [vmem:[%s11889_s7 + $0x290] sm:$0xff] }
 0x5f6   : > { %4683 = vmatpush.msra.mxu1 %v6892_v42  ;;  %v6885_v42 = vld [vmem:[%s11889_s7 + $0x278] sm:$0xff] }
 0x5f7   : > { %4750 = vmatpush.msra.mxu2 %v6885_v42 }
 0x5f8   : > { %4684 = vmatpush.msra.mxu1 %v6888_v31  ;;  %v6880_v31 = vld [vmem:[%s11889_s7 + $0x250] sm:$0xff] }
 0x5f9   : > { %4751 = vmatpush.msra.mxu2 %v6881_v28 }
 0x5fa   : > { %6806 = vmatmul.msk.f32.vlgmr.msrb.gmra.mxu3 %vm3712_vm0, %v3733_v29  ;;  %6822 = vmatmul.msk.f32.vlgmr.msrb.gmra.mxu0 %vm3712_vm0, %v3733_v29 }
 0x5fb   : > { %6838 = vmatmul.msk.f32.vlgmr.msrb.gmra.mxu1 %vm3712_vm0, %v3733_v29  ;;  %6854 = vmatmul.msk.f32.vlgmr.msrb.gmra.mxu2 %vm3712_vm0, %v3733_v29 }
 0x5fe   : > { %v9870_v63 = vpop.f32.mrf.mxu0 }
 0x5ff   : > { %12070 = vst [vmem:[#allocation17_spill] sm:$0xff] %v9870_v63  ;;  %v9872_v62 = vpop.f32.mrf.mxu1 }
 0x600   : > { %12071 = vst [vmem:[#allocation16_spill] sm:$0xff] %v9872_v62 }
 0x602   : > { %6807 = vmatmul.msk.f32.gmra.mxu3 %vm3712_vm0, %v9874_v26  ;;  %6823 = vmatmul.msk.f32.gmra.mxu0 %vm3712_vm0, %v9874_v26 }
 0x603   : > { %6839 = vmatmul.msk.f32.gmra.mxu1 %vm3712_vm0, %v9874_v26  ;;  %6855 = vmatmul.msk.f32.gmra.mxu2 %vm3712_vm0, %v9874_v26 }
 0x604   : > { %v9884_v33 = vpop.f32.mrf.mxu3 }
 0x605   : > { %v9886_v53 = vpop.f32.mrf.mxu2 }
 0x606   : > { %v9888_v20 = vpop.f32.mrf.mxu0 }
 0x607   : > { %12072 = vst [vmem:[#allocation41_spill] sm:$0xff] %v9888_v20  ;;  %v9890_v2 = vpop.f32.mrf.mxu1 }
 0x608   : > { %12073 = vst [vmem:[#allocation19_spill] sm:$0xff] %v9890_v2 }
 0x60a   : > { %6808 = vmatmul.msk.f32.gmra.mxu3 %vm3712_vm0, %v9892_v47  ;;  %6824 = vmatmul.msk.f32.gmra.mxu0 %vm3712_vm0, %v9892_v47 }
 0x60b   : > { %6840 = vmatmul.msk.f32.gmra.mxu1 %vm3712_vm0, %v9892_v47  ;;  %6856 = vmatmul.msk.f32.gmra.mxu2 %vm3712_vm0, %v9892_v47 }
 0x60c   : > { %v9902_v52 = vpop.f32.mrf.mxu3 }
 0x60d   : > { %v9904_v12 = vpop.f32.mrf.mxu2 }
 0x60e   : > { %v9906_v57 = vpop.f32.mrf.mxu0 }
 0x60f   : > { %12074 = vst [vmem:[#allocation21_spill] sm:$0xff] %v9906_v57  ;;  %v9908_v15 = vpop.f32.mrf.mxu1 }
 0x610   : > { %12075 = vst [vmem:[#allocation59_spill] sm:$0xff] %v9908_v15 }
 0x612   : > { %6809 = vmatmul.msk.f32.gmra.mxu3 %vm3712_vm0, %v9910_v9  ;;  %6825 = vmatmul.msk.f32.gmra.mxu0 %vm3712_vm0, %v9910_v9 }
 0x613   : > { %6841 = vmatmul.msk.f32.gmra.mxu1 %vm3712_vm0, %v9910_v9  ;;  %6857 = vmatmul.msk.f32.gmra.mxu2 %vm3712_vm0, %v9910_v9 }
 0x614   : > { %v9920_v49 = vpop.f32.mrf.mxu3 }
 0x615   : > { %v9922_v4 = vpop.f32.mrf.mxu2 }
 0x616   : > { %v9924_v5 = vpop.f32.mrf.mxu0 }
 0x617   : > { %12076 = vst [vmem:[#allocation63_spill] sm:$0xff] %v9924_v5  ;;  %v9926_v43 = vpop.f32.mrf.mxu1 }
 0x618   : > { %12077 = vst [vmem:[#allocation56_spill] sm:$0xff] %v9926_v43 }
 0x61a   : > { %6810 = vmatmul.msk.f32.gmra.mxu3 %vm3712_vm0, %v9928_v13  ;;  %6826 = vmatmul.msk.f32.gmra.mxu0 %vm3712_vm0, %v9928_v13 }
 0x61b   : > { %6842 = vmatmul.msk.f32.gmra.mxu1 %vm3712_vm0, %v9928_v13  ;;  %6858 = vmatmul.msk.f32.gmra.mxu2 %vm3712_vm0, %v9928_v13 }
 0x61c   : > { %v9938_v39 = vpop.f32.mrf.mxu3 }
 0x61d   : > { %v9940_v27 = vpop.f32.mrf.mxu2 }
 0x61e   : > { %v9942_v25 = vpop.f32.mrf.mxu0 }
 0x61f   : > { %12078 = vst [vmem:[#allocation69_spill] sm:$0xff] %v9942_v25  ;;  %v9944_v10 = vpop.f32.mrf.mxu1 }
 0x620   : > { %12079 = vst [vmem:[#allocation40_spill] sm:$0xff] %v9944_v10 }
 0x622   : > { %6811 = vmatmul.msk.f32.gmra.mxu3 %vm3712_vm0, %v9946_v21  ;;  %6827 = vmatmul.msk.f32.gmra.mxu0 %vm3712_vm0, %v9946_v21 }
 0x623   : > { %6843 = vmatmul.msk.f32.gmra.mxu1 %vm3712_vm0, %v9946_v21  ;;  %6859 = vmatmul.msk.f32.gmra.mxu2 %vm3712_vm0, %v9946_v21 }
 0x624   : > { %v9956_v61 = vpop.f32.mrf.mxu3 }
 0x625   : > { %v9958_v19 = vpop.f32.mrf.mxu2 }
 0x626   : > { %v9960_v55 = vpop.f32.mrf.mxu0 }
 0x627   : > { %12080 = vst [vmem:[#allocation44_spill] sm:$0xff] %v9960_v55  ;;  %v9962_v34 = vpop.f32.mrf.mxu1 }
 0x628   : > { %12081 = vst [vmem:[#allocation67_spill] sm:$0xff] %v9962_v34 }
 0x62a   : > { %6812 = vmatmul.msk.f32.gmra.mxu3 %vm3712_vm0, %v9964_v8  ;;  %6828 = vmatmul.msk.f32.gmra.mxu0 %vm3712_vm0, %v9964_v8 }
 0x62b   : > { %6844 = vmatmul.msk.f32.gmra.mxu1 %vm3712_vm0, %v9964_v8  ;;  %6860 = vmatmul.msk.f32.gmra.mxu2 %vm3712_vm0, %v9964_v8 }
 0x62c   : > { %v9974_v59 = vpop.f32.mrf.mxu3 }
 0x62d   : > { %v9976_v45 = vpop.f32.mrf.mxu2 }
 0x62e   : > { %v9978_v18 = vpop.f32.mrf.mxu0 }
 0x62f   : > { %12082 = vst [vmem:[#allocation20_spill] sm:$0xff] %v9978_v18  ;;  %v9980_v30 = vpop.f32.mrf.mxu1 }
 0x630   : > { %12083 = vst [vmem:[#allocation18_spill] sm:$0xff] %v9980_v30 }
 0x632   : > { %6813 = vmatmul.msk.f32.gmra.mxu3 %vm3712_vm0, %v9982_v17  ;;  %6829 = vmatmul.msk.f32.gmra.mxu0 %vm3712_vm0, %v9982_v17 }
 0x633   : > { %6845 = vmatmul.msk.f32.gmra.mxu1 %vm3712_vm0, %v9982_v17  ;;  %6861 = vmatmul.msk.f32.gmra.mxu2 %vm3712_vm0, %v9982_v17 }
 0x634   : > { %v9992_v22 = vpop.f32.mrf.mxu3 }
 0x635   : > { %v9994_v51 = vpop.f32.mrf.mxu2 }
 0x636   : > { %v9996_v40 = vpop.f32.mrf.mxu0 }
 0x637   : > { %12084 = vst [vmem:[#allocation23_spill] sm:$0xff] %v9996_v40  ;;  %v9998_v24 = vpop.f32.mrf.mxu1 }
 0x638   : > { %12085 = vst [vmem:[#allocation25_spill] sm:$0xff] %v9998_v24  ;;  %v6872_v24 = vld [vmem:[%s11889_s7 + $0x210] sm:$0xff] }
 0x63a   : > { %6814 = vmatmul.msk.f32.gmra.mxu3 %vm3712_vm0, %v10000_v41  ;;  %6830 = vmatmul.msk.f32.gmra.mxu0 %vm3712_vm0, %v10000_v41 }
 0x63b   : > { %6846 = vmatmul.msk.f32.gmra.mxu1 %vm3712_vm0, %v10000_v41  ;;  %6862 = vmatmul.msk.f32.gmra.mxu2 %vm3712_vm0, %v10000_v41 }
 0x63c   : > { %v10016_v16 = vpop.f32.mrf.mxu3 }
 0x63d   : > { %v10018_v35 = vpop.f32.mrf.mxu2 }
 0x63e   : > { %v10020_v48 = vpop.f32.mrf.mxu0 }
 0x63f   : > { %12086 = vst [vmem:[#allocation61_spill] sm:$0xff] %v10020_v48  ;;  %v10022_v6 = vpop.f32.mrf.mxu1  ;;  %v10138_v48 = vld [vmem:[#allocation4 + $0x64] sm:$0xff] }
 0x640   : > { %12087 = vst [vmem:[#allocation57_spill] sm:$0xff] %v10022_v6  ;;  %v6878_v6 = vld [vmem:[%s11889_s7 + $0x240] sm:$0xff] }
 0x642   : > { %6815 = vmatmul.msk.f32.gmra.mxu3 %vm3712_vm0, %v10030_v1  ;;  %6831 = vmatmul.msk.f32.gmra.mxu0 %vm3712_vm0, %v10030_v1 }
 0x643   : > { %6847 = vmatmul.msk.f32.gmra.mxu1 %vm3712_vm0, %v10030_v1  ;;  %6863 = vmatmul.msk.f32.gmra.mxu2 %vm3712_vm0, %v10030_v1 }
 0x644   : > { %v10040_v46 = vpop.f32.mrf.mxu3 }
 0x645   : > { %v10042_v37 = vpop.f32.mrf.mxu2 }
 0x646   : > { %v10044_v32 = vpop.f32.mrf.mxu0 }
 0x647   : > { %12088 = vst [vmem:[#allocation42_spill] sm:$0xff] %v10044_v32  ;;  %v10046_v14 = vpop.f32.mrf.mxu1  ;;  %v6884_v32 = vld [vmem:[%s11889_s7 + $0x270] sm:$0xff] }
 0x648   : > { %12089 = vst [vmem:[#allocation24_spill] sm:$0xff] %v10046_v14  ;;  %4685 = vmatpush.msra.mxu1 %v6884_v32  ;;  %v6874_v32 = vld [vmem:[%s11889_s7 + $0x220] sm:$0xff] }
 0x64a   : > { %6816 = vmatmul.msk.f32.gmra.mxu3 %vm3712_vm0, %v10048_v60  ;;  %6832 = vmatmul.msk.f32.gmra.mxu0 %vm3712_vm0, %v10048_v60 }
 0x64b   : > { %6848 = vmatmul.msk.f32.gmra.mxu1 %vm3712_vm0, %v10048_v60  ;;  %6864 = vmatmul.msk.f32.gmra.mxu2 %vm3712_vm0, %v10048_v60 }
 0x64c   : > { %v10064_v56 = vpop.f32.mrf.mxu3  ;;  %4686 = vmatpush.msra.mxu1 %v6880_v31  ;;  %v6873_v31 = vld [vmem:[%s11889_s7 + $0x218] sm:$0xff] }
 0x64d   : > { %v10066_v11 = vpop.f32.mrf.mxu2 }
 0x64e   : > { %v10068_v7 = vpop.f32.mrf.mxu0 }
 0x64f   : > { %12090 = vst [vmem:[#allocation22_spill] sm:$0xff] %v10068_v7  ;;  %v10076_v29 = vpop.f32.mrf.mxu1  ;;  %v6883_v7 = vld [vmem:[%s11889_s7 + $0x268] sm:$0xff] }
 0x650   : > { %12091 = vst [vmem:[#allocation46_spill] sm:$0xff] %v10076_v29  ;;  %v6882_v29 = vld [vmem:[%s11889_s7 + $0x260] sm:$0xff]  ;;  %4620 = vmatpush.msra.mxu0 %v6883_v7  ;;  %v6876_v7 = vld [vmem:[%s11889_s7 + $0x230] sm:$0xff] }
 0x651   : > { %4555 = vmatpush.msra.mxu3 %v6882_v29  ;;  %v6877_v29 = vld [vmem:[%s11889_s7 + $0x238] sm:$0xff]  ;;  %4687 = vmatpush.msra.mxu1 %v6876_v7 }
 0x652   : > { %6817 = vmatmul.msk.f32.gmra.mxu3 %vm3712_vm0, %v10084_v3  ;;  %6833 = vmatmul.msk.f32.gmra.mxu0 %vm3712_vm0, %v10084_v3 }
 0x653   : > { %6849 = vmatmul.msk.f32.gmra.mxu1 %vm3712_vm0, %v10084_v3  ;;  %6865 = vmatmul.msk.f32.gmra.mxu2 %vm3712_vm0, %v10084_v3 }
 0x654   : > { %v10112_v58 = vpop.f32.mrf.mxu3  ;;  %4556 = vmatpush.msra.mxu3 %v6878_v6  ;;  %4621 = vmatpush.msra.mxu0 %v6879_v44  ;;  %v6875_v6 = vld [vmem:[%s11889_s7 + $0x228] sm:$0xff]  ;;  %v6870_v44 = vld [vmem:[%s11889_s7 + $0x200] sm:$0xff] }
 0x655   : > { %v10120_v14 = vpop.f32.mrf.mxu2  ;;  %4752 = vmatpush.msra.mxu2 %v6877_v29  ;;  %4688 = vmatpush.msra.mxu1 %v6872_v24  ;;  %v10204_v29 = vld [vmem:[#allocation4 + $0x74] sm:$0xff] }
 0x656   : > { %v10128_v50 = vpop.f32.mrf.mxu0  ;;  %4557 = vmatpush.msra.mxu3 %v6874_v32  ;;  %4622 = vmatpush.msra.mxu0 %v6875_v6  ;;  %v10186_v32 = vld [vmem:[#allocation4 + $0x6c] sm:$0xff] }
 0x657   : > { %12092 = vst [vmem:[#allocation27_spill] sm:$0xff] %v10128_v50  ;;  %v10136_v36 = vpop.f32.mrf.mxu1  ;;  %4753 = vmatpush.msra.mxu2 %v6873_v31  ;;  %5102 = vmatpush.msrb.mxu1 %v6996_v54  ;;  %v6990_v54 = vld [vmem:[%s11889_s7 + $0x3c0] sm:$0xff] }
 0x658   : > { %12093 = vst [vmem:[#allocation30_spill] sm:$0xff] %v10136_v36  ;;  %v6871_v36 = vld [vmem:[%s11889_s7 + $0x208] sm:$0xff]  ;;  %4558 = vmatpush.msra.mxu3 %v6870_v44 }
 0x659   : > { %4623 = vmatpush.msra.mxu0 %v6871_v36 }
 0x65a   : > { %6818 = vmatmul.msk.f32.gmra.mxu3 %vm3712_vm0, %v10138_v48  ;;  %6834 = vmatmul.msk.f32.gmra.mxu0 %vm3712_vm0, %v10138_v48 }
 0x65b   : > { %6850 = vmatmul.msk.f32.gmra.mxu1 %vm3712_vm0, %v10138_v48  ;;  %6866 = vmatmul.msk.f32.gmra.mxu2 %vm3712_vm0, %v10138_v48 }
 0x65c   : > { %v10166_v42 = vpop.f32.mrf.mxu3 }
 0x65d   : > { %v10174_v50 = vpop.f32.mrf.mxu2 }
 0x65f   : > { %v10182_v28 = vpop.f32.mrf.mxu0 }
 0x660   : > { %12094 = vst [vmem:[#allocation64_spill] sm:$0xff] %v10182_v28  ;;  %v10184_v40 = vpop.f32.mrf.mxu1 }
 0x661   : > { %12095 = vst [vmem:[#allocation58_spill] sm:$0xff] %v10184_v40  ;;  %v10222_v40 = vld [vmem:[#allocation4 + $0x7c] sm:$0xff] }
 0x662   : > { %6819 = vmatmul.msk.f32.gmra.mxu3 %vm3712_vm0, %v10186_v32  ;;  %6835 = vmatmul.msk.f32.gmra.mxu0 %vm3712_vm0, %v10186_v32 }
 0x663   : > { %6851 = vmatmul.msk.f32.gmra.mxu1 %vm3712_vm0, %v10186_v32  ;;  %6867 = vmatmul.msk.f32.gmra.mxu2 %vm3712_vm0, %v10186_v32 }
 0x665   : > { %v10196_v6 = vpop.f32.mrf.mxu3 }
 0x666   : > { %12096 = vst [vmem:[#allocation45_spill] sm:$0xff] %v10196_v6  ;;  %v10198_v36 = vpop.f32.mrf.mxu2 }
 0x667   : > { %12097 = vst [vmem:[#allocation28_spill] sm:$0xff] %v10198_v36  ;;  %v10200_v24 = vpop.f32.mrf.mxu0 }
 0x668   : > { %12098 = vst [vmem:[#allocation26_spill] sm:$0xff] %v10200_v24  ;;  %v10202_v7 = vpop.f32.mrf.mxu1 }
 0x669   : > { %12099 = vst [vmem:[#allocation49_spill] sm:$0xff] %v10202_v7 }
 0x66a   : > { %6820 = vmatmul.msk.f32.gmra.mxu3 %vm3712_vm0, %v10204_v29  ;;  %6836 = vmatmul.msk.f32.gmra.mxu0 %vm3712_vm0, %v10204_v29 }
 0x66b   : > { %6852 = vmatmul.msk.f32.gmra.mxu1 %vm3712_vm0, %v10204_v29  ;;  %6868 = vmatmul.msk.f32.gmra.mxu2 %vm3712_vm0, %v10204_v29 }
 0x66d   : > { %v10214_v44 = vpop.f32.mrf.mxu3 }
 0x66e   : > { %12100 = vst [vmem:[#allocation35_spill] sm:$0xff] %v10214_v44  ;;  %v10216_v31 = vpop.f32.mrf.mxu2  ;;  %v6980_v44 = vld [vmem:[%s11889_s7 + $0x370] sm:$0xff] }
 0x66f   : > { %12101 = vst [vmem:[#allocation32_spill] sm:$0xff] %v10216_v31  ;;  %v10218_v24 = vpop.f32.mrf.mxu0 }
 0x670   : > { %12102 = vst [vmem:[#allocation68_spill] sm:$0xff] %v10218_v24  ;;  %v10220_v7 = vpop.f32.mrf.mxu1 }
 0x671   : > { %12103 = vst [vmem:[#allocation72_spill] sm:$0xff] %v10220_v7 }
 0x672   : > { %6821 = vmatmul.msk.f32.gmra.mxu3 %vm3712_vm0, %v10222_v40  ;;  %6837 = vmatmul.msk.f32.gmra.mxu0 %vm3712_vm0, %v10222_v40 }
 0x673   : > { %6853 = vmatmul.msk.f32.gmra.mxu1 %vm3712_vm0, %v10222_v40  ;;  %6869 = vmatmul.msk.f32.gmra.mxu2 %vm3712_vm0, %v10222_v40 }
 0x675   : > { %v10232_v28 = vpop.f32.mrf.mxu3 }
 0x676   : > { %12104 = vst [vmem:[#allocation60_spill] sm:$0xff] %v10232_v28  ;;  %v10234_v30 = vpop.f32.mrf.mxu2  ;;  %v6985_v28 = vld [vmem:[%s11889_s7 + $0x398] sm:$0xff] }
 0x677   : > { %12105 = vst [vmem:[#allocation76_spill] sm:$0xff] %v10234_v30  ;;  %v10236_v24 = vpop.f32.mrf.mxu0  ;;  %v6984_v30 = vld [vmem:[%s11889_s7 + $0x390] sm:$0xff] }
 0x678   : > { %12106 = vst [vmem:[#allocation47_spill] sm:$0xff] %v10236_v24  ;;  %v10238_v7 = vpop.f32.mrf.mxu1  ;;  %v6992_v24 = vld [vmem:[%s11889_s7 + $0x3d0] sm:$0xff] }
 0x679   : > { %12107 = vst [vmem:[#allocation51_spill] sm:$0xff] %v10238_v7  ;;  %5103 = vmatpush.msrb.mxu1 %v6992_v24  ;;  %v6989_v24 = vld [vmem:[%s11889_s7 + $0x3b8] sm:$0xff] }
 0x67a   : > { %6902 = vmatmul.msk.f32.vlgmr.msra.gmra.mxu3 %vm3712_vm0, %v9874_v26  ;;  %6918 = vmatmul.msk.f32.vlgmr.msra.gmra.mxu0 %vm3712_vm0, %v9874_v26 }
 0x67b   : > { %6934 = vmatmul.msk.f32.vlgmr.msra.gmra.mxu1 %vm3712_vm0, %v9874_v26  ;;  %6950 = vmatmul.msk.f32.vlgmr.msra.gmra.mxu2 %vm3712_vm0, %v9874_v26 }
 0x67d   : > { %v10248_v18 = vpop.f32.mrf.mxu3 }
 0x67e   : > { %v10250_v34 = vpop.f32.mrf.mxu2 }
 0x67f   : > { %v10252_v55 = vpop.f32.mrf.mxu0 }
 0x680   : > { %12108 = vst [vmem:[#allocation74_spill] sm:$0xff] %v10252_v55  ;;  %v10254_v10 = vpop.f32.mrf.mxu1 }
 0x681   : > { %12109 = vst [vmem:[#allocation36_spill] sm:$0xff] %v10254_v10 }
 0x682   : > { %6903 = vmatmul.msk.f32.gmra.mxu3 %vm3712_vm0, %v9892_v47  ;;  %6919 = vmatmul.msk.f32.gmra.mxu0 %vm3712_vm0, %v9892_v47 }
 0x683   : > { %6935 = vmatmul.msk.f32.gmra.mxu1 %vm3712_vm0, %v9892_v47  ;;  %6951 = vmatmul.msk.f32.gmra.mxu2 %vm3712_vm0, %v9892_v47 }
 0x685   : > { %v10264_v26 = vpop.f32.mrf.mxu3 }
 0x686   : > { %v10266_v25 = vpop.f32.mrf.mxu2 }
 0x687   : > { %v10268_v43 = vpop.f32.mrf.mxu0 }
 0x688   : > { %12110 = vst [vmem:[#allocation31_spill] sm:$0xff] %v10268_v43  ;;  %v10270_v5 = vpop.f32.mrf.mxu1 }
 0x689   : > { %12111 = vst [vmem:[#allocation71_spill] sm:$0xff] %v10270_v5 }
 0x68a   : > { %6904 = vmatmul.msk.f32.gmra.mxu3 %vm3712_vm0, %v9910_v9  ;;  %6920 = vmatmul.msk.f32.gmra.mxu0 %vm3712_vm0, %v9910_v9 }
 0x68b   : > { %6936 = vmatmul.msk.f32.gmra.mxu1 %vm3712_vm0, %v9910_v9  ;;  %6952 = vmatmul.msk.f32.gmra.mxu2 %vm3712_vm0, %v9910_v9 }
 0x68d   : > { %v10280_v47 = vpop.f32.mrf.mxu3 }
 0x68e   : > { %v10282_v15 = vpop.f32.mrf.mxu2 }
 0x68f   : > { %v10284_v57 = vpop.f32.mrf.mxu0 }
 0x690   : > { %12112 = vst [vmem:[#allocation37_spill] sm:$0xff] %v10284_v57  ;;  %v10286_v2 = vpop.f32.mrf.mxu1 }
 0x691   : > { %12113 = vst [vmem:[#allocation34_spill] sm:$0xff] %v10286_v2 }
 0x692   : > { %6905 = vmatmul.msk.f32.gmra.mxu3 %vm3712_vm0, %v9928_v13  ;;  %6921 = vmatmul.msk.f32.gmra.mxu0 %vm3712_vm0, %v9928_v13 }
 0x693   : > { %6937 = vmatmul.msk.f32.gmra.mxu1 %vm3712_vm0, %v9928_v13  ;;  %6953 = vmatmul.msk.f32.gmra.mxu2 %vm3712_vm0, %v9928_v13 }
 0x695   : > { %v10296_v9 = vpop.f32.mrf.mxu3 }
 0x696   : > { %v10298_v5 = vpop.f32.mrf.mxu2 }
 0x697   : > { %v10300_v43 = vpop.f32.mrf.mxu0 }
 0x698   : > { %12114 = vst [vmem:[#allocation62_spill] sm:$0xff] %v10300_v43  ;;  %v10302_v57 = vpop.f32.mrf.mxu1 }
 0x699   : > { %12115 = vst [vmem:[#allocation50_spill] sm:$0xff] %v10302_v57 }
 0x69a   : > { %6906 = vmatmul.msk.f32.gmra.mxu3 %vm3712_vm0, %v9946_v21  ;;  %6922 = vmatmul.msk.f32.gmra.mxu0 %vm3712_vm0, %v9946_v21 }
 0x69b   : > { %6938 = vmatmul.msk.f32.gmra.mxu1 %vm3712_vm0, %v9946_v21  ;;  %6954 = vmatmul.msk.f32.gmra.mxu2 %vm3712_vm0, %v9946_v21 }
 0x69d   : > { %v10312_v13 = vpop.f32.mrf.mxu3 }
 0x69e   : > { %v10314_v2 = vpop.f32.mrf.mxu2 }
 0x69f   : > { %v10316_v20 = vpop.f32.mrf.mxu0 }
 0x6a0   : > { %12116 = vst [vmem:[#allocation39_spill] sm:$0xff] %v10316_v20  ;;  %v10318_v43 = vpop.f32.mrf.mxu1 }
 0x6a1   : > { %12117 = vst [vmem:[#allocation33_spill] sm:$0xff] %v10318_v43 }
 0x6a2   : > { %6907 = vmatmul.msk.f32.gmra.mxu3 %vm3712_vm0, %v9964_v8  ;;  %6923 = vmatmul.msk.f32.gmra.mxu0 %vm3712_vm0, %v9964_v8 }
 0x6a3   : > { %6939 = vmatmul.msk.f32.gmra.mxu1 %vm3712_vm0, %v9964_v8  ;;  %6955 = vmatmul.msk.f32.gmra.mxu2 %vm3712_vm0, %v9964_v8 }
 0x6a5   : > { %v10328_v21 = vpop.f32.mrf.mxu3 }
 0x6a6   : > { %v10330_v57 = vpop.f32.mrf.mxu2 }
 0x6a7   : > { %v10332_v10 = vpop.f32.mrf.mxu0 }
 0x6a8   : > { %12118 = vst [vmem:[#allocation53_spill] sm:$0xff] %v10332_v10  ;;  %v10334_v20 = vpop.f32.mrf.mxu1 }
 0x6a9   : > { %12119 = vst [vmem:[#allocation73_spill] sm:$0xff] %v10334_v20 }
 0x6aa   : > { %6908 = vmatmul.msk.f32.gmra.mxu3 %vm3712_vm0, %v9982_v17  ;;  %6924 = vmatmul.msk.f32.gmra.mxu0 %vm3712_vm0, %v9982_v17 }
 0x6ab   : > { %6940 = vmatmul.msk.f32.gmra.mxu1 %vm3712_vm0, %v9982_v17  ;;  %6956 = vmatmul.msk.f32.gmra.mxu2 %vm3712_vm0, %v9982_v17 }
 0x6ad   : > { %v10344_v8 = vpop.f32.mrf.mxu3 }
 0x6ae   : > { %v10346_v43 = vpop.f32.mrf.mxu2 }
 0x6af   : > { %v10348_v62 = vpop.f32.mrf.mxu0 }
 0x6b0   : > { %12120 = vst [vmem:[#allocation70_spill] sm:$0xff] %v10348_v62  ;;  %v10350_v10 = vpop.f32.mrf.mxu1 }
 0x6b1   : > { %12121 = vst [vmem:[#allocation48_spill] sm:$0xff] %v10350_v10 }
 0x6b2   : > { %6909 = vmatmul.msk.f32.gmra.mxu3 %vm3712_vm0, %v10000_v41  ;;  %6925 = vmatmul.msk.f32.gmra.mxu0 %vm3712_vm0, %v10000_v41 }
 0x6b3   : > { %6941 = vmatmul.msk.f32.gmra.mxu1 %vm3712_vm0, %v10000_v41  ;;  %6957 = vmatmul.msk.f32.gmra.mxu2 %vm3712_vm0, %v10000_v41  ;;  %v6994_v41 = vld [vmem:[%s11889_s7 + $0x3e0] sm:$0xff] }
 0x6b4   : > { %4972 = vmatpush.msrb.mxu3 %v6994_v41 }
 0x6b5   : > { %v10360_v17 = vpop.f32.mrf.mxu3 }
 0x6b6   : > { %v10362_v20 = vpop.f32.mrf.mxu2  ;;  %4973 = vmatpush.msrb.mxu3 %v6990_v54  ;;  %v6986_v54 = vld [vmem:[%s11889_s7 + $0x3a0] sm:$0xff] }
 0x6b7   : > { %v10364_v55 = vpop.f32.mrf.mxu0 }
 0x6b8   : > { %12122 = vst [vmem:[#allocation65_spill] sm:$0xff] %v10364_v55  ;;  %v10366_v62 = vpop.f32.mrf.mxu1  ;;  %4974 = vmatpush.msrb.mxu3 %v6986_v54  ;;  %v6979_v54 = vld [vmem:[%s11889_s7 + $0x368] sm:$0xff] }
 0x6b9   : > { %12123 = vst [vmem:[#allocation52_spill] sm:$0xff] %v10366_v62  ;;  %v6997_v62 = vld [vmem:[%s11889_s7 + $0x3f8] sm:$0xff] }
 0x6ba   : > { %6910 = vmatmul.msk.f32.gmra.mxu3 %vm3712_vm0, %v10030_v1  ;;  %6926 = vmatmul.msk.f32.gmra.mxu0 %vm3712_vm0, %v10030_v1 }
 0x6bb   : > { %6942 = vmatmul.msk.f32.gmra.mxu1 %vm3712_vm0, %v10030_v1  ;;  %6958 = vmatmul.msk.f32.gmra.mxu2 %vm3712_vm0, %v10030_v1  ;;  %v6995_v1 = vld [vmem:[%s11889_s7 + $0x3e8] sm:$0xff] }
 0x6bc   : > { %5167 = vmatpush.msrb.mxu2 %v6997_v62  ;;  %5037 = vmatpush.msrb.mxu0 %v6995_v1 }
 0x6bd   : > { %v10382_v55 = vpop.f32.mrf.mxu3 }
 0x6be   : > { %v10384_v10 = vpop.f32.mrf.mxu2 }
 0x6bf   : > { %v10386_v63 = vpop.f32.mrf.mxu0 }
 0x6c0   : > { %12124 = vst [vmem:[#allocation55_spill] sm:$0xff] %v10386_v63  ;;  %v10388_v7 = vpop.f32.mrf.mxu1 }
 0x6c1   : > { %12125 = vst [vmem:[#allocation43_spill] sm:$0xff] %v10388_v7 }
 0x6c2   : > { %6911 = vmatmul.msk.f32.gmra.mxu3 %vm3712_vm0, %v10048_v60  ;;  %6927 = vmatmul.msk.f32.gmra.mxu0 %vm3712_vm0, %v10048_v60 }
 0x6c3   : > { %6943 = vmatmul.msk.f32.gmra.mxu1 %vm3712_vm0, %v10048_v60  ;;  %6959 = vmatmul.msk.f32.gmra.mxu2 %vm3712_vm0, %v10048_v60  ;;  %v6993_v60 = vld [vmem:[%s11889_s7 + $0x3d8] sm:$0xff] }
 0x6c4   : > { %5168 = vmatpush.msrb.mxu2 %v6993_v60  ;;  %v6987_v60 = vld [vmem:[%s11889_s7 + $0x3a8] sm:$0xff] }
 0x6c5   : > { %v10404_v62 = vpop.f32.mrf.mxu3 }
 0x6c6   : > { %v10406_v41 = vpop.f32.mrf.mxu2  ;;  %5169 = vmatpush.msrb.mxu2 %v6989_v24 }
 0x6c7   : > { %v10408_v7 = vpop.f32.mrf.mxu0 }
 0x6c8   : > { %12126 = vst [vmem:[#allocation75_spill] sm:$0xff] %v10408_v7  ;;  %v10410_v63 = vpop.f32.mrf.mxu1  ;;  %5170 = vmatpush.msrb.mxu2 %v6985_v28  ;;  %v6977_v28 = vld [vmem:[%s11889_s7 + $0x358] sm:$0xff] }
 0x6c9   : > { %12127 = vst [vmem:[#allocation54_spill] sm:$0xff] %v10410_v63 }
 0x6ca   : > { %6912 = vmatmul.msk.f32.gmra.mxu3 %vm3712_vm0, %v10084_v3  ;;  %6928 = vmatmul.msk.f32.gmra.mxu0 %vm3712_vm0, %v10084_v3 }
 0x6cb   : > { %6944 = vmatmul.msk.f32.gmra.mxu1 %vm3712_vm0, %v10084_v3  ;;  %6960 = vmatmul.msk.f32.gmra.mxu2 %vm3712_vm0, %v10084_v3  ;;  %v6991_v3 = vld [vmem:[%s11889_s7 + $0x3c8] sm:$0xff] }
 0x6cc   : > { %5038 = vmatpush.msrb.mxu0 %v6991_v3  ;;  %v6982_v3 = vld [vmem:[%s11889_s7 + $0x380] sm:$0xff] }
 0x6cd   : > { %v10426_v1 = vpop.f32.mrf.mxu3  ;;  %4975 = vmatpush.msrb.mxu3 %v6982_v3  ;;  %v6975_v3 = vld [vmem:[%s11889_s7 + $0x348] sm:$0xff] }
 0x6ce   : > { %v10428_v63 = vpop.f32.mrf.mxu2  ;;  %5039 = vmatpush.msrb.mxu0 %v6987_v60 }
 0x6cf   : > { %v10430_v7 = vpop.f32.mrf.mxu0 }
 0x6d0   : > { %12128 = vst [vmem:[#allocation77_spill] sm:$0xff] %v10430_v7  ;;  %v10438_v23 = vpop.f32.mrf.mxu1  ;;  %v6983_v7 = vld [vmem:[%s11889_s7 + $0x388] sm:$0xff] }
 0x6d1   : > { %12129 = vst [vmem:[#allocation78_spill] sm:$0xff] %v10438_v23  ;;  %v6988_v23 = vld [vmem:[%s11889_s7 + $0x3b0] sm:$0xff]  ;;  %5040 = vmatpush.msrb.mxu0 %v6983_v7  ;;  %v6974_v7 = vld [vmem:[%s11889_s7 + $0x340] sm:$0xff] }
 0x6d2   : > { %6913 = vmatmul.msk.f32.gmra.mxu3 %vm3712_vm0, %v10138_v48  ;;  %6929 = vmatmul.msk.f32.gmra.mxu0 %vm3712_vm0, %v10138_v48 }
 0x6d3   : > { %6945 = vmatmul.msk.f32.gmra.mxu1 %vm3712_vm0, %v10138_v48  ;;  %6961 = vmatmul.msk.f32.gmra.mxu2 %vm3712_vm0, %v10138_v48  ;;  %v6978_v48 = vld [vmem:[%s11889_s7 + $0x360] sm:$0xff] }
 0x6d4   : > { %5104 = vmatpush.msrb.mxu1 %v6988_v23  ;;  %v6981_v23 = vld [vmem:[%s11889_s7 + $0x378] sm:$0xff]  ;;  %4976 = vmatpush.msrb.mxu3 %v6978_v48  ;;  %v6971_v48 = vld [vmem:[%s11889_s7 + $0x328] sm:$0xff] }
 0x6d5   : > { %v10472_v31 = vpop.f32.mrf.mxu3  ;;  %5041 = vmatpush.msrb.mxu0 %v6979_v54  ;;  %5171 = vmatpush.msrb.mxu2 %v6981_v23  ;;  %v6972_v54 = vld [vmem:[%s11889_s7 + $0x330] sm:$0xff]  ;;  %v6973_v23 = vld [vmem:[%s11889_s7 + $0x338] sm:$0xff] }
 0x6d6   : > { %v10480_v60 = vpop.f32.mrf.mxu2  ;;  %5105 = vmatpush.msrb.mxu1 %v6984_v30  ;;  %v6976_v30 = vld [vmem:[%s11889_s7 + $0x350] sm:$0xff]  ;;  %4977 = vmatpush.msrb.mxu3 %v6974_v7  ;;  %v6967_v7 = vld [vmem:[%s11889_s7 + $0x308] sm:$0xff] }
 0x6d7   : > { %v10488_v24 = vpop.f32.mrf.mxu0  ;;  %5042 = vmatpush.msrb.mxu0 %v6975_v3  ;;  %5172 = vmatpush.msrb.mxu2 %v6977_v28 }
 0x6d8   : > { %12130 = vst [vmem:[#allocation79_spill] sm:$0xff] %v10488_v24  ;;  %v10490_v36 = vpop.f32.mrf.mxu1  ;;  %5106 = vmatpush.msrb.mxu1 %v6980_v44  ;;  %v6970_v44 = vld [vmem:[%s11889_s7 + $0x320] sm:$0xff]  ;;  %v6968_v24 = vld [vmem:[%s11889_s7 + $0x310] sm:$0xff] }
 0x6d9   : > { %12131 = vst [vmem:[#allocation80_spill] sm:$0xff] %v10490_v36  ;;  %4978 = vmatpush.msrb.mxu3 %v6970_v44  ;;  %5043 = vmatpush.msrb.mxu0 %v6971_v48 }
 0x6da   : > { %6914 = vmatmul.msk.f32.gmra.mxu3 %vm3712_vm0, %v10186_v32  ;;  %6930 = vmatmul.msk.f32.gmra.mxu0 %vm3712_vm0, %v10186_v32 }
 0x6db   : > { %6946 = vmatmul.msk.f32.gmra.mxu1 %vm3712_vm0, %v10186_v32  ;;  %6962 = vmatmul.msk.f32.gmra.mxu2 %vm3712_vm0, %v10186_v32  ;;  %v6966_v32 = vld [vmem:[%s11889_s7 + $0x300] sm:$0xff] }
 0x6dc   : > { %5107 = vmatpush.msrb.mxu1 %v6976_v30  ;;  %v6969_v30 = vld [vmem:[%s11889_s7 + $0x318] sm:$0xff]  ;;  %5173 = vmatpush.msrb.mxu2 %v6973_v23 }
 0x6dd   : > { %v10524_v36 = vpop.f32.mrf.mxu3  ;;  %4979 = vmatpush.msrb.mxu3 %v6966_v32  ;;  %5044 = vmatpush.msrb.mxu0 %v6967_v7  ;;  %v10574_v7 = vld [vmem:[#allocation4 + $0x84] sm:$0xff] }
 0x6de   : > { %v10532_v3 = vpop.f32.mrf.mxu2  ;;  %5108 = vmatpush.msrb.mxu1 %v6972_v54  ;;  %5174 = vmatpush.msrb.mxu2 %v6969_v30  ;;  %12139 = vst [vmem:[#allocation88_spill] sm:$0xff] %v10574_v7 }
 0x6df   : > { %v10540_v28 = vpop.f32.mrf.mxu0 }
 0x6e0   : > { %12132 = vst [vmem:[#allocation81_spill] sm:$0xff] %v10540_v28  ;;  %v10542_v6 = vpop.f32.mrf.mxu1  ;;  %5109 = vmatpush.msrb.mxu1 %v6968_v24  ;;  %v4399_v28 = vadd.f32 %v10250_v34, %v9868_v38  ;;  %v4402_v38 = vadd.f32 %v10266_v25, %v9886_v53  ;;  %v4405_v53 = vadd.f32 %v10282_v15, %v9904_v12 }
 0x6e1   : > { %12133 = vst [vmem:[#allocation82_spill] sm:$0xff] %v10542_v6  ;;  %v4204_v6 = vadd.f32 %v10248_v18, %v9866_v0  ;;  %v4207_v0 = vadd.f32 %v10264_v26, %v9884_v33  ;;  %v4210_v33 = vadd.f32 %v10280_v47, %v9902_v52  ;;  %v4213_v52 = vadd.f32 %v10296_v9, %v9920_v49 }
 0x6e2   : > { %6915 = vmatmul.msk.f32.gmra.mxu3 %vm3712_vm0, %v10204_v29  ;;  %6931 = vmatmul.msk.f32.gmra.mxu0 %vm3712_vm0, %v10204_v29  ;;  %v4408_v12 = vadd.f32 %v10298_v5, %v9922_v4  ;;  %v4216_v49 = vadd.f32 %v10312_v13, %v9938_v39  ;;  %v4411_v4 = vadd.f32 %v10314_v2, %v9940_v27 }
 0x6e3   : > { %6947 = vmatmul.msk.f32.gmra.mxu1 %vm3712_vm0, %v10204_v29  ;;  %6963 = vmatmul.msk.f32.gmra.mxu2 %vm3712_vm0, %v10204_v29  ;;  %v4219_v2 = vadd.f32 %v10328_v21, %v9956_v61  ;;  %v4414_v39 = vadd.f32 %v10330_v57, %v9958_v19  ;;  %v4222_v57 = vadd.f32 %v10344_v8, %v9974_v59 }
 0x6e4   : > { %v4417_v61 = vadd.f32 %v10346_v43, %v9976_v45  ;;  %v4225_v43 = vadd.f32 %v10360_v17, %v9992_v22  ;;  %v4420_v59 = vadd.f32 %v10362_v20, %v9994_v51  ;;  %v7090_v20 = vld [vmem:[%s11889_s7 + $0x4e0] sm:$0xff]  ;;  %v7093_v22 = vld [vmem:[%s11889_s7 + $0x4f8] sm:$0xff]  ;;  %v4228_v51 = vadd.f32 %v10382_v55, %v10016_v16  ;;  %v7091_v55 = vld [vmem:[%s11889_s7 + $0x4e8] sm:$0xff] }
 0x6e5   : > { %v10552_v44 = vpop.f32.mrf.mxu3  ;;  %5393 = vmatpush.msra.mxu3 %v7090_v20  ;;  %5588 = vmatpush.msra.mxu2 %v7093_v22  ;;  %v4423_v17 = vadd.f32 %v10384_v10, %v10018_v35  ;;  %v7092_v16 = vld [vmem:[%s11889_s7 + $0x4f0] sm:$0xff]  ;;  %v4231_v10 = vadd.f32 %v10404_v62, %v10040_v46  ;;  %v4426_v35 = vadd.f32 %v10406_v41, %v10042_v37  ;;  %v7086_v46 = vld [vmem:[%s11889_s7 + $0x4c0] sm:$0xff]  ;;  %v7089_v37 = vld [vmem:[%s11889_s7 + $0x4d8] sm:$0xff] }
 0x6e6   : > { %v10554_v48 = vpop.f32.mrf.mxu2  ;;  %5458 = vmatpush.msra.mxu0 %v7091_v55  ;;  %5523 = vmatpush.msra.mxu1 %v7092_v16  ;;  %v4234_v62 = vadd.f32 %v10426_v1, %v10064_v56  ;;  %v4429_v41 = vadd.f32 %v10428_v63, %v10066_v11  ;;  %v7088_v56 = vld [vmem:[%s11889_s7 + $0x4d0] sm:$0xff]  ;;  %v4878_v63 = vld [vmem:[#allocation4 + $0x68] sm:$0xff]  ;;  %v7082_v11 = vld [vmem:[%s11889_s7 + $0x4a0] sm:$0xff] }
 0x6e7   : > { %v10556_v54 = vpop.f32.mrf.mxu0  ;;  %5394 = vmatpush.msra.mxu3 %v7086_v46  ;;  %5589 = vmatpush.msra.mxu2 %v7089_v37  ;;  %v7085_v46 = vld [vmem:[%s11889_s7 + $0x4b8] sm:$0xff]  ;;  %v7078_v37 = vld [vmem:[%s11889_s7 + $0x480] sm:$0xff] }
 0x6e8   : > { %12134 = vst [vmem:[#allocation83_spill] sm:$0xff] %v10556_v54  ;;  %v10558_v24 = vpop.f32.mrf.mxu1  ;;  %5524 = vmatpush.msra.mxu1 %v7088_v56 }
 0x6e9   : > { %12135 = vst [vmem:[#allocation84_spill] sm:$0xff] %v10558_v24  ;;  %5395 = vmatpush.msra.mxu3 %v7082_v11  ;;  %5590 = vmatpush.msra.mxu2 %v7085_v46 }
 0x6ea   : > { %6916 = vmatmul.msk.f32.gmra.mxu3 %vm3712_vm0, %v10222_v40  ;;  %6932 = vmatmul.msk.f32.gmra.mxu0 %vm3712_vm0, %v10222_v40 }
 0x6eb   : > { %6948 = vmatmul.msk.f32.gmra.mxu1 %vm3712_vm0, %v10222_v40  ;;  %6964 = vmatmul.msk.f32.gmra.mxu2 %vm3712_vm0, %v10222_v40 }
 0x6ec   : > { %5396 = vmatpush.msra.mxu3 %v7078_v37  ;;  %v4879_v37 = vld [vmem:[#allocation4 + $0x70] sm:$0xff] }
 0x6ed   : > { %v10568_v29 = vpop.f32.mrf.mxu3 }
 0x6ee   : > { %12136 = vst [vmem:[#allocation85_spill] sm:$0xff] %v10568_v29  ;;  %v10570_v23 = vpop.f32.mrf.mxu2  ;;  %v4868_v29 = vld [vmem:[#allocation4 + $0x18] sm:$0xff] }
 0x6ef   : > { %12137 = vst [vmem:[#allocation86_spill] sm:$0xff] %v10570_v23  ;;  %v10572_v32 = vpop.f32.mrf.mxu0 }
 0x6f0   : > { %12138 = vst [vmem:[#allocation87_spill] sm:$0xff] %v10572_v32  ;;  %v10576_v30 = vpop.f32.mrf.mxu1 }
 0x6f1   : > { %12140 = vst [vmem:[#allocation89_spill] sm:$0xff] %v10576_v30  ;;  %v4867_v30 = vld [vmem:[#allocation4 + $0x10] sm:$0xff] }
 0x6f2   : > { %6917 = vmatmul.msk.f32.gmra.mxu3 %vm3712_vm0, %v10574_v7  ;;  %6933 = vmatmul.msk.f32.gmra.mxu0 %vm3712_vm0, %v10574_v7 }
 0x6f3   : > { %6949 = vmatmul.msk.f32.gmra.mxu1 %vm3712_vm0, %v10574_v7  ;;  %6965 = vmatmul.msk.f32.gmra.mxu2 %vm3712_vm0, %v10574_v7 }
 0x6f5   : > { %v10586_v40 = vpop.f32.mrf.mxu3 }
 0x6f6   : > { %12141 = vst [vmem:[#allocation90_spill] sm:$0xff] %v10586_v40  ;;  %v10588_v24 = vpop.f32.mrf.mxu2 }
 0x6f7   : > { %12142 = vst [vmem:[#allocation91_spill] sm:$0xff] %v10588_v24  ;;  %v10590_v32 = vpop.f32.mrf.mxu0 }
 0x6f8   : > { %12143 = vst [vmem:[#allocation92_spill] sm:$0xff] %v10590_v32  ;;  %v10592_v54 = vpop.f32.mrf.mxu1 }
 0x6f9   : > { %12144 = vst [vmem:[#allocation93_spill] sm:$0xff] %v10592_v54 }
 0x6fa   : > { %6998 = vmatmul.msk.f32.vlgmr.msrb.gmra.mxu3 %vm3712_vm0, %v4867_v30  ;;  %7014 = vmatmul.msk.f32.vlgmr.msrb.gmra.mxu0 %vm3712_vm0, %v4867_v30 }
 0x6fb   : > { %7030 = vmatmul.msk.f32.vlgmr.msrb.gmra.mxu1 %vm3712_vm0, %v4867_v30  ;;  %7046 = vmatmul.msk.f32.vlgmr.msrb.gmra.mxu2 %vm3712_vm0, %v4867_v30 }
 0x6fd   : > { %v4560_v7 = vpop.f32.mrf.mxu3 }
 0x6fe   : > { %v10602_v24 = vadd.f32 %v4560_v7, %v4204_v6  ;;  %v4755_v32 = vpop.f32.mrf.mxu2  ;;  %v4869_v7 = vld [vmem:[#allocation4 + $0x20] sm:$0xff] }
 0x6ff   : > { %v10604_v54 = vadd.f32 %v4755_v32, %v4399_v28  ;;  %v10606_v40 = vpop.f32.mrf.mxu0 }
 0x700   : > { %v10608_v23 = vpop.f32.mrf.mxu1 }
 0x702   : > { %6999 = vmatmul.msk.f32.gmra.mxu3 %vm3712_vm0, %v4868_v29  ;;  %7015 = vmatmul.msk.f32.gmra.mxu0 %vm3712_vm0, %v4868_v29 }
 0x703   : > { %7031 = vmatmul.msk.f32.gmra.mxu1 %vm3712_vm0, %v4868_v29  ;;  %7047 = vmatmul.msk.f32.gmra.mxu2 %vm3712_vm0, %v4868_v29 }
 0x705   : > { %v4563_v34 = vpop.f32.mrf.mxu3 }
 0x706   : > { %v10618_v18 = vadd.f32 %v4563_v34, %v4207_v0  ;;  %v4758_v6 = vpop.f32.mrf.mxu2 }
 0x707   : > { %v10620_v28 = vadd.f32 %v4758_v6, %v4402_v38  ;;  %v10622_v32 = vpop.f32.mrf.mxu0  ;;  %v4870_v6 = vld [vmem:[#allocation4 + $0x28] sm:$0xff] }
 0x708   : > { %v10624_v30 = vpop.f32.mrf.mxu1 }
 0x70a   : > { %7000 = vmatmul.msk.f32.gmra.mxu3 %vm3712_vm0, %v4869_v7  ;;  %7016 = vmatmul.msk.f32.gmra.mxu0 %vm3712_vm0, %v4869_v7 }
 0x70b   : > { %7032 = vmatmul.msk.f32.gmra.mxu1 %vm3712_vm0, %v4869_v7  ;;  %7048 = vmatmul.msk.f32.gmra.mxu2 %vm3712_vm0, %v4869_v7 }
 0x70d   : > { %v4566_v25 = vpop.f32.mrf.mxu3 }
 0x70e   : > { %v10634_v26 = vadd.f32 %v4566_v25, %v4210_v33  ;;  %v4761_v29 = vpop.f32.mrf.mxu2 }
 0x70f   : > { %v10636_v0 = vadd.f32 %v4761_v29, %v4405_v53  ;;  %v10638_v38 = vpop.f32.mrf.mxu0  ;;  %v4871_v29 = vld [vmem:[#allocation4 + $0x30] sm:$0xff] }
 0x710   : > { %v10640_v34 = vpop.f32.mrf.mxu1 }
 0x712   : > { %7001 = vmatmul.msk.f32.gmra.mxu3 %vm3712_vm0, %v4870_v6  ;;  %7017 = vmatmul.msk.f32.gmra.mxu0 %vm3712_vm0, %v4870_v6 }
 0x713   : > { %7033 = vmatmul.msk.f32.gmra.mxu1 %vm3712_vm0, %v4870_v6  ;;  %7049 = vmatmul.msk.f32.gmra.mxu2 %vm3712_vm0, %v4870_v6 }
 0x715   : > { %v4569_v15 = vpop.f32.mrf.mxu3 }
 0x716   : > { %v10650_v47 = vadd.f32 %v4569_v15, %v4213_v52  ;;  %v4764_v7 = vpop.f32.mrf.mxu2 }
 0x717   : > { %v10652_v33 = vadd.f32 %v4764_v7, %v4408_v12  ;;  %v10654_v53 = vpop.f32.mrf.mxu0  ;;  %v4872_v7 = vld [vmem:[#allocation4 + $0x38] sm:$0xff] }
 0x718   : > { %v10656_v25 = vpop.f32.mrf.mxu1 }
 0x71a   : > { %7002 = vmatmul.msk.f32.gmra.mxu3 %vm3712_vm0, %v4871_v29  ;;  %7018 = vmatmul.msk.f32.gmra.mxu0 %vm3712_vm0, %v4871_v29 }
 0x71b   : > { %7034 = vmatmul.msk.f32.gmra.mxu1 %vm3712_vm0, %v4871_v29  ;;  %7050 = vmatmul.msk.f32.gmra.mxu2 %vm3712_vm0, %v4871_v29 }
 0x71d   : > { %v4572_v5 = vpop.f32.mrf.mxu3 }
 0x71e   : > { %v10666_v9 = vadd.f32 %v4572_v5, %v4216_v49  ;;  %v4767_v6 = vpop.f32.mrf.mxu2  ;;  %v4873_v5 = vld [vmem:[#allocation4 + $0x40] sm:$0xff] }
 0x71f   : > { %v10668_v52 = vadd.f32 %v4767_v6, %v4411_v4  ;;  %v10670_v12 = vpop.f32.mrf.mxu0 }
 0x720   : > { %12145 = vst [vmem:[#allocation94_spill] sm:$0xff] %v10670_v12  ;;  %v10672_v15 = vpop.f32.mrf.mxu1  ;;  %v5713_v12 = vld [vmem:[#allocation4 + $0x38] sm:$0xff] }
 0x721   : > { %12146 = vst [vmem:[#allocation95_spill] sm:$0xff] %v10672_v15 }
 0x722   : > { %7003 = vmatmul.msk.f32.gmra.mxu3 %vm3712_vm0, %v4872_v7  ;;  %7019 = vmatmul.msk.f32.gmra.mxu0 %vm3712_vm0, %v4872_v7 }
 0x723   : > { %7035 = vmatmul.msk.f32.gmra.mxu1 %vm3712_vm0, %v4872_v7  ;;  %7051 = vmatmul.msk.f32.gmra.mxu2 %vm3712_vm0, %v4872_v7 }
 0x725   : > { %v4575_v27 = vpop.f32.mrf.mxu3 }
 0x726   : > { %v10682_v13 = vadd.f32 %v4575_v27, %v4219_v2  ;;  %v4770_v29 = vpop.f32.mrf.mxu2 }
 0x727   : > { %v10684_v49 = vadd.f32 %v4770_v29, %v4414_v39  ;;  %v10686_v4 = vpop.f32.mrf.mxu0  ;;  %v4874_v29 = vld [vmem:[#allocation4 + $0x48] sm:$0xff] }
 0x728   : > { %12147 = vst [vmem:[#allocation96_spill] sm:$0xff] %v10686_v4  ;;  %v10688_v6 = vpop.f32.mrf.mxu1  ;;  %v5297_v4 = vld [vmem:[#allocation4 + $0x5c] sm:$0xff] }
 0x729   : > { %12148 = vst [vmem:[#allocation97_spill] sm:$0xff] %v10688_v6  ;;  %v5294_v6 = vld [vmem:[#allocation4 + $0x44] sm:$0xff] }
 0x72a   : > { %7004 = vmatmul.msk.f32.gmra.mxu3 %vm3712_vm0, %v4873_v5  ;;  %7020 = vmatmul.msk.f32.gmra.mxu0 %vm3712_vm0, %v4873_v5 }
 0x72b   : > { %7036 = vmatmul.msk.f32.gmra.mxu1 %vm3712_vm0, %v4873_v5  ;;  %7052 = vmatmul.msk.f32.gmra.mxu2 %vm3712_vm0, %v4873_v5 }
 0x72d   : > { %v4578_v19 = vpop.f32.mrf.mxu3 }
 0x72e   : > { %v10698_v21 = vadd.f32 %v4578_v19, %v4222_v57  ;;  %v4773_v7 = vpop.f32.mrf.mxu2 }
 0x72f   : > { %v10700_v2 = vadd.f32 %v4773_v7, %v4417_v61  ;;  %v10702_v39 = vpop.f32.mrf.mxu0  ;;  %v4875_v7 = vld [vmem:[#allocation4 + $0x50] sm:$0xff] }
 0x730   : > { %12149 = vst [vmem:[#allocation98_spill] sm:$0xff] %v10702_v39  ;;  %v10704_v27 = vpop.f32.mrf.mxu1 }
 0x731   : > { %12150 = vst [vmem:[#allocation99_spill] sm:$0xff] %v10704_v27  ;;  %v5293_v27 = vld [vmem:[#allocation4 + $0x3c] sm:$0xff] }
 0x732   : > { %7005 = vmatmul.msk.f32.gmra.mxu3 %vm3712_vm0, %v4874_v29  ;;  %7021 = vmatmul.msk.f32.gmra.mxu0 %vm3712_vm0, %v4874_v29 }
 0x733   : > { %7037 = vmatmul.msk.f32.gmra.mxu1 %vm3712_vm0, %v4874_v29  ;;  %7053 = vmatmul.msk.f32.gmra.mxu2 %vm3712_vm0, %v4874_v29 }
 0x735   : > { %v4581_v45 = vpop.f32.mrf.mxu3 }
 0x736   : > { %v10714_v8 = vadd.f32 %v4581_v45, %v4225_v43  ;;  %v4776_v5 = vpop.f32.mrf.mxu2 }
 0x737   : > { %v10716_v57 = vadd.f32 %v4776_v5, %v4420_v59  ;;  %v10718_v61 = vpop.f32.mrf.mxu0 }
 0x738   : > { %12151 = vst [vmem:[#allocation100_spill] sm:$0xff] %v10718_v61  ;;  %v10720_v19 = vpop.f32.mrf.mxu1 }
 0x739   : > { %12152 = vst [vmem:[#allocation101_spill] sm:$0xff] %v10720_v19  ;;  %v4876_v19 = vld [vmem:[#allocation4 + $0x58] sm:$0xff] }
 0x73a   : > { %7006 = vmatmul.msk.f32.gmra.mxu3 %vm3712_vm0, %v4875_v7  ;;  %7022 = vmatmul.msk.f32.gmra.mxu0 %vm3712_vm0, %v4875_v7 }
 0x73b   : > { %7038 = vmatmul.msk.f32.gmra.mxu1 %vm3712_vm0, %v4875_v7  ;;  %7054 = vmatmul.msk.f32.gmra.mxu2 %vm3712_vm0, %v4875_v7 }
 0x73d   : > { %v4584_v29 = vpop.f32.mrf.mxu3 }
 0x73e   : > { %v10736_v43 = vadd.f32 %v4584_v29, %v4228_v51  ;;  %v4779_v59 = vpop.f32.mrf.mxu2 }
 0x73f   : > { %v10738_v45 = vadd.f32 %v4779_v59, %v4423_v17  ;;  %v10740_v5 = vpop.f32.mrf.mxu0  ;;  %v4877_v59 = vld [vmem:[#allocation4 + $0x60] sm:$0xff] }
 0x740   : > { %12153 = vst [vmem:[#allocation102_spill] sm:$0xff] %v10740_v5  ;;  %v10742_v7 = vpop.f32.mrf.mxu1  ;;  %v5292_v5 = vld [vmem:[#allocation4 + $0x34] sm:$0xff] }
 0x741   : > { %12154 = vst [vmem:[#allocation103_spill] sm:$0xff] %v10742_v7 }
 0x742   : > { %7007 = vmatmul.msk.f32.gmra.mxu3 %vm3712_vm0, %v4876_v19  ;;  %7023 = vmatmul.msk.f32.gmra.mxu0 %vm3712_vm0, %v4876_v19 }
 0x743   : > { %7039 = vmatmul.msk.f32.gmra.mxu1 %vm3712_vm0, %v4876_v19  ;;  %7055 = vmatmul.msk.f32.gmra.mxu2 %vm3712_vm0, %v4876_v19 }
 0x745   : > { %v4587_v20 = vpop.f32.mrf.mxu3 }
 0x746   : > { %v10758_v22 = vadd.f32 %v4587_v20, %v4231_v10  ;;  %v4782_v51 = vpop.f32.mrf.mxu2  ;;  %v7087_v20 = vld [vmem:[%s11889_s7 + $0x4c8] sm:$0xff] }
 0x747   : > { %v10760_v17 = vadd.f32 %v4782_v51, %v4426_v35  ;;  %v10762_v29 = vpop.f32.mrf.mxu0  ;;  %5459 = vmatpush.msra.mxu0 %v7087_v20  ;;  %v7083_v51 = vld [vmem:[%s11889_s7 + $0x4a8] sm:$0xff]  ;;  %v4432_v20 = vadd.f32 %v10480_v60, %v10120_v14  ;;  %v7076_v14 = vld [vmem:[%s11889_s7 + $0x470] sm:$0xff]  ;;  %v7077_v60 = vld [vmem:[%s11889_s7 + $0x478] sm:$0xff] }
 0x748   : > { %12155 = vst [vmem:[#allocation104_spill] sm:$0xff] %v10762_v29  ;;  %v10764_v7 = vpop.f32.mrf.mxu1 }
 0x749   : > { %12156 = vst [vmem:[#allocation105_spill] sm:$0xff] %v10764_v7  ;;  %5460 = vmatpush.msra.mxu0 %v7083_v51  ;;  %v5291_v7 = vld [vmem:[#allocation4 + $0x2c] sm:$0xff] }
 0x74a   : > { %7008 = vmatmul.msk.f32.gmra.mxu3 %vm3712_vm0, %v4877_v59  ;;  %7024 = vmatmul.msk.f32.gmra.mxu0 %vm3712_vm0, %v4877_v59 }
 0x74b   : > { %7040 = vmatmul.msk.f32.gmra.mxu1 %vm3712_vm0, %v4877_v59  ;;  %7056 = vmatmul.msk.f32.gmra.mxu2 %vm3712_vm0, %v4877_v59  ;;  %v7084_v59 = vld [vmem:[%s11889_s7 + $0x4b0] sm:$0xff] }
 0x74c   : > { %5525 = vmatpush.msra.mxu1 %v7084_v59 }
 0x74d   : > { %v4590_v19 = vpop.f32.mrf.mxu3 }
 0x74e   : > { %v10780_v55 = vadd.f32 %v4590_v19, %v4234_v62  ;;  %v4785_v16 = vpop.f32.mrf.mxu2  ;;  %v7079_v62 = vld [vmem:[%s11889_s7 + $0x488] sm:$0xff]  ;;  %v7080_v19 = vld [vmem:[%s11889_s7 + $0x490] sm:$0xff] }
 0x74f   : > { %v10782_v10 = vadd.f32 %v4785_v16, %v4429_v41  ;;  %v10784_v35 = vpop.f32.mrf.mxu0  ;;  %v4237_v41 = vadd.f32 %v10472_v31, %v10112_v58  ;;  %v7081_v16 = vld [vmem:[%s11889_s7 + $0x498] sm:$0xff]  ;;  %v7074_v58 = vld [vmem:[%s11889_s7 + $0x460] sm:$0xff]  ;;  %v7075_v31 = vld [vmem:[%s11889_s7 + $0x468] sm:$0xff]  ;;  %5461 = vmatpush.msra.mxu0 %v7079_v62  ;;  %5526 = vmatpush.msra.mxu1 %v7080_v19 }
 0x750   : > { %12157 = vst [vmem:[#allocation106_spill] sm:$0xff] %v10784_v35  ;;  %v10792_v1 = vpop.f32.mrf.mxu1  ;;  %5591 = vmatpush.msra.mxu2 %v7081_v16  ;;  %5397 = vmatpush.msra.mxu3 %v7074_v58  ;;  %v7070_v62 = vld [vmem:[%s11889_s7 + $0x440] sm:$0xff]  ;;  %v7072_v19 = vld [vmem:[%s11889_s7 + $0x450] sm:$0xff]  ;;  %v7073_v16 = vld [vmem:[%s11889_s7 + $0x458] sm:$0xff]  ;;  %v4240_v58 = vadd.f32 %v10524_v36, %v10166_v42 }
 0x751   : > { %12158 = vst [vmem:[#allocation107_spill] sm:$0xff] %v10792_v1  ;;  %5462 = vmatpush.msra.mxu0 %v7075_v31  ;;  %5527 = vmatpush.msra.mxu1 %v7076_v14  ;;  %v7068_v31 = vld [vmem:[%s11889_s7 + $0x430] sm:$0xff]  ;;  %v4435_v14 = vadd.f32 %v10532_v3, %v10174_v50  ;;  %v7062_v42 = vld [vmem:[%s11889_s7 + $0x400] sm:$0xff]  ;;  %v7063_v36 = vld [vmem:[%s11889_s7 + $0x408] sm:$0xff] }
 0x752   : > { %7009 = vmatmul.msk.f32.gmra.mxu3 %vm3712_vm0, %v4878_v63  ;;  %7025 = vmatmul.msk.f32.gmra.mxu0 %vm3712_vm0, %v4878_v63  ;;  %v7064_v50 = vld [vmem:[%s11889_s7 + $0x410] sm:$0xff]  ;;  %v7065_v3 = vld [vmem:[%s11889_s7 + $0x418] sm:$0xff]  ;;  %v5290_v1 = vld [vmem:[#allocation4 + $0x24] sm:$0xff] }
 0x753   : > { %7041 = vmatmul.msk.f32.gmra.mxu1 %vm3712_vm0, %v4878_v63  ;;  %7057 = vmatmul.msk.f32.gmra.mxu2 %vm3712_vm0, %v4878_v63 }
 0x754   : > { %5592 = vmatpush.msra.mxu2 %v7077_v60  ;;  %5398 = vmatpush.msra.mxu3 %v7070_v62 }
 0x755   : > { %v4593_v56 = vpop.f32.mrf.mxu3  ;;  %5528 = vmatpush.msra.mxu1 %v7072_v19 }
 0x756   : > { %v10832_v63 = vadd.f32 %v4593_v56, %v4237_v41  ;;  %v4788_v11 = vpop.f32.mrf.mxu2  ;;  %v7071_v41 = vld [vmem:[%s11889_s7 + $0x448] sm:$0xff]  ;;  %5593 = vmatpush.msra.mxu2 %v7073_v16 }
 0x757   : > { %v10840_v51 = vadd.f32 %v4788_v11, %v4432_v20  ;;  %v10842_v59 = vpop.f32.mrf.mxu0  ;;  %v7066_v20 = vld [vmem:[%s11889_s7 + $0x420] sm:$0xff]  ;;  %v7067_v56 = vld [vmem:[%s11889_s7 + $0x428] sm:$0xff]  ;;  %5463 = vmatpush.msra.mxu0 %v7071_v41  ;;  %v7069_v11 = vld [vmem:[%s11889_s7 + $0x438] sm:$0xff]  ;;  %5529 = vmatpush.msra.mxu1 %v7068_v31 }
 0x758   : > { %12159 = vst [vmem:[#allocation108_spill] sm:$0xff] %v10842_v59  ;;  %v10844_v46 = vpop.f32.mrf.mxu1  ;;  %5399 = vmatpush.msra.mxu3 %v7066_v20  ;;  %5594 = vmatpush.msra.mxu2 %v7069_v11  ;;  %v4880_v20 = vld [vmem:[#allocation4 + $0x78] sm:$0xff]  ;;  %v12164_v31 = vld [vmem:[#allocation28_spill] sm:$0xff] }
 0x759   : > { %12160 = vst [vmem:[#allocation109_spill] sm:$0xff] %v10844_v46  ;;  %5464 = vmatpush.msra.mxu0 %v7067_v56  ;;  %5530 = vmatpush.msra.mxu1 %v7064_v50  ;;  %v12163_v56 = vld [vmem:[#allocation45_spill] sm:$0xff]  ;;  %v4438_v11 = vadd.f32 %v10554_v48, %v12164_v31  ;;  %v4881_v50 = vld [vmem:[#allocation4 + $0x80] sm:$0xff] }
 0x75a   : > { %7010 = vmatmul.msk.f32.gmra.mxu3 %vm3712_vm0, %v4879_v37  ;;  %7026 = vmatmul.msk.f32.gmra.mxu0 %vm3712_vm0, %v4879_v37  ;;  %v12168_v48 = vld [vmem:[#allocation85_spill] sm:$0xff] }
 0x75b   : > { %7042 = vmatmul.msk.f32.gmra.mxu1 %vm3712_vm0, %v4879_v37  ;;  %7058 = vmatmul.msk.f32.gmra.mxu2 %vm3712_vm0, %v4879_v37  ;;  %v5288_v59 = vld [vmem:[#allocation4 + $0x14] sm:$0xff] }
 0x75c   : > { %5400 = vmatpush.msra.mxu3 %v7062_v42  ;;  %5465 = vmatpush.msra.mxu0 %v7063_v36 }
 0x75d   : > { %v4596_v60 = vpop.f32.mrf.mxu3  ;;  %5595 = vmatpush.msra.mxu2 %v7065_v3 }
 0x75e   : > { %v10884_v37 = vadd.f32 %v4596_v60, %v4240_v58  ;;  %v4791_v62 = vpop.f32.mrf.mxu2  ;;  %v4243_v58 = vadd.f32 %v10552_v44, %v12163_v56  ;;  %v12167_v44 = vld [vmem:[#allocation35_spill] sm:$0xff]  ;;  %v12169_v56 = vld [vmem:[#allocation32_spill] sm:$0xff] }
 0x75f   : > { %v10892_v41 = vadd.f32 %v4791_v62, %v4435_v14  ;;  %v10894_v19 = vpop.f32.mrf.mxu0 }
 0x760   : > { %12161 = vst [vmem:[#allocation110_spill] sm:$0xff] %v10894_v19  ;;  %v10896_v16 = vpop.f32.mrf.mxu1 }
 0x761   : > { %12162 = vst [vmem:[#allocation111_spill] sm:$0xff] %v10896_v16  ;;  %v10928_v16 = vld [vmem:[#allocation4 + $0x88] sm:$0xff] }
 0x762   : > { %7011 = vmatmul.msk.f32.gmra.mxu3 %vm3712_vm0, %v4880_v20  ;;  %7027 = vmatmul.msk.f32.gmra.mxu0 %vm3712_vm0, %v4880_v20 }
 0x763   : > { %7043 = vmatmul.msk.f32.gmra.mxu1 %vm3712_vm0, %v4880_v20  ;;  %7059 = vmatmul.msk.f32.gmra.mxu2 %vm3712_vm0, %v4880_v20  ;;  %v4246_v20 = vadd.f32 %v12168_v48, %v12167_v44  ;;  %v12174_v44 = vld [vmem:[#allocation90_spill] sm:$0xff] }
 0x765   : > { %v4599_v14 = vpop.f32.mrf.mxu3 }
 0x766   : > { %v10906_v60 = vadd.f32 %v4599_v14, %v4243_v58  ;;  %v4794_v42 = vpop.f32.mrf.mxu2  ;;  %v12170_v58 = vld [vmem:[#allocation86_spill] sm:$0xff] }
 0x767   : > { %v10908_v36 = vadd.f32 %v4794_v42, %v4438_v11  ;;  %v10910_v62 = vpop.f32.mrf.mxu0  ;;  %v4441_v31 = vadd.f32 %v12170_v58, %v12169_v56  ;;  %v12176_v56 = vld [vmem:[#allocation91_spill] sm:$0xff] }
 0x768   : > { %12165 = vst [vmem:[#allocation45_spill] sm:$0xff] %v10910_v62  ;;  %v10912_v3 = vpop.f32.mrf.mxu1 }
 0x769   : > { %12166 = vst [vmem:[#allocation28_spill] sm:$0xff] %v10912_v3 }
 0x76a   : > { %7012 = vmatmul.msk.f32.gmra.mxu3 %vm3712_vm0, %v4881_v50  ;;  %7028 = vmatmul.msk.f32.gmra.mxu0 %vm3712_vm0, %v4881_v50 }
 0x76b   : > { %7044 = vmatmul.msk.f32.gmra.mxu1 %vm3712_vm0, %v4881_v50  ;;  %7060 = vmatmul.msk.f32.gmra.mxu2 %vm3712_vm0, %v4881_v50  ;;  %v12173_v50 = vld [vmem:[#allocation60_spill] sm:$0xff] }
 0x76c   : > { %v4249_v48 = vadd.f32 %v12174_v44, %v12173_v50 }
 0x76d   : > { %v4602_v11 = vpop.f32.mrf.mxu3 }
 0x76e   : > { %v10922_v14 = vadd.f32 %v4602_v11, %v4246_v20  ;;  %v4797_v42 = vpop.f32.mrf.mxu2  ;;  %v12175_v20 = vld [vmem:[#allocation76_spill] sm:$0xff] }
 0x76f   : > { %v10924_v62 = vadd.f32 %v4797_v42, %v4441_v31  ;;  %v10926_v3 = vpop.f32.mrf.mxu0  ;;  %v4444_v58 = vadd.f32 %v12176_v56, %v12175_v20 }
 0x770   : > { %12171 = vst [vmem:[#allocation35_spill] sm:$0xff] %v10926_v3  ;;  %v10930_v19 = vpop.f32.mrf.mxu1 }
 0x771   : > { %12172 = vst [vmem:[#allocation85_spill] sm:$0xff] %v10930_v19 }
 0x772   : > { %7013 = vmatmul.msk.f32.gmra.mxu3 %vm3712_vm0, %v10928_v16  ;;  %7029 = vmatmul.msk.f32.gmra.mxu0 %vm3712_vm0, %v10928_v16 }
 0x773   : > { %7045 = vmatmul.msk.f32.gmra.mxu1 %vm3712_vm0, %v10928_v16  ;;  %7061 = vmatmul.msk.f32.gmra.mxu2 %vm3712_vm0, %v10928_v16 }
 0x775   : > { %v4605_v31 = vpop.f32.mrf.mxu3 }
 0x776   : > { %v10944_v11 = vadd.f32 %v4605_v31, %v4249_v48  ;;  %v4800_v42 = vpop.f32.mrf.mxu2  ;;  %v5289_v31 = vld [vmem:[#allocation4 + $0x1c] sm:$0xff] }
 0x777   : > { %v10946_v19 = vadd.f32 %v4800_v42, %v4444_v58  ;;  %v10948_v3 = vpop.f32.mrf.mxu0 }
 0x778   : > { %v10950_v46 = vpop.f32.mrf.mxu1 }
 0x77a   : > { %7094 = vmatmul.msk.f32.vlgmr.msra.gmra.mxu3 %vm3712_vm0, %v5288_v59  ;;  %7110 = vmatmul.msk.f32.vlgmr.msra.gmra.mxu0 %vm3712_vm0, %v5288_v59 }
 0x77b   : > { %7126 = vmatmul.msk.f32.vlgmr.msra.gmra.mxu1 %vm3712_vm0, %v5288_v59  ;;  %7142 = vmatmul.msk.f32.vlgmr.msra.gmra.mxu2 %vm3712_vm0, %v5288_v59 }
 0x77d   : > { %v4981_v50 = vpop.f32.mrf.mxu3 }
 0x77e   : > { %v10957_v44 = vadd.f32 %v4981_v50, %v10602_v24  ;;  %v5176_v48 = vpop.f32.mrf.mxu2 }
 0x77f   : > { %v10960_v20 = vadd.f32 %v5176_v48, %v10604_v54  ;;  %v10962_v56 = vpop.f32.mrf.mxu0 }
 0x780   : > { %v10964_v58 = vpop.f32.mrf.mxu1 }
 0x782   : > { %7095 = vmatmul.msk.f32.gmra.mxu3 %vm3712_vm0, %v5289_v31  ;;  %7111 = vmatmul.msk.f32.gmra.mxu0 %vm3712_vm0, %v5289_v31 }
 0x783   : > { %7127 = vmatmul.msk.f32.gmra.mxu1 %vm3712_vm0, %v5289_v31  ;;  %7143 = vmatmul.msk.f32.gmra.mxu2 %vm3712_vm0, %v5289_v31 }
 0x785   : > { %v4984_v59 = vpop.f32.mrf.mxu3 }
 0x786   : > { %v10971_v24 = vadd.f32 %v4984_v59, %v10618_v18  ;;  %v5179_v42 = vpop.f32.mrf.mxu2 }
 0x787   : > { %v10974_v54 = vadd.f32 %v5179_v42, %v10620_v28  ;;  %v10976_v50 = vpop.f32.mrf.mxu0 }
 0x788   : > { %v10978_v48 = vpop.f32.mrf.mxu1 }
 0x78a   : > { %7096 = vmatmul.msk.f32.gmra.mxu3 %vm3712_vm0, %v5290_v1  ;;  %7112 = vmatmul.msk.f32.gmra.mxu0 %vm3712_vm0, %v5290_v1 }
 0x78b   : > { %7128 = vmatmul.msk.f32.gmra.mxu1 %vm3712_vm0, %v5290_v1  ;;  %7144 = vmatmul.msk.f32.gmra.mxu2 %vm3712_vm0, %v5290_v1 }
 0x78d   : > { %v4987_v31 = vpop.f32.mrf.mxu3 }
 0x78e   : > { %v10985_v18 = vadd.f32 %v4987_v31, %v10634_v26  ;;  %v5182_v59 = vpop.f32.mrf.mxu2 }
 0x78f   : > { %v10988_v28 = vadd.f32 %v5182_v59, %v10636_v0  ;;  %v10990_v42 = vpop.f32.mrf.mxu0 }
 0x790   : > { %v10992_v35 = vpop.f32.mrf.mxu1 }
 0x792   : > { %7097 = vmatmul.msk.f32.gmra.mxu3 %vm3712_vm0, %v5291_v7  ;;  %7113 = vmatmul.msk.f32.gmra.mxu0 %vm3712_vm0, %v5291_v7 }
 0x793   : > { %7129 = vmatmul.msk.f32.gmra.mxu1 %vm3712_vm0, %v5291_v7  ;;  %7145 = vmatmul.msk.f32.gmra.mxu2 %vm3712_vm0, %v5291_v7 }
 0x795   : > { %v4990_v1 = vpop.f32.mrf.mxu3 }
 0x796   : > { %v10999_v26 = vadd.f32 %v4990_v1, %v10650_v47  ;;  %v5185_v31 = vpop.f32.mrf.mxu2 }
 0x797   : > { %v11002_v0 = vadd.f32 %v5185_v31, %v10652_v33  ;;  %v11004_v59 = vpop.f32.mrf.mxu0 }
 0x798   : > { %v11006_v29 = vpop.f32.mrf.mxu1 }
 0x79a   : > { %7098 = vmatmul.msk.f32.gmra.mxu3 %vm3712_vm0, %v5292_v5  ;;  %7114 = vmatmul.msk.f32.gmra.mxu0 %vm3712_vm0, %v5292_v5 }
 0x79b   : > { %7130 = vmatmul.msk.f32.gmra.mxu1 %vm3712_vm0, %v5292_v5  ;;  %7146 = vmatmul.msk.f32.gmra.mxu2 %vm3712_vm0, %v5292_v5 }
 0x79d   : > { %v4993_v7 = vpop.f32.mrf.mxu3 }
 0x79e   : > { %v11013_v47 = vadd.f32 %v4993_v7, %v10666_v9  ;;  %v5188_v1 = vpop.f32.mrf.mxu2 }
 0x79f   : > { %v11016_v33 = vadd.f32 %v5188_v1, %v10668_v52  ;;  %v11018_v31 = vpop.f32.mrf.mxu0 }
 0x7a0   : > { %12177 = vst [vmem:[#allocation32_spill] sm:$0xff] %v11018_v31  ;;  %v11020_v61 = vpop.f32.mrf.mxu1  ;;  %v5712_v31 = vld [vmem:[#allocation4 + $0x30] sm:$0xff] }
 0x7a1   : > { %12178 = vst [vmem:[#allocation86_spill] sm:$0xff] %v11020_v61  ;;  %v7187_v61 = vld [vmem:[%s11889_s7 + $0x5e8] sm:$0xff] }
 0x7a2   : > { %7099 = vmatmul.msk.f32.gmra.mxu3 %vm3712_vm0, %v5293_v27  ;;  %7115 = vmatmul.msk.f32.gmra.mxu0 %vm3712_vm0, %v5293_v27 }
 0x7a3   : > { %7131 = vmatmul.msk.f32.gmra.mxu1 %vm3712_vm0, %v5293_v27  ;;  %7147 = vmatmul.msk.f32.gmra.mxu2 %vm3712_vm0, %v5293_v27 }
 0x7a4   : > { %5879 = vmatpush.msrb.mxu0 %v7187_v61  ;;  %v7185_v61 = vld [vmem:[%s11889_s7 + $0x5d8] sm:$0xff] }
 0x7a5   : > { %v4996_v5 = vpop.f32.mrf.mxu3 }
 0x7a6   : > { %v11027_v9 = vadd.f32 %v4996_v5, %v10682_v13  ;;  %v5191_v7 = vpop.f32.mrf.mxu2 }
 0x7a7   : > { %v11030_v52 = vadd.f32 %v5191_v7, %v10684_v49  ;;  %v11032_v1 = vpop.f32.mrf.mxu0 }
 0x7a8   : > { %12179 = vst [vmem:[#allocation60_spill] sm:$0xff] %v11032_v1  ;;  %v11034_v39 = vpop.f32.mrf.mxu1  ;;  %v5295_v1 = vld [vmem:[#allocation4 + $0x4c] sm:$0xff] }
 0x7a9   : > { %12180 = vst [vmem:[#allocation90_spill] sm:$0xff] %v11034_v39 }
 0x7aa   : > { %7100 = vmatmul.msk.f32.gmra.mxu3 %vm3712_vm0, %v5294_v6  ;;  %7116 = vmatmul.msk.f32.gmra.mxu0 %vm3712_vm0, %v5294_v6 }
 0x7ab   : > { %7132 = vmatmul.msk.f32.gmra.mxu1 %vm3712_vm0, %v5294_v6  ;;  %7148 = vmatmul.msk.f32.gmra.mxu2 %vm3712_vm0, %v5294_v6 }
 0x7ad   : > { %v4999_v27 = vpop.f32.mrf.mxu3 }
 0x7ae   : > { %v11041_v13 = vadd.f32 %v4999_v27, %v10698_v21  ;;  %v5194_v5 = vpop.f32.mrf.mxu2 }
 0x7af   : > { %v11044_v49 = vadd.f32 %v5194_v5, %v10700_v2  ;;  %v11046_v7 = vpop.f32.mrf.mxu0 }
 0x7b0   : > { %12181 = vst [vmem:[#allocation76_spill] sm:$0xff] %v11046_v7  ;;  %v11048_v39 = vpop.f32.mrf.mxu1  ;;  %v5296_v7 = vld [vmem:[#allocation4 + $0x54] sm:$0xff] }
 0x7b1   : > { %12182 = vst [vmem:[#allocation91_spill] sm:$0xff] %v11048_v39 }
 0x7b2   : > { %7101 = vmatmul.msk.f32.gmra.mxu3 %vm3712_vm0, %v5295_v1  ;;  %7117 = vmatmul.msk.f32.gmra.mxu0 %vm3712_vm0, %v5295_v1 }
 0x7b3   : > { %7133 = vmatmul.msk.f32.gmra.mxu1 %vm3712_vm0, %v5295_v1  ;;  %7149 = vmatmul.msk.f32.gmra.mxu2 %vm3712_vm0, %v5295_v1 }
 0x7b5   : > { %v5002_v6 = vpop.f32.mrf.mxu3 }
 0x7b6   : > { %v11055_v21 = vadd.f32 %v5002_v6, %v10714_v8  ;;  %v5197_v27 = vpop.f32.mrf.mxu2  ;;  %v7186_v8 = vld [vmem:[%s11889_s7 + $0x5e0] sm:$0xff] }
 0x7b7   : > { %v11058_v2 = vadd.f32 %v5197_v27, %v10716_v57  ;;  %v11060_v5 = vpop.f32.mrf.mxu0  ;;  %v7189_v57 = vld [vmem:[%s11889_s7 + $0x5f8] sm:$0xff]  ;;  %5814 = vmatpush.msrb.mxu3 %v7186_v8  ;;  %v7188_v8 = vld [vmem:[%s11889_s7 + $0x5f0] sm:$0xff] }
 0x7b8   : > { %12183 = vst [vmem:[#allocation112_spill] sm:$0xff] %v11060_v5  ;;  %v11062_v39 = vpop.f32.mrf.mxu1  ;;  %6009 = vmatpush.msrb.mxu2 %v7189_v57  ;;  %5944 = vmatpush.msrb.mxu1 %v7188_v8 }
 0x7b9   : > { %12184 = vst [vmem:[#allocation113_spill] sm:$0xff] %v11062_v39 }
 0x7ba   : > { %7102 = vmatmul.msk.f32.gmra.mxu3 %vm3712_vm0, %v5296_v7  ;;  %7118 = vmatmul.msk.f32.gmra.mxu0 %vm3712_vm0, %v5296_v7 }
 0x7bb   : > { %7134 = vmatmul.msk.f32.gmra.mxu1 %vm3712_vm0, %v5296_v7  ;;  %7150 = vmatmul.msk.f32.gmra.mxu2 %vm3712_vm0, %v5296_v7 }
 0x7bc   : > { %6010 = vmatpush.msrb.mxu2 %v7185_v61  ;;  %v7179_v61 = vld [vmem:[%s11889_s7 + $0x5a8] sm:$0xff] }
 0x7bd   : > { %v5005_v1 = vpop.f32.mrf.mxu3 }
 0x7be   : > { %v11075_v6 = vadd.f32 %v5005_v1, %v10736_v43  ;;  %v5200_v27 = vpop.f32.mrf.mxu2 }
 0x7bf   : > { %v11078_v39 = vadd.f32 %v5200_v27, %v10738_v45  ;;  %v11080_v5 = vpop.f32.mrf.mxu0 }
 0x7c0   : > { %12185 = vst [vmem:[#allocation114_spill] sm:$0xff] %v11075_v6  ;;  %v11082_v7 = vpop.f32.mrf.mxu1 }
 0x7c1   : > { %12186 = vst [vmem:[#allocation115_spill] sm:$0xff] %v11080_v5  ;;  %v5298_v5 = vld [vmem:[#allocation4 + $0x64] sm:$0xff] }
 0x7c2   : > { %12187 = vst [vmem:[#allocation116_spill] sm:$0xff] %v11082_v7  ;;  %7103 = vmatmul.msk.f32.gmra.mxu3 %vm3712_vm0, %v5297_v4  ;;  %7119 = vmatmul.msk.f32.gmra.mxu0 %vm3712_vm0, %v5297_v4 }
 0x7c3   : > { %7135 = vmatmul.msk.f32.gmra.mxu1 %vm3712_vm0, %v5297_v4  ;;  %7151 = vmatmul.msk.f32.gmra.mxu2 %vm3712_vm0, %v5297_v4  ;;  %v7182_v4 = vld [vmem:[%s11889_s7 + $0x5c0] sm:$0xff] }
 0x7c4   : > { %5815 = vmatpush.msrb.mxu3 %v7182_v4 }
 0x7c5   : > { %v5008_v43 = vpop.f32.mrf.mxu3 }
 0x7c6   : > { %v11095_v45 = vadd.f32 %v5008_v43, %v10758_v22  ;;  %v5203_v57 = vpop.f32.mrf.mxu2 }
 0x7c7   : > { %v11098_v1 = vadd.f32 %v5203_v57, %v10760_v17  ;;  %v11100_v27 = vpop.f32.mrf.mxu0 }
 0x7c8   : > { %12188 = vst [vmem:[#allocation117_spill] sm:$0xff] %v11095_v45  ;;  %v11102_v7 = vpop.f32.mrf.mxu1  ;;  %v7172_v45 = vld [vmem:[%s11889_s7 + $0x570] sm:$0xff] }
 0x7c9   : > { %12189 = vst [vmem:[#allocation118_spill] sm:$0xff] %v11100_v27 }
 0x7ca   : > { %12190 = vst [vmem:[#allocation119_spill] sm:$0xff] %v11102_v7  ;;  %7104 = vmatmul.msk.f32.gmra.mxu3 %vm3712_vm0, %v5298_v5  ;;  %7120 = vmatmul.msk.f32.gmra.mxu0 %vm3712_vm0, %v5298_v5  ;;  %v7184_v7 = vld [vmem:[%s11889_s7 + $0x5d0] sm:$0xff] }
 0x7cb   : > { %7136 = vmatmul.msk.f32.gmra.mxu1 %vm3712_vm0, %v5298_v5  ;;  %7152 = vmatmul.msk.f32.gmra.mxu2 %vm3712_vm0, %v5298_v5  ;;  %v7183_v5 = vld [vmem:[%s11889_s7 + $0x5c8] sm:$0xff] }
 0x7cc   : > { %5880 = vmatpush.msrb.mxu0 %v7183_v5  ;;  %5945 = vmatpush.msrb.mxu1 %v7184_v7  ;;  %v7181_v7 = vld [vmem:[%s11889_s7 + $0x5b8] sm:$0xff]  ;;  %v7175_v5 = vld [vmem:[%s11889_s7 + $0x588] sm:$0xff] }
 0x7cd   : > { %v5011_v22 = vpop.f32.mrf.mxu3  ;;  %6011 = vmatpush.msrb.mxu2 %v7181_v7 }
 0x7ce   : > { %v11115_v17 = vadd.f32 %v5011_v22, %v10780_v55  ;;  %v5206_v8 = vpop.f32.mrf.mxu2  ;;  %v5299_v55 = vld [vmem:[#allocation4 + $0x6c] sm:$0xff]  ;;  %5881 = vmatpush.msrb.mxu0 %v7179_v61 }
 0x7cf   : > { %v11118_v43 = vadd.f32 %v5206_v8, %v10782_v10  ;;  %v11120_v57 = vpop.f32.mrf.mxu0  ;;  %v7178_v10 = vld [vmem:[%s11889_s7 + $0x5a0] sm:$0xff]  ;;  %v7180_v22 = vld [vmem:[%s11889_s7 + $0x5b0] sm:$0xff] }
 0x7d0   : > { %12191 = vst [vmem:[#allocation120_spill] sm:$0xff] %v11115_v17  ;;  %v11128_v4 = vpop.f32.mrf.mxu1  ;;  %v7174_v8 = vld [vmem:[%s11889_s7 + $0x580] sm:$0xff]  ;;  %5816 = vmatpush.msrb.mxu3 %v7178_v10  ;;  %5946 = vmatpush.msrb.mxu1 %v7180_v22  ;;  %v7171_v10 = vld [vmem:[%s11889_s7 + $0x568] sm:$0xff]  ;;  %v7173_v22 = vld [vmem:[%s11889_s7 + $0x578] sm:$0xff] }
 0x7d1   : > { %12192 = vst [vmem:[#allocation121_spill] sm:$0xff] %v11120_v57  ;;  %v7177_v57 = vld [vmem:[%s11889_s7 + $0x598] sm:$0xff]  ;;  %5882 = vmatpush.msrb.mxu0 %v7175_v5  ;;  %v7164_v5 = vld [vmem:[%s11889_s7 + $0x530] sm:$0xff] }
 0x7d2   : > { %12193 = vst [vmem:[#allocation122_spill] sm:$0xff] %v11128_v4  ;;  %7105 = vmatmul.msk.f32.gmra.mxu3 %vm3712_vm0, %v5299_v55  ;;  %7121 = vmatmul.msk.f32.gmra.mxu0 %vm3712_vm0, %v5299_v55  ;;  %v7176_v4 = vld [vmem:[%s11889_s7 + $0x590] sm:$0xff] }
 0x7d3   : > { %7137 = vmatmul.msk.f32.gmra.mxu1 %vm3712_vm0, %v5299_v55  ;;  %7153 = vmatmul.msk.f32.gmra.mxu2 %vm3712_vm0, %v5299_v55  ;;  %v7170_v55 = vld [vmem:[%s11889_s7 + $0x560] sm:$0xff] }
 0x7d4   : > { %5817 = vmatpush.msrb.mxu3 %v7174_v8  ;;  %5947 = vmatpush.msrb.mxu1 %v7176_v4  ;;  %v7166_v8 = vld [vmem:[%s11889_s7 + $0x540] sm:$0xff]  ;;  %v7163_v4 = vld [vmem:[%s11889_s7 + $0x528] sm:$0xff] }
 0x7d5   : > { %v5014_v17 = vpop.f32.mrf.mxu3  ;;  %6012 = vmatpush.msrb.mxu2 %v7177_v57  ;;  %5883 = vmatpush.msrb.mxu0 %v7171_v10  ;;  %v7162_v57 = vld [vmem:[%s11889_s7 + $0x520] sm:$0xff] }
 0x7d6   : > { %v11165_v61 = vadd.f32 %v5014_v17, %v10832_v63  ;;  %v5209_v27 = vpop.f32.mrf.mxu2  ;;  %5818 = vmatpush.msrb.mxu3 %v7170_v55  ;;  %v5300_v17 = vld [vmem:[#allocation4 + $0x74] sm:$0xff]  ;;  %5948 = vmatpush.msrb.mxu1 %v7172_v45 }
 0x7d7   : > { %v11174_v7 = vadd.f32 %v5209_v27, %v10840_v51  ;;  %v11176_v6 = vpop.f32.mrf.mxu0  ;;  %6013 = vmatpush.msrb.mxu2 %v7173_v22  ;;  %v7167_v51 = vld [vmem:[%s11889_s7 + $0x548] sm:$0xff]  ;;  %v7168_v27 = vld [vmem:[%s11889_s7 + $0x550] sm:$0xff]  ;;  %v7169_v45 = vld [vmem:[%s11889_s7 + $0x558] sm:$0xff] }
 0x7d8   : > { %12194 = vst [vmem:[#allocation123_spill] sm:$0xff] %v11176_v6  ;;  %v11178_v63 = vpop.f32.mrf.mxu1  ;;  %5819 = vmatpush.msrb.mxu3 %v7166_v8  ;;  %5884 = vmatpush.msrb.mxu0 %v7167_v51  ;;  %v7165_v55 = vld [vmem:[%s11889_s7 + $0x538] sm:$0xff]  ;;  %v7158_v22 = vld [vmem:[%s11889_s7 + $0x500] sm:$0xff] }
 0x7d9   : > { %12195 = vst [vmem:[#allocation124_spill] sm:$0xff] %v11178_v63  ;;  %5949 = vmatpush.msrb.mxu1 %v7168_v27  ;;  %6014 = vmatpush.msrb.mxu2 %v7169_v45  ;;  %v7160_v63 = vld [vmem:[%s11889_s7 + $0x510] sm:$0xff]  ;;  %v7161_v27 = vld [vmem:[%s11889_s7 + $0x518] sm:$0xff] }
 0x7da   : > { %7106 = vmatmul.msk.f32.gmra.mxu3 %vm3712_vm0, %v5300_v17  ;;  %7122 = vmatmul.msk.f32.gmra.mxu0 %vm3712_vm0, %v5300_v17 }
 0x7db   : > { %7138 = vmatmul.msk.f32.gmra.mxu1 %vm3712_vm0, %v5300_v17  ;;  %7154 = vmatmul.msk.f32.gmra.mxu2 %vm3712_vm0, %v5300_v17  ;;  %v7159_v17 = vld [vmem:[%s11889_s7 + $0x508] sm:$0xff] }
 0x7dc   : > { %5820 = vmatpush.msrb.mxu3 %v7162_v57  ;;  %5885 = vmatpush.msrb.mxu0 %v7163_v4  ;;  %v5301_v57 = vld [vmem:[#allocation4 + $0x7c] sm:$0xff] }
 0x7dd   : > { %v5017_v10 = vpop.f32.mrf.mxu3  ;;  %5950 = vmatpush.msrb.mxu1 %v7164_v5  ;;  %6015 = vmatpush.msrb.mxu2 %v7165_v55 }
 0x7de   : > { %v11215_v8 = vadd.f32 %v5017_v10, %v10884_v37  ;;  %v5212_v51 = vpop.f32.mrf.mxu2  ;;  %5821 = vmatpush.msrb.mxu3 %v7158_v22  ;;  %5886 = vmatpush.msrb.mxu0 %v7159_v17  ;;  %v12200_v22 = vld [vmem:[#allocation88_spill] sm:$0xff] }
 0x7df   : > { %v11224_v45 = vadd.f32 %v5212_v51, %v10892_v41  ;;  %v11226_v6 = vpop.f32.mrf.mxu0  ;;  %5951 = vmatpush.msrb.mxu1 %v7160_v63  ;;  %6016 = vmatpush.msrb.mxu2 %v7161_v27 }
 0x7e0   : > { %12196 = vst [vmem:[#allocation125_spill] sm:$0xff] %v11226_v6  ;;  %v11228_v37 = vpop.f32.mrf.mxu1 }
 0x7e1   : > { %12197 = vst [vmem:[#allocation126_spill] sm:$0xff] %v11228_v37  ;;  %v5711_v37 = vld [vmem:[#allocation4 + $0x28] sm:$0xff] }
 0x7e2   : > { %7107 = vmatmul.msk.f32.gmra.mxu3 %vm3712_vm0, %v5301_v57  ;;  %7123 = vmatmul.msk.f32.gmra.mxu0 %vm3712_vm0, %v5301_v57 }
 0x7e3   : > { %7139 = vmatmul.msk.f32.gmra.mxu1 %vm3712_vm0, %v5301_v57  ;;  %7155 = vmatmul.msk.f32.gmra.mxu2 %vm3712_vm0, %v5301_v57  ;;  %v5303_v57 = vld [vmem:[#allocation4 + $0x8c] sm:$0xff] }
 0x7e5   : > { %v5020_v41 = vpop.f32.mrf.mxu3 }
 0x7e6   : > { %v11235_v4 = vadd.f32 %v5020_v41, %v10906_v60  ;;  %v5215_v5 = vpop.f32.mrf.mxu2 }
 0x7e7   : > { %v11238_v55 = vadd.f32 %v5215_v5, %v10908_v36  ;;  %v11240_v10 = vpop.f32.mrf.mxu0 }
 0x7e8   : > { %12198 = vst [vmem:[#allocation127_spill] sm:$0xff] %v11240_v10  ;;  %v11242_v63 = vpop.f32.mrf.mxu1 }
 0x7e9   : > { %12199 = vst [vmem:[#allocation128_spill] sm:$0xff] %v11242_v63 }
 0x7ea   : > { %7108 = vmatmul.msk.f32.gmra.mxu3 %vm3712_vm0, %v12200_v22  ;;  %7124 = vmatmul.msk.f32.gmra.mxu0 %vm3712_vm0, %v12200_v22 }
 0x7eb   : > { %7140 = vmatmul.msk.f32.gmra.mxu1 %vm3712_vm0, %v12200_v22  ;;  %7156 = vmatmul.msk.f32.gmra.mxu2 %vm3712_vm0, %v12200_v22 }
 0x7ed   : > { %v5023_v60 = vpop.f32.mrf.mxu3 }
 0x7ee   : > { %v11253_v36 = vadd.f32 %v5023_v60, %v10922_v14  ;;  %v5218_v17 = vpop.f32.mrf.mxu2 }
 0x7ef   : > { %v11256_v51 = vadd.f32 %v5218_v17, %v10924_v62  ;;  %v11258_v27 = vpop.f32.mrf.mxu0 }
 0x7f0   : > { %12201 = vst [vmem:[#allocation88_spill] sm:$0xff] %v11258_v27  ;;  %v11260_v41 = vpop.f32.mrf.mxu1  ;;  %v5710_v27 = vld [vmem:[#allocation4 + $0x20] sm:$0xff] }
 0x7f1   : > { %12202 = vst [vmem:[#allocation129_spill] sm:$0xff] %v11260_v41  ;;  %v5709_v41 = vld [vmem:[#allocation4 + $0x18] sm:$0xff] }
 0x7f2   : > { %7109 = vmatmul.msk.f32.gmra.mxu3 %vm3712_vm0, %v5303_v57  ;;  %7125 = vmatmul.msk.f32.gmra.mxu0 %vm3712_vm0, %v5303_v57 }
 0x7f3   : > { %7141 = vmatmul.msk.f32.gmra.mxu1 %vm3712_vm0, %v5303_v57  ;;  %7157 = vmatmul.msk.f32.gmra.mxu2 %vm3712_vm0, %v5303_v57 }
 0x7f5   : > { %v5026_v5 = vpop.f32.mrf.mxu3 }
 0x7f6   : > { %v11267_v14 = vadd.f32 %v5026_v5, %v10944_v11  ;;  %v5221_v22 = vpop.f32.mrf.mxu2 }
 0x7f7   : > { %v11270_v62 = vadd.f32 %v5221_v22, %v10946_v19  ;;  %v11272_v60 = vpop.f32.mrf.mxu0 }
 0x7f8   : > { %v11274_v17 = vpop.f32.mrf.mxu1 }
 0x7fa   : > { %7190 = vmatmul.msk.f32.vlgmr.msrb.gmra.mxu3 %vm3712_vm0, %v5709_v41  ;;  %7206 = vmatmul.msk.f32.vlgmr.msrb.gmra.mxu0 %vm3712_vm0, %v5709_v41 }
 0x7fb   : > { %7222 = vmatmul.msk.f32.vlgmr.msrb.gmra.mxu1 %vm3712_vm0, %v5709_v41  ;;  %7238 = vmatmul.msk.f32.vlgmr.msrb.gmra.mxu2 %vm3712_vm0, %v5709_v41 }
 0x7fd   : > { %v5402_v57 = vpop.f32.mrf.mxu3 }
 0x7fe   : > { %v11281_v11 = vadd.f32 %v5402_v57, %v10957_v44  ;;  %v5597_v5 = vpop.f32.mrf.mxu2 }
 0x7ff   : > { %v11284_v19 = vadd.f32 %v5597_v5, %v10960_v20  ;;  %v11286_v22 = vpop.f32.mrf.mxu0 }
 0x800   : > { %v11288_v63 = vpop.f32.mrf.mxu1 }
 0x802   : > { %7191 = vmatmul.msk.f32.gmra.mxu3 %vm3712_vm0, %v5710_v27  ;;  %7207 = vmatmul.msk.f32.gmra.mxu0 %vm3712_vm0, %v5710_v27 }
 0x803   : > { %7223 = vmatmul.msk.f32.gmra.mxu1 %vm3712_vm0, %v5710_v27  ;;  %7239 = vmatmul.msk.f32.gmra.mxu2 %vm3712_vm0, %v5710_v27 }
 0x805   : > { %v5405_v41 = vpop.f32.mrf.mxu3 }
 0x806   : > { %v11295_v44 = vadd.f32 %v5405_v41, %v10971_v24  ;;  %v5600_v57 = vpop.f32.mrf.mxu2 }
 0x807   : > { %v11298_v20 = vadd.f32 %v5600_v57, %v10974_v54  ;;  %v11300_v5 = vpop.f32.mrf.mxu0 }
 0x808   : > { %v11302_v10 = vpop.f32.mrf.mxu1 }
 0x80a   : > { %7192 = vmatmul.msk.f32.gmra.mxu3 %vm3712_vm0, %v5711_v37  ;;  %7208 = vmatmul.msk.f32.gmra.mxu0 %vm3712_vm0, %v5711_v37 }
 0x80b   : > { %7224 = vmatmul.msk.f32.gmra.mxu1 %vm3712_vm0, %v5711_v37  ;;  %7240 = vmatmul.msk.f32.gmra.mxu2 %vm3712_vm0, %v5711_v37 }
 0x80d   : > { %v5408_v27 = vpop.f32.mrf.mxu3 }
 0x80e   : > { %v11309_v24 = vadd.f32 %v5408_v27, %v10985_v18  ;;  %v5603_v41 = vpop.f32.mrf.mxu2 }
 0x80f   : > { %v11312_v54 = vadd.f32 %v5603_v41, %v10988_v28  ;;  %v11314_v57 = vpop.f32.mrf.mxu0 }
 0x810   : > { %v11316_v6 = vpop.f32.mrf.mxu1 }
 0x812   : > { %7193 = vmatmul.msk.f32.gmra.mxu3 %vm3712_vm0, %v5712_v31  ;;  %7209 = vmatmul.msk.f32.gmra.mxu0 %vm3712_vm0, %v5712_v31 }
 0x813   : > { %7225 = vmatmul.msk.f32.gmra.mxu1 %vm3712_vm0, %v5712_v31  ;;  %7241 = vmatmul.msk.f32.gmra.mxu2 %vm3712_vm0, %v5712_v31 }
 0x815   : > { %v5411_v37 = vpop.f32.mrf.mxu3 }
 0x816   : > { %v11323_v18 = vadd.f32 %v5411_v37, %v10999_v26  ;;  %v5606_v27 = vpop.f32.mrf.mxu2 }
 0x817   : > { %v11326_v28 = vadd.f32 %v5606_v27, %v11002_v0  ;;  %v11328_v41 = vpop.f32.mrf.mxu0 }
 0x818   : > { %12203 = vst [vmem:[#allocation130_spill] sm:$0xff] %v11328_v41  ;;  %v11330_v15 = vpop.f32.mrf.mxu1 }
 0x819   : > { %12204 = vst [vmem:[#allocation131_spill] sm:$0xff] %v11330_v15  ;;  %v5714_v15 = vld [vmem:[#allocation4 + $0x40] sm:$0xff] }
 0x81a   : > { %7194 = vmatmul.msk.f32.gmra.mxu3 %vm3712_vm0, %v5713_v12  ;;  %7210 = vmatmul.msk.f32.gmra.mxu0 %vm3712_vm0, %v5713_v12 }
 0x81b   : > { %7226 = vmatmul.msk.f32.gmra.mxu1 %vm3712_vm0, %v5713_v12  ;;  %7242 = vmatmul.msk.f32.gmra.mxu2 %vm3712_vm0, %v5713_v12 }
 0x81d   : > { %v5414_v31 = vpop.f32.mrf.mxu3 }
 0x81e   : > { %v11337_v26 = vadd.f32 %v5414_v31, %v11013_v47  ;;  %v5609_v37 = vpop.f32.mrf.mxu2 }
 0x81f   : > { %v11340_v0 = vadd.f32 %v5609_v37, %v11016_v33  ;;  %v11342_v27 = vpop.f32.mrf.mxu0 }
 0x820   : > { %12205 = vst [vmem:[#allocation132_spill] sm:$0xff] %v11342_v27  ;;  %v11344_v41 = vpop.f32.mrf.mxu1 }
 0x821   : > { %12206 = vst [vmem:[#allocation133_spill] sm:$0xff] %v11344_v41  ;;  %v5715_v41 = vld [vmem:[#allocation4 + $0x48] sm:$0xff] }
 0x822   : > { %7195 = vmatmul.msk.f32.gmra.mxu3 %vm3712_vm0, %v5714_v15  ;;  %7211 = vmatmul.msk.f32.gmra.mxu0 %vm3712_vm0, %v5714_v15 }
 0x823   : > { %7227 = vmatmul.msk.f32.gmra.mxu1 %vm3712_vm0, %v5714_v15  ;;  %7243 = vmatmul.msk.f32.gmra.mxu2 %vm3712_vm0, %v5714_v15 }
 0x825   : > { %v5417_v12 = vpop.f32.mrf.mxu3 }
 0x826   : > { %v11351_v47 = vadd.f32 %v5417_v12, %v11027_v9  ;;  %v5612_v31 = vpop.f32.mrf.mxu2 }
 0x827   : > { %v11354_v33 = vadd.f32 %v5612_v31, %v11030_v52  ;;  %v11356_v37 = vpop.f32.mrf.mxu0 }
 0x828   : > { %12207 = vst [vmem:[#allocation134_spill] sm:$0xff] %v11356_v37  ;;  %v11358_v27 = vpop.f32.mrf.mxu1  ;;  %v5716_v37 = vld [vmem:[#allocation4 + $0x50] sm:$0xff] }
 0x829   : > { %12208 = vst [vmem:[#allocation135_spill] sm:$0xff] %v11358_v27 }
 0x82a   : > { %7196 = vmatmul.msk.f32.gmra.mxu3 %vm3712_vm0, %v5715_v41  ;;  %7212 = vmatmul.msk.f32.gmra.mxu0 %vm3712_vm0, %v5715_v41 }
 0x82b   : > { %7228 = vmatmul.msk.f32.gmra.mxu1 %vm3712_vm0, %v5715_v41  ;;  %7244 = vmatmul.msk.f32.gmra.mxu2 %vm3712_vm0, %v5715_v41 }
 0x82d   : > { %v5420_v15 = vpop.f32.mrf.mxu3 }
 0x82e   : > { %v11365_v9 = vadd.f32 %v5420_v15, %v11041_v13  ;;  %v5615_v12 = vpop.f32.mrf.mxu2 }
 0x82f   : > { %v11368_v52 = vadd.f32 %v5615_v12, %v11044_v49  ;;  %v11370_v31 = vpop.f32.mrf.mxu0 }
 0x830   : > { %12209 = vst [vmem:[#allocation136_spill] sm:$0xff] %v11370_v31  ;;  %v11372_v27 = vpop.f32.mrf.mxu1  ;;  %v5717_v31 = vld [vmem:[#allocation4 + $0x58] sm:$0xff] }
 0x831   : > { %12210 = vst [vmem:[#allocation137_spill] sm:$0xff] %v11372_v27 }
 0x832   : > { %7197 = vmatmul.msk.f32.gmra.mxu3 %vm3712_vm0, %v5716_v37  ;;  %7213 = vmatmul.msk.f32.gmra.mxu0 %vm3712_vm0, %v5716_v37 }
 0x833   : > { %7229 = vmatmul.msk.f32.gmra.mxu1 %vm3712_vm0, %v5716_v37  ;;  %7245 = vmatmul.msk.f32.gmra.mxu2 %vm3712_vm0, %v5716_v37 }
 0x835   : > { %v5423_v41 = vpop.f32.mrf.mxu3 }
 0x836   : > { %v11379_v13 = vadd.f32 %v5423_v41, %v11055_v21  ;;  %v5618_v15 = vpop.f32.mrf.mxu2 }
 0x837   : > { %v11382_v49 = vadd.f32 %v5618_v15, %v11058_v2  ;;  %v11384_v12 = vpop.f32.mrf.mxu0  ;;  %v5718_v15 = vld [vmem:[#allocation4 + $0x60] sm:$0xff] }
 0x838   : > { %v11386_v27 = vpop.f32.mrf.mxu1 }
 0x839   : > { %12211 = vst [vmem:[#allocation138_spill] sm:$0xff] %v11382_v49 }
 0x83a   : > { %12212 = vst [vmem:[#allocation139_spill] sm:$0xff] %v11386_v27  ;;  %7198 = vmatmul.msk.f32.gmra.mxu3 %vm3712_vm0, %v5717_v31  ;;  %7214 = vmatmul.msk.f32.gmra.mxu0 %vm3712_vm0, %v5717_v31 }
 0x83b   : > { %7230 = vmatmul.msk.f32.gmra.mxu1 %vm3712_vm0, %v5717_v31  ;;  %7246 = vmatmul.msk.f32.gmra.mxu2 %vm3712_vm0, %v5717_v31 }
 0x83d   : > { %v11392_v37 = vpop.f32.mrf.mxu3 }
 0x83e   : > { %12213 = vst [vmem:[#allocation140_spill] sm:$0xff] %v11392_v37  ;;  %v5621_v21 = vpop.f32.mrf.mxu2 }
 0x83f   : > { %v11395_v41 = vadd.f32 %v5621_v21, %v11078_v39  ;;  %v11397_v2 = vpop.f32.mrf.mxu0 }
 0x840   : > { %12214 = vst [vmem:[#allocation141_spill] sm:$0xff] %v11397_v2  ;;  %v11399_v49 = vpop.f32.mrf.mxu1  ;;  %v5719_v2 = vld [vmem:[#allocation4 + $0x68] sm:$0xff] }
 0x841   : > { %12215 = vst [vmem:[#allocation142_spill] sm:$0xff] %v11399_v49 }
 0x842   : > { %7199 = vmatmul.msk.f32.gmra.mxu3 %vm3712_vm0, %v5718_v15  ;;  %7215 = vmatmul.msk.f32.gmra.mxu0 %vm3712_vm0, %v5718_v15 }
 0x843   : > { %7231 = vmatmul.msk.f32.gmra.mxu1 %vm3712_vm0, %v5718_v15  ;;  %7247 = vmatmul.msk.f32.gmra.mxu2 %vm3712_vm0, %v5718_v15 }
 0x845   : > { %v11405_v31 = vpop.f32.mrf.mxu3 }
 0x846   : > { %12216 = vst [vmem:[#allocation143_spill] sm:$0xff] %v11405_v31  ;;  %v5624_v37 = vpop.f32.mrf.mxu2 }
 0x847   : > { %v11408_v27 = vadd.f32 %v5624_v37, %v11098_v1  ;;  %v11410_v39 = vpop.f32.mrf.mxu0 }
 0x848   : > { %12217 = vst [vmem:[#allocation144_spill] sm:$0xff] %v11410_v39  ;;  %v11412_v21 = vpop.f32.mrf.mxu1 }
 0x849   : > { %12218 = vst [vmem:[#allocation145_spill] sm:$0xff] %v11412_v21  ;;  %v5720_v21 = vld [vmem:[#allocation4 + $0x70] sm:$0xff] }
 0x84a   : > { %7200 = vmatmul.msk.f32.gmra.mxu3 %vm3712_vm0, %v5719_v2  ;;  %7216 = vmatmul.msk.f32.gmra.mxu0 %vm3712_vm0, %v5719_v2 }
 0x84b   : > { %7232 = vmatmul.msk.f32.gmra.mxu1 %vm3712_vm0, %v5719_v2  ;;  %7248 = vmatmul.msk.f32.gmra.mxu2 %vm3712_vm0, %v5719_v2 }
 0x84d   : > { %v11418_v15 = vpop.f32.mrf.mxu3 }
 0x84e   : > { %12219 = vst [vmem:[#allocation146_spill] sm:$0xff] %v11418_v15  ;;  %v5627_v31 = vpop.f32.mrf.mxu2 }
 0x84f   : > { %v11421_v49 = vadd.f32 %v5627_v31, %v11118_v43  ;;  %v11423_v1 = vpop.f32.mrf.mxu0 }
 0x850   : > { %12220 = vst [vmem:[#allocation147_spill] sm:$0xff] %v11423_v1  ;;  %v11425_v37 = vpop.f32.mrf.mxu1  ;;  %v5721_v1 = vld [vmem:[#allocation4 + $0x78] sm:$0xff] }
 0x851   : > { %12221 = vst [vmem:[#allocation148_spill] sm:$0xff] %v11425_v37 }
 0x852   : > { %7201 = vmatmul.msk.f32.gmra.mxu3 %vm3712_vm0, %v5720_v21  ;;  %7217 = vmatmul.msk.f32.gmra.mxu0 %vm3712_vm0, %v5720_v21 }
 0x853   : > { %7233 = vmatmul.msk.f32.gmra.mxu1 %vm3712_vm0, %v5720_v21  ;;  %7249 = vmatmul.msk.f32.gmra.mxu2 %vm3712_vm0, %v5720_v21 }
 0x855   : > { %v5435_v2 = vpop.f32.mrf.mxu3 }
 0x856   : > { %v11432_v15 = vadd.f32 %v5435_v2, %v11165_v61  ;;  %v5630_v39 = vpop.f32.mrf.mxu2 }
 0x857   : > { %v11435_v43 = vadd.f32 %v5630_v39, %v11174_v7  ;;  %v11437_v31 = vpop.f32.mrf.mxu0 }
 0x858   : > { %12223 = vst [vmem:[#allocation150_spill] sm:$0xff] %v11437_v31  ;;  %v11439_v37 = vpop.f32.mrf.mxu1 }
 0x859   : > { %12222 = vst [vmem:[#allocation149_spill] sm:$0xff] %v11435_v43 }
 0x85a   : > { %12224 = vst [vmem:[#allocation151_spill] sm:$0xff] %v11439_v37  ;;  %7202 = vmatmul.msk.f32.gmra.mxu3 %vm3712_vm0, %v5721_v1  ;;  %7218 = vmatmul.msk.f32.gmra.mxu0 %vm3712_vm0, %v5721_v1  ;;  %v5722_v37 = vld [vmem:[#allocation4 + $0x80] sm:$0xff] }
 0x85b   : > { %7234 = vmatmul.msk.f32.gmra.mxu1 %vm3712_vm0, %v5721_v1  ;;  %7250 = vmatmul.msk.f32.gmra.mxu2 %vm3712_vm0, %v5721_v1 }
 0x85d   : > { %v5438_v21 = vpop.f32.mrf.mxu3 }
 0x85e   : > { %v11446_v61 = vadd.f32 %v5438_v21, %v11215_v8  ;;  %v5633_v2 = vpop.f32.mrf.mxu2 }
 0x85f   : > { %v11449_v7 = vadd.f32 %v5633_v2, %v11224_v45  ;;  %v11451_v39 = vpop.f32.mrf.mxu0 }
 0x860   : > { %12225 = vst [vmem:[#allocation152_spill] sm:$0xff] %v11446_v61  ;;  %v11453_v31 = vpop.f32.mrf.mxu1 }
 0x861   : > { %12226 = vst [vmem:[#allocation153_spill] sm:$0xff] %v11449_v7  ;;  %v12240_v7 = vld [vmem:[#allocation51_spill] sm:$0xff] }
 0x862   : > { %12227 = vst [vmem:[#allocation154_spill] sm:$0xff] %v11451_v39  ;;  %7203 = vmatmul.msk.f32.gmra.mxu3 %vm3712_vm0, %v5722_v37  ;;  %7219 = vmatmul.msk.f32.gmra.mxu0 %vm3712_vm0, %v5722_v37 }
 0x863   : > { %12228 = vst [vmem:[#allocation155_spill] sm:$0xff] %v11453_v31  ;;  %7235 = vmatmul.msk.f32.gmra.mxu1 %vm3712_vm0, %v5722_v37  ;;  %7251 = vmatmul.msk.f32.gmra.mxu2 %vm3712_vm0, %v5722_v37 }
 0x865   : > { %v5441_v1 = vpop.f32.mrf.mxu3 }
 0x866   : > { %v11460_v8 = vadd.f32 %v5441_v1, %v11235_v4  ;;  %v5636_v21 = vpop.f32.mrf.mxu2 }
 0x867   : > { %v11463_v45 = vadd.f32 %v5636_v21, %v11238_v55  ;;  %v11465_v2 = vpop.f32.mrf.mxu0 }
 0x868   : > { %12229 = vst [vmem:[#allocation156_spill] sm:$0xff] %v11460_v8  ;;  %v11467_v39 = vpop.f32.mrf.mxu1  ;;  %v12238_v8 = vld [vmem:[#allocation47_spill] sm:$0xff] }
 0x869   : > { %12230 = vst [vmem:[#allocation157_spill] sm:$0xff] %v11463_v45  ;;  %v12237_v45 = vld [vmem:[#allocation66_spill] sm:$0xff] }
 0x86a   : > { %12231 = vst [vmem:[#allocation158_spill] sm:$0xff] %v11465_v2  ;;  %7204 = vmatmul.msk.f32.gmra.mxu3 %vm3712_vm0, %v10928_v16  ;;  %7220 = vmatmul.msk.f32.gmra.mxu0 %vm3712_vm0, %v10928_v16  ;;  %v4269_v31 = vadd.f32 %v12238_v8, %v12237_v45 }
 0x86b   : > { %12232 = vst [vmem:[#allocation159_spill] sm:$0xff] %v11467_v39  ;;  %7236 = vmatmul.msk.f32.gmra.mxu1 %vm3712_vm0, %v10928_v16  ;;  %7252 = vmatmul.msk.f32.gmra.mxu2 %vm3712_vm0, %v10928_v16  ;;  %v5724_v39 = vld [vmem:[#allocation4 + $0x90] sm:$0xff]  ;;  %v12239_v16 = vld [vmem:[#allocation38_spill] sm:$0xff] }
 0x86d   : > { %v5444_v4 = vpop.f32.mrf.mxu3 }
 0x86e   : > { %v11478_v55 = vadd.f32 %v5444_v4, %v11253_v36  ;;  %v5639_v37 = vpop.f32.mrf.mxu2  ;;  %v4334_v36 = vadd.f32 %v12240_v7, %v12239_v16 }
 0x86f   : > { %v11481_v1 = vadd.f32 %v5639_v37, %v11256_v51  ;;  %v11483_v21 = vpop.f32.mrf.mxu0  ;;  %v12241_v51 = vld [vmem:[#allocation92_spill] sm:$0xff]  ;;  %v12242_v37 = vld [vmem:[#allocation93_spill] sm:$0xff] }
 0x870   : > { %12233 = vst [vmem:[#allocation160_spill] sm:$0xff] %v11478_v55  ;;  %v11485_v2 = vpop.f32.mrf.mxu1  ;;  %v4804_v4 = vadd.f32 %v12241_v51, %v4269_v31  ;;  %v12246_v51 = vld [vmem:[#allocation74_spill] sm:$0xff] }
 0x871   : > { %12234 = vst [vmem:[#allocation161_spill] sm:$0xff] %v11481_v1 }
 0x872   : > { %12235 = vst [vmem:[#allocation162_spill] sm:$0xff] %v11483_v21  ;;  %7205 = vmatmul.msk.f32.gmra.mxu3 %vm3712_vm0, %v5724_v39  ;;  %7221 = vmatmul.msk.f32.gmra.mxu0 %vm3712_vm0, %v5724_v39  ;;  %v4805_v21 = vadd.f32 %v12242_v37, %v4334_v36 }
 0x873   : > { %12236 = vst [vmem:[#allocation163_spill] sm:$0xff] %v11485_v2  ;;  %7237 = vmatmul.msk.f32.gmra.mxu1 %vm3712_vm0, %v5724_v39  ;;  %7253 = vmatmul.msk.f32.gmra.mxu2 %vm3712_vm0, %v5724_v39  ;;  %v5225_v2 = vadd.f32 %v10948_v3, %v4804_v4  ;;  %v6130_v39 = vld [vmem:[%s11890_s8] sm:$0xf]  ;;  %v12245_v3 = vld [vmem:[#allocation17_spill] sm:$0xff] }
 0x874   : > { %v5226_v55 = vadd.f32 %v10950_v46, %v4805_v21  ;;  %v11512_v4 = vperm.slane %v6130_v39, 1  ;;  %v12247_v46 = vld [vmem:[#allocation16_spill] sm:$0xff] }
 0x875   : > { %v5447_v1 = vpop.f32.mrf.mxu3  ;;  %v5646_v31 = vadd.f32 %v11272_v60, %v5225_v2  ;;  %v12248_v21 = vld [vmem:[#allocation36_spill] sm:$0xff] }
 0x876   : > { %v11499_v8 = vadd.f32 %v5447_v1, %v11267_v14  ;;  %v5642_v45 = vpop.f32.mrf.mxu2  ;;  %v5647_v36 = vadd.f32 %v11274_v17, %v5226_v55  ;;  %v4272_v14 = vadd.f32 %v12246_v51, %v12245_v3  ;;  %v11522_v17 = vperm.slane %v6130_v39, 3 }
 0x877   : > { %v11503_v61 = vadd.f32 %v5642_v45, %v11270_v62  ;;  %v5888_v7 = vpop.f32.mrf.mxu0  ;;  %v4337_v62 = vadd.f32 %v12248_v21, %v12247_v46  ;;  %v11516_v45 = vperm.slane %v6130_v39, 2 }
 0x878   : > { %12243 = vst [vmem:[#allocation66_spill] sm:$0xff] %v11499_v8  ;;  %v5953_v16 = vpop.f32.mrf.mxu1  ;;  %v6067_v1 = vadd.f32 %v5888_v7, %v5646_v31  ;;  %v11519_v8 = vperm.slane %v6130_v39, 0 }
 0x879   : > { %12244 = vst [vmem:[#allocation47_spill] sm:$0xff] %v11503_v61  ;;  %v6068_v37 = vadd.f32 %v5953_v16, %v5647_v36  ;;  %v4808_v61 = vadd.f32 %v10606_v40, %v4272_v14  ;;  %v4809_v60 = vadd.f32 %v10608_v23, %v4337_v62 }
 0x87a   : > { %v6141_v7 = vadd.f32 %v11512_v4, %v6067_v1  ;;  %v12250_v1 = vld [vmem:[#allocation31_spill] sm:$0xff] }
 0x87b   : > { %v5229_v55 = vadd.f32 %v10962_v56, %v4808_v61  ;;  %v5230_v16 = vadd.f32 %v10964_v58, %v4809_v60  ;;  %v6142_v36 = vadd.f32 %v11516_v45, %v6068_v37  ;;  %v12249_v61 = vld [vmem:[#allocation41_spill] sm:$0xff]  ;;  %v12251_v60 = vld [vmem:[#allocation19_spill] sm:$0xff] }
 0x87c   : > { %v6205_v21 = vmax.f32 %v6141_v7, 0.0  ;;  %v12252_v37 = vld [vmem:[#allocation71_spill] sm:$0xff] }
 0x87d   : > { %v5823_v2 = vpop.f32.mrf.mxu3  ;;  %v5650_v14 = vadd.f32 %v11286_v22, %v5229_v55  ;;  %v5651_v46 = vadd.f32 %v11288_v63, %v5230_v16 }
 0x87e   : > { %v6066_v31 = vadd.f32 %v5823_v2, %v11281_v11  ;;  %v6018_v3 = vpop.f32.mrf.mxu2  ;;  %v4275_v11 = vadd.f32 %v12250_v1, %v12249_v61  ;;  %v4340_v2 = vadd.f32 %v12252_v37, %v12251_v60 }
 0x87f   : > { %v6069_v40 = vadd.f32 %v6018_v3, %v11284_v19  ;;  %v5891_v51 = vpop.f32.mrf.mxu0  ;;  %v6206_v19 = vmax.f32 %v6142_v36, 0.0 }
 0x880   : > { %v6140_v23 = vadd.f32 %v11519_v8, %v6066_v31  ;;  %v5956_v39 = vpop.f32.mrf.mxu1  ;;  %v6071_v58 = vadd.f32 %v5891_v51, %v5650_v14  ;;  %v4812_v22 = vadd.f32 %v10622_v32, %v4275_v11  ;;  %v4813_v31 = vadd.f32 %v10624_v30, %v4340_v2  ;;  %v12254_v11 = vld [vmem:[#allocation37_spill] sm:$0xff] }
 0x881   : > { %v6143_v56 = vadd.f32 %v11522_v17, %v6069_v40  ;;  %v6072_v43 = vadd.f32 %v5956_v39, %v5651_v46 }
 0x882   : > { %v6204_v62 = vmax.f32 %v6140_v23, 0.0  ;;  %v5233_v40 = vadd.f32 %v10976_v50, %v4812_v22  ;;  %v6145_v61 = vadd.f32 %v11512_v4, %v6071_v58  ;;  %v5234_v14 = vadd.f32 %v10978_v48, %v4813_v31  ;;  %v12255_v58 = vld [vmem:[#allocation59_spill] sm:$0xff] }
 0x883   : > { %v6207_v3 = vmax.f32 %v6143_v56, 0.0  ;;  %v6146_v36 = vadd.f32 %v11516_v45, %v6072_v43 }
 0x884   : > { %v6268_v55 = vmax.f32 %v6204_v62, %v6205_v21  ;;  %v5654_v30 = vadd.f32 %v11300_v5, %v5233_v40  ;;  %v5655_v50 = vadd.f32 %v11302_v10, %v5234_v14  ;;  %v6209_v48 = vmax.f32 %v6145_v61, 0.0 }
 0x885   : > { %v6284_v63 = vmax.f32 %v6206_v19, %v6207_v3  ;;  %v5826_v16 = vpop.f32.mrf.mxu3  ;;  %v6210_v37 = vmax.f32 %v6146_v36, 0.0 }
 0x886   : > { %v6070_v7 = vadd.f32 %v5826_v16, %v11295_v44  ;;  %v6021_v51 = vpop.f32.mrf.mxu2  ;;  %v12253_v44 = vld [vmem:[#allocation21_spill] sm:$0xff] }
 0x887   : > { %v6073_v23 = vadd.f32 %v6021_v51, %v11298_v20  ;;  %v5894_v39 = vpop.f32.mrf.mxu0  ;;  %v11546_v32 = vmax.f32 %v6268_v55, %v6284_v63  ;;  %v4278_v21 = vadd.f32 %v12254_v11, %v12253_v44  ;;  %v12256_v20 = vld [vmem:[#allocation34_spill] sm:$0xff] }
 0x888   : > { %v6144_v46 = vadd.f32 %v11519_v8, %v6070_v7  ;;  %v5959_v56 = vpop.f32.mrf.mxu1  ;;  %v6075_v43 = vadd.f32 %v5894_v39, %v5654_v30  ;;  %v4343_v60 = vadd.f32 %v12256_v20, %v12255_v58  ;;  %v12258_v30 = vld [vmem:[#allocation62_spill] sm:$0xff] }
 0x889   : > { %v6147_v1 = vadd.f32 %v11522_v17, %v6073_v23  ;;  %v6076_v19 = vadd.f32 %v5959_v56, %v5655_v50  ;;  %v4816_v5 = vadd.f32 %v10638_v38, %v4278_v21 }
 0x88a   : > { %v6208_v62 = vmax.f32 %v6144_v46, 0.0  ;;  %v4817_v22 = vadd.f32 %v10640_v34, %v4343_v60  ;;  %v6149_v63 = vadd.f32 %v11512_v4, %v6075_v43 }
 0x88b   : > { %v6211_v2 = vmax.f32 %v6147_v1, 0.0  ;;  %v5237_v31 = vadd.f32 %v10990_v42, %v4816_v5  ;;  %v6150_v7 = vadd.f32 %v11516_v45, %v6076_v19  ;;  %v12259_v1 = vld [vmem:[#allocation56_spill] sm:$0xff] }
 0x88c   : > { %v6269_v3 = vmax.f32 %v6208_v62, %v6209_v48  ;;  %v5238_v61 = vadd.f32 %v10992_v35, %v4817_v22  ;;  %v6213_v35 = vmax.f32 %v6149_v63, 0.0 }
 0x88d   : > { %v6285_v10 = vmax.f32 %v6210_v37, %v6211_v2  ;;  %v5829_v55 = vpop.f32.mrf.mxu3  ;;  %v5658_v34 = vadd.f32 %v11314_v57, %v5237_v31  ;;  %v6214_v11 = vmax.f32 %v6150_v7, 0.0 }
 0x88e   : > { %v6074_v16 = vadd.f32 %v5829_v55, %v11309_v24  ;;  %v6024_v40 = vpop.f32.mrf.mxu2  ;;  %v5659_v42 = vadd.f32 %v11316_v6, %v5238_v61  ;;  %v12257_v24 = vld [vmem:[#allocation63_spill] sm:$0xff] }
 0x88f   : > { %v6077_v51 = vadd.f32 %v6024_v40, %v11312_v54  ;;  %v5897_v14 = vpop.f32.mrf.mxu0  ;;  %v11564_v38 = vmax.f32 %v6269_v3, %v6285_v10  ;;  %v4281_v46 = vadd.f32 %v12258_v30, %v12257_v24  ;;  %v12260_v54 = vld [vmem:[#allocation50_spill] sm:$0xff]  ;;  %v12264_v40 = vld [vmem:[#allocation39_spill] sm:$0xff] }
 0x890   : > { %v6148_v36 = vadd.f32 %v11519_v8, %v6074_v16  ;;  %v5962_v23 = vpop.f32.mrf.mxu1  ;;  %v6079_v50 = vadd.f32 %v5897_v14, %v5658_v34  ;;  %v4346_v44 = vadd.f32 %v12260_v54, %v12259_v1  ;;  %v12261_v10 = vld [vmem:[#allocation130_spill] sm:$0xff]  ;;  %v12265_v14 = vld [vmem:[#allocation40_spill] sm:$0xff] }
 0x891   : > { %v6151_v39 = vadd.f32 %v11522_v17, %v6077_v51  ;;  %v6080_v48 = vadd.f32 %v5962_v23, %v5659_v42  ;;  %v4820_v57 = vadd.f32 %v10654_v53, %v4281_v46  ;;  %v12268_v46 = vld [vmem:[#allocation95_spill] sm:$0xff]  ;;  %v12269_v1 = vld [vmem:[#allocation32_spill] sm:$0xff] }
 0x892   : > { %v6212_v56 = vmax.f32 %v6148_v36, 0.0  ;;  %v4821_v43 = vadd.f32 %v10656_v25, %v4346_v44  ;;  %v6153_v60 = vadd.f32 %v11512_v4, %v6079_v50 }
 0x893   : > { %v6215_v21 = vmax.f32 %v6151_v39, 0.0  ;;  %v5241_v20 = vadd.f32 %v11004_v59, %v4820_v57  ;;  %v6154_v5 = vadd.f32 %v11516_v45, %v6080_v48  ;;  %v12262_v59 = vld [vmem:[#allocation131_spill] sm:$0xff]  ;;  %v12267_v39 = vld [vmem:[#allocation94_spill] sm:$0xff] }
 0x894   : > { %v6270_v62 = vmax.f32 %v6212_v56, %v6213_v35  ;;  %v5242_v19 = vadd.f32 %v11006_v29, %v4821_v43  ;;  %v6217_v29 = vmax.f32 %v6153_v60, 0.0  ;;  %v12270_v48 = vld [vmem:[#allocation86_spill] sm:$0xff] }
 0x895   : > { %v6286_v6 = vmax.f32 %v6214_v11, %v6215_v21  ;;  %v5832_v58 = vpop.f32.mrf.mxu3  ;;  %v5662_v25 = vadd.f32 %v12261_v10, %v5241_v20  ;;  %v6218_v36 = vmax.f32 %v6154_v5, 0.0  ;;  %v12271_v20 = vld [vmem:[#allocation132_spill] sm:$0xff] }
 0x896   : > { %v6078_v37 = vadd.f32 %v5832_v58, %v11323_v18  ;;  %v6027_v2 = vpop.f32.mrf.mxu2  ;;  %v5663_v63 = vadd.f32 %v12262_v59, %v5242_v19  ;;  %v12263_v18 = vld [vmem:[#allocation69_spill] sm:$0xff]  ;;  %v12275_v59 = vld [vmem:[#allocation67_spill] sm:$0xff] }
 0x897   : > { %v6081_v3 = vadd.f32 %v6027_v2, %v11326_v28  ;;  %v5900_v22 = vpop.f32.mrf.mxu0  ;;  %v11582_v53 = vmax.f32 %v6270_v62, %v6286_v6  ;;  %v4284_v61 = vadd.f32 %v12264_v40, %v12263_v18  ;;  %v12266_v28 = vld [vmem:[#allocation33_spill] sm:$0xff] }
 0x898   : > { %v6152_v55 = vadd.f32 %v11519_v8, %v6078_v37  ;;  %v5965_v31 = vpop.f32.mrf.mxu1  ;;  %v6083_v51 = vadd.f32 %v5900_v22, %v5662_v25  ;;  %v4349_v34 = vadd.f32 %v12266_v28, %v12265_v14  ;;  %v12272_v19 = vld [vmem:[#allocation133_spill] sm:$0xff] }
 0x899   : > { %v6155_v16 = vadd.f32 %v11522_v17, %v6081_v3  ;;  %v6084_v42 = vadd.f32 %v5965_v31, %v5663_v63  ;;  %v4824_v24 = vadd.f32 %v12267_v39, %v4284_v61  ;;  %v12274_v22 = vld [vmem:[#allocation53_spill] sm:$0xff]  ;;  %v12277_v61 = vld [vmem:[#allocation96_spill] sm:$0xff] }
 0x89a   : > { %v6216_v7 = vmax.f32 %v6152_v55, 0.0  ;;  %v4825_v35 = vadd.f32 %v12268_v46, %v4349_v34  ;;  %v6157_v44 = vadd.f32 %v11512_v4, %v6083_v51  ;;  %v12278_v51 = vld [vmem:[#allocation97_spill] sm:$0xff] }
 0x89b   : > { %v6219_v23 = vmax.f32 %v6155_v16, 0.0  ;;  %v5245_v54 = vadd.f32 %v12269_v1, %v4824_v24  ;;  %v6158_v62 = vadd.f32 %v11516_v45, %v6084_v42 }
 0x89c   : > { %v6271_v30 = vmax.f32 %v6216_v7, %v6217_v29  ;;  %v5246_v57 = vadd.f32 %v12270_v48, %v4825_v35  ;;  %v6221_v25 = vmax.f32 %v6157_v44, 0.0  ;;  %v12282_v48 = vld [vmem:[#allocation135_spill] sm:$0xff] }
 0x89d   : > { %v6287_v56 = vmax.f32 %v6218_v36, %v6219_v23  ;;  %v5835_v50 = vpop.f32.mrf.mxu3  ;;  %v5666_v60 = vadd.f32 %v12271_v20, %v5245_v54  ;;  %v6222_v16 = vmax.f32 %v6158_v62, 0.0  ;;  %v12279_v36 = vld [vmem:[#allocation60_spill] sm:$0xff]  ;;  %v12281_v54 = vld [vmem:[#allocation134_spill] sm:$0xff] }
 0x89e   : > { %v6082_v11 = vadd.f32 %v5835_v50, %v11337_v26  ;;  %v6030_v21 = vpop.f32.mrf.mxu2  ;;  %v5667_v5 = vadd.f32 %v12272_v19, %v5246_v57  ;;  %v12273_v26 = vld [vmem:[#allocation44_spill] sm:$0xff] }
 0x89f   : > { %v6085_v43 = vadd.f32 %v6030_v21, %v11340_v0  ;;  %v5903_v6 = vpop.f32.mrf.mxu0  ;;  %v11600_v58 = vmax.f32 %v6271_v30, %v6287_v56  ;;  %v4287_v10 = vadd.f32 %v12274_v22, %v12273_v26  ;;  %v12276_v0 = vld [vmem:[#allocation73_spill] sm:$0xff]  ;;  %v12280_v30 = vld [vmem:[#allocation90_spill] sm:$0xff] }
 0x8a0   : > { %v6156_v37 = vadd.f32 %v11519_v8, %v6082_v11  ;;  %v5968_v2 = vpop.f32.mrf.mxu1  ;;  %v6087_v31 = vadd.f32 %v5903_v6, %v5666_v60  ;;  %v4352_v63 = vadd.f32 %v12276_v0, %v12275_v59  ;;  %v12287_v22 = vld [vmem:[#allocation98_spill] sm:$0xff] }
 0x8a1   : > { %v6159_v3 = vadd.f32 %v11522_v17, %v6085_v43  ;;  %v6088_v40 = vadd.f32 %v5968_v2, %v5667_v5  ;;  %v4828_v29 = vadd.f32 %v12277_v61, %v4287_v10  ;;  %v12284_v43 = vld [vmem:[#allocation70_spill] sm:$0xff] }
 0x8a2   : > { %v6220_v55 = vmax.f32 %v6156_v37, 0.0  ;;  %v4829_v14 = vadd.f32 %v12278_v51, %v4352_v63  ;;  %v6161_v42 = vadd.f32 %v11512_v4, %v6087_v31  ;;  %v12285_v2 = vld [vmem:[#allocation18_spill] sm:$0xff]  ;;  %v12289_v63 = vld [vmem:[#allocation76_spill] sm:$0xff] }
 0x8a3   : > { %v6223_v18 = vmax.f32 %v6159_v3, 0.0  ;;  %v5249_v23 = vadd.f32 %v12279_v36, %v4828_v29  ;;  %v6162_v35 = vadd.f32 %v11516_v45, %v6088_v40  ;;  %v12290_v29 = vld [vmem:[#allocation91_spill] sm:$0xff] }
 0x8a4   : > { %v6272_v7 = vmax.f32 %v6220_v55, %v6221_v25  ;;  %v5250_v46 = vadd.f32 %v12280_v30, %v4829_v14  ;;  %v6225_v20 = vmax.f32 %v6161_v42, 0.0  ;;  %v12288_v55 = vld [vmem:[#allocation99_spill] sm:$0xff] }
 0x8a5   : > { %v6288_v28 = vmax.f32 %v6222_v16, %v6223_v18  ;;  %v5838_v34 = vpop.f32.mrf.mxu3  ;;  %v5670_v44 = vadd.f32 %v12281_v54, %v5249_v23  ;;  %v6226_v5 = vmax.f32 %v6162_v35, 0.0  ;;  %v12291_v36 = vld [vmem:[#allocation23_spill] sm:$0xff]  ;;  %v12292_v23 = vld [vmem:[#allocation65_spill] sm:$0xff] }
 0x8a6   : > { %v6086_v39 = vadd.f32 %v5838_v34, %v11351_v47  ;;  %v6033_v24 = vpop.f32.mrf.mxu2  ;;  %v5671_v57 = vadd.f32 %v12282_v48, %v5250_v46  ;;  %v12283_v47 = vld [vmem:[#allocation20_spill] sm:$0xff]  ;;  %v4293_v42 = vadd.f32 %v12292_v23, %v12291_v36  ;;  %v12294_v35 = vld [vmem:[#allocation25_spill] sm:$0xff] }
 0x8a7   : > { %v6089_v56 = vadd.f32 %v6033_v24, %v11354_v33  ;;  %v5906_v50 = vpop.f32.mrf.mxu0  ;;  %v11618_v1 = vmax.f32 %v6272_v7, %v6288_v28  ;;  %v4290_v6 = vadd.f32 %v12284_v43, %v12283_v47  ;;  %v12286_v33 = vld [vmem:[#allocation48_spill] sm:$0xff]  ;;  %v12305_v23 = vld [vmem:[#allocation57_spill] sm:$0xff] }
 0x8a8   : > { %v6160_v11 = vadd.f32 %v11519_v8, %v6086_v39  ;;  %v5971_v21 = vpop.f32.mrf.mxu1  ;;  %v6091_v37 = vadd.f32 %v5906_v50, %v5670_v44  ;;  %v4355_v19 = vadd.f32 %v12286_v33, %v12285_v2  ;;  %v12293_v39 = vld [vmem:[#allocation136_spill] sm:$0xff]  ;;  %v12296_v50 = vld [vmem:[#allocation137_spill] sm:$0xff] }
 0x8a9   : > { %v6163_v62 = vadd.f32 %v11522_v17, %v6089_v56  ;;  %v6092_v26 = vadd.f32 %v5971_v21, %v5671_v57  ;;  %v4832_v10 = vadd.f32 %v12287_v22, %v4290_v6  ;;  %v12300_v33 = vld [vmem:[#allocation113_spill] sm:$0xff] }
 0x8aa   : > { %v6224_v60 = vmax.f32 %v6160_v11, 0.0  ;;  %v4833_v31 = vadd.f32 %v12288_v55, %v4355_v19  ;;  %v6165_v18 = vadd.f32 %v11512_v4, %v6091_v37  ;;  %v12297_v11 = vld [vmem:[#allocation100_spill] sm:$0xff]  ;;  %v12301_v55 = vld [vmem:[#allocation139_spill] sm:$0xff] }
 0x8ab   : > { %v6227_v3 = vmax.f32 %v6163_v62, 0.0  ;;  %v5253_v16 = vadd.f32 %v12289_v63, %v4832_v10  ;;  %v6166_v51 = vadd.f32 %v11516_v45, %v6092_v26  ;;  %v12298_v62 = vld [vmem:[#allocation101_spill] sm:$0xff] }
 0x8ac   : > { %v6273_v25 = vmax.f32 %v6224_v60, %v6225_v20  ;;  %v5254_v7 = vadd.f32 %v12290_v29, %v4833_v31  ;;  %v6229_v21 = vmax.f32 %v6165_v18, 0.0  ;;  %v12299_v60 = vld [vmem:[#allocation112_spill] sm:$0xff] }
 0x8ad   : > { %v6289_v59 = vmax.f32 %v6226_v5, %v6227_v3  ;;  %v5841_v0 = vpop.f32.mrf.mxu3  ;;  %v5674_v24 = vadd.f32 %v12293_v39, %v5253_v16  ;;  %v6230_v43 = vmax.f32 %v6166_v51, 0.0  ;;  %v12303_v51 = vld [vmem:[#allocation61_spill] sm:$0xff] }
 0x8ae   : > { %v6090_v40 = vadd.f32 %v5841_v0, %v11365_v9  ;;  %v6036_v61 = vpop.f32.mrf.mxu2  ;;  %v12295_v9 = vld [vmem:[#allocation52_spill] sm:$0xff]  ;;  %v5675_v54 = vadd.f32 %v12296_v50, %v5254_v7  ;;  %v12302_v0 = vld [vmem:[#allocation138_spill] sm:$0xff] }
 0x8af   : > { %v6093_v14 = vadd.f32 %v6036_v61, %v11368_v52  ;;  %v5909_v28 = vpop.f32.mrf.mxu0  ;;  %v11636_v34 = vmax.f32 %v6273_v25, %v6289_v59  ;;  %v4358_v56 = vadd.f32 %v12295_v9, %v12294_v35  ;;  %v4836_v52 = vadd.f32 %v12297_v11, %v4293_v42  ;;  %v12306_v42 = vld [vmem:[#allocation43_spill] sm:$0xff]  ;;  %v12308_v9 = vld [vmem:[#allocation114_spill] sm:$0xff] }
 0x8b0   : > { %v6164_v30 = vadd.f32 %v11519_v8, %v6090_v40  ;;  %v5974_v46 = vpop.f32.mrf.mxu1  ;;  %v6095_v57 = vadd.f32 %v5909_v28, %v5674_v24  ;;  %v4361_v39 = vadd.f32 %v12306_v42, %v12305_v23  ;;  %v12322_v42 = vld [vmem:[#allocation105_spill] sm:$0xff] }
 0x8b1   : > { %v6167_v44 = vadd.f32 %v11522_v17, %v6093_v14  ;;  %v4837_v47 = vadd.f32 %v12298_v62, %v4358_v56  ;;  %v6096_v20 = vadd.f32 %v5974_v46, %v5675_v54  ;;  %v5257_v37 = vadd.f32 %v12299_v60, %v4836_v52  ;;  %v12304_v14 = vld [vmem:[#allocation55_spill] sm:$0xff]  ;;  %v12307_v46 = vld [vmem:[#allocation102_spill] sm:$0xff]  ;;  %v12309_v56 = vld [vmem:[#allocation140_spill] sm:$0xff] }
 0x8b2   : > { %v6228_v48 = vmax.f32 %v6164_v30, 0.0  ;;  %v6169_v22 = vadd.f32 %v11512_v4, %v6095_v57  ;;  %v5677_v50 = vadd.f32 %v12309_v56, %v12308_v9 }
 0x8b3   : > { %v6231_v6 = vmax.f32 %v6167_v44, 0.0  ;;  %v5258_v19 = vadd.f32 %v12300_v33, %v4837_v47  ;;  %v5678_v26 = vadd.f32 %v11384_v12, %v5257_v37  ;;  %v6170_v59 = vadd.f32 %v11516_v45, %v6096_v20  ;;  %v12310_v44 = vld [vmem:[#allocation103_spill] sm:$0xff] }
 0x8b4   : > { %v6274_v2 = vmax.f32 %v6228_v48, %v6229_v21  ;;  %v6233_v28 = vmax.f32 %v6169_v22, 0.0  ;;  %v4841_v11 = vadd.f32 %v12310_v44, %v4361_v39  ;;  %v12311_v48 = vld [vmem:[#allocation115_spill] sm:$0xff]  ;;  %v12314_v22 = vld [vmem:[#allocation142_spill] sm:$0xff] }
 0x8b5   : > { %v6290_v5 = vmax.f32 %v6230_v43, %v6231_v6  ;;  %v5844_v3 = vpop.f32.mrf.mxu3  ;;  %v5679_v31 = vadd.f32 %v12301_v55, %v5258_v19  ;;  %v6234_v24 = vmax.f32 %v6170_v59, 0.0  ;;  %v12312_v6 = vld [vmem:[#allocation116_spill] sm:$0xff]  ;;  %v12313_v19 = vld [vmem:[#allocation141_spill] sm:$0xff]  ;;  %v12315_v55 = vld [vmem:[#allocation42_spill] sm:$0xff] }
 0x8b6   : > { %v6094_v10 = vadd.f32 %v5844_v3, %v11379_v13  ;;  %v6039_v25 = vpop.f32.mrf.mxu2  ;;  %v4296_v13 = vadd.f32 %v12304_v14, %v12303_v51  ;;  %v5262_v20 = vadd.f32 %v12312_v6, %v4841_v11  ;;  %v12319_v51 = vld [vmem:[#allocation104_spill] sm:$0xff]  ;;  %v12326_v6 = vld [vmem:[#allocation145_spill] sm:$0xff] }
 0x8b7   : > { %v6097_v63 = vadd.f32 %v6039_v25, %v12302_v0  ;;  %v5912_v16 = vpop.f32.mrf.mxu0  ;;  %v11656_v18 = vmax.f32 %v6274_v2, %v6290_v5 }
 0x8b8   : > { %v6168_v40 = vadd.f32 %v11519_v8, %v6094_v10  ;;  %v6099_v61 = vadd.f32 %v5912_v16, %v5678_v26  ;;  %v5977_v29 = vpop.f32.mrf.mxu1  ;;  %v4840_v35 = vadd.f32 %v12307_v46, %v4296_v13  ;;  %v5683_v10 = vadd.f32 %v12314_v22, %v5262_v20  ;;  %v12320_v13 = vld [vmem:[#allocation117_spill] sm:$0xff]  ;;  %v12323_v46 = vld [vmem:[#allocation118_spill] sm:$0xff] }
 0x8b9   : > { %v6171_v12 = vadd.f32 %v11522_v17, %v6097_v63  ;;  %v6100_v7 = vadd.f32 %v5977_v29, %v5679_v31  ;;  %v12316_v31 = vld [vmem:[#allocation75_spill] sm:$0xff]  ;;  %v12329_v22 = vld [vmem:[#allocation46_spill] sm:$0xff] }
 0x8ba   : > { %v6232_v36 = vmax.f32 %v6168_v40, 0.0  ;;  %v5261_v57 = vadd.f32 %v12311_v48, %v4840_v35  ;;  %v6173_v62 = vadd.f32 %v11512_v4, %v6099_v61  ;;  %v4299_v59 = vadd.f32 %v12316_v31, %v12315_v55  ;;  %v12317_v40 = vld [vmem:[#allocation24_spill] sm:$0xff] }
 0x8bb   : > { %v6235_v30 = vmax.f32 %v6171_v12, 0.0  ;;  %v6174_v60 = vadd.f32 %v11516_v45, %v6100_v7 }
 0x8bc   : > { %v6275_v54 = vmax.f32 %v6232_v36, %v6233_v28  ;;  %v5682_v5 = vadd.f32 %v12313_v19, %v5261_v57  ;;  %v6237_v0 = vmax.f32 %v6173_v62, 0.0  ;;  %v4844_v14 = vadd.f32 %v12319_v51, %v4299_v59  ;;  %v12321_v28 = vld [vmem:[#allocation143_spill] sm:$0xff]  ;;  %v12325_v57 = vld [vmem:[#allocation144_spill] sm:$0xff]  ;;  %v12331_v59 = vld [vmem:[#allocation106_spill] sm:$0xff] }
 0x8bd   : > { %v6291_v52 = vmax.f32 %v6234_v24, %v6235_v30  ;;  %v5847_v21 = vpop.f32.mrf.mxu3  ;;  %v6238_v29 = vmax.f32 %v6174_v60, 0.0  ;;  %v5681_v36 = vadd.f32 %v12321_v28, %v12320_v13  ;;  %v12335_v51 = vld [vmem:[#allocation121_spill] sm:$0xff] }
 0x8be   : > { %v6098_v47 = vadd.f32 %v5847_v21, %v5677_v50  ;;  %v6042_v43 = vpop.f32.mrf.mxu2  ;;  %v5265_v35 = vadd.f32 %v12323_v46, %v4844_v14 }
 0x8bf   : > { %v6101_v37 = vadd.f32 %v6042_v43, %v11395_v41  ;;  %v5915_v2 = vpop.f32.mrf.mxu0  ;;  %v11673_v33 = vmax.f32 %v6275_v54, %v6291_v52  ;;  %v12318_v41 = vld [vmem:[#allocation54_spill] sm:$0xff]  ;;  %v12324_v54 = vld [vmem:[#allocation119_spill] sm:$0xff] }
 0x8c0   : > { %v6172_v3 = vadd.f32 %v11519_v8, %v6098_v47  ;;  %v5980_v26 = vpop.f32.mrf.mxu1  ;;  %v6103_v16 = vadd.f32 %v5915_v2, %v5682_v5  ;;  %v4364_v61 = vadd.f32 %v12318_v41, %v12317_v40  ;;  %v5686_v62 = vadd.f32 %v12325_v57, %v5265_v35  ;;  %v12328_v2 = vld [vmem:[#allocation77_spill] sm:$0xff]  ;;  %v12337_v35 = vld [vmem:[#allocation147_spill] sm:$0xff] }
 0x8c1   : > { %v6175_v25 = vadd.f32 %v11522_v17, %v6101_v37  ;;  %v6104_v7 = vadd.f32 %v5980_v26, %v5683_v10  ;;  %v12327_v37 = vld [vmem:[#allocation22_spill] sm:$0xff] }
 0x8c2   : > { %v6236_v63 = vmax.f32 %v6172_v3, 0.0  ;;  %v4845_v39 = vadd.f32 %v12322_v42, %v4364_v61  ;;  %v6177_v9 = vadd.f32 %v11512_v4, %v6103_v16  ;;  %v4302_v19 = vadd.f32 %v12328_v2, %v12327_v37  ;;  %v12333_v16 = vld [vmem:[#allocation146_spill] sm:$0xff]  ;;  %v12334_v61 = vld [vmem:[#allocation107_spill] sm:$0xff] }
 0x8c3   : > { %v6239_v12 = vmax.f32 %v6175_v25, 0.0  ;;  %v6178_v11 = vadd.f32 %v11516_v45, %v6104_v7 }
 0x8c4   : > { %v6276_v23 = vmax.f32 %v6236_v63, %v6237_v0  ;;  %v5266_v44 = vadd.f32 %v12324_v54, %v4845_v39  ;;  %v6241_v5 = vmax.f32 %v6177_v9, 0.0  ;;  %v4848_v0 = vadd.f32 %v12331_v59, %v4302_v19  ;;  %v12332_v63 = vld [vmem:[#allocation120_spill] sm:$0xff] }
 0x8c5   : > { %v6292_v24 = vmax.f32 %v6238_v29, %v6239_v12  ;;  %v5850_v30 = vpop.f32.mrf.mxu3  ;;  %v6242_v25 = vmax.f32 %v6178_v11, 0.0  ;;  %v5685_v40 = vadd.f32 %v12333_v16, %v12332_v63  ;;  %v12338_v54 = vld [vmem:[#allocation148_spill] sm:$0xff] }
 0x8c6   : > { %v6102_v56 = vadd.f32 %v5850_v30, %v5681_v36  ;;  %v6045_v50 = vpop.f32.mrf.mxu2  ;;  %v5687_v20 = vadd.f32 %v12326_v6, %v5266_v44  ;;  %v5269_v14 = vadd.f32 %v12335_v51, %v4848_v0  ;;  %v12341_v6 = vld [vmem:[#allocation30_spill] sm:$0xff]  ;;  %v12343_v19 = vld [vmem:[#allocation108_spill] sm:$0xff] }
 0x8c7   : > { %v6105_v52 = vadd.f32 %v6045_v50, %v11408_v27  ;;  %v5918_v21 = vpop.f32.mrf.mxu0  ;;  %v11692_v48 = vmax.f32 %v6276_v23, %v6292_v24  ;;  %v12330_v27 = vld [vmem:[#allocation78_spill] sm:$0xff]  ;;  %v12346_v63 = vld [vmem:[#allocation124_spill] sm:$0xff] }
 0x8c8   : > { %v6176_v47 = vadd.f32 %v11519_v8, %v6102_v56  ;;  %v5983_v43 = vpop.f32.mrf.mxu1  ;;  %v6107_v26 = vadd.f32 %v5918_v21, %v5686_v62  ;;  %v4367_v10 = vadd.f32 %v12330_v27, %v12329_v22  ;;  %v12336_v23 = vld [vmem:[#allocation122_spill] sm:$0xff]  ;;  %v5690_v9 = vadd.f32 %v12337_v35, %v5269_v14  ;;  %v12340_v21 = vld [vmem:[#allocation79_spill] sm:$0xff] }
 0x8c9   : > { %v6179_v60 = vadd.f32 %v11522_v17, %v6105_v52  ;;  %v6108_v31 = vadd.f32 %v5983_v43, %v5687_v20  ;;  %v12339_v52 = vld [vmem:[#allocation27_spill] sm:$0xff] }
 0x8ca   : > { %v6240_v3 = vmax.f32 %v6176_v47, 0.0  ;;  %v4849_v29 = vadd.f32 %v12334_v61, %v4367_v10  ;;  %v6181_v13 = vadd.f32 %v11512_v4, %v6107_v26  ;;  %v4305_v57 = vadd.f32 %v12340_v21, %v12339_v52  ;;  %v12344_v26 = vld [vmem:[#allocation109_spill] sm:$0xff]  ;;  %v12354_v52 = vld [vmem:[#allocation110_spill] sm:$0xff] }
 0x8cb   : > { %v6243_v55 = vmax.f32 %v6179_v60, 0.0  ;;  %v6182_v39 = vadd.f32 %v11516_v45, %v6108_v31 }
 0x8cc   : > { %v6277_v41 = vmax.f32 %v6240_v3, %v6241_v5  ;;  %v5270_v42 = vadd.f32 %v12336_v23, %v4849_v29  ;;  %v6245_v62 = vmax.f32 %v6181_v13, 0.0  ;;  %v4852_v5 = vadd.f32 %v12343_v19, %v4305_v57 }
 0x8cd   : > { %v6293_v12 = vmax.f32 %v6242_v25, %v6243_v55  ;;  %v5853_v7 = vpop.f32.mrf.mxu3  ;;  %v6246_v60 = vmax.f32 %v6182_v39, 0.0  ;;  %v12345_v25 = vld [vmem:[#allocation123_spill] sm:$0xff] }
 0x8ce   : > { %v6106_v28 = vadd.f32 %v5853_v7, %v5685_v40  ;;  %v6048_v36 = vpop.f32.mrf.mxu2  ;;  %v5691_v44 = vadd.f32 %v12338_v54, %v5270_v42  ;;  %v5273_v55 = vadd.f32 %v12345_v25, %v4852_v5  ;;  %v12348_v7 = vld [vmem:[#allocation150_spill] sm:$0xff]  ;;  %v12351_v42 = vld [vmem:[#allocation81_spill] sm:$0xff] }
 0x8cf   : > { %v6109_v24 = vadd.f32 %v6048_v36, %v11421_v49  ;;  %v5921_v30 = vpop.f32.mrf.mxu0  ;;  %v11711_v46 = vmax.f32 %v6277_v41, %v6293_v12  ;;  %v12342_v49 = vld [vmem:[#allocation80_spill] sm:$0xff]  ;;  %v12347_v41 = vld [vmem:[#allocation149_spill] sm:$0xff]  ;;  %v12358_v5 = vld [vmem:[#allocation126_spill] sm:$0xff] }
 0x8d0   : > { %v6180_v56 = vadd.f32 %v11519_v8, %v6106_v28  ;;  %v5986_v50 = vpop.f32.mrf.mxu1  ;;  %v6111_v43 = vadd.f32 %v5921_v30, %v5690_v9  ;;  %v4370_v20 = vadd.f32 %v12342_v49, %v12341_v6  ;;  %v5694_v51 = vadd.f32 %v12348_v7, %v5273_v55  ;;  %v12349_v28 = vld [vmem:[#allocation151_spill] sm:$0xff]  ;;  %v12352_v9 = vld [vmem:[#allocation58_spill] sm:$0xff]  ;;  %v12356_v49 = vld [vmem:[#allocation125_spill] sm:$0xff] }
 0x8d1   : > { %v6183_v11 = vadd.f32 %v11522_v17, %v6109_v24  ;;  %v6112_v2 = vadd.f32 %v5986_v50, %v5691_v44  ;;  %v12360_v55 = vld [vmem:[#allocation154_spill] sm:$0xff] }
 0x8d2   : > { %v6244_v47 = vmax.f32 %v6180_v56, 0.0  ;;  %v4853_v22 = vadd.f32 %v12344_v26, %v4370_v20  ;;  %v6185_v31 = vadd.f32 %v11512_v4, %v6111_v43  ;;  %v12353_v56 = vld [vmem:[#allocation82_spill] sm:$0xff] }
 0x8d3   : > { %v6247_v37 = vmax.f32 %v6183_v11, 0.0  ;;  %v6186_v40 = vadd.f32 %v11516_v45, %v6112_v2  ;;  %v4373_v50 = vadd.f32 %v12353_v56, %v12352_v9 }
 0x8d4   : > { %v6278_v3 = vmax.f32 %v6244_v47, %v6245_v62  ;;  %v5274_v16 = vadd.f32 %v12346_v63, %v4853_v22  ;;  %v6249_v24 = vmax.f32 %v6185_v31, 0.0  ;;  %v12355_v62 = vld [vmem:[#allocation111_spill] sm:$0xff]  ;;  %v12359_v22 = vld [vmem:[#allocation153_spill] sm:$0xff] }
 0x8d5   : > { %v6294_v27 = vmax.f32 %v6246_v60, %v6247_v37  ;;  %v5856_v10 = vpop.f32.mrf.mxu3  ;;  %v6250_v54 = vmax.f32 %v6186_v40, 0.0  ;;  %v4857_v47 = vadd.f32 %v12355_v62, %v4373_v50  ;;  %v12357_v37 = vld [vmem:[#allocation152_spill] sm:$0xff]  ;;  %v12361_v63 = vld [vmem:[#allocation155_spill] sm:$0xff] }
 0x8d6   : > { %v6110_v59 = vadd.f32 %v5856_v10, %v11432_v15  ;;  %v6051_v0 = vpop.f32.mrf.mxu2  ;;  %v5695_v36 = vadd.f32 %v12349_v28, %v5274_v16  ;;  %v12350_v15 = vld [vmem:[#allocation64_spill] sm:$0xff] }
 0x8d7   : > { %v6113_v61 = vadd.f32 %v6051_v0, %v12347_v41  ;;  %v5924_v29 = vpop.f32.mrf.mxu0  ;;  %v11729_v12 = vmax.f32 %v6278_v3, %v6294_v27  ;;  %v4308_v39 = vadd.f32 %v12351_v42, %v12350_v15  ;;  %v5278_v3 = vadd.f32 %v12358_v5, %v4857_v47  ;;  %v12362_v41 = vld [vmem:[#allocation26_spill] sm:$0xff]  ;;  %v12365_v28 = vld [vmem:[#allocation84_spill] sm:$0xff] }
 0x8d8   : > { %v6184_v14 = vadd.f32 %v11519_v8, %v6110_v59  ;;  %v5989_v13 = vpop.f32.mrf.mxu1  ;;  %v6115_v35 = vadd.f32 %v5924_v29, %v5694_v51  ;;  %v12370_v62 = vld [vmem:[#allocation128_spill] sm:$0xff] }
 0x8d9   : > { %v6187_v23 = vadd.f32 %v11522_v17, %v6113_v61  ;;  %v6116_v11 = vadd.f32 %v5989_v13, %v5695_v36  ;;  %v4856_v21 = vadd.f32 %v12354_v52, %v4308_v39  ;;  %v5699_v16 = vadd.f32 %v12361_v63, %v5278_v3  ;;  %v12363_v61 = vld [vmem:[#allocation83_spill] sm:$0xff]  ;;  %v12364_v13 = vld [vmem:[#allocation49_spill] sm:$0xff]  ;;  %v12369_v52 = vld [vmem:[#allocation156_spill] sm:$0xff] }
 0x8da   : > { %v6248_v30 = vmax.f32 %v6184_v14, 0.0  ;;  %v6189_v60 = vadd.f32 %v11512_v4, %v6115_v35  ;;  %v4311_v29 = vadd.f32 %v12363_v61, %v12362_v41  ;;  %v4376_v36 = vadd.f32 %v12365_v28, %v12364_v13  ;;  %v12366_v39 = vld [vmem:[#allocation45_spill] sm:$0xff]  ;;  %v12367_v35 = vld [vmem:[#allocation28_spill] sm:$0xff]  ;;  %v12373_v3 = vld [vmem:[#allocation159_spill] sm:$0xff] }
 0x8db   : > { %v6251_v44 = vmax.f32 %v6187_v23, 0.0  ;;  %v5277_v20 = vadd.f32 %v12356_v49, %v4856_v21  ;;  %v6190_v26 = vadd.f32 %v11516_v45, %v6116_v11  ;;  %v12376_v63 = vld [vmem:[#allocation72_spill] sm:$0xff]  ;;  %v12379_v13 = vld [vmem:[#allocation85_spill] sm:$0xff] }
 0x8dc   : > { %v6279_v57 = vmax.f32 %v6248_v30, %v6249_v24  ;;  %v6253_v7 = vmax.f32 %v6189_v60, 0.0  ;;  %v4860_v24 = vadd.f32 %v12366_v39, %v4311_v29  ;;  %v4861_v9 = vadd.f32 %v12367_v35, %v4376_v36 }
 0x8dd   : > { %v6295_v43 = vmax.f32 %v6250_v54, %v6251_v44  ;;  %v5859_v6 = vpop.f32.mrf.mxu3  ;;  %v5698_v31 = vadd.f32 %v12360_v55, %v5277_v20  ;;  %v6254_v23 = vmax.f32 %v6190_v26, 0.0  ;;  %v12368_v54 = vld [vmem:[#allocation127_spill] sm:$0xff] }
 0x8de   : > { %v6114_v2 = vadd.f32 %v5859_v6, %v12357_v37  ;;  %v6054_v19 = vpop.f32.mrf.mxu2  ;;  %v5281_v44 = vadd.f32 %v12368_v54, %v4860_v24  ;;  %v5282_v47 = vadd.f32 %v12370_v62, %v4861_v9  ;;  %v12371_v6 = vld [vmem:[#allocation157_spill] sm:$0xff]  ;;  %v12372_v37 = vld [vmem:[#allocation158_spill] sm:$0xff]  ;;  %v12381_v24 = vld [vmem:[#allocation160_spill] sm:$0xff] }
 0x8df   : > { %v6117_v27 = vadd.f32 %v6054_v19, %v12359_v22  ;;  %v5927_v10 = vpop.f32.mrf.mxu0  ;;  %v11747_v25 = vmax.f32 %v6279_v57, %v6295_v43  ;;  %v12382_v9 = vld [vmem:[#allocation129_spill] sm:$0xff] }
 0x8e0   : > { %v6188_v59 = vadd.f32 %v11519_v8, %v6114_v2  ;;  %v5992_v0 = vpop.f32.mrf.mxu1  ;;  %v6119_v14 = vadd.f32 %v5927_v10, %v5698_v31  ;;  %v5702_v2 = vadd.f32 %v12372_v37, %v5281_v44  ;;  %v5703_v26 = vadd.f32 %v12373_v3, %v5282_v47  ;;  %v12375_v10 = vld [vmem:[#allocation87_spill] sm:$0xff]  ;;  %v12383_v54 = vld [vmem:[#allocation161_spill] sm:$0xff] }
 0x8e1   : > { %v6191_v40 = vadd.f32 %v11522_v17, %v6117_v27  ;;  %v6120_v42 = vadd.f32 %v5992_v0, %v5699_v16  ;;  %v12374_v27 = vld [vmem:[#allocation68_spill] sm:$0xff]  ;;  %v12377_v16 = vld [vmem:[#allocation89_spill] sm:$0xff] }
 0x8e2   : > { %v6252_v51 = vmax.f32 %v6188_v59, 0.0  ;;  %v6193_v11 = vadd.f32 %v11512_v4, %v6119_v14  ;;  %v4314_v55 = vadd.f32 %v12375_v10, %v12374_v27 }
 0x8e3   : > { %v6255_v15 = vmax.f32 %v6191_v40, 0.0  ;;  %v6194_v43 = vadd.f32 %v11516_v45, %v6120_v42  ;;  %v4379_v40 = vadd.f32 %v12377_v16, %v12376_v63  ;;  %v12387_v63 = vld [vmem:[#allocation47_spill] sm:$0xff] }
 0x8e4   : > { %v6280_v30 = vmax.f32 %v6252_v51, %v6253_v7  ;;  %v6257_v31 = vmax.f32 %v6193_v11, 0.0  ;;  %v12378_v7 = vld [vmem:[#allocation35_spill] sm:$0xff] }
 0x8e5   : > { %v6296_v56 = vmax.f32 %v6254_v23, %v6255_v15  ;;  %v5862_v50 = vpop.f32.mrf.mxu3  ;;  %v6258_v41 = vmax.f32 %v6194_v43, 0.0  ;;  %v4864_v51 = vadd.f32 %v12378_v7, %v4314_v55  ;;  %v4865_v28 = vadd.f32 %v12379_v13, %v4379_v40  ;;  %v12380_v15 = vld [vmem:[#allocation88_spill] sm:$0xff]  ;;  %v12385_v43 = vld [vmem:[#allocation163_spill] sm:$0xff]  ;;  %v12386_v55 = vld [vmem:[#allocation66_spill] sm:$0xff] }
 0x8e6   : > { %v6118_v21 = vadd.f32 %v5862_v50, %v12369_v52  ;;  %v6057_v57 = vpop.f32.mrf.mxu2 }
 0x8e7   : > { %v6121_v49 = vadd.f32 %v6057_v57, %v12371_v6  ;;  %v5930_v20 = vpop.f32.mrf.mxu0  ;;  %v11765_v60 = vmax.f32 %v6280_v30, %v6296_v56  ;;  %v5285_v42 = vadd.f32 %v12380_v15, %v4864_v51  ;;  %v5286_v56 = vadd.f32 %v12382_v9, %v4865_v28 }
 0x8e8   : > { %v6192_v19 = vadd.f32 %v11519_v8, %v6118_v21  ;;  %v5995_v5 = vpop.f32.mrf.mxu1  ;;  %v6123_v0 = vadd.f32 %v5930_v20, %v5702_v2  ;;  %v12384_v21 = vld [vmem:[#allocation162_spill] sm:$0xff] }
 0x8e9   : > { %v6195_v22 = vadd.f32 %v11522_v17, %v6121_v49  ;;  %v6124_v29 = vadd.f32 %v5995_v5, %v5703_v26  ;;  %v5706_v57 = vadd.f32 %v12384_v21, %v5285_v42  ;;  %v5707_v6 = vadd.f32 %v12385_v43, %v5286_v56  ;;  %v7357_v42 = vld [vmem:[%s11892_s10] ss:$0 sm:$0xff] }
 0x8ea   : > { %v6256_v59 = vmax.f32 %v6192_v19, 0.0  ;;  %v6197_v39 = vadd.f32 %v11512_v4, %v6123_v0 }
 0x8eb   : > { %v6259_v61 = vmax.f32 %v6195_v22, 0.0  ;;  %v6198_v50 = vadd.f32 %v11516_v45, %v6124_v29 }
 0x8ec   : > { %v6281_v14 = vmax.f32 %v6256_v59, %v6257_v31  ;;  %v6261_v20 = vmax.f32 %v6197_v39, 0.0 }
 0x8ed   : > { %v6297_v36 = vmax.f32 %v6258_v41, %v6259_v61  ;;  %v5865_v23 = vpop.f32.mrf.mxu3  ;;  %v6262_v19 = vmax.f32 %v6198_v50, 0.0 }
 0x8ee   : > { %v6122_v30 = vadd.f32 %v5865_v23, %v12381_v24  ;;  %v6060_v35 = vpop.f32.mrf.mxu2  ;;  %v7504_v23 = vmov 1.0  }
 0x8ef   : > { %v6125_v44 = vadd.f32 %v6060_v35, %v12383_v54  ;;  %v5933_v11 = vpop.f32.mrf.mxu0  ;;  %v6313_v52 = vmax.f32 %v6281_v14, %v6297_v36 }
 0x8f0   : > { %v6196_v62 = vadd.f32 %v11519_v8, %v6122_v30  ;;  %v5998_v47 = vpop.f32.mrf.mxu1  ;;  %v6127_v2 = vadd.f32 %v5933_v11, %v5706_v57 }
 0x8f1   : > { %v6199_v49 = vadd.f32 %v11522_v17, %v6125_v44  ;;  %v6128_v3 = vadd.f32 %v5998_v47, %v5707_v6 }
 0x8f2   : > { %v6260_v37 = vmax.f32 %v6196_v62, 0.0  ;;  %v6201_v10 = vadd.f32 %v11512_v4, %v6127_v2 }
 0x8f3   : > { %v6263_v5 = vmax.f32 %v6199_v49, 0.0  ;;  %v6202_v0 = vadd.f32 %v11516_v45, %v6128_v3  ;;  %v12389_v45 = vld [vmem:[#allocation29_spill] sm:$0xff] }
 0x8f4   : > { %v6282_v26 = vmax.f32 %v6260_v37, %v6261_v20  ;;  %v6265_v29 = vmax.f32 %v6201_v10, 0.0 }
 0x8f5   : > { %v6298_v22 = vmax.f32 %v6262_v19, %v6263_v5  ;;  %v5868_v27 = vpop.f32.mrf.mxu3  ;;  %v6266_v51 = vmax.f32 %v6202_v0, 0.0 }
 0x8f6   : > { %v6126_v31 = vadd.f32 %v5868_v27, %v12386_v55  ;;  %v6063_v59 = vpop.f32.mrf.mxu2 }
 0x8f7   : > { %v6129_v16 = vadd.f32 %v6063_v59, %v12387_v63  ;;  %v6314_v40 = vmax.f32 %v6282_v26, %v6298_v22 }
 0x8f8   : > { %v6200_v41 = vadd.f32 %v11519_v8, %v6126_v31  ;;  %v12388_v8 = vlaneseq }
 0x8f9   : > { %v6203_v61 = vadd.f32 %v11522_v17, %v6129_v16  ;;  %v6318_v17 = vmul.u32 32, %v12389_v45 }
 0x8fa   : > { %v6264_v7 = vmax.f32 %v6200_v41, 0.0  ;;  %v6317_v4 = vand.u32 127, %v12388_v8 }
 0x8fb   : > { %v6267_v14 = vmax.f32 %v6203_v61, 0.0  ;;  %v6322_v15 = vadd.s32 16, %v6318_v17 }
 0x8fc   : > { %v6283_v13 = vmax.f32 %v6264_v7, %v6265_v29  ;;  %vm6319_vm6 = vcmp.eq.s32.totalorder %v6317_v4, %v6318_v17 }
 0x8fd   : > { %v6299_v28 = vmax.f32 %v6266_v51, %v6267_v14  ;;  %vm6323_vm7 = vcmp.eq.s32.totalorder %v6317_v4, %v6322_v15 }
 0x8ff   : > { %v6315_v36 = vmax.f32 %v6283_v13, %v6299_v28 }
 0x901   : > { %6326 = vmatpush.msra.mxu3 %v6315_v36 }
 0x903   : > { %6327 = vmatpush.msra.mxu3 %v6314_v40 }
 0x905   : > { %6328 = vmatpush.msra.mxu3 %v6313_v52 }
 0x907   : > { %6329 = vmatpush.msra.mxu3 %v11765_v60 }
 0x909   : > { %6330 = vmatpush.msra.mxu3 %v11747_v25 }
 0x90b   : > { %6331 = vmatpush.msra.mxu3 %v11729_v12 }
 0x90d   : > { %6332 = vmatpush.msra.mxu3 %v11711_v46 }
 0x90f   : > { %6333 = vmatpush.msra.mxu3 %v11692_v48 }
 0x911   : > { %6334 = vmatpush.msra.mxu3 %v11673_v33 }
 0x913   : > { %6335 = vmatpush.msra.mxu3 %v11656_v18 }
 0x915   : > { %6336 = vmatpush.msra.mxu3 %v11636_v34 }
 0x917   : > { %6337 = vmatpush.msra.mxu3 %v11618_v1 }
 0x919   : > { %6338 = vmatpush.msra.mxu3 %v11600_v58 }
 0x91b   : > { %6339 = vmatpush.msra.mxu3 %v11582_v53 }
 0x91d   : > { %6340 = vmatpush.msra.mxu3 %v11564_v38 }
 0x91f   : > { %6341 = vmatpush.msra.mxu3 %v11546_v32 }
 0x920   : > { %7256 = vmatmul.msk.f32.vlgmr.msra.gmra.mxu3 %vm6319_vm6, %v7504_v23 }
 0x921   : > { %6346 = vmatpush.msrb.mxu3 %v6315_v36 }
 0x923   : > { %6347 = vmatpush.msrb.mxu3 %v6314_v40 }
 0x925   : > { %6348 = vmatpush.msrb.mxu3 %v6313_v52 }
 0x927   : > { %6349 = vmatpush.msrb.mxu3 %v11765_v60 }
 0x929   : > { %6350 = vmatpush.msrb.mxu3 %v11747_v25 }
 0x92b   : > { %6351 = vmatpush.msrb.mxu3 %v11729_v12 }
 0x92d   : > { %6352 = vmatpush.msrb.mxu3 %v11711_v46 }
 0x92f   : > { %6353 = vmatpush.msrb.mxu3 %v11692_v48  ;;  %v6372_v48 = vld [vmem:[%s11891_s9] sm:$0xff] }
 0x931   : > { %6354 = vmatpush.msrb.mxu3 %v11673_v33  ;;  %v6379_v33 = vld [vmem:[%s11891_s9 + $0x38] sm:$0xff] }
 0x933   : > { %6355 = vmatpush.msrb.mxu3 %v11656_v18  ;;  %v6373_v18 = vld [vmem:[%s11891_s9 + $0x8] sm:$0xff] }
 0x935   : > { %6356 = vmatpush.msrb.mxu3 %v11636_v34  ;;  %v6378_v34 = vld [vmem:[%s11891_s9 + $0x30] sm:$0xff] }
 0x937   : > { %6357 = vmatpush.msrb.mxu3 %v11618_v1 }
 0x939   : > { %6358 = vmatpush.msrb.mxu3 %v11600_v58  ;;  %v6377_v58 = vld [vmem:[%s11891_s9 + $0x28] sm:$0xff] }
 0x93b   : > { %6359 = vmatpush.msrb.mxu3 %v11582_v53  ;;  %v6374_v53 = vld [vmem:[%s11891_s9 + $0x10] sm:$0xff] }
 0x93d   : > { %6360 = vmatpush.msrb.mxu3 %v11564_v38  ;;  %v6376_v38 = vld [vmem:[%s11891_s9 + $0x20] sm:$0xff] }
 0x93f   : > { %6361 = vmatpush.msrb.mxu3 %v11546_v32  ;;  %v6375_v32 = vld [vmem:[%s11891_s9 + $0x18] sm:$0xff] }
 0x940   : > { %7257 = vmatmul.msk.f32.vlgmr.msrb.gmra.mxu3 %vm6323_vm7, %v7504_v23 }
 0x941   : > { %6395 = vmatpush.msra.mxu3 %v6379_v33 }
 0x943   : > { %6396 = vmatpush.msra.mxu3 %v6378_v34 }
 0x945   : > { %6397 = vmatpush.msra.mxu3 %v6377_v58 }
 0x947   : > { %6398 = vmatpush.msra.mxu3 %v6376_v38 }
 0x949   : > { %6399 = vmatpush.msra.mxu3 %v6375_v32 }
 0x94b   : > { %6400 = vmatpush.msra.mxu3 %v6374_v53 }
 0x94d   : > { %6401 = vmatpush.msra.mxu3 %v6373_v18 }
 0x94f   : > { %6402 = vmatpush.msra.mxu3 %v6372_v48 }
 0x9a3   : > { %v6343_v1 = vpop.f32.mrf.mxu3 }
 0x9a4   : > { %6367 = vrot.lane.b32.xlu2 %v6343_v1, %s7503_s30 }
 0x9c3   : > { %v6363_v12 = vpop.f32.mrf.mxu3 }
 0x9fe   : > { %v6368_v46 = vpop.permute.xlu2 %6367 }
 0x9ff   : > { %v6370_v25 = vadd.f32 %v6368_v46, %v6343_v1 }
 0xa01   : > { %v6371_v60 = vadd.f32 %v6370_v25, %v6363_v12 }
 0xa03   : > { %7258 = vmatmul.msk.f32.vlgmr.msra.gmra.mxu3 %vm3712_vm0, %v6371_v60 }
 0xa86   : > { %v6404_v39 = vpop.f32.mrf.mxu3 }
 0xa87   : > { %v6405_v24 = vadd.f32 %v7357_v42, %v6404_v39 }
 0xa89   : > { %6408 = vst.msk [vmem:[%s416_s29] sm:$0xf] %vm6407_vm8, %v6405_v24 }
 0xa8a   : > { %7450 = shalt.err (!%p7447_p8)
}
 0xa8b   : > { %7296 = dma.vmem_to_hbm [thread:$0]  (%p7603_p5), %s6423_s26, 64, %s6425_s3, %s6410_s13  }
 0xa8c PF: > { %p7313_p9 = scmp.ge.s32.totalorder %s7493_s20, 2  ;;  %s6436_s16 = sand.u32 1, %s7481_s17  }
 0xa8d   : > { %s6437_s19 = scalar_lea.sflag [#allocation7], %s6436_s16 }
 0xa8e   : > { %p7306_p10 = pnand %p7313_p9, %p7607_p6 }
 0xa90   : > { %p7307_p11 = pneg %p7306_p10 }
 0xa92   : > { %7476 = dma.done.wait (%p7307_p11), %s6437_s19, 64  }
 0xa93   : > { %7478 = vsyncadd (%p7307_p11), %s6437_s19, 4294967232  ;;  %s12390_s15 = sld [smem:[#allocation14_spill]]  ;;  %p23_p12 = scmp.ge.s32.totalorder %s7590_s23, 4  }
 0xa94   : > { %s12391_s19 = sld [smem:[#allocation15_spill]]  ;;  %s12392_s17 = smov %s7485_s18 }
 0xa95   : > { %s12394_s20 = smov %s7590_s23  ;;  %25 = sbr.rel (!%p23_p12) target bundleno = 7 (0x7), region = 120 }
 0xa99   : > { %s12393_s18 = smov %s12390_s15 }
 0xa9a   :  { %6443 = vsyncpa [#allocation6], 1 }
 0xa9b   :  { %6445 = vsyncpa [#allocation6 + $0x1], 1 }
 0xa9c   :  { %6446 = vsyncpa [#allocation9], 1 }
 0xa9d   :  { %6447 = vsyncpa [#allocation7], 1 }
 0xa9e   :  { %6449 = vsyncpa [#allocation7 + $0x1], 1 }

</bundles_post_ra>
